<compile_context>
chip_gen: v5e
topology: v5e:2x2
jax: 0.10.0
libtpu: 0.0.40
codegen_flags: <defaults>
</compile_context>

<pallas_src>
import functools

import jax
import jax.numpy as jnp
from jax.experimental import pallas as pl
from jax.experimental.pallas import tpu as pltpu


# ------------------------------------------------------------------ tiling helper

def _pick_lane_tile(m, cap):
    """Largest divisor of m that is a multiple of 128 and <= cap; guards against
    awkward m by falling back to the largest plain divisor <= cap (never a block
    bigger than cap, so scoped VMEM stays bounded on v7x too)."""
    if m <= cap:
        return m
    t = (min(cap, m) // 128) * 128
    while t >= 128:
        if m % t == 0:
            return t
        t -= 128
    for t in range(cap, 0, -1):
        if m % t == 0:
            return t
    return m


# ------------------------------------------------------------------ Pallas kernels

def snn_conv_lif(patches, w, *, threshold, current_decay, voltage_decay,
                 lane_tile=1024):
    """Fused bias-free conv-GEMM + CUBA-LIF neuron (lava-dl style, hard reset).

    patches: (T, K, M) with M = N*Ho*Wo pixels in the lane dim.
    w:       (O, K)
    returns spikes (T, O, M) in bfloat16 (spikes are 0/1, exact).
    # TODO(synk): lava-dl quantizes the decays to 12-bit fixed point; float used here.
    """
    T, K, M = patches.shape
    O = w.shape[0]
    tm = _pick_lane_tile(M, lane_tile)

    def kernel(p_ref, w_ref, s_ref):
        wv = w_ref[...]
        cur = jnp.zeros((O, tm), jnp.float32)
        volt = jnp.zeros((O, tm), jnp.float32)
        for t in range(T):  # T is small & static -> unrolled
            z = jnp.dot(wv, p_ref[t, :, :], preferred_element_type=jnp.float32)
            cur = cur * (1.0 - current_decay) + z
            volt = volt * (1.0 - voltage_decay) + cur
            spk = (volt >= threshold).astype(jnp.float32)
            volt = volt * (1.0 - spk)  # hard reset after spike
            s_ref[t, :, :] = spk.astype(s_ref.dtype)

    return pl.pallas_call(
        kernel,
        out_shape=jax.ShapeDtypeStruct((T, O, M), jnp.bfloat16),
        grid=(M // tm,),
        in_specs=[
            pl.BlockSpec((T, K, tm), lambda i: (0, 0, i)),
            pl.BlockSpec((O, K), lambda i: (0, 0)),
        ],
        out_specs=pl.BlockSpec((T, O, tm), lambda i: (0, 0, i)),
        compiler_params=pltpu.CompilerParams(dimension_semantics=("parallel",)),
    )(patches.astype(jnp.bfloat16), w.astype(jnp.bfloat16))


def snn_conv_lif_accum(patches, w, interval, quant, *, threshold, current_decay,
                       voltage_decay, lane_tile=512):
    """Fused conv-GEMM + CUBA-LIF + quantize(scale=1, zp=0) + Accumulator(interval).

    patches: (T, K, M) -> accumulated output (G, O, M), G = T // interval.
    Accumulated values are small integers (0..interval) -> exact in bfloat16.
    """
    T, K, M = patches.shape
    O = w.shape[0]
    G = T // interval
    tm = _pick_lane_tile(M, lane_tile)

    def kernel(p_ref, w_ref, o_ref):
        wv = w_ref[...]
        cur = jnp.zeros((O, tm), jnp.float32)
        volt = jnp.zeros((O, tm), jnp.float32)
        for g in range(G):
            acc = jnp.zeros((O, tm), jnp.float32)
            for i in range(interval):
                t = g * interval + i
                z = jnp.dot(wv, p_ref[t, :, :], preferred_element_type=jnp.float32)
                cur = cur * (1.0 - current_decay) + z
                volt = volt * (1.0 - voltage_decay) + cur
                spk = (volt >= threshold).astype(jnp.float32)
                volt = volt * (1.0 - spk)  # hard reset
                if quant:
                    spk = jnp.clip(jnp.round(spk), 0.0, 255.0)  # quint8, scale=1, zp=0
                acc = acc + spk
            o_ref[g, :, :] = acc.astype(o_ref.dtype)

    return pl.pallas_call(
        kernel,
        out_shape=jax.ShapeDtypeStruct((G, O, M), jnp.bfloat16),
        grid=(M // tm,),
        in_specs=[
            pl.BlockSpec((T, K, tm), lambda i: (0, 0, i)),
            pl.BlockSpec((O, K), lambda i: (0, 0)),
        ],
        out_specs=pl.BlockSpec((G, O, tm), lambda i: (0, 0, i)),
        compiler_params=pltpu.CompilerParams(dimension_semantics=("parallel",)),
    )(patches.astype(jnp.bfloat16), w.astype(jnp.bfloat16))


def gemmT_bias_act(w, p, bias, relu, lane_tile=2048):
    """out(O, M) = relu?(w(O, K) @ p(K, M) + bias[:, None]).

    Transposed conv-GEMM: output lane dim is the big pixel count M, not the
    small channel count O, so stores are lane-dense.
    """
    O, K = w.shape
    K2, M = p.shape
    assert K == K2
    tm = _pick_lane_tile(M, lane_tile)
    bias2 = bias.reshape(O, 1).astype(jnp.float32)

    def kernel(w_ref, p_ref, b_ref, o_ref):
        acc = jnp.dot(w_ref[...], p_ref[...], preferred_element_type=jnp.float32)
        acc = acc + b_ref[...]
        if relu:
            acc = jnp.maximum(acc, 0.0)
        o_ref[...] = acc

    return pl.pallas_call(
        kernel,
        out_shape=jax.ShapeDtypeStruct((O, M), jnp.float32),
        grid=(M // tm,),
        in_specs=[
            pl.BlockSpec((O, K), lambda i: (0, 0)),
            pl.BlockSpec((K, tm), lambda i: (0, i)),
            pl.BlockSpec((O, 1), lambda i: (0, 0)),
        ],
        out_specs=pl.BlockSpec((O, tm), lambda i: (0, i)),
        compiler_params=pltpu.CompilerParams(dimension_semantics=("parallel",)),
    )(w.astype(jnp.bfloat16), p.astype(jnp.bfloat16), bias2)


def matmul_bias_act(a, b, bias, relu):
    """out = relu?(a @ b + bias);  a:(M,K)  b:(K,N)  bias:(N,)  ->  (M,N) f32.

    Used for the FC head: M = batch (tiny), lane dim = out features (2056/128/11).
    """
    M, K = a.shape
    K2, N = b.shape
    assert K == K2
    bias2 = bias.reshape(1, N).astype(jnp.float32)

    def kernel(a_ref, b_ref, bias_ref, o_ref):
        acc = jnp.dot(a_ref[...], b_ref[...], preferred_element_type=jnp.float32)
        acc = acc + bias_ref[...]
        if relu:
            acc = jnp.maximum(acc, 0.0)
        o_ref[...] = acc

    return pl.pallas_call(
        kernel,
        out_shape=jax.ShapeDtypeStruct((M, N), jnp.float32),
        grid=(1,),
        in_specs=[
            pl.BlockSpec((M, K), lambda i: (0, 0)),
            pl.BlockSpec((K, N), lambda i: (0, 0)),
            pl.BlockSpec((1, N), lambda i: (0, 0)),
        ],
        out_specs=pl.BlockSpec((M, N), lambda i: (0, 0)),
        compiler_params=pltpu.CompilerParams(dimension_semantics=("arbitrary",)),
    )(a.astype(jnp.bfloat16), b.astype(jnp.bfloat16), bias2)


# ------------------------------------------------------------------ glue (im2col, conv)

def im2col_cm(x, k=3, stride=2, pad=1):
    """Channel-major im2col with pixels in the lane dim.

    x: (..., C, N, H, W) -> patches (..., k*k*C, N*Ho*Wo); feature order (kh, kw, c).
    """
    *lead, C, N, H, W = x.shape
    Ho = (H + 2 * pad - k) // stride + 1
    Wo = (W + 2 * pad - k) // stride + 1
    pad_width = [(0, 0)] * (len(lead) + 2) + [(pad, pad), (pad, pad)]
    xp = jnp.pad(x, pad_width)
    cols = []
    for i in range(k):
        for j in range(k):
            cols.append(xp[..., i:i + stride * Ho:stride, j:j + stride * Wo:stride])
    p = jnp.stack(cols, axis=len(lead))          # (..., k*k, C, N, Ho, Wo)
    return p.reshape(*lead, k * k * C, N * Ho * Wo), Ho, Wo


def w_kmajor(w):
    """torch conv weight (O, Cin, kh, kw) -> (O, kh*kw*Cin) matching im2col_cm order."""
    return jnp.transpose(w, (0, 2, 3, 1)).reshape(w.shape[0], -1)


def conv2d_cnhw(h, w, b, relu):
    """h: (Cin, N, H, W); w torch (O, Cin, 3, 3); b: (O,) -> (O, N, Ho, Wo)."""
    C, N, H, W = h.shape
    p, Ho, Wo = im2col_cm(h.astype(jnp.bfloat16))
    out = gemmT_bias_act(w_kmajor(w), p, b, relu)      # (O, N*Ho*Wo)
    return out.reshape(-1, N, Ho, Wo)


# ------------------------------------------------------------------ parameters

def init_params(key, timesteps, interval):
    c_in, c1, c2 = 2, 4, 8                      # SNN: 2 -> 4 -> 8
    ann_cin = c2 * (timesteps // interval)      # ANN first conv in_channels
    ks = jax.random.split(key, 20)

    def conv_w(k, o, i, ksz=3):
        return jax.random.normal(k, (o, i, ksz, ksz), jnp.float32) / jnp.sqrt(i * ksz * ksz)

    def lin_w(k, i, o):
        return jax.random.normal(k, (i, o), jnp.float32) / jnp.sqrt(i)

    def bias(k, o):
        return 0.01 * jax.random.normal(k, (o,), jnp.float32)

    return {
        "snn_w1": conv_w(ks[0], c1, c_in),
        "snn_w2": conv_w(ks[1], c2, c1),
        "ann_w1": conv_w(ks[2], 16, ann_cin), "ann_b1": bias(ks[3], 16),
        "ann_w2": conv_w(ks[4], 32, 16),      "ann_b2": bias(ks[5], 32),
        "ann_w3": conv_w(ks[6], 64, 32),      "ann_b3": bias(ks[7], 64),
        "ann_w4": conv_w(ks[8], 128, 64),     "ann_b4": bias(ks[9], 128),
        "fc1_w": lin_w(ks[10], 2 * 2 * 128, 2056), "fc1_b": bias(ks[11], 2056),
        "fc2_w": lin_w(ks[12], 2056, 128),         "fc2_b": bias(ks[13], 128),
        "fc3_w": lin_w(ks[14], 128, 11),           "fc3_b": bias(ks[15], 11),
    }


# ------------------------------------------------------------------ HNN forward (eval mode)

def hnn_forward(params, x, interval, quant=True):
    """x: (N, C=2, H, W, T) spike tensor (torch NCHWT) -> logits (N, 11)."""
    threshold, current_decay, voltage_decay = 1.0, 0.3, 0.25
    N, C, H, W, T = x.shape
    # (N, C, H, W, T) -> (T, C, N, H, W); spikes are 0/1 -> exact in bf16.
    xt = jnp.transpose(x, (4, 1, 0, 2, 3)).astype(jnp.bfloat16)

    # ---- SNN stage 1: SpkConv(2->4, s2, p1) fused with CUBA-LIF ----
    p1, H1, W1 = im2col_cm(xt)                                   # (T, 18, N*H1*W1)
    s1 = snn_conv_lif(p1, w_kmajor(params["snn_w1"]),
                      threshold=threshold, current_decay=current_decay,
                      voltage_decay=voltage_decay, lane_tile=1024)
    # SpkDrop(0.05): identity in eval mode

    # ---- SNN stage 2: SpkConv(4->8) fused with LIF + quantize + Accumulator ----
    s1 = s1.reshape(T, s1.shape[1], N, H1, W1)
    p2, H2, W2 = im2col_cm(s1)                                   # (T, 36, N*H2*W2)
    acc = snn_conv_lif_accum(p2, w_kmajor(params["snn_w2"]), interval, quant,
                             threshold=threshold, current_decay=current_decay,
                             voltage_decay=voltage_decay, lane_tile=512)  # (G, 8, M2)
    G = T // interval
    Cs = acc.shape[1]
    # TODO(synk): Accumulator channel ordering assumed channel-major: out_ch = c * G + g
    h = jnp.transpose(acc.reshape(G, Cs, N, H2, W2), (1, 0, 2, 3, 4))
    h = h.reshape(Cs * G, N, H2, W2)

    # ---- ANN conv stack (channels-in-sublanes / pixels-in-lanes layout) ----
    h = conv2d_cnhw(h, params["ann_w1"], params["ann_b1"], relu=True)
    h = conv2d_cnhw(h, params["ann_w2"], params["ann_b2"], relu=True)
    h = conv2d_cnhw(h, params["ann_w3"], params["ann_b3"], relu=True)
    h = conv2d_cnhw(h, params["ann_w4"], params["ann_b4"], relu=True)

    # ---- Flatten (torch NCHW order) + MLP head ----
    Cf, Nf, Hf, Wf = h.shape
    h = jnp.transpose(h, (1, 0, 2, 3)).reshape(Nf, Cf * Hf * Wf)  # (N, 2*2*128)
    h = matmul_bias_act(h, params["fc1_w"], params["fc1_b"], relu=True)
    # Dropout(0.25): identity in eval mode
    h = matmul_bias_act(h, params["fc2_w"], params["fc2_b"], relu=True)
    # Dropout(0.25): identity in eval mode
    h = matmul_bias_act(h, params["fc3_w"], params["fc3_b"], relu=False)
    return h  # (N, 11) logits; eval mode returns pre-softmax outputs


# ------------------------------------------------------------------ main

if __name__ == "__main__":
    timesteps, interval = 8, 4
    N = 2
    # Spatial size 128 is implied by the module: two stride-2 SNN convs + four
    # stride-2 ANN convs must reach 2x2 for Linear(2*2*128, 2056).
    key = jax.random.PRNGKey(0)
    kp, kx = jax.random.split(key)
    params = init_params(kp, timesteps, interval)
    x = jax.random.bernoulli(kx, 0.3, (N, 2, 128, 128, timesteps)).astype(jnp.float32)

    fwd = jax.jit(functools.partial(hnn_forward, interval=interval, quant=True))
    out = fwd(params, x)
    jax.block_until_ready(out)
    assert out.shape == (N, 11) and out.dtype == jnp.float32
    print("KERNEL_OK")
</pallas_src>

<mosaic_0001>
module attributes {stable_mosaic.version = 11 : i64} {
  func.func @kernel(%arg0: i32, %arg1: memref<8x18x1024xbf16, #tpu.memory_space<vmem>>, %arg2: memref<4x18xbf16, #tpu.memory_space<vmem>>, %arg3: memref<8x4x1024xbf16, #tpu.memory_space<vmem>>) attributes {dimension_semantics = [#tpu.dimension_semantics<parallel>], iteration_bounds = array<i64: 8>, scalar_prefetch = 0 : i64, scratch_operands = 0 : i64, tpu.core_type = #tpu.core_type<tc>, window_params = [{transform_indices = @transform_0, window_bounds = array<i64: 8, 18, 1024>}, {pipeline_mode = #tpu.pipeline_mode<synchronous>, transform_indices = @transform_1, window_bounds = array<i64: 4, 18>}, {transform_indices = @transform_2, window_bounds = array<i64: 8, 4, 1024>}]} {
    %c0 = arith.constant 0 : index
    %c0_0 = arith.constant 0 : index
    %0 = vector.load %arg2[%c0, %c0_0] : memref<4x18xbf16, #tpu.memory_space<vmem>>, vector<4x18xbf16>
    %cst = arith.constant 0.000000e+00 : f32
    %1 = vector.broadcast %cst : f32 to vector<4x1024xf32>
    %cst_1 = arith.constant 0.000000e+00 : f32
    %2 = vector.broadcast %cst_1 : f32 to vector<4x1024xf32>
    %c0_2 = arith.constant 0 : index
    %c0_3 = arith.constant 0 : index
    %c0_4 = arith.constant 0 : index
    %3 = vector.load %arg1[%c0_2, %c0_3, %c0_4] : memref<8x18x1024xbf16, #tpu.memory_space<vmem>>, vector<1x18x1024xbf16>
    %4 = vector.shape_cast %3 : vector<1x18x1024xbf16> to vector<18x1024xbf16>
    %cst_5 = arith.constant dense<0.000000e+00> : vector<4x1024xf32>
    %5 = tpu.matmul %0, %4, %cst_5 {dimension_numbers = #tpu.dot_dimension_numbers<[1], [0], [0], [1], [0, 0, 1, 1], [], []>} : vector<4x18xbf16>, vector<18x1024xbf16>, vector<4x1024xf32> -> vector<4x1024xf32>
    %cst_6 = arith.constant 0.699999988 : f32
    %6 = vector.broadcast %cst_6 : f32 to vector<4x1024xf32>
    %7 = arith.mulf %1, %6 : vector<4x1024xf32>
    %8 = arith.addf %7, %5 : vector<4x1024xf32>
    %cst_7 = arith.constant 7.500000e-01 : f32
    %9 = vector.broadcast %cst_7 : f32 to vector<4x1024xf32>
    %10 = arith.mulf %2, %9 : vector<4x1024xf32>
    %11 = arith.addf %10, %8 : vector<4x1024xf32>
    %cst_8 = arith.constant 1.000000e+00 : f32
    %12 = vector.broadcast %cst_8 : f32 to vector<4x1024xf32>
    %13 = arith.cmpf oge, %11, %12 : vector<4x1024xf32>
    %14 = arith.extui %13 : vector<4x1024xi1> to vector<4x1024xi32>
    %15 = arith.sitofp %14 : vector<4x1024xi32> to vector<4x1024xf32>
    %cst_9 = arith.constant 1.000000e+00 : f32
    %16 = vector.broadcast %cst_9 : f32 to vector<4x1024xf32>
    %17 = arith.subf %16, %15 : vector<4x1024xf32>
    %18 = arith.mulf %11, %17 : vector<4x1024xf32>
    %19 = arith.truncf %15 : vector<4x1024xf32> to vector<4x1024xbf16>
    %c0_10 = arith.constant 0 : index
    %c0_11 = arith.constant 0 : index
    %c0_12 = arith.constant 0 : index
    %20 = vector.load %arg3[%c0_10, %c0_11, %c0_12] : memref<8x4x1024xbf16, #tpu.memory_space<vmem>>, vector<1x4x1024xbf16>
    %21 = vector.shape_cast %20 : vector<1x4x1024xbf16> to vector<4x1024xbf16>
    %22 = vector.shape_cast %19 : vector<4x1024xbf16> to vector<1x4x1024xbf16>
    tpu.vector_store %arg3[%c0_10, %c0_11, %c0_12], %22 {strides = array<i32>} : memref<8x4x1024xbf16, #tpu.memory_space<vmem>>, vector<1x4x1024xbf16>,
    %c1 = arith.constant 1 : index
    %c0_13 = arith.constant 0 : index
    %c0_14 = arith.constant 0 : index
    %23 = vector.load %arg1[%c1, %c0_13, %c0_14] : memref<8x18x1024xbf16, #tpu.memory_space<vmem>>, vector<1x18x1024xbf16>
    %24 = vector.shape_cast %23 : vector<1x18x1024xbf16> to vector<18x1024xbf16>
    %cst_15 = arith.constant dense<0.000000e+00> : vector<4x1024xf32>
    %25 = tpu.matmul %0, %24, %cst_15 {dimension_numbers = #tpu.dot_dimension_numbers<[1], [0], [0], [1], [0, 0, 1, 1], [], []>} : vector<4x18xbf16>, vector<18x1024xbf16>, vector<4x1024xf32> -> vector<4x1024xf32>
    %cst_16 = arith.constant 0.699999988 : f32
    %26 = vector.broadcast %cst_16 : f32 to vector<4x1024xf32>
    %27 = arith.mulf %8, %26 : vector<4x1024xf32>
    %28 = arith.addf %27, %25 : vector<4x1024xf32>
    %cst_17 = arith.constant 7.500000e-01 : f32
    %29 = vector.broadcast %cst_17 : f32 to vector<4x1024xf32>
    %30 = arith.mulf %18, %29 : vector<4x1024xf32>
    %31 = arith.addf %30, %28 : vector<4x1024xf32>
    %cst_18 = arith.constant 1.000000e+00 : f32
    %32 = vector.broadcast %cst_18 : f32 to vector<4x1024xf32>
    %33 = arith.cmpf oge, %31, %32 : vector<4x1024xf32>
    %34 = arith.extui %33 : vector<4x1024xi1> to vector<4x1024xi32>
    %35 = arith.sitofp %34 : vector<4x1024xi32> to vector<4x1024xf32>
    %cst_19 = arith.constant 1.000000e+00 : f32
    %36 = vector.broadcast %cst_19 : f32 to vector<4x1024xf32>
    %37 = arith.subf %36, %35 : vector<4x1024xf32>
    %38 = arith.mulf %31, %37 : vector<4x1024xf32>
    %39 = arith.truncf %35 : vector<4x1024xf32> to vector<4x1024xbf16>
    %c1_20 = arith.constant 1 : index
    %c0_21 = arith.constant 0 : index
    %c0_22 = arith.constant 0 : index
    %40 = vector.load %arg3[%c1_20, %c0_21, %c0_22] : memref<8x4x1024xbf16, #tpu.memory_space<vmem>>, vector<1x4x1024xbf16>
    %41 = vector.shape_cast %40 : vector<1x4x1024xbf16> to vector<4x1024xbf16>
    %42 = vector.shape_cast %39 : vector<4x1024xbf16> to vector<1x4x1024xbf16>
    tpu.vector_store %arg3[%c1_20, %c0_21, %c0_22], %42 {strides = array<i32>} : memref<8x4x1024xbf16, #tpu.memory_space<vmem>>, vector<1x4x1024xbf16>,
    %c2 = arith.constant 2 : index
    %c0_23 = arith.constant 0 : index
    %c0_24 = arith.constant 0 : index
    %43 = vector.load %arg1[%c2, %c0_23, %c0_24] : memref<8x18x1024xbf16, #tpu.memory_space<vmem>>, vector<1x18x1024xbf16>
    %44 = vector.shape_cast %43 : vector<1x18x1024xbf16> to vector<18x1024xbf16>
    %cst_25 = arith.constant dense<0.000000e+00> : vector<4x1024xf32>
    %45 = tpu.matmul %0, %44, %cst_25 {dimension_numbers = #tpu.dot_dimension_numbers<[1], [0], [0], [1], [0, 0, 1, 1], [], []>} : vector<4x18xbf16>, vector<18x1024xbf16>, vector<4x1024xf32> -> vector<4x1024xf32>
    %cst_26 = arith.constant 0.699999988 : f32
    %46 = vector.broadcast %cst_26 : f32 to vector<4x1024xf32>
    %47 = arith.mulf %28, %46 : vector<4x1024xf32>
    %48 = arith.addf %47, %45 : vector<4x1024xf32>
    %cst_27 = arith.constant 7.500000e-01 : f32
    %49 = vector.broadcast %cst_27 : f32 to vector<4x1024xf32>
    %50 = arith.mulf %38, %49 : vector<4x1024xf32>
    %51 = arith.addf %50, %48 : vector<4x1024xf32>
    %cst_28 = arith.constant 1.000000e+00 : f32
    %52 = vector.broadcast %cst_28 : f32 to vector<4x1024xf32>
    %53 = arith.cmpf oge, %51, %52 : vector<4x1024xf32>
    %54 = arith.extui %53 : vector<4x1024xi1> to vector<4x1024xi32>
    %55 = arith.sitofp %54 : vector<4x1024xi32> to vector<4x1024xf32>
    %cst_29 = arith.constant 1.000000e+00 : f32
    %56 = vector.broadcast %cst_29 : f32 to vector<4x1024xf32>
    %57 = arith.subf %56, %55 : vector<4x1024xf32>
    %58 = arith.mulf %51, %57 : vector<4x1024xf32>
    %59 = arith.truncf %55 : vector<4x1024xf32> to vector<4x1024xbf16>
    %c2_30 = arith.constant 2 : index
    %c0_31 = arith.constant 0 : index
    %c0_32 = arith.constant 0 : index
    %60 = vector.load %arg3[%c2_30, %c0_31, %c0_32] : memref<8x4x1024xbf16, #tpu.memory_space<vmem>>, vector<1x4x1024xbf16>
    %61 = vector.shape_cast %60 : vector<1x4x1024xbf16> to vector<4x1024xbf16>
    %62 = vector.shape_cast %59 : vector<4x1024xbf16> to vector<1x4x1024xbf16>
    tpu.vector_store %arg3[%c2_30, %c0_31, %c0_32], %62 {strides = array<i32>} : memref<8x4x1024xbf16, #tpu.memory_space<vmem>>, vector<1x4x1024xbf16>,
    %c3 = arith.constant 3 : index
    %c0_33 = arith.constant 0 : index
    %c0_34 = arith.constant 0 : index
    %63 = vector.load %arg1[%c3, %c0_33, %c0_34] : memref<8x18x1024xbf16, #tpu.memory_space<vmem>>, vector<1x18x1024xbf16>
    %64 = vector.shape_cast %63 : vector<1x18x1024xbf16> to vector<18x1024xbf16>
    %cst_35 = arith.constant dense<0.000000e+00> : vector<4x1024xf32>
    %65 = tpu.matmul %0, %64, %cst_35 {dimension_numbers = #tpu.dot_dimension_numbers<[1], [0], [0], [1], [0, 0, 1, 1], [], []>} : vector<4x18xbf16>, vector<18x1024xbf16>, vector<4x1024xf32> -> vector<4x1024xf32>
    %cst_36 = arith.constant 0.699999988 : f32
    %66 = vector.broadcast %cst_36 : f32 to vector<4x1024xf32>
    %67 = arith.mulf %48, %66 : vector<4x1024xf32>
    %68 = arith.addf %67, %65 : vector<4x1024xf32>
    %cst_37 = arith.constant 7.500000e-01 : f32
    %69 = vector.broadcast %cst_37 : f32 to vector<4x1024xf32>
    %70 = arith.mulf %58, %69 : vector<4x1024xf32>
    %71 = arith.addf %70, %68 : vector<4x1024xf32>
    %cst_38 = arith.constant 1.000000e+00 : f32
    %72 = vector.broadcast %cst_38 : f32 to vector<4x1024xf32>
    %73 = arith.cmpf oge, %71, %72 : vector<4x1024xf32>
    %74 = arith.extui %73 : vector<4x1024xi1> to vector<4x1024xi32>
    %75 = arith.sitofp %74 : vector<4x1024xi32> to vector<4x1024xf32>
    %cst_39 = arith.constant 1.000000e+00 : f32
    %76 = vector.broadcast %cst_39 : f32 to vector<4x1024xf32>
    %77 = arith.subf %76, %75 : vector<4x1024xf32>
    %78 = arith.mulf %71, %77 : vector<4x1024xf32>
    %79 = arith.truncf %75 : vector<4x1024xf32> to vector<4x1024xbf16>
    %c3_40 = arith.constant 3 : index
    %c0_41 = arith.constant 0 : index
    %c0_42 = arith.constant 0 : index
    %80 = vector.load %arg3[%c3_40, %c0_41, %c0_42] : memref<8x4x1024xbf16, #tpu.memory_space<vmem>>, vector<1x4x1024xbf16>
    %81 = vector.shape_cast %80 : vector<1x4x1024xbf16> to vector<4x1024xbf16>
    %82 = vector.shape_cast %79 : vector<4x1024xbf16> to vector<1x4x1024xbf16>
    tpu.vector_store %arg3[%c3_40, %c0_41, %c0_42], %82 {strides = array<i32>} : memref<8x4x1024xbf16, #tpu.memory_space<vmem>>, vector<1x4x1024xbf16>,
    %c4 = arith.constant 4 : index
    %c0_43 = arith.constant 0 : index
    %c0_44 = arith.constant 0 : index
    %83 = vector.load %arg1[%c4, %c0_43, %c0_44] : memref<8x18x1024xbf16, #tpu.memory_space<vmem>>, vector<1x18x1024xbf16>
    %84 = vector.shape_cast %83 : vector<1x18x1024xbf16> to vector<18x1024xbf16>
    %cst_45 = arith.constant dense<0.000000e+00> : vector<4x1024xf32>
    %85 = tpu.matmul %0, %84, %cst_45 {dimension_numbers = #tpu.dot_dimension_numbers<[1], [0], [0], [1], [0, 0, 1, 1], [], []>} : vector<4x18xbf16>, vector<18x1024xbf16>, vector<4x1024xf32> -> vector<4x1024xf32>
    %cst_46 = arith.constant 0.699999988 : f32
    %86 = vector.broadcast %cst_46 : f32 to vector<4x1024xf32>
    %87 = arith.mulf %68, %86 : vector<4x1024xf32>
    %88 = arith.addf %87, %85 : vector<4x1024xf32>
    %cst_47 = arith.constant 7.500000e-01 : f32
    %89 = vector.broadcast %cst_47 : f32 to vector<4x1024xf32>
    %90 = arith.mulf %78, %89 : vector<4x1024xf32>
    %91 = arith.addf %90, %88 : vector<4x1024xf32>
    %cst_48 = arith.constant 1.000000e+00 : f32
    %92 = vector.broadcast %cst_48 : f32 to vector<4x1024xf32>
    %93 = arith.cmpf oge, %91, %92 : vector<4x1024xf32>
    %94 = arith.extui %93 : vector<4x1024xi1> to vector<4x1024xi32>
    %95 = arith.sitofp %94 : vector<4x1024xi32> to vector<4x1024xf32>
    %cst_49 = arith.constant 1.000000e+00 : f32
    %96 = vector.broadcast %cst_49 : f32 to vector<4x1024xf32>
    %97 = arith.subf %96, %95 : vector<4x1024xf32>
    %98 = arith.mulf %91, %97 : vector<4x1024xf32>
    %99 = arith.truncf %95 : vector<4x1024xf32> to vector<4x1024xbf16>
    %c4_50 = arith.constant 4 : index
    %c0_51 = arith.constant 0 : index
    %c0_52 = arith.constant 0 : index
    %100 = vector.load %arg3[%c4_50, %c0_51, %c0_52] : memref<8x4x1024xbf16, #tpu.memory_space<vmem>>, vector<1x4x1024xbf16>
    %101 = vector.shape_cast %100 : vector<1x4x1024xbf16> to vector<4x1024xbf16>
    %102 = vector.shape_cast %99 : vector<4x1024xbf16> to vector<1x4x1024xbf16>
    tpu.vector_store %arg3[%c4_50, %c0_51, %c0_52], %102 {strides = array<i32>} : memref<8x4x1024xbf16, #tpu.memory_space<vmem>>, vector<1x4x1024xbf16>,
    %c5 = arith.constant 5 : index
    %c0_53 = arith.constant 0 : index
    %c0_54 = arith.constant 0 : index
    %103 = vector.load %arg1[%c5, %c0_53, %c0_54] : memref<8x18x1024xbf16, #tpu.memory_space<vmem>>, vector<1x18x1024xbf16>
    %104 = vector.shape_cast %103 : vector<1x18x1024xbf16> to vector<18x1024xbf16>
    %cst_55 = arith.constant dense<0.000000e+00> : vector<4x1024xf32>
    %105 = tpu.matmul %0, %104, %cst_55 {dimension_numbers = #tpu.dot_dimension_numbers<[1], [0], [0], [1], [0, 0, 1, 1], [], []>} : vector<4x18xbf16>, vector<18x1024xbf16>, vector<4x1024xf32> -> vector<4x1024xf32>
    %cst_56 = arith.constant 0.699999988 : f32
    %106 = vector.broadcast %cst_56 : f32 to vector<4x1024xf32>
    %107 = arith.mulf %88, %106 : vector<4x1024xf32>
    %108 = arith.addf %107, %105 : vector<4x1024xf32>
    %cst_57 = arith.constant 7.500000e-01 : f32
    %109 = vector.broadcast %cst_57 : f32 to vector<4x1024xf32>
    %110 = arith.mulf %98, %109 : vector<4x1024xf32>
    %111 = arith.addf %110, %108 : vector<4x1024xf32>
    %cst_58 = arith.constant 1.000000e+00 : f32
    %112 = vector.broadcast %cst_58 : f32 to vector<4x1024xf32>
    %113 = arith.cmpf oge, %111, %112 : vector<4x1024xf32>
    %114 = arith.extui %113 : vector<4x1024xi1> to vector<4x1024xi32>
    %115 = arith.sitofp %114 : vector<4x1024xi32> to vector<4x1024xf32>
    %cst_59 = arith.constant 1.000000e+00 : f32
    %116 = vector.broadcast %cst_59 : f32 to vector<4x1024xf32>
    %117 = arith.subf %116, %115 : vector<4x1024xf32>
    %118 = arith.mulf %111, %117 : vector<4x1024xf32>
    %119 = arith.truncf %115 : vector<4x1024xf32> to vector<4x1024xbf16>
    %c5_60 = arith.constant 5 : index
    %c0_61 = arith.constant 0 : index
    %c0_62 = arith.constant 0 : index
    %120 = vector.load %arg3[%c5_60, %c0_61, %c0_62] : memref<8x4x1024xbf16, #tpu.memory_space<vmem>>, vector<1x4x1024xbf16>
    %121 = vector.shape_cast %120 : vector<1x4x1024xbf16> to vector<4x1024xbf16>
    %122 = vector.shape_cast %119 : vector<4x1024xbf16> to vector<1x4x1024xbf16>
    tpu.vector_store %arg3[%c5_60, %c0_61, %c0_62], %122 {strides = array<i32>} : memref<8x4x1024xbf16, #tpu.memory_space<vmem>>, vector<1x4x1024xbf16>,
    %c6 = arith.constant 6 : index
    %c0_63 = arith.constant 0 : index
    %c0_64 = arith.constant 0 : index
    %123 = vector.load %arg1[%c6, %c0_63, %c0_64] : memref<8x18x1024xbf16, #tpu.memory_space<vmem>>, vector<1x18x1024xbf16>
    %124 = vector.shape_cast %123 : vector<1x18x1024xbf16> to vector<18x1024xbf16>
    %cst_65 = arith.constant dense<0.000000e+00> : vector<4x1024xf32>
    %125 = tpu.matmul %0, %124, %cst_65 {dimension_numbers = #tpu.dot_dimension_numbers<[1], [0], [0], [1], [0, 0, 1, 1], [], []>} : vector<4x18xbf16>, vector<18x1024xbf16>, vector<4x1024xf32> -> vector<4x1024xf32>
    %cst_66 = arith.constant 0.699999988 : f32
    %126 = vector.broadcast %cst_66 : f32 to vector<4x1024xf32>
    %127 = arith.mulf %108, %126 : vector<4x1024xf32>
    %128 = arith.addf %127, %125 : vector<4x1024xf32>
    %cst_67 = arith.constant 7.500000e-01 : f32
    %129 = vector.broadcast %cst_67 : f32 to vector<4x1024xf32>
    %130 = arith.mulf %118, %129 : vector<4x1024xf32>
    %131 = arith.addf %130, %128 : vector<4x1024xf32>
    %cst_68 = arith.constant 1.000000e+00 : f32
    %132 = vector.broadcast %cst_68 : f32 to vector<4x1024xf32>
    %133 = arith.cmpf oge, %131, %132 : vector<4x1024xf32>
    %134 = arith.extui %133 : vector<4x1024xi1> to vector<4x1024xi32>
    %135 = arith.sitofp %134 : vector<4x1024xi32> to vector<4x1024xf32>
    %cst_69 = arith.constant 1.000000e+00 : f32
    %136 = vector.broadcast %cst_69 : f32 to vector<4x1024xf32>
    %137 = arith.subf %136, %135 : vector<4x1024xf32>
    %138 = arith.mulf %131, %137 : vector<4x1024xf32>
    %139 = arith.truncf %135 : vector<4x1024xf32> to vector<4x1024xbf16>
    %c6_70 = arith.constant 6 : index
    %c0_71 = arith.constant 0 : index
    %c0_72 = arith.constant 0 : index
    %140 = vector.load %arg3[%c6_70, %c0_71, %c0_72] : memref<8x4x1024xbf16, #tpu.memory_space<vmem>>, vector<1x4x1024xbf16>
    %141 = vector.shape_cast %140 : vector<1x4x1024xbf16> to vector<4x1024xbf16>
    %142 = vector.shape_cast %139 : vector<4x1024xbf16> to vector<1x4x1024xbf16>
    tpu.vector_store %arg3[%c6_70, %c0_71, %c0_72], %142 {strides = array<i32>} : memref<8x4x1024xbf16, #tpu.memory_space<vmem>>, vector<1x4x1024xbf16>,
    %c7 = arith.constant 7 : index
    %c0_73 = arith.constant 0 : index
    %c0_74 = arith.constant 0 : index
    %143 = vector.load %arg1[%c7, %c0_73, %c0_74] : memref<8x18x1024xbf16, #tpu.memory_space<vmem>>, vector<1x18x1024xbf16>
    %144 = vector.shape_cast %143 : vector<1x18x1024xbf16> to vector<18x1024xbf16>
    %cst_75 = arith.constant dense<0.000000e+00> : vector<4x1024xf32>
    %145 = tpu.matmul %0, %144, %cst_75 {dimension_numbers = #tpu.dot_dimension_numbers<[1], [0], [0], [1], [0, 0, 1, 1], [], []>} : vector<4x18xbf16>, vector<18x1024xbf16>, vector<4x1024xf32> -> vector<4x1024xf32>
    %cst_76 = arith.constant 0.699999988 : f32
    %146 = vector.broadcast %cst_76 : f32 to vector<4x1024xf32>
    %147 = arith.mulf %128, %146 : vector<4x1024xf32>
    %148 = arith.addf %147, %145 : vector<4x1024xf32>
    %cst_77 = arith.constant 7.500000e-01 : f32
    %149 = vector.broadcast %cst_77 : f32 to vector<4x1024xf32>
    %150 = arith.mulf %138, %149 : vector<4x1024xf32>
    %151 = arith.addf %150, %148 : vector<4x1024xf32>
    %cst_78 = arith.constant 1.000000e+00 : f32
    %152 = vector.broadcast %cst_78 : f32 to vector<4x1024xf32>
    %153 = arith.cmpf oge, %151, %152 : vector<4x1024xf32>
    %154 = arith.extui %153 : vector<4x1024xi1> to vector<4x1024xi32>
    %155 = arith.sitofp %154 : vector<4x1024xi32> to vector<4x1024xf32>
    %156 = arith.truncf %155 : vector<4x1024xf32> to vector<4x1024xbf16>
    %c7_79 = arith.constant 7 : index
    %c0_80 = arith.constant 0 : index
    %c0_81 = arith.constant 0 : index
    %157 = vector.load %arg3[%c7_79, %c0_80, %c0_81] : memref<8x4x1024xbf16, #tpu.memory_space<vmem>>, vector<1x4x1024xbf16>
    %158 = vector.shape_cast %157 : vector<1x4x1024xbf16> to vector<4x1024xbf16>
    %159 = vector.shape_cast %156 : vector<4x1024xbf16> to vector<1x4x1024xbf16>
    tpu.vector_store %arg3[%c7_79, %c0_80, %c0_81], %159 {strides = array<i32>} : memref<8x4x1024xbf16, #tpu.memory_space<vmem>>, vector<1x4x1024xbf16>,
    return
  }
  func.func @transform_0(%arg0: i32) -> (i32, i32, i32) {
    %c0_i32 = arith.constant 0 : i32
    %c0_i32_0 = arith.constant 0 : i32
    %c0_i32_1 = arith.constant 0 : i32
    return %c0_i32, %c0_i32_0, %arg0 : i32, i32, i32
  }
  func.func @transform_1(%arg0: i32) -> (i32, i32) {
    %c0_i32 = arith.constant 0 : i32
    %c0_i32_0 = arith.constant 0 : i32
    %c0_i32_1 = arith.constant 0 : i32
    return %c0_i32, %c0_i32_0 : i32, i32
  }
  func.func @transform_2(%arg0: i32) -> (i32, i32, i32) {
    %c0_i32 = arith.constant 0 : i32
    %c0_i32_0 = arith.constant 0 : i32
    %c0_i32_1 = arith.constant 0 : i32
    return %c0_i32, %c0_i32_0, %arg0 : i32, i32, i32
  }
}

module attributes {stable_mosaic.version = 11 : i64} {
  func.func @kernel(%arg0: i32, %arg1: memref<8x36x512xbf16, #tpu.memory_space<vmem>>, %arg2: memref<8x36xbf16, #tpu.memory_space<vmem>>, %arg3: memref<2x8x512xbf16, #tpu.memory_space<vmem>>) attributes {dimension_semantics = [#tpu.dimension_semantics<parallel>], iteration_bounds = array<i64: 4>, scalar_prefetch = 0 : i64, scratch_operands = 0 : i64, tpu.core_type = #tpu.core_type<tc>, window_params = [{transform_indices = @transform_0, window_bounds = array<i64: 8, 36, 512>}, {pipeline_mode = #tpu.pipeline_mode<synchronous>, transform_indices = @transform_1, window_bounds = array<i64: 8, 36>}, {transform_indices = @transform_2, window_bounds = array<i64: 2, 8, 512>}]} {
    %c0 = arith.constant 0 : index
    %c0_0 = arith.constant 0 : index
    %0 = vector.load %arg2[%c0, %c0_0] : memref<8x36xbf16, #tpu.memory_space<vmem>>, vector<8x36xbf16>
    %cst = arith.constant 0.000000e+00 : f32
    %1 = vector.broadcast %cst : f32 to vector<8x512xf32>
    %cst_1 = arith.constant 0.000000e+00 : f32
    %2 = vector.broadcast %cst_1 : f32 to vector<8x512xf32>
    %cst_2 = arith.constant 0.000000e+00 : f32
    %3 = vector.broadcast %cst_2 : f32 to vector<8x512xf32>
    %c0_3 = arith.constant 0 : index
    %c0_4 = arith.constant 0 : index
    %c0_5 = arith.constant 0 : index
    %4 = vector.load %arg1[%c0_3, %c0_4, %c0_5] : memref<8x36x512xbf16, #tpu.memory_space<vmem>>, vector<1x36x512xbf16>
    %5 = vector.shape_cast %4 : vector<1x36x512xbf16> to vector<36x512xbf16>
    %cst_6 = arith.constant dense<0.000000e+00> : vector<8x512xf32>
    %6 = tpu.matmul %0, %5, %cst_6 {dimension_numbers = #tpu.dot_dimension_numbers<[1], [0], [0], [1], [0, 0, 1, 1], [], []>} : vector<8x36xbf16>, vector<36x512xbf16>, vector<8x512xf32> -> vector<8x512xf32>
    %cst_7 = arith.constant 0.699999988 : f32
    %7 = vector.broadcast %cst_7 : f32 to vector<8x512xf32>
    %8 = arith.mulf %1, %7 : vector<8x512xf32>
    %9 = arith.addf %8, %6 : vector<8x512xf32>
    %cst_8 = arith.constant 7.500000e-01 : f32
    %10 = vector.broadcast %cst_8 : f32 to vector<8x512xf32>
    %11 = arith.mulf %2, %10 : vector<8x512xf32>
    %12 = arith.addf %11, %9 : vector<8x512xf32>
    %cst_9 = arith.constant 1.000000e+00 : f32
    %13 = vector.broadcast %cst_9 : f32 to vector<8x512xf32>
    %14 = arith.cmpf oge, %12, %13 : vector<8x512xf32>
    %15 = arith.extui %14 : vector<8x512xi1> to vector<8x512xi32>
    %16 = arith.sitofp %15 : vector<8x512xi32> to vector<8x512xf32>
    %cst_10 = arith.constant 1.000000e+00 : f32
    %17 = vector.broadcast %cst_10 : f32 to vector<8x512xf32>
    %18 = arith.subf %17, %16 : vector<8x512xf32>
    %19 = arith.mulf %12, %18 : vector<8x512xf32>
    %20 = math.roundeven %16 : vector<8x512xf32>
    %cst_11 = arith.constant 0.000000e+00 : f32
    %cst_12 = arith.constant 2.550000e+02 : f32
    %21 = vector.broadcast %cst_11 : f32 to vector<8x512xf32>
    %22 = arith.maximumf %21, %20 : vector<8x512xf32>
    %23 = vector.broadcast %cst_12 : f32 to vector<8x512xf32>
    %24 = arith.minimumf %23, %22 : vector<8x512xf32>
    %25 = arith.addf %3, %24 : vector<8x512xf32>
    %c1 = arith.constant 1 : index
    %c0_13 = arith.constant 0 : index
    %c0_14 = arith.constant 0 : index
    %26 = vector.load %arg1[%c1, %c0_13, %c0_14] : memref<8x36x512xbf16, #tpu.memory_space<vmem>>, vector<1x36x512xbf16>
    %27 = vector.shape_cast %26 : vector<1x36x512xbf16> to vector<36x512xbf16>
    %cst_15 = arith.constant dense<0.000000e+00> : vector<8x512xf32>
    %28 = tpu.matmul %0, %27, %cst_15 {dimension_numbers = #tpu.dot_dimension_numbers<[1], [0], [0], [1], [0, 0, 1, 1], [], []>} : vector<8x36xbf16>, vector<36x512xbf16>, vector<8x512xf32> -> vector<8x512xf32>
    %cst_16 = arith.constant 0.699999988 : f32
    %29 = vector.broadcast %cst_16 : f32 to vector<8x512xf32>
    %30 = arith.mulf %9, %29 : vector<8x512xf32>
    %31 = arith.addf %30, %28 : vector<8x512xf32>
    %cst_17 = arith.constant 7.500000e-01 : f32
    %32 = vector.broadcast %cst_17 : f32 to vector<8x512xf32>
    %33 = arith.mulf %19, %32 : vector<8x512xf32>
    %34 = arith.addf %33, %31 : vector<8x512xf32>
    %cst_18 = arith.constant 1.000000e+00 : f32
    %35 = vector.broadcast %cst_18 : f32 to vector<8x512xf32>
    %36 = arith.cmpf oge, %34, %35 : vector<8x512xf32>
    %37 = arith.extui %36 : vector<8x512xi1> to vector<8x512xi32>
    %38 = arith.sitofp %37 : vector<8x512xi32> to vector<8x512xf32>
    %cst_19 = arith.constant 1.000000e+00 : f32
    %39 = vector.broadcast %cst_19 : f32 to vector<8x512xf32>
    %40 = arith.subf %39, %38 : vector<8x512xf32>
    %41 = arith.mulf %34, %40 : vector<8x512xf32>
    %42 = math.roundeven %38 : vector<8x512xf32>
    %cst_20 = arith.constant 0.000000e+00 : f32
    %cst_21 = arith.constant 2.550000e+02 : f32
    %43 = vector.broadcast %cst_20 : f32 to vector<8x512xf32>
    %44 = arith.maximumf %43, %42 : vector<8x512xf32>
    %45 = vector.broadcast %cst_21 : f32 to vector<8x512xf32>
    %46 = arith.minimumf %45, %44 : vector<8x512xf32>
    %47 = arith.addf %25, %46 : vector<8x512xf32>
    %c2 = arith.constant 2 : index
    %c0_22 = arith.constant 0 : index
    %c0_23 = arith.constant 0 : index
    %48 = vector.load %arg1[%c2, %c0_22, %c0_23] : memref<8x36x512xbf16, #tpu.memory_space<vmem>>, vector<1x36x512xbf16>
    %49 = vector.shape_cast %48 : vector<1x36x512xbf16> to vector<36x512xbf16>
    %cst_24 = arith.constant dense<0.000000e+00> : vector<8x512xf32>
    %50 = tpu.matmul %0, %49, %cst_24 {dimension_numbers = #tpu.dot_dimension_numbers<[1], [0], [0], [1], [0, 0, 1, 1], [], []>} : vector<8x36xbf16>, vector<36x512xbf16>, vector<8x512xf32> -> vector<8x512xf32>
    %cst_25 = arith.constant 0.699999988 : f32
    %51 = vector.broadcast %cst_25 : f32 to vector<8x512xf32>
    %52 = arith.mulf %31, %51 : vector<8x512xf32>
    %53 = arith.addf %52, %50 : vector<8x512xf32>
    %cst_26 = arith.constant 7.500000e-01 : f32
    %54 = vector.broadcast %cst_26 : f32 to vector<8x512xf32>
    %55 = arith.mulf %41, %54 : vector<8x512xf32>
    %56 = arith.addf %55, %53 : vector<8x512xf32>
    %cst_27 = arith.constant 1.000000e+00 : f32
    %57 = vector.broadcast %cst_27 : f32 to vector<8x512xf32>
    %58 = arith.cmpf oge, %56, %57 : vector<8x512xf32>
    %59 = arith.extui %58 : vector<8x512xi1> to vector<8x512xi32>
    %60 = arith.sitofp %59 : vector<8x512xi32> to vector<8x512xf32>
    %cst_28 = arith.constant 1.000000e+00 : f32
    %61 = vector.broadcast %cst_28 : f32 to vector<8x512xf32>
    %62 = arith.subf %61, %60 : vector<8x512xf32>
    %63 = arith.mulf %56, %62 : vector<8x512xf32>
    %64 = math.roundeven %60 : vector<8x512xf32>
    %cst_29 = arith.constant 0.000000e+00 : f32
    %cst_30 = arith.constant 2.550000e+02 : f32
    %65 = vector.broadcast %cst_29 : f32 to vector<8x512xf32>
    %66 = arith.maximumf %65, %64 : vector<8x512xf32>
    %67 = vector.broadcast %cst_30 : f32 to vector<8x512xf32>
    %68 = arith.minimumf %67, %66 : vector<8x512xf32>
    %69 = arith.addf %47, %68 : vector<8x512xf32>
    %c3 = arith.constant 3 : index
    %c0_31 = arith.constant 0 : index
    %c0_32 = arith.constant 0 : index
    %70 = vector.load %arg1[%c3, %c0_31, %c0_32] : memref<8x36x512xbf16, #tpu.memory_space<vmem>>, vector<1x36x512xbf16>
    %71 = vector.shape_cast %70 : vector<1x36x512xbf16> to vector<36x512xbf16>
    %cst_33 = arith.constant dense<0.000000e+00> : vector<8x512xf32>
    %72 = tpu.matmul %0, %71, %cst_33 {dimension_numbers = #tpu.dot_dimension_numbers<[1], [0], [0], [1], [0, 0, 1, 1], [], []>} : vector<8x36xbf16>, vector<36x512xbf16>, vector<8x512xf32> -> vector<8x512xf32>
    %cst_34 = arith.constant 0.699999988 : f32
    %73 = vector.broadcast %cst_34 : f32 to vector<8x512xf32>
    %74 = arith.mulf %53, %73 : vector<8x512xf32>
    %75 = arith.addf %74, %72 : vector<8x512xf32>
    %cst_35 = arith.constant 7.500000e-01 : f32
    %76 = vector.broadcast %cst_35 : f32 to vector<8x512xf32>
    %77 = arith.mulf %63, %76 : vector<8x512xf32>
    %78 = arith.addf %77, %75 : vector<8x512xf32>
    %cst_36 = arith.constant 1.000000e+00 : f32
    %79 = vector.broadcast %cst_36 : f32 to vector<8x512xf32>
    %80 = arith.cmpf oge, %78, %79 : vector<8x512xf32>
    %81 = arith.extui %80 : vector<8x512xi1> to vector<8x512xi32>
    %82 = arith.sitofp %81 : vector<8x512xi32> to vector<8x512xf32>
    %cst_37 = arith.constant 1.000000e+00 : f32
    %83 = vector.broadcast %cst_37 : f32 to vector<8x512xf32>
    %84 = arith.subf %83, %82 : vector<8x512xf32>
    %85 = arith.mulf %78, %84 : vector<8x512xf32>
    %86 = math.roundeven %82 : vector<8x512xf32>
    %cst_38 = arith.constant 0.000000e+00 : f32
    %cst_39 = arith.constant 2.550000e+02 : f32
    %87 = vector.broadcast %cst_38 : f32 to vector<8x512xf32>
    %88 = arith.maximumf %87, %86 : vector<8x512xf32>
    %89 = vector.broadcast %cst_39 : f32 to vector<8x512xf32>
    %90 = arith.minimumf %89, %88 : vector<8x512xf32>
    %91 = arith.addf %69, %90 : vector<8x512xf32>
    %92 = arith.truncf %91 : vector<8x512xf32> to vector<8x512xbf16>
    %c0_40 = arith.constant 0 : index
    %c0_41 = arith.constant 0 : index
    %c0_42 = arith.constant 0 : index
    %93 = vector.load %arg3[%c0_40, %c0_41, %c0_42] : memref<2x8x512xbf16, #tpu.memory_space<vmem>>, vector<1x8x512xbf16>
    %94 = vector.shape_cast %93 : vector<1x8x512xbf16> to vector<8x512xbf16>
    %95 = vector.shape_cast %92 : vector<8x512xbf16> to vector<1x8x512xbf16>
    tpu.vector_store %arg3[%c0_40, %c0_41, %c0_42], %95 {strides = array<i32>} : memref<2x8x512xbf16, #tpu.memory_space<vmem>>, vector<1x8x512xbf16>,
    %cst_43 = arith.constant 0.000000e+00 : f32
    %96 = vector.broadcast %cst_43 : f32 to vector<8x512xf32>
    %c4 = arith.constant 4 : index
    %c0_44 = arith.constant 0 : index
    %c0_45 = arith.constant 0 : index
    %97 = vector.load %arg1[%c4, %c0_44, %c0_45] : memref<8x36x512xbf16, #tpu.memory_space<vmem>>, vector<1x36x512xbf16>
    %98 = vector.shape_cast %97 : vector<1x36x512xbf16> to vector<36x512xbf16>
    %cst_46 = arith.constant dense<0.000000e+00> : vector<8x512xf32>
    %99 = tpu.matmul %0, %98, %cst_46 {dimension_numbers = #tpu.dot_dimension_numbers<[1], [0], [0], [1], [0, 0, 1, 1], [], []>} : vector<8x36xbf16>, vector<36x512xbf16>, vector<8x512xf32> -> vector<8x512xf32>
    %cst_47 = arith.constant 0.699999988 : f32
    %100 = vector.broadcast %cst_47 : f32 to vector<8x512xf32>
    %101 = arith.mulf %75, %100 : vector<8x512xf32>
    %102 = arith.addf %101, %99 : vector<8x512xf32>
    %cst_48 = arith.constant 7.500000e-01 : f32
    %103 = vector.broadcast %cst_48 : f32 to vector<8x512xf32>
    %104 = arith.mulf %85, %103 : vector<8x512xf32>
    %105 = arith.addf %104, %102 : vector<8x512xf32>
    %cst_49 = arith.constant 1.000000e+00 : f32
    %106 = vector.broadcast %cst_49 : f32 to vector<8x512xf32>
    %107 = arith.cmpf oge, %105, %106 : vector<8x512xf32>
    %108 = arith.extui %107 : vector<8x512xi1> to vector<8x512xi32>
    %109 = arith.sitofp %108 : vector<8x512xi32> to vector<8x512xf32>
    %cst_50 = arith.constant 1.000000e+00 : f32
    %110 = vector.broadcast %cst_50 : f32 to vector<8x512xf32>
    %111 = arith.subf %110, %109 : vector<8x512xf32>
    %112 = arith.mulf %105, %111 : vector<8x512xf32>
    %113 = math.roundeven %109 : vector<8x512xf32>
    %cst_51 = arith.constant 0.000000e+00 : f32
    %cst_52 = arith.constant 2.550000e+02 : f32
    %114 = vector.broadcast %cst_51 : f32 to vector<8x512xf32>
    %115 = arith.maximumf %114, %113 : vector<8x512xf32>
    %116 = vector.broadcast %cst_52 : f32 to vector<8x512xf32>
    %117 = arith.minimumf %116, %115 : vector<8x512xf32>
    %118 = arith.addf %96, %117 : vector<8x512xf32>
    %c5 = arith.constant 5 : index
    %c0_53 = arith.constant 0 : index
    %c0_54 = arith.constant 0 : index
    %119 = vector.load %arg1[%c5, %c0_53, %c0_54] : memref<8x36x512xbf16, #tpu.memory_space<vmem>>, vector<1x36x512xbf16>
    %120 = vector.shape_cast %119 : vector<1x36x512xbf16> to vector<36x512xbf16>
    %cst_55 = arith.constant dense<0.000000e+00> : vector<8x512xf32>
    %121 = tpu.matmul %0, %120, %cst_55 {dimension_numbers = #tpu.dot_dimension_numbers<[1], [0], [0], [1], [0, 0, 1, 1], [], []>} : vector<8x36xbf16>, vector<36x512xbf16>, vector<8x512xf32> -> vector<8x512xf32>
    %cst_56 = arith.constant 0.699999988 : f32
    %122 = vector.broadcast %cst_56 : f32 to vector<8x512xf32>
    %123 = arith.mulf %102, %122 : vector<8x512xf32>
    %124 = arith.addf %123, %121 : vector<8x512xf32>
    %cst_57 = arith.constant 7.500000e-01 : f32
    %125 = vector.broadcast %cst_57 : f32 to vector<8x512xf32>
    %126 = arith.mulf %112, %125 : vector<8x512xf32>
    %127 = arith.addf %126, %124 : vector<8x512xf32>
    %cst_58 = arith.constant 1.000000e+00 : f32
    %128 = vector.broadcast %cst_58 : f32 to vector<8x512xf32>
    %129 = arith.cmpf oge, %127, %128 : vector<8x512xf32>
    %130 = arith.extui %129 : vector<8x512xi1> to vector<8x512xi32>
    %131 = arith.sitofp %130 : vector<8x512xi32> to vector<8x512xf32>
    %cst_59 = arith.constant 1.000000e+00 : f32
    %132 = vector.broadcast %cst_59 : f32 to vector<8x512xf32>
    %133 = arith.subf %132, %131 : vector<8x512xf32>
    %134 = arith.mulf %127, %133 : vector<8x512xf32>
    %135 = math.roundeven %131 : vector<8x512xf32>
    %cst_60 = arith.constant 0.000000e+00 : f32
    %cst_61 = arith.constant 2.550000e+02 : f32
    %136 = vector.broadcast %cst_60 : f32 to vector<8x512xf32>
    %137 = arith.maximumf %136, %135 : vector<8x512xf32>
    %138 = vector.broadcast %cst_61 : f32 to vector<8x512xf32>
    %139 = arith.minimumf %138, %137 : vector<8x512xf32>
    %140 = arith.addf %118, %139 : vector<8x512xf32>
    %c6 = arith.constant 6 : index
    %c0_62 = arith.constant 0 : index
    %c0_63 = arith.constant 0 : index
    %141 = vector.load %arg1[%c6, %c0_62, %c0_63] : memref<8x36x512xbf16, #tpu.memory_space<vmem>>, vector<1x36x512xbf16>
    %142 = vector.shape_cast %141 : vector<1x36x512xbf16> to vector<36x512xbf16>
    %cst_64 = arith.constant dense<0.000000e+00> : vector<8x512xf32>
    %143 = tpu.matmul %0, %142, %cst_64 {dimension_numbers = #tpu.dot_dimension_numbers<[1], [0], [0], [1], [0, 0, 1, 1], [], []>} : vector<8x36xbf16>, vector<36x512xbf16>, vector<8x512xf32> -> vector<8x512xf32>
    %cst_65 = arith.constant 0.699999988 : f32
    %144 = vector.broadcast %cst_65 : f32 to vector<8x512xf32>
    %145 = arith.mulf %124, %144 : vector<8x512xf32>
    %146 = arith.addf %145, %143 : vector<8x512xf32>
    %cst_66 = arith.constant 7.500000e-01 : f32
    %147 = vector.broadcast %cst_66 : f32 to vector<8x512xf32>
    %148 = arith.mulf %134, %147 : vector<8x512xf32>
    %149 = arith.addf %148, %146 : vector<8x512xf32>
    %cst_67 = arith.constant 1.000000e+00 : f32
    %150 = vector.broadcast %cst_67 : f32 to vector<8x512xf32>
    %151 = arith.cmpf oge, %149, %150 : vector<8x512xf32>
    %152 = arith.extui %151 : vector<8x512xi1> to vector<8x512xi32>
    %153 = arith.sitofp %152 : vector<8x512xi32> to vector<8x512xf32>
    %cst_68 = arith.constant 1.000000e+00 : f32
    %154 = vector.broadcast %cst_68 : f32 to vector<8x512xf32>
    %155 = arith.subf %154, %153 : vector<8x512xf32>
    %156 = arith.mulf %149, %155 : vector<8x512xf32>
    %157 = math.roundeven %153 : vector<8x512xf32>
    %cst_69 = arith.constant 0.000000e+00 : f32
    %cst_70 = arith.constant 2.550000e+02 : f32
    %158 = vector.broadcast %cst_69 : f32 to vector<8x512xf32>
    %159 = arith.maximumf %158, %157 : vector<8x512xf32>
    %160 = vector.broadcast %cst_70 : f32 to vector<8x512xf32>
    %161 = arith.minimumf %160, %159 : vector<8x512xf32>
    %162 = arith.addf %140, %161 : vector<8x512xf32>
    %c7 = arith.constant 7 : index
    %c0_71 = arith.constant 0 : index
    %c0_72 = arith.constant 0 : index
    %163 = vector.load %arg1[%c7, %c0_71, %c0_72] : memref<8x36x512xbf16, #tpu.memory_space<vmem>>, vector<1x36x512xbf16>
    %164 = vector.shape_cast %163 : vector<1x36x512xbf16> to vector<36x512xbf16>
    %cst_73 = arith.constant dense<0.000000e+00> : vector<8x512xf32>
    %165 = tpu.matmul %0, %164, %cst_73 {dimension_numbers = #tpu.dot_dimension_numbers<[1], [0], [0], [1], [0, 0, 1, 1], [], []>} : vector<8x36xbf16>, vector<36x512xbf16>, vector<8x512xf32> -> vector<8x512xf32>
    %cst_74 = arith.constant 0.699999988 : f32
    %166 = vector.broadcast %cst_74 : f32 to vector<8x512xf32>
    %167 = arith.mulf %146, %166 : vector<8x512xf32>
    %168 = arith.addf %167, %165 : vector<8x512xf32>
    %cst_75 = arith.constant 7.500000e-01 : f32
    %169 = vector.broadcast %cst_75 : f32 to vector<8x512xf32>
    %170 = arith.mulf %156, %169 : vector<8x512xf32>
    %171 = arith.addf %170, %168 : vector<8x512xf32>
    %cst_76 = arith.constant 1.000000e+00 : f32
    %172 = vector.broadcast %cst_76 : f32 to vector<8x512xf32>
    %173 = arith.cmpf oge, %171, %172 : vector<8x512xf32>
    %174 = arith.extui %173 : vector<8x512xi1> to vector<8x512xi32>
    %175 = arith.sitofp %174 : vector<8x512xi32> to vector<8x512xf32>
    %176 = math.roundeven %175 : vector<8x512xf32>
    %cst_77 = arith.constant 0.000000e+00 : f32
    %cst_78 = arith.constant 2.550000e+02 : f32
    %177 = vector.broadcast %cst_77 : f32 to vector<8x512xf32>
    %178 = arith.maximumf %177, %176 : vector<8x512xf32>
    %179 = vector.broadcast %cst_78 : f32 to vector<8x512xf32>
    %180 = arith.minimumf %179, %178 : vector<8x512xf32>
    %181 = arith.addf %162, %180 : vector<8x512xf32>
    %182 = arith.truncf %181 : vector<8x512xf32> to vector<8x512xbf16>
    %c1_79 = arith.constant 1 : index
    %c0_80 = arith.constant 0 : index
    %c0_81 = arith.constant 0 : index
    %183 = vector.load %arg3[%c1_79, %c0_80, %c0_81] : memref<2x8x512xbf16, #tpu.memory_space<vmem>>, vector<1x8x512xbf16>
    %184 = vector.shape_cast %183 : vector<1x8x512xbf16> to vector<8x512xbf16>
    %185 = vector.shape_cast %182 : vector<8x512xbf16> to vector<1x8x512xbf16>
    tpu.vector_store %arg3[%c1_79, %c0_80, %c0_81], %185 {strides = array<i32>} : memref<2x8x512xbf16, #tpu.memory_space<vmem>>, vector<1x8x512xbf16>,
    return
  }
  func.func @transform_0(%arg0: i32) -> (i32, i32, i32) {
    %c0_i32 = arith.constant 0 : i32
    %c0_i32_0 = arith.constant 0 : i32
    %c0_i32_1 = arith.constant 0 : i32
    return %c0_i32, %c0_i32_0, %arg0 : i32, i32, i32
  }
  func.func @transform_1(%arg0: i32) -> (i32, i32) {
    %c0_i32 = arith.constant 0 : i32
    %c0_i32_0 = arith.constant 0 : i32
    %c0_i32_1 = arith.constant 0 : i32
    return %c0_i32, %c0_i32_0 : i32, i32
  }
  func.func @transform_2(%arg0: i32) -> (i32, i32, i32) {
    %c0_i32 = arith.constant 0 : i32
    %c0_i32_0 = arith.constant 0 : i32
    %c0_i32_1 = arith.constant 0 : i32
    return %c0_i32, %c0_i32_0, %arg0 : i32, i32, i32
  }
}

module attributes {stable_mosaic.version = 11 : i64} {
  func.func @kernel(%arg0: i32, %arg1: memref<16x144xbf16, #tpu.memory_space<vmem>>, %arg2: memref<144x512xbf16, #tpu.memory_space<vmem>>, %arg3: memref<16x1xf32, #tpu.memory_space<vmem>>, %arg4: memref<16x512xf32, #tpu.memory_space<vmem>>) attributes {dimension_semantics = [#tpu.dimension_semantics<parallel>], iteration_bounds = array<i64: 1>, scalar_prefetch = 0 : i64, scratch_operands = 0 : i64, tpu.core_type = #tpu.core_type<tc>, window_params = [{pipeline_mode = #tpu.pipeline_mode<synchronous>, transform_indices = @transform_0, window_bounds = array<i64: 16, 144>}, {transform_indices = @transform_1, window_bounds = array<i64: 144, 512>}, {pipeline_mode = #tpu.pipeline_mode<synchronous>, transform_indices = @transform_2, window_bounds = array<i64: 16, 1>}, {transform_indices = @transform_3, window_bounds = array<i64: 16, 512>}]} {
    %c0 = arith.constant 0 : index
    %c0_0 = arith.constant 0 : index
    %0 = vector.load %arg1[%c0, %c0_0] : memref<16x144xbf16, #tpu.memory_space<vmem>>, vector<16x144xbf16>
    %c0_1 = arith.constant 0 : index
    %c0_2 = arith.constant 0 : index
    %1 = vector.load %arg2[%c0_1, %c0_2] : memref<144x512xbf16, #tpu.memory_space<vmem>>, vector<144x512xbf16>
    %cst = arith.constant dense<0.000000e+00> : vector<16x512xf32>
    %2 = tpu.matmul %0, %1, %cst {dimension_numbers = #tpu.dot_dimension_numbers<[1], [0], [0], [1], [0, 0, 1, 1], [], []>} : vector<16x144xbf16>, vector<144x512xbf16>, vector<16x512xf32> -> vector<16x512xf32>
    %c0_3 = arith.constant 0 : index
    %c0_4 = arith.constant 0 : index
    %3 = vector.load %arg3[%c0_3, %c0_4] : memref<16x1xf32, #tpu.memory_space<vmem>>, vector<16x1xf32>
    %4 = vector.broadcast %3 : vector<16x1xf32> to vector<16x512xf32>
    %5 = arith.addf %2, %4 : vector<16x512xf32>
    %cst_5 = arith.constant 0.000000e+00 : f32
    %6 = vector.broadcast %cst_5 : f32 to vector<16x512xf32>
    %7 = arith.maximumf %5, %6 : vector<16x512xf32>
    %c0_6 = arith.constant 0 : index
    %c0_7 = arith.constant 0 : index
    %8 = vector.load %arg4[%c0_6, %c0_7] : memref<16x512xf32, #tpu.memory_space<vmem>>, vector<16x512xf32>
    tpu.vector_store %arg4[%c0_6, %c0_7], %7 {strides = array<i32>} : memref<16x512xf32, #tpu.memory_space<vmem>>, vector<16x512xf32>,
    return
  }
  func.func @transform_0(%arg0: i32) -> (i32, i32) {
    %c0_i32 = arith.constant 0 : i32
    %c0_i32_0 = arith.constant 0 : i32
    %c0_i32_1 = arith.constant 0 : i32
    return %c0_i32, %c0_i32_0 : i32, i32
  }
  func.func @transform_1(%arg0: i32) -> (i32, i32) {
    %c0_i32 = arith.constant 0 : i32
    %c0_i32_0 = arith.constant 0 : i32
    return %c0_i32, %arg0 : i32, i32
  }
  func.func @transform_2(%arg0: i32) -> (i32, i32) {
    %c0_i32 = arith.constant 0 : i32
    %c0_i32_0 = arith.constant 0 : i32
    %c0_i32_1 = arith.constant 0 : i32
    return %c0_i32, %c0_i32_0 : i32, i32
  }
  func.func @transform_3(%arg0: i32) -> (i32, i32) {
    %c0_i32 = arith.constant 0 : i32
    %c0_i32_0 = arith.constant 0 : i32
    return %c0_i32, %arg0 : i32, i32
  }
}

module attributes {stable_mosaic.version = 11 : i64} {
  func.func @kernel(%arg0: i32, %arg1: memref<32x144xbf16, #tpu.memory_space<vmem>>, %arg2: memref<144x128xbf16, #tpu.memory_space<vmem>>, %arg3: memref<32x1xf32, #tpu.memory_space<vmem>>, %arg4: memref<32x128xf32, #tpu.memory_space<vmem>>) attributes {dimension_semantics = [#tpu.dimension_semantics<parallel>], iteration_bounds = array<i64: 1>, scalar_prefetch = 0 : i64, scratch_operands = 0 : i64, tpu.core_type = #tpu.core_type<tc>, window_params = [{pipeline_mode = #tpu.pipeline_mode<synchronous>, transform_indices = @transform_0, window_bounds = array<i64: 32, 144>}, {transform_indices = @transform_1, window_bounds = array<i64: 144, 128>}, {pipeline_mode = #tpu.pipeline_mode<synchronous>, transform_indices = @transform_2, window_bounds = array<i64: 32, 1>}, {transform_indices = @transform_3, window_bounds = array<i64: 32, 128>}]} {
    %c0 = arith.constant 0 : index
    %c0_0 = arith.constant 0 : index
    %0 = vector.load %arg1[%c0, %c0_0] : memref<32x144xbf16, #tpu.memory_space<vmem>>, vector<32x144xbf16>
    %c0_1 = arith.constant 0 : index
    %c0_2 = arith.constant 0 : index
    %1 = vector.load %arg2[%c0_1, %c0_2] : memref<144x128xbf16, #tpu.memory_space<vmem>>, vector<144x128xbf16>
    %cst = arith.constant dense<0.000000e+00> : vector<32x128xf32>
    %2 = tpu.matmul %0, %1, %cst {dimension_numbers = #tpu.dot_dimension_numbers<[1], [0], [0], [1], [0, 0, 1, 1], [], []>} : vector<32x144xbf16>, vector<144x128xbf16>, vector<32x128xf32> -> vector<32x128xf32>
    %c0_3 = arith.constant 0 : index
    %c0_4 = arith.constant 0 : index
    %3 = vector.load %arg3[%c0_3, %c0_4] : memref<32x1xf32, #tpu.memory_space<vmem>>, vector<32x1xf32>
    %4 = vector.broadcast %3 : vector<32x1xf32> to vector<32x128xf32>
    %5 = arith.addf %2, %4 : vector<32x128xf32>
    %cst_5 = arith.constant 0.000000e+00 : f32
    %6 = vector.broadcast %cst_5 : f32 to vector<32x128xf32>
    %7 = arith.maximumf %5, %6 : vector<32x128xf32>
    %c0_6 = arith.constant 0 : index
    %c0_7 = arith.constant 0 : index
    %8 = vector.load %arg4[%c0_6, %c0_7] : memref<32x128xf32, #tpu.memory_space<vmem>>, vector<32x128xf32>
    tpu.vector_store %arg4[%c0_6, %c0_7], %7 {strides = array<i32>} : memref<32x128xf32, #tpu.memory_space<vmem>>, vector<32x128xf32>,
    return
  }
  func.func @transform_0(%arg0: i32) -> (i32, i32) {
    %c0_i32 = arith.constant 0 : i32
    %c0_i32_0 = arith.constant 0 : i32
    %c0_i32_1 = arith.constant 0 : i32
    return %c0_i32, %c0_i32_0 : i32, i32
  }
  func.func @transform_1(%arg0: i32) -> (i32, i32) {
    %c0_i32 = arith.constant 0 : i32
    %c0_i32_0 = arith.constant 0 : i32
    return %c0_i32, %arg0 : i32, i32
  }
  func.func @transform_2(%arg0: i32) -> (i32, i32) {
    %c0_i32 = arith.constant 0 : i32
    %c0_i32_0 = arith.constant 0 : i32
    %c0_i32_1 = arith.constant 0 : i32
    return %c0_i32, %c0_i32_0 : i32, i32
  }
  func.func @transform_3(%arg0: i32) -> (i32, i32) {
    %c0_i32 = arith.constant 0 : i32
    %c0_i32_0 = arith.constant 0 : i32
    return %c0_i32, %arg0 : i32, i32
  }
}

module attributes {stable_mosaic.version = 11 : i64} {
  func.func @kernel(%arg0: i32, %arg1: memref<64x288xbf16, #tpu.memory_space<vmem>>, %arg2: memref<288x32xbf16, #tpu.memory_space<vmem>>, %arg3: memref<64x1xf32, #tpu.memory_space<vmem>>, %arg4: memref<64x32xf32, #tpu.memory_space<vmem>>) attributes {dimension_semantics = [#tpu.dimension_semantics<parallel>], iteration_bounds = array<i64: 1>, scalar_prefetch = 0 : i64, scratch_operands = 0 : i64, tpu.core_type = #tpu.core_type<tc>, window_params = [{pipeline_mode = #tpu.pipeline_mode<synchronous>, transform_indices = @transform_0, window_bounds = array<i64: 64, 288>}, {transform_indices = @transform_1, window_bounds = array<i64: 288, 32>}, {pipeline_mode = #tpu.pipeline_mode<synchronous>, transform_indices = @transform_2, window_bounds = array<i64: 64, 1>}, {transform_indices = @transform_3, window_bounds = array<i64: 64, 32>}]} {
    %c0 = arith.constant 0 : index
    %c0_0 = arith.constant 0 : index
    %0 = vector.load %arg1[%c0, %c0_0] : memref<64x288xbf16, #tpu.memory_space<vmem>>, vector<64x288xbf16>
    %c0_1 = arith.constant 0 : index
    %c0_2 = arith.constant 0 : index
    %1 = vector.load %arg2[%c0_1, %c0_2] : memref<288x32xbf16, #tpu.memory_space<vmem>>, vector<288x32xbf16>
    %cst = arith.constant dense<0.000000e+00> : vector<64x32xf32>
    %2 = tpu.matmul %0, %1, %cst {dimension_numbers = #tpu.dot_dimension_numbers<[1], [0], [0], [1], [0, 0, 1, 1], [], []>} : vector<64x288xbf16>, vector<288x32xbf16>, vector<64x32xf32> -> vector<64x32xf32>
    %c0_3 = arith.constant 0 : index
    %c0_4 = arith.constant 0 : index
    %3 = vector.load %arg3[%c0_3, %c0_4] : memref<64x1xf32, #tpu.memory_space<vmem>>, vector<64x1xf32>
    %4 = vector.broadcast %3 : vector<64x1xf32> to vector<64x32xf32>
    %5 = arith.addf %2, %4 : vector<64x32xf32>
    %cst_5 = arith.constant 0.000000e+00 : f32
    %6 = vector.broadcast %cst_5 : f32 to vector<64x32xf32>
    %7 = arith.maximumf %5, %6 : vector<64x32xf32>
    %c0_6 = arith.constant 0 : index
    %c0_7 = arith.constant 0 : index
    %8 = vector.load %arg4[%c0_6, %c0_7] : memref<64x32xf32, #tpu.memory_space<vmem>>, vector<64x32xf32>
    tpu.vector_store %arg4[%c0_6, %c0_7], %7 {strides = array<i32>} : memref<64x32xf32, #tpu.memory_space<vmem>>, vector<64x32xf32>,
    return
  }
  func.func @transform_0(%arg0: i32) -> (i32, i32) {
    %c0_i32 = arith.constant 0 : i32
    %c0_i32_0 = arith.constant 0 : i32
    %c0_i32_1 = arith.constant 0 : i32
    return %c0_i32, %c0_i32_0 : i32, i32
  }
  func.func @transform_1(%arg0: i32) -> (i32, i32) {
    %c0_i32 = arith.constant 0 : i32
    %c0_i32_0 = arith.constant 0 : i32
    return %c0_i32, %arg0 : i32, i32
  }
  func.func @transform_2(%arg0: i32) -> (i32, i32) {
    %c0_i32 = arith.constant 0 : i32
    %c0_i32_0 = arith.constant 0 : i32
    %c0_i32_1 = arith.constant 0 : i32
    return %c0_i32, %c0_i32_0 : i32, i32
  }
  func.func @transform_3(%arg0: i32) -> (i32, i32) {
    %c0_i32 = arith.constant 0 : i32
    %c0_i32_0 = arith.constant 0 : i32
    return %c0_i32, %arg0 : i32, i32
  }
}

module attributes {stable_mosaic.version = 11 : i64} {
  func.func @kernel(%arg0: i32, %arg1: memref<128x576xbf16, #tpu.memory_space<vmem>>, %arg2: memref<576x8xbf16, #tpu.memory_space<vmem>>, %arg3: memref<128x1xf32, #tpu.memory_space<vmem>>, %arg4: memref<128x8xf32, #tpu.memory_space<vmem>>) attributes {dimension_semantics = [#tpu.dimension_semantics<parallel>], iteration_bounds = array<i64: 1>, scalar_prefetch = 0 : i64, scratch_operands = 0 : i64, tpu.core_type = #tpu.core_type<tc>, window_params = [{pipeline_mode = #tpu.pipeline_mode<synchronous>, transform_indices = @transform_0, window_bounds = array<i64: 128, 576>}, {transform_indices = @transform_1, window_bounds = array<i64: 576, 8>}, {pipeline_mode = #tpu.pipeline_mode<synchronous>, transform_indices = @transform_2, window_bounds = array<i64: 128, 1>}, {transform_indices = @transform_3, window_bounds = array<i64: 128, 8>}]} {
    %c0 = arith.constant 0 : index
    %c0_0 = arith.constant 0 : index
    %0 = vector.load %arg1[%c0, %c0_0] : memref<128x576xbf16, #tpu.memory_space<vmem>>, vector<128x576xbf16>
    %c0_1 = arith.constant 0 : index
    %c0_2 = arith.constant 0 : index
    %1 = vector.load %arg2[%c0_1, %c0_2] : memref<576x8xbf16, #tpu.memory_space<vmem>>, vector<576x8xbf16>
    %cst = arith.constant dense<0.000000e+00> : vector<128x8xf32>
    %2 = tpu.matmul %0, %1, %cst {dimension_numbers = #tpu.dot_dimension_numbers<[1], [0], [0], [1], [0, 0, 1, 1], [], []>} : vector<128x576xbf16>, vector<576x8xbf16>, vector<128x8xf32> -> vector<128x8xf32>
    %c0_3 = arith.constant 0 : index
    %c0_4 = arith.constant 0 : index
    %3 = vector.load %arg3[%c0_3, %c0_4] : memref<128x1xf32, #tpu.memory_space<vmem>>, vector<128x1xf32>
    %4 = vector.broadcast %3 : vector<128x1xf32> to vector<128x8xf32>
    %5 = arith.addf %2, %4 : vector<128x8xf32>
    %cst_5 = arith.constant 0.000000e+00 : f32
    %6 = vector.broadcast %cst_5 : f32 to vector<128x8xf32>
    %7 = arith.maximumf %5, %6 : vector<128x8xf32>
    %c0_6 = arith.constant 0 : index
    %c0_7 = arith.constant 0 : index
    %8 = vector.load %arg4[%c0_6, %c0_7] : memref<128x8xf32, #tpu.memory_space<vmem>>, vector<128x8xf32>
    tpu.vector_store %arg4[%c0_6, %c0_7], %7 {strides = array<i32>} : memref<128x8xf32, #tpu.memory_space<vmem>>, vector<128x8xf32>,
    return
  }
  func.func @transform_0(%arg0: i32) -> (i32, i32) {
    %c0_i32 = arith.constant 0 : i32
    %c0_i32_0 = arith.constant 0 : i32
    %c0_i32_1 = arith.constant 0 : i32
    return %c0_i32, %c0_i32_0 : i32, i32
  }
  func.func @transform_1(%arg0: i32) -> (i32, i32) {
    %c0_i32 = arith.constant 0 : i32
    %c0_i32_0 = arith.constant 0 : i32
    return %c0_i32, %arg0 : i32, i32
  }
  func.func @transform_2(%arg0: i32) -> (i32, i32) {
    %c0_i32 = arith.constant 0 : i32
    %c0_i32_0 = arith.constant 0 : i32
    %c0_i32_1 = arith.constant 0 : i32
    return %c0_i32, %c0_i32_0 : i32, i32
  }
  func.func @transform_3(%arg0: i32) -> (i32, i32) {
    %c0_i32 = arith.constant 0 : i32
    %c0_i32_0 = arith.constant 0 : i32
    return %c0_i32, %arg0 : i32, i32
  }
}

module attributes {stable_mosaic.version = 11 : i64} {
  func.func @kernel(%arg0: i32, %arg1: memref<2x512xbf16, #tpu.memory_space<vmem>>, %arg2: memref<512x2056xbf16, #tpu.memory_space<vmem>>, %arg3: memref<1x2056xf32, #tpu.memory_space<vmem>>, %arg4: memref<2x2056xf32, #tpu.memory_space<vmem>>) attributes {dimension_semantics = [#tpu.dimension_semantics<arbitrary>], iteration_bounds = array<i64: 1>, scalar_prefetch = 0 : i64, scratch_operands = 0 : i64, tpu.core_type = #tpu.core_type<tc>, window_params = [{pipeline_mode = #tpu.pipeline_mode<synchronous>, transform_indices = @transform_0, window_bounds = array<i64: 2, 512>}, {pipeline_mode = #tpu.pipeline_mode<synchronous>, transform_indices = @transform_1, window_bounds = array<i64: 512, 2056>}, {pipeline_mode = #tpu.pipeline_mode<synchronous>, transform_indices = @transform_2, window_bounds = array<i64: 1, 2056>}, {pipeline_mode = #tpu.pipeline_mode<synchronous>, transform_indices = @transform_3, window_bounds = array<i64: 2, 2056>}]} {
    %c0 = arith.constant 0 : index
    %c0_0 = arith.constant 0 : index
    %0 = vector.load %arg1[%c0, %c0_0] : memref<2x512xbf16, #tpu.memory_space<vmem>>, vector<2x512xbf16>
    %c0_1 = arith.constant 0 : index
    %c0_2 = arith.constant 0 : index
    %1 = vector.load %arg2[%c0_1, %c0_2] : memref<512x2056xbf16, #tpu.memory_space<vmem>>, vector<512x2056xbf16>
    %cst = arith.constant dense<0.000000e+00> : vector<2x2056xf32>
    %2 = tpu.matmul %0, %1, %cst {dimension_numbers = #tpu.dot_dimension_numbers<[1], [0], [0], [1], [0, 0, 1, 1], [], []>} : vector<2x512xbf16>, vector<512x2056xbf16>, vector<2x2056xf32> -> vector<2x2056xf32>
    %c0_3 = arith.constant 0 : index
    %c0_4 = arith.constant 0 : index
    %3 = vector.load %arg3[%c0_3, %c0_4] : memref<1x2056xf32, #tpu.memory_space<vmem>>, vector<1x2056xf32>
    %4 = vector.broadcast %3 : vector<1x2056xf32> to vector<2x2056xf32>
    %5 = arith.addf %2, %4 : vector<2x2056xf32>
    %cst_5 = arith.constant 0.000000e+00 : f32
    %6 = vector.broadcast %cst_5 : f32 to vector<2x2056xf32>
    %7 = arith.maximumf %5, %6 : vector<2x2056xf32>
    %c0_6 = arith.constant 0 : index
    %c0_7 = arith.constant 0 : index
    %8 = vector.load %arg4[%c0_6, %c0_7] : memref<2x2056xf32, #tpu.memory_space<vmem>>, vector<2x2056xf32>
    tpu.vector_store %arg4[%c0_6, %c0_7], %7 {strides = array<i32>} : memref<2x2056xf32, #tpu.memory_space<vmem>>, vector<2x2056xf32>,
    return
  }
  func.func @transform_0(%arg0: i32) -> (i32, i32) {
    %c0_i32 = arith.constant 0 : i32
    %c0_i32_0 = arith.constant 0 : i32
    %c0_i32_1 = arith.constant 0 : i32
    return %c0_i32, %c0_i32_0 : i32, i32
  }
  func.func @transform_1(%arg0: i32) -> (i32, i32) {
    %c0_i32 = arith.constant 0 : i32
    %c0_i32_0 = arith.constant 0 : i32
    %c0_i32_1 = arith.constant 0 : i32
    return %c0_i32, %c0_i32_0 : i32, i32
  }
  func.func @transform_2(%arg0: i32) -> (i32, i32) {
    %c0_i32 = arith.constant 0 : i32
    %c0_i32_0 = arith.constant 0 : i32
    %c0_i32_1 = arith.constant 0 : i32
    return %c0_i32, %c0_i32_0 : i32, i32
  }
  func.func @transform_3(%arg0: i32) -> (i32, i32) {
    %c0_i32 = arith.constant 0 : i32
    %c0_i32_0 = arith.constant 0 : i32
    %c0_i32_1 = arith.constant 0 : i32
    return %c0_i32, %c0_i32_0 : i32, i32
  }
}

module attributes {stable_mosaic.version = 11 : i64} {
  func.func @kernel(%arg0: i32, %arg1: memref<2x2056xbf16, #tpu.memory_space<vmem>>, %arg2: memref<2056x128xbf16, #tpu.memory_space<vmem>>, %arg3: memref<1x128xf32, #tpu.memory_space<vmem>>, %arg4: memref<2x128xf32, #tpu.memory_space<vmem>>) attributes {dimension_semantics = [#tpu.dimension_semantics<arbitrary>], iteration_bounds = array<i64: 1>, scalar_prefetch = 0 : i64, scratch_operands = 0 : i64, tpu.core_type = #tpu.core_type<tc>, window_params = [{pipeline_mode = #tpu.pipeline_mode<synchronous>, transform_indices = @transform_0, window_bounds = array<i64: 2, 2056>}, {pipeline_mode = #tpu.pipeline_mode<synchronous>, transform_indices = @transform_1, window_bounds = array<i64: 2056, 128>}, {pipeline_mode = #tpu.pipeline_mode<synchronous>, transform_indices = @transform_2, window_bounds = array<i64: 1, 128>}, {pipeline_mode = #tpu.pipeline_mode<synchronous>, transform_indices = @transform_3, window_bounds = array<i64: 2, 128>}]} {
    %c0 = arith.constant 0 : index
    %c0_0 = arith.constant 0 : index
    %0 = vector.load %arg1[%c0, %c0_0] : memref<2x2056xbf16, #tpu.memory_space<vmem>>, vector<2x2056xbf16>
    %c0_1 = arith.constant 0 : index
    %c0_2 = arith.constant 0 : index
    %1 = vector.load %arg2[%c0_1, %c0_2] : memref<2056x128xbf16, #tpu.memory_space<vmem>>, vector<2056x128xbf16>
    %cst = arith.constant dense<0.000000e+00> : vector<2x128xf32>
    %2 = tpu.matmul %0, %1, %cst {dimension_numbers = #tpu.dot_dimension_numbers<[1], [0], [0], [1], [0, 0, 1, 1], [], []>} : vector<2x2056xbf16>, vector<2056x128xbf16>, vector<2x128xf32> -> vector<2x128xf32>
    %c0_3 = arith.constant 0 : index
    %c0_4 = arith.constant 0 : index
    %3 = vector.load %arg3[%c0_3, %c0_4] : memref<1x128xf32, #tpu.memory_space<vmem>>, vector<1x128xf32>
    %4 = vector.broadcast %3 : vector<1x128xf32> to vector<2x128xf32>
    %5 = arith.addf %2, %4 : vector<2x128xf32>
    %cst_5 = arith.constant 0.000000e+00 : f32
    %6 = vector.broadcast %cst_5 : f32 to vector<2x128xf32>
    %7 = arith.maximumf %5, %6 : vector<2x128xf32>
    %c0_6 = arith.constant 0 : index
    %c0_7 = arith.constant 0 : index
    %8 = vector.load %arg4[%c0_6, %c0_7] : memref<2x128xf32, #tpu.memory_space<vmem>>, vector<2x128xf32>
    tpu.vector_store %arg4[%c0_6, %c0_7], %7 {strides = array<i32>} : memref<2x128xf32, #tpu.memory_space<vmem>>, vector<2x128xf32>,
    return
  }
  func.func @transform_0(%arg0: i32) -> (i32, i32) {
    %c0_i32 = arith.constant 0 : i32
    %c0_i32_0 = arith.constant 0 : i32
    %c0_i32_1 = arith.constant 0 : i32
    return %c0_i32, %c0_i32_0 : i32, i32
  }
  func.func @transform_1(%arg0: i32) -> (i32, i32) {
    %c0_i32 = arith.constant 0 : i32
    %c0_i32_0 = arith.constant 0 : i32
    %c0_i32_1 = arith.constant 0 : i32
    return %c0_i32, %c0_i32_0 : i32, i32
  }
  func.func @transform_2(%arg0: i32) -> (i32, i32) {
    %c0_i32 = arith.constant 0 : i32
    %c0_i32_0 = arith.constant 0 : i32
    %c0_i32_1 = arith.constant 0 : i32
    return %c0_i32, %c0_i32_0 : i32, i32
  }
  func.func @transform_3(%arg0: i32) -> (i32, i32) {
    %c0_i32 = arith.constant 0 : i32
    %c0_i32_0 = arith.constant 0 : i32
    %c0_i32_1 = arith.constant 0 : i32
    return %c0_i32, %c0_i32_0 : i32, i32
  }
}

module attributes {stable_mosaic.version = 11 : i64} {
  func.func @kernel(%arg0: i32, %arg1: memref<2x128xbf16, #tpu.memory_space<vmem>>, %arg2: memref<128x11xbf16, #tpu.memory_space<vmem>>, %arg3: memref<1x11xf32, #tpu.memory_space<vmem>>, %arg4: memref<2x11xf32, #tpu.memory_space<vmem>>) attributes {dimension_semantics = [#tpu.dimension_semantics<arbitrary>], iteration_bounds = array<i64: 1>, scalar_prefetch = 0 : i64, scratch_operands = 0 : i64, tpu.core_type = #tpu.core_type<tc>, window_params = [{pipeline_mode = #tpu.pipeline_mode<synchronous>, transform_indices = @transform_0, window_bounds = array<i64: 2, 128>}, {pipeline_mode = #tpu.pipeline_mode<synchronous>, transform_indices = @transform_1, window_bounds = array<i64: 128, 11>}, {pipeline_mode = #tpu.pipeline_mode<synchronous>, transform_indices = @transform_2, window_bounds = array<i64: 1, 11>}, {pipeline_mode = #tpu.pipeline_mode<synchronous>, transform_indices = @transform_3, window_bounds = array<i64: 2, 11>}]} {
    %c0 = arith.constant 0 : index
    %c0_0 = arith.constant 0 : index
    %0 = vector.load %arg1[%c0, %c0_0] : memref<2x128xbf16, #tpu.memory_space<vmem>>, vector<2x128xbf16>
    %c0_1 = arith.constant 0 : index
    %c0_2 = arith.constant 0 : index
    %1 = vector.load %arg2[%c0_1, %c0_2] : memref<128x11xbf16, #tpu.memory_space<vmem>>, vector<128x11xbf16>
    %cst = arith.constant dense<0.000000e+00> : vector<2x11xf32>
    %2 = tpu.matmul %0, %1, %cst {dimension_numbers = #tpu.dot_dimension_numbers<[1], [0], [0], [1], [0, 0, 1, 1], [], []>} : vector<2x128xbf16>, vector<128x11xbf16>, vector<2x11xf32> -> vector<2x11xf32>
    %c0_3 = arith.constant 0 : index
    %c0_4 = arith.constant 0 : index
    %3 = vector.load %arg3[%c0_3, %c0_4] : memref<1x11xf32, #tpu.memory_space<vmem>>, vector<1x11xf32>
    %4 = vector.broadcast %3 : vector<1x11xf32> to vector<2x11xf32>
    %5 = arith.addf %2, %4 : vector<2x11xf32>
    %c0_5 = arith.constant 0 : index
    %c0_6 = arith.constant 0 : index
    %6 = vector.load %arg4[%c0_5, %c0_6] : memref<2x11xf32, #tpu.memory_space<vmem>>, vector<2x11xf32>
    tpu.vector_store %arg4[%c0_5, %c0_6], %5 {strides = array<i32>} : memref<2x11xf32, #tpu.memory_space<vmem>>, vector<2x11xf32>,
    return
  }
  func.func @transform_0(%arg0: i32) -> (i32, i32) {
    %c0_i32 = arith.constant 0 : i32
    %c0_i32_0 = arith.constant 0 : i32
    %c0_i32_1 = arith.constant 0 : i32
    return %c0_i32, %c0_i32_0 : i32, i32
  }
  func.func @transform_1(%arg0: i32) -> (i32, i32) {
    %c0_i32 = arith.constant 0 : i32
    %c0_i32_0 = arith.constant 0 : i32
    %c0_i32_1 = arith.constant 0 : i32
    return %c0_i32, %c0_i32_0 : i32, i32
  }
  func.func @transform_2(%arg0: i32) -> (i32, i32) {
    %c0_i32 = arith.constant 0 : i32
    %c0_i32_0 = arith.constant 0 : i32
    %c0_i32_1 = arith.constant 0 : i32
    return %c0_i32, %c0_i32_0 : i32, i32
  }
  func.func @transform_3(%arg0: i32) -> (i32, i32) {
    %c0_i32 = arith.constant 0 : i32
    %c0_i32_0 = arith.constant 0 : i32
    %c0_i32_1 = arith.constant 0 : i32
    return %c0_i32, %c0_i32_0 : i32, i32
  }
}

</mosaic_0001>

<bundles_post_ra>
// kernel: hnn_forward.9
= control target key start
LH: loop header
LB: loop body
LE: loop exit
PB: predicated region body
PF: predicated region fallthrough
CT: control target
= control target key end

     0   :  { %s3508_s9 = smov 0   ;;  %s3510_s10 = smov 0   ;;  %s4926_s0 = inlined_call_operand.vmem [shape: bf16[8,18,8192], index: 0, kind: input, shape index: {}]   ;;  %s4927_s1 = inlined_call_operand.vmem [shape: bf16[4,18], index: 1, kind: input, shape index: {}]   ;;  %s4928_s2 = inlined_call_operand.vmem [shape: bf16[8,4,8192], index: 2, kind: output, shape index: {}]  }
   0x1   :  { %s3512_s11 = smov 0  }
   0x2 LB: > { %s2879_s12 = sadd.s32 4294967295, %s3490_s11   ;;  %s3525_s13 = sadd.s32 1, %s3490_s11   ;;  %s3490_s11 = sphi %s3512_s11, %s4932_s11   ;;  %s3486_s10 = sphi %s3510_s10, %s4931_s10   ;;  %s3482_s9 = sphi %s3508_s9, %s4930_s9  }
   0x3   : > { %s16_s14 = ssub.s32 %s3490_s11, %s3525_s13  ;;  %s19_s15 = sadd.s32 1, %s3486_s10 }
   0x4   : > { %p17_p0 = scmp.eq.s32.totalorder %s16_s14, 0  ;;  %p26_p1 = scmp.ne.s32.totalorder %s3486_s10, %s3482_s9 }
   0x5   : > { %p27_p2 = scmp.eq.s32.totalorder %s3490_s11, 0  ;;  %p77_p3 = scmp.eq.s32.totalorder %s2879_s12, 7 }
   0x6   : > { %s3536_s16 = scalar_select %p17_p0, %s3486_s10, %s19_s15  }
   0x7   : > { %p28_p4 = por %p27_p2, %p26_p1  ;;  %p3538_p5 = por %p77_p3, %p26_p1 }
   0x8   : > { %p2882_p6 = scmp.ge.s32.totalorder %s3490_s11, 8 }
   0xa   : > { %102 = sbr.rel (%p2882_p6) target bundleno = 115 (0x73), region = 20 }
   0xf   : > { %105 = sbr.rel (!%p28_p4) target bundleno = 115 (0x73), region = 24  ;;  %s107_s18 = sand.u32 (%p28_p4), 1, %s3486_s10  }
  0x10   : > { %s3374_s19 = sshll.u32 (%p28_p4), %s3490_s11, 5  ;;  %s3440_s20 = smul.u32 (%p28_p4), 768, %s107_s18 }
  0x11   : > { %s3548_s23 = scalar_lea.vmem (%p28_p4), %s4926_s0, %s3374_s19 }
  0x12   : > { %v125_v0 = vld [vmem:[%s3548_s23] sm:$0xff] (%p28_p4)  ;;  %v127_v1 = vld [vmem:[%s3548_s23 + $0x8] sm:$0xff] (%p28_p4)  ;;  %v129_v2 = vld [vmem:[%s3548_s23 + $0x10] sm:$0xff] (%p28_p4)  ;;  %s3553_s24 = scalar_lea.vmem (%p28_p4), [#allocation2], %s3440_s20 }
  0x13   : > { %126 = vst [vmem:[%s3553_s24] sm:$0xff] (%p28_p4), %v125_v0  ;;  %v131_v3 = vld [vmem:[%s3548_s23 + $0x18] sm:$0xff] (%p28_p4)  ;;  %v133_v4 = vld [vmem:[%s3548_s23 + $0x100] sm:$0xff] (%p28_p4)  ;;  %v135_v5 = vld [vmem:[%s3548_s23 + $0x108] sm:$0xff] (%p28_p4) }
  0x14   : > { %128 = vst [vmem:[%s3553_s24 + $0x8] sm:$0xff] %v127_v1  ;;  %v137_v6 = vld [vmem:[%s3548_s23 + $0x110] sm:$0xff]  ;;  %v139_v7 = vld [vmem:[%s3548_s23 + $0x118] sm:$0xff]  ;;  %v141_v8 = vld [vmem:[%s3548_s23 + $0x200] sm:$0xff] }
  0x15   : > { %130 = vst [vmem:[%s3553_s24 + $0x10] sm:$0xff] %v129_v2  ;;  %v143_v9 = vld [vmem:[%s3548_s23 + $0x208] sm:$0xff]  ;;  %v145_v10 = vld [vmem:[%s3548_s23 + $0x210] sm:$0xff]  ;;  %v147_v11 = vld [vmem:[%s3548_s23 + $0x218] sm:$0xff] }
  0x16   : > { %132 = vst [vmem:[%s3553_s24 + $0x18] sm:$0xff] %v131_v3  ;;  %v149_v12 = vld [vmem:[%s3548_s23 + $0x300] sm:$0xff]  ;;  %v151_v13 = vld [vmem:[%s3548_s23 + $0x308] sm:$0xff]  ;;  %v153_v14 = vld [vmem:[%s3548_s23 + $0x310] sm:$0xff] }
  0x17   : > { %134 = vst [vmem:[%s3553_s24 + $0x20] sm:$0xff] %v133_v4  ;;  %v155_v15 = vld [vmem:[%s3548_s23 + $0x318] sm:$0xff]  ;;  %v157_v16 = vld [vmem:[%s3548_s23 + $0x400] sm:$0xff]  ;;  %v159_v17 = vld [vmem:[%s3548_s23 + $0x408] sm:$0xff] }
  0x18   : > { %136 = vst [vmem:[%s3553_s24 + $0x28] sm:$0xff] %v135_v5  ;;  %v161_v18 = vld [vmem:[%s3548_s23 + $0x410] sm:$0xff]  ;;  %v163_v19 = vld [vmem:[%s3548_s23 + $0x418] sm:$0xff]  ;;  %v165_v20 = vld [vmem:[%s3548_s23 + $0x500] sm:$0xff] }
  0x19   : > { %138 = vst [vmem:[%s3553_s24 + $0x30] sm:$0xff] %v137_v6  ;;  %v167_v21 = vld [vmem:[%s3548_s23 + $0x508] sm:$0xff]  ;;  %v169_v22 = vld [vmem:[%s3548_s23 + $0x510] sm:$0xff]  ;;  %v171_v23 = vld [vmem:[%s3548_s23 + $0x518] sm:$0xff] }
  0x1a   : > { %140 = vst [vmem:[%s3553_s24 + $0x38] sm:$0xff] %v139_v7  ;;  %v173_v24 = vld [vmem:[%s3548_s23 + $0x600] sm:$0xff]  ;;  %v175_v25 = vld [vmem:[%s3548_s23 + $0x608] sm:$0xff]  ;;  %v177_v26 = vld [vmem:[%s3548_s23 + $0x610] sm:$0xff] }
  0x1b   : > { %142 = vst [vmem:[%s3553_s24 + $0x40] sm:$0xff] %v141_v8  ;;  %v179_v27 = vld [vmem:[%s3548_s23 + $0x618] sm:$0xff]  ;;  %v181_v28 = vld [vmem:[%s3548_s23 + $0x700] sm:$0xff]  ;;  %v183_v29 = vld [vmem:[%s3548_s23 + $0x708] sm:$0xff] }
  0x1c   : > { %144 = vst [vmem:[%s3553_s24 + $0x48] sm:$0xff] %v143_v9  ;;  %v185_v30 = vld [vmem:[%s3548_s23 + $0x710] sm:$0xff]  ;;  %v187_v31 = vld [vmem:[%s3548_s23 + $0x718] sm:$0xff]  ;;  %v189_v32 = vld [vmem:[%s3548_s23 + $0x800] sm:$0xff] }
  0x1d   : > { %146 = vst [vmem:[%s3553_s24 + $0x50] sm:$0xff] %v145_v10  ;;  %v191_v33 = vld [vmem:[%s3548_s23 + $0x808] sm:$0xff]  ;;  %v193_v34 = vld [vmem:[%s3548_s23 + $0x810] sm:$0xff]  ;;  %v195_v35 = vld [vmem:[%s3548_s23 + $0x818] sm:$0xff] }
  0x1e   : > { %148 = vst [vmem:[%s3553_s24 + $0x58] sm:$0xff] %v147_v11  ;;  %v197_v36 = vld [vmem:[%s3548_s23 + $0x900] sm:$0xff]  ;;  %v199_v37 = vld [vmem:[%s3548_s23 + $0x908] sm:$0xff]  ;;  %v201_v38 = vld [vmem:[%s3548_s23 + $0x910] sm:$0xff] }
  0x1f   : > { %150 = vst [vmem:[%s3553_s24 + $0x60] sm:$0xff] %v149_v12  ;;  %v203_v39 = vld [vmem:[%s3548_s23 + $0x918] sm:$0xff]  ;;  %v205_v40 = vld [vmem:[%s3548_s23 + $0xa00] sm:$0xff]  ;;  %v207_v41 = vld [vmem:[%s3548_s23 + $0xa08] sm:$0xff] }
  0x20   : > { %152 = vst [vmem:[%s3553_s24 + $0x68] sm:$0xff] %v151_v13  ;;  %v209_v42 = vld [vmem:[%s3548_s23 + $0xa10] sm:$0xff]  ;;  %v211_v43 = vld [vmem:[%s3548_s23 + $0xa18] sm:$0xff]  ;;  %v213_v44 = vld [vmem:[%s3548_s23 + $0xb00] sm:$0xff] }
  0x21   : > { %154 = vst [vmem:[%s3553_s24 + $0x70] sm:$0xff] %v153_v14  ;;  %v215_v45 = vld [vmem:[%s3548_s23 + $0xb08] sm:$0xff]  ;;  %v217_v46 = vld [vmem:[%s3548_s23 + $0xb10] sm:$0xff]  ;;  %v219_v47 = vld [vmem:[%s3548_s23 + $0xb18] sm:$0xff] }
  0x22   : > { %156 = vst [vmem:[%s3553_s24 + $0x78] sm:$0xff] %v155_v15  ;;  %v221_v48 = vld [vmem:[%s3548_s23 + $0xc00] sm:$0xff]  ;;  %v223_v49 = vld [vmem:[%s3548_s23 + $0xc08] sm:$0xff]  ;;  %v225_v50 = vld [vmem:[%s3548_s23 + $0xc10] sm:$0xff] }
  0x23   : > { %158 = vst [vmem:[%s3553_s24 + $0x80] sm:$0xff] %v157_v16  ;;  %v227_v51 = vld [vmem:[%s3548_s23 + $0xc18] sm:$0xff]  ;;  %v229_v52 = vld [vmem:[%s3548_s23 + $0xd00] sm:$0xff]  ;;  %v231_v53 = vld [vmem:[%s3548_s23 + $0xd08] sm:$0xff] }
  0x24   : > { %160 = vst [vmem:[%s3553_s24 + $0x88] sm:$0xff] %v159_v17  ;;  %v233_v54 = vld [vmem:[%s3548_s23 + $0xd10] sm:$0xff]  ;;  %v235_v55 = vld [vmem:[%s3548_s23 + $0xd18] sm:$0xff]  ;;  %v237_v56 = vld [vmem:[%s3548_s23 + $0xe00] sm:$0xff] }
  0x25   : > { %162 = vst [vmem:[%s3553_s24 + $0x90] sm:$0xff] %v161_v18  ;;  %v239_v57 = vld [vmem:[%s3548_s23 + $0xe08] sm:$0xff]  ;;  %v241_v58 = vld [vmem:[%s3548_s23 + $0xe10] sm:$0xff]  ;;  %v243_v59 = vld [vmem:[%s3548_s23 + $0xe18] sm:$0xff] }
  0x26   : > { %164 = vst [vmem:[%s3553_s24 + $0x98] sm:$0xff] %v163_v19  ;;  %v245_v60 = vld [vmem:[%s3548_s23 + $0xf00] sm:$0xff]  ;;  %v247_v61 = vld [vmem:[%s3548_s23 + $0xf08] sm:$0xff]  ;;  %v249_v62 = vld [vmem:[%s3548_s23 + $0xf10] sm:$0xff] }
  0x27   : > { %166 = vst [vmem:[%s3553_s24 + $0xa0] sm:$0xff] %v165_v20  ;;  %v251_v63 = vld [vmem:[%s3548_s23 + $0xf18] sm:$0xff]  ;;  %v253_v0 = vld [vmem:[%s3548_s23 + $0x1000] sm:$0xff]  ;;  %v255_v1 = vld [vmem:[%s3548_s23 + $0x1008] sm:$0xff] }
  0x28   : > { %168 = vst [vmem:[%s3553_s24 + $0xa8] sm:$0xff] %v167_v21  ;;  %v257_v2 = vld [vmem:[%s3548_s23 + $0x1010] sm:$0xff]  ;;  %v259_v3 = vld [vmem:[%s3548_s23 + $0x1018] sm:$0xff]  ;;  %v261_v4 = vld [vmem:[%s3548_s23 + $0x1100] sm:$0xff] }
  0x29   : > { %170 = vst [vmem:[%s3553_s24 + $0xb0] sm:$0xff] %v169_v22  ;;  %v263_v5 = vld [vmem:[%s3548_s23 + $0x1108] sm:$0xff]  ;;  %v265_v6 = vld [vmem:[%s3548_s23 + $0x1110] sm:$0xff]  ;;  %v267_v7 = vld [vmem:[%s3548_s23 + $0x1118] sm:$0xff] }
  0x2a   : > { %172 = vst [vmem:[%s3553_s24 + $0xb8] sm:$0xff] %v171_v23  ;;  %v269_v8 = vld [vmem:[%s3548_s23 + $0x1200] sm:$0xff]  ;;  %v271_v9 = vld [vmem:[%s3548_s23 + $0x1208] sm:$0xff]  ;;  %v273_v10 = vld [vmem:[%s3548_s23 + $0x1210] sm:$0xff] }
  0x2b   : > { %174 = vst [vmem:[%s3553_s24 + $0xc0] sm:$0xff] %v173_v24  ;;  %v275_v11 = vld [vmem:[%s3548_s23 + $0x1218] sm:$0xff]  ;;  %v277_v12 = vld [vmem:[%s3548_s23 + $0x1300] sm:$0xff]  ;;  %v279_v13 = vld [vmem:[%s3548_s23 + $0x1308] sm:$0xff] }
  0x2c   : > { %176 = vst [vmem:[%s3553_s24 + $0xc8] sm:$0xff] %v175_v25  ;;  %v281_v14 = vld [vmem:[%s3548_s23 + $0x1310] sm:$0xff]  ;;  %v283_v15 = vld [vmem:[%s3548_s23 + $0x1318] sm:$0xff]  ;;  %v285_v16 = vld [vmem:[%s3548_s23 + $0x1400] sm:$0xff] }
  0x2d   : > { %178 = vst [vmem:[%s3553_s24 + $0xd0] sm:$0xff] %v177_v26  ;;  %v287_v17 = vld [vmem:[%s3548_s23 + $0x1408] sm:$0xff]  ;;  %v289_v18 = vld [vmem:[%s3548_s23 + $0x1410] sm:$0xff]  ;;  %v291_v19 = vld [vmem:[%s3548_s23 + $0x1418] sm:$0xff] }
  0x2e   : > { %180 = vst [vmem:[%s3553_s24 + $0xd8] sm:$0xff] %v179_v27  ;;  %v293_v20 = vld [vmem:[%s3548_s23 + $0x1500] sm:$0xff]  ;;  %v295_v21 = vld [vmem:[%s3548_s23 + $0x1508] sm:$0xff]  ;;  %v297_v22 = vld [vmem:[%s3548_s23 + $0x1510] sm:$0xff] }
  0x2f   : > { %182 = vst [vmem:[%s3553_s24 + $0xe0] sm:$0xff] %v181_v28  ;;  %v299_v23 = vld [vmem:[%s3548_s23 + $0x1518] sm:$0xff]  ;;  %v301_v24 = vld [vmem:[%s3548_s23 + $0x1600] sm:$0xff]  ;;  %v303_v25 = vld [vmem:[%s3548_s23 + $0x1608] sm:$0xff] }
  0x30   : > { %184 = vst [vmem:[%s3553_s24 + $0xe8] sm:$0xff] %v183_v29  ;;  %v305_v26 = vld [vmem:[%s3548_s23 + $0x1610] sm:$0xff]  ;;  %v307_v27 = vld [vmem:[%s3548_s23 + $0x1618] sm:$0xff]  ;;  %v309_v28 = vld [vmem:[%s3548_s23 + $0x1700] sm:$0xff] }
  0x31   : > { %186 = vst [vmem:[%s3553_s24 + $0xf0] sm:$0xff] %v185_v30  ;;  %v311_v29 = vld [vmem:[%s3548_s23 + $0x1708] sm:$0xff]  ;;  %v313_v30 = vld [vmem:[%s3548_s23 + $0x1710] sm:$0xff] }
  0x32   : > { %188 = vst [vmem:[%s3553_s24 + $0xf8] sm:$0xff] %v187_v31  ;;  %v315_v31 = vld [vmem:[%s3548_s23 + $0x1718] sm:$0xff] }
  0x33   : > { %190 = vst [vmem:[%s3553_s24 + $0x100] sm:$0xff] %v189_v32 }
  0x34   : > { %192 = vst [vmem:[%s3553_s24 + $0x108] sm:$0xff] %v191_v33 }
  0x35   : > { %194 = vst [vmem:[%s3553_s24 + $0x110] sm:$0xff] %v193_v34 }
  0x36   : > { %196 = vst [vmem:[%s3553_s24 + $0x118] sm:$0xff] %v195_v35 }
  0x37   : > { %198 = vst [vmem:[%s3553_s24 + $0x120] sm:$0xff] %v197_v36 }
  0x38   : > { %200 = vst [vmem:[%s3553_s24 + $0x128] sm:$0xff] %v199_v37 }
  0x39   : > { %202 = vst [vmem:[%s3553_s24 + $0x130] sm:$0xff] %v201_v38 }
  0x3a   : > { %204 = vst [vmem:[%s3553_s24 + $0x138] sm:$0xff] %v203_v39 }
  0x3b   : > { %206 = vst [vmem:[%s3553_s24 + $0x140] sm:$0xff] %v205_v40 }
  0x3c   : > { %208 = vst [vmem:[%s3553_s24 + $0x148] sm:$0xff] %v207_v41 }
  0x3d   : > { %210 = vst [vmem:[%s3553_s24 + $0x150] sm:$0xff] %v209_v42 }
  0x3e   : > { %212 = vst [vmem:[%s3553_s24 + $0x158] sm:$0xff] %v211_v43 }
  0x3f   : > { %214 = vst [vmem:[%s3553_s24 + $0x160] sm:$0xff] %v213_v44 }
  0x40   : > { %216 = vst [vmem:[%s3553_s24 + $0x168] sm:$0xff] %v215_v45 }
  0x41   : > { %218 = vst [vmem:[%s3553_s24 + $0x170] sm:$0xff] %v217_v46 }
  0x42   : > { %220 = vst [vmem:[%s3553_s24 + $0x178] sm:$0xff] %v219_v47 }
  0x43   : > { %222 = vst [vmem:[%s3553_s24 + $0x180] sm:$0xff] %v221_v48 }
  0x44   : > { %224 = vst [vmem:[%s3553_s24 + $0x188] sm:$0xff] %v223_v49 }
  0x45   : > { %226 = vst [vmem:[%s3553_s24 + $0x190] sm:$0xff] %v225_v50 }
  0x46   : > { %228 = vst [vmem:[%s3553_s24 + $0x198] sm:$0xff] %v227_v51 }
  0x47   : > { %230 = vst [vmem:[%s3553_s24 + $0x1a0] sm:$0xff] %v229_v52 }
  0x48   : > { %232 = vst [vmem:[%s3553_s24 + $0x1a8] sm:$0xff] %v231_v53 }
  0x49   : > { %234 = vst [vmem:[%s3553_s24 + $0x1b0] sm:$0xff] %v233_v54 }
  0x4a   : > { %236 = vst [vmem:[%s3553_s24 + $0x1b8] sm:$0xff] %v235_v55 }
  0x4b   : > { %238 = vst [vmem:[%s3553_s24 + $0x1c0] sm:$0xff] %v237_v56 }
  0x4c   : > { %240 = vst [vmem:[%s3553_s24 + $0x1c8] sm:$0xff] %v239_v57 }
  0x4d   : > { %242 = vst [vmem:[%s3553_s24 + $0x1d0] sm:$0xff] %v241_v58 }
  0x4e   : > { %244 = vst [vmem:[%s3553_s24 + $0x1d8] sm:$0xff] %v243_v59 }
  0x4f   : > { %246 = vst [vmem:[%s3553_s24 + $0x1e0] sm:$0xff] %v245_v60 }
  0x50   : > { %248 = vst [vmem:[%s3553_s24 + $0x1e8] sm:$0xff] %v247_v61 }
  0x51   : > { %250 = vst [vmem:[%s3553_s24 + $0x1f0] sm:$0xff] %v249_v62 }
  0x52   : > { %252 = vst [vmem:[%s3553_s24 + $0x1f8] sm:$0xff] %v251_v63 }
  0x53   : > { %254 = vst [vmem:[%s3553_s24 + $0x200] sm:$0xff] %v253_v0 }
  0x54   : > { %256 = vst [vmem:[%s3553_s24 + $0x208] sm:$0xff] %v255_v1 }
  0x55   : > { %258 = vst [vmem:[%s3553_s24 + $0x210] sm:$0xff] %v257_v2 }
  0x56   : > { %260 = vst [vmem:[%s3553_s24 + $0x218] sm:$0xff] %v259_v3 }
  0x57   : > { %262 = vst [vmem:[%s3553_s24 + $0x220] sm:$0xff] %v261_v4 }
  0x58   : > { %264 = vst [vmem:[%s3553_s24 + $0x228] sm:$0xff] %v263_v5 }
  0x59   : > { %266 = vst [vmem:[%s3553_s24 + $0x230] sm:$0xff] %v265_v6 }
  0x5a   : > { %268 = vst [vmem:[%s3553_s24 + $0x238] sm:$0xff] %v267_v7 }
  0x5b   : > { %270 = vst [vmem:[%s3553_s24 + $0x240] sm:$0xff] %v269_v8 }
  0x5c   : > { %272 = vst [vmem:[%s3553_s24 + $0x248] sm:$0xff] %v271_v9 }
  0x5d   : > { %274 = vst [vmem:[%s3553_s24 + $0x250] sm:$0xff] %v273_v10 }
  0x5e   : > { %276 = vst [vmem:[%s3553_s24 + $0x258] sm:$0xff] %v275_v11 }
  0x5f   : > { %278 = vst [vmem:[%s3553_s24 + $0x260] sm:$0xff] %v277_v12 }
  0x60   : > { %280 = vst [vmem:[%s3553_s24 + $0x268] sm:$0xff] %v279_v13 }
  0x61   : > { %282 = vst [vmem:[%s3553_s24 + $0x270] sm:$0xff] %v281_v14 }
  0x62   : > { %284 = vst [vmem:[%s3553_s24 + $0x278] sm:$0xff] %v283_v15 }
  0x63   : > { %286 = vst [vmem:[%s3553_s24 + $0x280] sm:$0xff] %v285_v16 }
  0x64   : > { %288 = vst [vmem:[%s3553_s24 + $0x288] sm:$0xff] %v287_v17 }
  0x65   : > { %290 = vst [vmem:[%s3553_s24 + $0x290] sm:$0xff] %v289_v18 }
  0x66   : > { %292 = vst [vmem:[%s3553_s24 + $0x298] sm:$0xff] %v291_v19 }
  0x67   : > { %294 = vst [vmem:[%s3553_s24 + $0x2a0] sm:$0xff] %v293_v20 }
  0x68   : > { %296 = vst [vmem:[%s3553_s24 + $0x2a8] sm:$0xff] %v295_v21 }
  0x69   : > { %298 = vst [vmem:[%s3553_s24 + $0x2b0] sm:$0xff] %v297_v22 }
  0x6a   : > { %300 = vst [vmem:[%s3553_s24 + $0x2b8] sm:$0xff] %v299_v23 }
  0x6b   : > { %302 = vst [vmem:[%s3553_s24 + $0x2c0] sm:$0xff] %v301_v24 }
  0x6c   : > { %304 = vst [vmem:[%s3553_s24 + $0x2c8] sm:$0xff] %v303_v25 }
  0x6d   : > { %306 = vst [vmem:[%s3553_s24 + $0x2d0] sm:$0xff] %v305_v26 }
  0x6e   : > { %308 = vst [vmem:[%s3553_s24 + $0x2d8] sm:$0xff] %v307_v27 }
  0x6f   : > { %310 = vst [vmem:[%s3553_s24 + $0x2e0] sm:$0xff] %v309_v28 }
  0x70   : > { %312 = vst [vmem:[%s3553_s24 + $0x2e8] sm:$0xff] %v311_v29 }
  0x71   : > { %314 = vst [vmem:[%s3553_s24 + $0x2f0] sm:$0xff] %v313_v30 }
  0x72   : > { %316 = vst [vmem:[%s3553_s24 + $0x2f8] sm:$0xff] %v315_v31 }
  0x73 PF: > { %p2885_p7 = scmp.ge.s32.totalorder %s3490_s11, 1  ;;  %p321_p8 = scmp.lt.s32.totalorder %s3490_s11, 9 }
  0x75   : > { %p322_p9 = pnand %p2885_p7, %p321_p8 }
  0x76   : > { %s328_s25 = sand.u32 (!%p322_p9), 1, %s3482_s9  }
  0x77   : > { %325 = sbr.rel (%p322_p9) target bundleno = 531 (0x213), region = 47  ;;  %s2886_s30 = sshll.u32 (!%p322_p9), %s328_s25, 7 }
  0x78   : > { %s3441_s26 = smul.u32 (!%p322_p9), 768, %s328_s25  ;;  %s4017_s3 = scalar_lea.vmem (!%p322_p9), [#allocation3], %s2886_s30 }
  0x7a   : > { %s3749_s27 = scalar_lea.vmem (!%p322_p9), [#allocation2], %s3441_s26 }
  0x7c   : > { %v360_v32 = vld [vmem:[%s3749_s27 + $0x40] sm:$0x11]  ;;  %v361_v33 = vld [vmem:[%s3749_s27 + $0x48] sm:$0x11]  ;;  %vm428_vm0 = vcmask 1040384   ;;  %vm424_vm1 = vcmask 146432  }
  0x7d   : > { %v2889_v34 = vld [vmem:[%s3749_s27] sm:$0xf]  ;;  %v392_v35 = vunpack.c.l.b16 %v360_v32  ;;  %v393_v36 = vunpack.c.h.b16 %v360_v32  ;;  %v394_v37 = vunpack.c.l.b16 %v361_v33  ;;  %v395_v38 = vunpack.c.h.b16 %v361_v33  ;;  %v3375_v40 = vld [vmem:[%s3749_s27 + $0x4] sm:$0xf]  ;;  %v2897_v46 = vld [vmem:[%s3749_s27 + $0x8] sm:$0xf] }
  0x7e   : > { %v3379_v39 = vld [vmem:[%s3749_s27 + $0x1c] sm:$0xf0]  ;;  %v2891_v41 = vld [vmem:[%s3749_s27 + $0x20] sm:$0xf0]  ;;  %v363_v47 = vld [vmem:[%s3749_s27 + $0x58] sm:$0x11] }
  0x7f   : > { %v408_v42 = vpack.c.b16 %v392_v35, %v392_v35  ;;  %v409_v43 = vpack.c.b16 %v393_v36, %v393_v36  ;;  %v410_v44 = vpack.c.b16 %v394_v37, %v394_v37  ;;  %v411_v45 = vpack.c.b16 %v395_v38, %v395_v38  ;;  %v362_v48 = vld [vmem:[%s3749_s27 + $0x50] sm:$0x11]  ;;  %v3380_v51 = vld [vmem:[%s3749_s27 + $0x24] sm:$0xf0]  ;;  %v3376_v52 = vld [vmem:[%s3749_s27 + $0xc] sm:$0xf] }
  0x80   : > { %v2890_v49 = vor.u32 %v3379_v39, %v2889_v34  ;;  %v2894_v50 = vor.u32 %v3375_v40, %v2891_v41  ;;  %v2899_v53 = vld [vmem:[%s3749_s27 + $0x28] sm:$0xf0]  ;;  %v398_v54 = vunpack.c.l.b16 %v363_v47  ;;  %v399_v55 = vunpack.c.h.b16 %v363_v47  ;;  %v2943_v3 = vld [vmem:[%s3749_s27 + $0xa0] sm:$0x11]  ;;  %v2913_v7 = vld [vmem:[%s3749_s27 + $0x18] sm:$0xf] }
  0x81   : > { %v430_v56 = vsel %vm428_vm0, %v408_v42, 0  ;;  %v433_v57 = vsel %vm428_vm0, %v409_v43, 0  ;;  %v436_v58 = vsel %vm428_vm0, %v410_v44, 0  ;;  %v439_v59 = vsel %vm428_vm0, %v411_v45, 0  ;;  %v2944_v2 = vld [vmem:[%s3749_s27 + $0xa8] sm:$0x11] }
  0x82   : > { %459 = vmatpush.bf16.msra.mxu0 %v430_v56  ;;  %472 = vmatpush.bf16.msra.mxu1 %v433_v57  ;;  %v414_v60 = vpack.c.b16 %v398_v54, %v398_v54  ;;  %v415_v61 = vpack.c.b16 %v399_v55, %v399_v55  ;;  %v396_v62 = vunpack.c.l.b16 %v362_v48  ;;  %v397_v63 = vunpack.c.h.b16 %v362_v48  ;;  %v3382_v8 = vld [vmem:[%s3749_s27 + $0x34] sm:$0xf0]  ;;  %v3378_v10 = vld [vmem:[%s3749_s27 + $0x1c] sm:$0xf]  ;;  %v3778_v15 = vld [vmem:[%s4927_s1] sm:$0x3] }
  0x83   : > { %485 = vmatpush.bf16.msra.mxu2 %v436_v58  ;;  %498 = vmatpush.bf16.msra.mxu3 %v439_v59  ;;  %v2898_v0 = vor.u32 %v3380_v51, %v2897_v46  ;;  %v2902_v1 = vor.u32 %v3376_v52, %v2899_v53  ;;  %v2915_v11 = vld [vmem:[%s3749_s27 + $0x38] sm:$0xf0]  ;;  %v683_v12 = vunpack.c.l.b16 %v2944_v2  ;;  %v684_v13 = vunpack.c.h.b16 %v2944_v2  ;;  %v2905_v17 = vld [vmem:[%s3749_s27 + $0x10] sm:$0xf]  ;;  %v3377_v25 = vld [vmem:[%s3749_s27 + $0x14] sm:$0xf] }
  0x84   : > { %v448_v4 = vsel %vm428_vm0, %v414_v60, 0  ;;  %v412_v5 = vpack.c.b16 %v396_v62, %v396_v62  ;;  %v413_v6 = vpack.c.b16 %v397_v63, %v397_v63  ;;  %v451_v9 = vsel %vm428_vm0, %v415_v61, 0  ;;  %v3381_v18 = vld [vmem:[%s3749_s27 + $0x2c] sm:$0xf0]  ;;  %v2907_v26 = vld [vmem:[%s3749_s27 + $0x30] sm:$0xf0] }
  0x85   : > { %v681_v14 = vunpack.c.l.b16 %v2943_v3  ;;  %v682_v16 = vunpack.c.h.b16 %v2943_v3  ;;  %v699_v19 = vpack.c.b16 %v683_v12, %v683_v12  ;;  %v700_v20 = vpack.c.b16 %v684_v13, %v684_v13  ;;  %v2957_v29 = vld [vmem:[%s3749_s27 + $0x68] sm:$0xf]  ;;  %v3384_v33 = vld [vmem:[%s3749_s27 + $0x6c] sm:$0xf]  ;;  %v2949_v37 = vld [vmem:[%s3749_s27 + $0x60] sm:$0xf] }
  0x86   : > { %460 = vmatpush.bf16.msra.mxu0 %v2890_v49  ;;  %473 = vmatpush.bf16.msra.mxu1 %v2894_v50  ;;  %v442_v21 = vsel %vm428_vm0, %v412_v5, 0  ;;  %v445_v22 = vsel %vm428_vm0, %v413_v6, 0  ;;  %v2914_v23 = vor.u32 %v3382_v8, %v2913_v7  ;;  %v2918_v24 = vor.u32 %v3378_v10, %v2915_v11  ;;  %v3388_v30 = vld [vmem:[%s3749_s27 + $0x84] sm:$0xf0]  ;;  %v2959_v34 = vld [vmem:[%s3749_s27 + $0x88] sm:$0xf0] }
  0x87   : > { %486 = vmatpush.bf16.msra.mxu2 %v2898_v0  ;;  %499 = vmatpush.bf16.msra.mxu3 %v2902_v1  ;;  %v697_v27 = vpack.c.b16 %v681_v14, %v681_v14  ;;  %v698_v28 = vpack.c.b16 %v682_v16, %v682_v16  ;;  %v720_v31 = vsel %vm428_vm0, %v699_v19, 0  ;;  %v723_v32 = vsel %vm428_vm0, %v700_v20, 0  ;;  %v3387_v38 = vld [vmem:[%s3749_s27 + $0x7c] sm:$0xf0]  ;;  %v3383_v39 = vld [vmem:[%s3749_s27 + $0x64] sm:$0xf] }
  0x88   : > { %v2906_v35 = vor.u32 %v3381_v18, %v2905_v17  ;;  %v2910_v36 = vor.u32 %v3377_v25, %v2907_v26  ;;  %v2958_v42 = vor.u32 %v3388_v30, %v2957_v29  ;;  %v2962_v43 = vor.u32 %v3384_v33, %v2959_v34  ;;  %v2951_v44 = vld [vmem:[%s3749_s27 + $0x80] sm:$0xf0]  ;;  %v2946_v45 = vld [vmem:[%s3749_s27 + $0xb8] sm:$0x11]  ;;  %v2945_v46 = vld [vmem:[%s3749_s27 + $0xb0] sm:$0x11] }
  0x89   : > { %2919 = vmatmul.msk.bf16.vlgmr.msra.gmra.mxu0 %vm424_vm1, %v3778_v15  ;;  %2920 = vmatmul.msk.bf16.vlgmr.msra.gmra.mxu1 %vm424_vm1, %v3778_v15  ;;  %v714_v40 = vsel %vm428_vm0, %v697_v27, 0  ;;  %v717_v41 = vsel %vm428_vm0, %v698_v28, 0  ;;  %v2950_v47 = vor.u32 %v3387_v38, %v2949_v37  ;;  %v2954_v48 = vor.u32 %v3383_v39, %v2951_v44  ;;  %v2973_v57 = vld [vmem:[%s3749_s27 + $0x78] sm:$0xf]  ;;  %v3386_v59 = vld [vmem:[%s3749_s27 + $0x7c] sm:$0xf] }
  0x8a   : > { %2921 = vmatmul.msk.bf16.vlgmr.msra.gmra.mxu2 %vm424_vm1, %v3778_v15  ;;  %2922 = vmatmul.msk.bf16.vlgmr.msra.gmra.mxu3 %vm424_vm1, %v3778_v15  ;;  %v687_v49 = vunpack.c.l.b16 %v2946_v45  ;;  %v688_v50 = vunpack.c.h.b16 %v2946_v45  ;;  %v685_v51 = vunpack.c.l.b16 %v2945_v46  ;;  %v686_v52 = vunpack.c.h.b16 %v2945_v46  ;;  %v3390_v58 = vld [vmem:[%s3749_s27 + $0x94] sm:$0xf0]  ;;  %v2975_v60 = vld [vmem:[%s3749_s27 + $0x98] sm:$0xf0]  ;;  %v2965_v63 = vld [vmem:[%s3749_s27 + $0x70] sm:$0xf] }
  0x8b   : > { %537 = vmatpush.bf16.msrb.mxu2 %v448_v4  ;;  %550 = vmatpush.bf16.msrb.mxu3 %v451_v9  ;;  %v3389_v0 = vld [vmem:[%s3749_s27 + $0x8c] sm:$0xf0]  ;;  %v3385_v3 = vld [vmem:[%s3749_s27 + $0x74] sm:$0xf]  ;;  %v2974_v5 = vor.u32 %v3390_v58, %v2973_v57  ;;  %v2978_v6 = vor.u32 %v3386_v59, %v2975_v60  ;;  %v3006_v9 = vld [vmem:[%s3749_s27 + $0x108] sm:$0x11] }
  0x8c   : > { %511 = vmatpush.bf16.msrb.mxu0 %v442_v21  ;;  %524 = vmatpush.bf16.msrb.mxu1 %v445_v22  ;;  %v703_v53 = vpack.c.b16 %v687_v49, %v687_v49  ;;  %v704_v54 = vpack.c.b16 %v688_v50, %v688_v50  ;;  %v701_v55 = vpack.c.b16 %v685_v51, %v685_v51  ;;  %v2967_v4 = vld [vmem:[%s3749_s27 + $0x90] sm:$0xf0]  ;;  %v3005_v10 = vld [vmem:[%s3749_s27 + $0x100] sm:$0x11]  ;;  %v989_v11 = vunpack.c.l.b16 %v3006_v9  ;;  %v3019_v20 = vld [vmem:[%s3749_s27 + $0xc8] sm:$0xf] }
  0x8d   : > { %v702_v56 = vpack.c.b16 %v686_v52, %v686_v52  ;;  %v2966_v7 = vor.u32 %v3389_v0, %v2965_v63  ;;  %v2970_v8 = vor.u32 %v3385_v3, %v2967_v4  ;;  %v990_v12 = vunpack.c.h.b16 %v3006_v9  ;;  %v3396_v21 = vld [vmem:[%s3749_s27 + $0xe4] sm:$0xf0]  ;;  %v3392_v22 = vld [vmem:[%s3749_s27 + $0xcc] sm:$0xf]  ;;  %v3011_v26 = vld [vmem:[%s3749_s27 + $0xc0] sm:$0xf] }
  0x8e   : > { %v732_v61 = vsel %vm428_vm0, %v703_v53, 0  ;;  %v735_v62 = vsel %vm428_vm0, %v704_v54, 0  ;;  %v726_v1 = vsel %vm428_vm0, %v701_v55, 0  ;;  %v987_v13 = vunpack.c.l.b16 %v3005_v10  ;;  %v3395_v27 = vld [vmem:[%s3749_s27 + $0xdc] sm:$0xf0]  ;;  %s3439_s6 = sshll.u32 (%p3538_p5), %s2879_s12, 4 }
  0x8f   : > { %538 = vmatpush.bf16.msrb.mxu2 %v2914_v23  ;;  %551 = vmatpush.bf16.msrb.mxu3 %v2918_v24  ;;  %v729_v2 = vsel %vm428_vm0, %v702_v56, 0  ;;  %v988_v14 = vunpack.c.h.b16 %v3005_v10  ;;  %v1005_v16 = vpack.c.b16 %v989_v11, %v989_v11  ;;  %v1006_v17 = vpack.c.b16 %v990_v12, %v990_v12  ;;  %v3021_v23 = vld [vmem:[%s3749_s27 + $0xe8] sm:$0xf0]  ;;  %v3391_v30 = vld [vmem:[%s3749_s27 + $0xc4] sm:$0xf]  ;;  %s2775_s9 = scalar_lea.vmem (%p3538_p5), %s4928_s2, %s3439_s6 }
  0x90   : > { %512 = vmatpush.bf16.msrb.mxu0 %v2906_v35  ;;  %525 = vmatpush.bf16.msrb.mxu1 %v2910_v36  ;;  %v1003_v18 = vpack.c.b16 %v987_v13, %v987_v13  ;;  %v3024_v33 = vor.u32 %v3392_v22, %v3021_v23  ;;  %v3012_v34 = vor.u32 %v3395_v27, %v3011_v26  ;;  %v3008_v36 = vld [vmem:[%s3749_s27 + $0x118] sm:$0x11]  ;;  %v3007_v37 = vld [vmem:[%s3749_s27 + $0x110] sm:$0x11]  ;;  %v3067_v63 = vld [vmem:[%s3749_s27 + $0x160] sm:$0x11] }
  0x91   : > { %v1004_v19 = vpack.c.b16 %v988_v14, %v988_v14  ;;  %v1026_v24 = vsel %vm428_vm0, %v1005_v16, 0  ;;  %v1029_v25 = vsel %vm428_vm0, %v1006_v17, 0  ;;  %v993_v38 = vunpack.c.l.b16 %v3008_v36  ;;  %v3035_v46 = vld [vmem:[%s3749_s27 + $0xd8] sm:$0xf]  ;;  %v3037_v49 = vld [vmem:[%s3749_s27 + $0xf8] sm:$0xf0] }
  0x92   : > { %v1020_v28 = vsel %vm428_vm0, %v1003_v18, 0  ;;  %v994_v39 = vunpack.c.h.b16 %v3008_v36  ;;  %v3027_v52 = vld [vmem:[%s3749_s27 + $0xd0] sm:$0xf]  ;;  %v3393_v56 = vld [vmem:[%s3749_s27 + $0xd4] sm:$0xf]  ;;  %v1294_v3 = vunpack.c.h.b16 %v3067_v63  ;;  %vm619_vm6 = vcmask 1041408  }
  0x93   : > { %769 = vmatpush.bf16.msra.mxu2 %v720_v31  ;;  %782 = vmatpush.bf16.msra.mxu3 %v723_v32  ;;  %v1023_v29 = vsel %vm428_vm0, %v1004_v19, 0  ;;  %v3013_v31 = vld [vmem:[%s3749_s27 + $0xe0] sm:$0xf0]  ;;  %v3020_v32 = vor.u32 %v3396_v21, %v3019_v20  ;;  %v3397_v53 = vld [vmem:[%s3749_s27 + $0xec] sm:$0xf0]  ;;  %vm623_vm7 = vcmask 1045508  }
  0x94   : > { %743 = vmatpush.bf16.msra.mxu0 %v714_v40  ;;  %756 = vmatpush.bf16.msra.mxu1 %v717_v41  ;;  %v3016_v35 = vor.u32 %v3391_v30, %v3013_v31  ;;  %v991_v40 = vunpack.c.l.b16 %v3007_v37  ;;  %v992_v41 = vunpack.c.h.b16 %v3007_v37  ;;  %v3029_v57 = vld [vmem:[%s3749_s27 + $0xf0] sm:$0xf0]  ;;  %v3028_v60 = vor.u32 %v3397_v53, %v3027_v52  ;;  %v3404_v9 = vld [vmem:[%s3749_s27 + $0x144] sm:$0xf0]  ;;  %v3400_v10 = vld [vmem:[%s3749_s27 + $0x12c] sm:$0xf] }
  0x95   : > { %v3083_v11 = vld [vmem:[%s3749_s27 + $0x148] sm:$0xf0]  ;;  %v3073_v14 = vld [vmem:[%s3749_s27 + $0x120] sm:$0xf]  ;;  %v3399_v19 = vld [vmem:[%s3749_s27 + $0x124] sm:$0xf] }
  0x96   : > { %v1007_v44 = vpack.c.b16 %v991_v40, %v991_v40  ;;  %v1008_v45 = vpack.c.b16 %v992_v41, %v992_v41  ;;  %v3403_v16 = vld [vmem:[%s3749_s27 + $0x13c] sm:$0xf0]  ;;  %v3075_v20 = vld [vmem:[%s3749_s27 + $0x140] sm:$0xf0]  ;;  %v3086_v22 = vor.u32 %v3400_v10, %v3083_v11  ;;  %v3069_v26 = vld [vmem:[%s3749_s27 + $0x170] sm:$0x11] }
  0x97   : > { %770 = vmatpush.bf16.msra.mxu2 %v2958_v42  ;;  %783 = vmatpush.bf16.msra.mxu3 %v2962_v43  ;;  %v1009_v42 = vpack.c.b16 %v993_v38, %v993_v38  ;;  %v1010_v43 = vpack.c.b16 %v994_v39, %v994_v39  ;;  %v3074_v23 = vor.u32 %v3403_v16, %v3073_v14  ;;  %v1298_v30 = vunpack.c.h.b16 %v3069_v26  ;;  %v3406_v36 = vld [vmem:[%s3749_s27 + $0x154] sm:$0xf0]  ;;  %v3402_v37 = vld [vmem:[%s3749_s27 + $0x13c] sm:$0xf]  ;;  %v3089_v41 = vld [vmem:[%s3749_s27 + $0x130] sm:$0xf] }
  0x98   : > { %744 = vmatpush.bf16.msra.mxu0 %v2950_v47  ;;  %757 = vmatpush.bf16.msra.mxu1 %v2954_v48  ;;  %v3398_v47 = vld [vmem:[%s3749_s27 + $0xf4] sm:$0xf0]  ;;  %v3394_v48 = vld [vmem:[%s3749_s27 + $0xdc] sm:$0xf]  ;;  %v1032_v54 = vsel %vm428_vm0, %v1007_v44, 0  ;;  %v1035_v55 = vsel %vm428_vm0, %v1008_v45, 0 }
  0x99   : > { %2923 = vmatmul.msk.bf16.vlgmr.msrb.gmra.mxu0 %vm424_vm1, %v3778_v15  ;;  %2924 = vmatmul.msk.bf16.vlgmr.msrb.gmra.mxu1 %vm424_vm1, %v3778_v15  ;;  %v1038_v50 = vsel %vm428_vm0, %v1009_v42, 0  ;;  %v1041_v51 = vsel %vm428_vm0, %v1010_v43, 0  ;;  %v3036_v58 = vor.u32 %v3398_v47, %v3035_v46  ;;  %v3040_v59 = vor.u32 %v3394_v48, %v3037_v49  ;;  %v3099_v38 = vld [vmem:[%s3749_s27 + $0x158] sm:$0xf0]  ;;  %v3405_v42 = vld [vmem:[%s3749_s27 + $0x14c] sm:$0xf0] }
  0x9a   : > { %2925 = vmatmul.msk.bf16.vlgmr.msrb.gmra.mxu2 %vm424_vm1, %v3778_v15  ;;  %2926 = vmatmul.msk.bf16.vlgmr.msrb.gmra.mxu3 %vm424_vm1, %v3778_v15  ;;  %v3401_v45 = vld [vmem:[%s3749_s27 + $0x134] sm:$0xf]  ;;  %v3102_v48 = vor.u32 %v3402_v37, %v3099_v38  ;;  %v3090_v49 = vor.u32 %v3405_v42, %v3089_v41  ;;  %v3129_v52 = vld [vmem:[%s3749_s27 + $0x1c0] sm:$0x11]  ;;  %vm627_vm8 = vcmask 1043456  }
  0x9b   : > { %821 = vmatpush.bf16.msrb.mxu2 %v732_v61  ;;  %834 = vmatpush.bf16.msrb.mxu3 %v735_v62  ;;  %v3032_v61 = vor.u32 %v3393_v56, %v3029_v57  ;;  %v3068_v62 = vld [vmem:[%s3749_s27 + $0x168] sm:$0x11]  ;;  %v3091_v46 = vld [vmem:[%s3749_s27 + $0x150] sm:$0xf0]  ;;  %v1600_v56 = vunpack.c.h.b16 %v3129_v52  ;;  %v3191_v41 = vld [vmem:[%s3749_s27 + $0x220] sm:$0x11] }
  0x9c   : > { %795 = vmatpush.bf16.msrb.mxu0 %v726_v1  ;;  %808 = vmatpush.bf16.msrb.mxu1 %v729_v2  ;;  %v1295_v0 = vunpack.c.l.b16 %v3068_v62  ;;  %v1296_v1 = vunpack.c.h.b16 %v3068_v62  ;;  %v1293_v2 = vunpack.c.l.b16 %v3067_v63  ;;  %v3412_v62 = vld [vmem:[%s3749_s27 + $0x1a4] sm:$0xf0]  ;;  %v3408_v63 = vld [vmem:[%s3749_s27 + $0x18c] sm:$0xf]  ;;  %v3131_v14 = vld [vmem:[%s3749_s27 + $0x1d0] sm:$0x11] }
  0x9e   : > { %v1311_v4 = vpack.c.b16 %v1295_v0, %v1295_v0  ;;  %v3145_v0 = vld [vmem:[%s3749_s27 + $0x1a8] sm:$0xf0] }
  0x9f   : > { %822 = vmatpush.bf16.msrb.mxu2 %v2974_v5  ;;  %835 = vmatpush.bf16.msrb.mxu3 %v2978_v6  ;;  %v1312_v5 = vpack.c.b16 %v1296_v1, %v1296_v1  ;;  %v1309_v6 = vpack.c.b16 %v1293_v2, %v1293_v2  ;;  %v3148_v10 = vor.u32 %v3408_v63, %v3145_v0  ;;  %v3199_v63 = vld [vmem:[%s3749_s27 + $0x200] sm:$0xf0]  ;;  %v3492_v0 = vmov 0.0  }
  0xa0   : > { %796 = vmatpush.bf16.msrb.mxu0 %v2966_v7  ;;  %809 = vmatpush.bf16.msrb.mxu1 %v2970_v8  ;;  %v1310_v7 = vpack.c.b16 %v1294_v3, %v1294_v3  ;;  %v3081_v8 = vld [vmem:[%s3749_s27 + $0x128] sm:$0xf]  ;;  %v1332_v12 = vsel %vm428_vm0, %v1311_v4, 0 }
  0xa1   : > { %v1335_v13 = vsel %vm428_vm0, %v1312_v5, 0  ;;  %v1326_v17 = vsel %vm428_vm0, %v1309_v6, 0  ;;  %v3082_v21 = vor.u32 %v3404_v9, %v3081_v8  ;;  %v3135_v5 = vld [vmem:[%s3749_s27 + $0x180] sm:$0xf]  ;;  %v3137_v8 = vld [vmem:[%s3749_s27 + $0x1a0] sm:$0xf0] }
  0xa2   : > { %v1329_v18 = vsel %vm428_vm0, %v1310_v7, 0  ;;  %v3411_v6 = vld [vmem:[%s3749_s27 + $0x19c] sm:$0xf0]  ;;  %v3407_v7 = vld [vmem:[%s3749_s27 + $0x184] sm:$0xf] }
  0xa3   : > { %v3136_v11 = vor.u32 %v3411_v6, %v3135_v5 }
  0xa9   : > { %2979 = vmatmul.msk.bf16.vlgmr.msra.gmra.mxu0 %vm424_vm1, %v3778_v15  ;;  %2980 = vmatmul.msk.bf16.vlgmr.msra.gmra.mxu1 %vm424_vm1, %v3778_v15 }
  0xaa   : > { %2981 = vmatmul.msk.bf16.vlgmr.msra.gmra.mxu2 %vm424_vm1, %v3778_v15  ;;  %2982 = vmatmul.msk.bf16.vlgmr.msra.gmra.mxu3 %vm424_vm1, %v3778_v15 }
  0xab   : > { %1075 = vmatpush.bf16.msra.mxu2 %v1026_v24  ;;  %1088 = vmatpush.bf16.msra.mxu3 %v1029_v25  ;;  %v3078_v24 = vor.u32 %v3399_v19, %v3075_v20  ;;  %v3070_v25 = vld [vmem:[%s3749_s27 + $0x178] sm:$0x11]  ;;  %v1604_v19 = vunpack.c.h.b16 %v3131_v14 }
  0xac   : > { %1049 = vmatpush.bf16.msra.mxu0 %v1020_v28  ;;  %1062 = vmatpush.bf16.msra.mxu1 %v1023_v29  ;;  %v1299_v27 = vunpack.c.l.b16 %v3070_v25  ;;  %v1300_v28 = vunpack.c.h.b16 %v3070_v25  ;;  %v1297_v29 = vunpack.c.l.b16 %v3069_v26 }
  0xae   : > { %v1315_v31 = vpack.c.b16 %v1299_v27, %v1299_v27 }
  0xaf   : > { %1076 = vmatpush.bf16.msra.mxu2 %v3020_v32  ;;  %1089 = vmatpush.bf16.msra.mxu3 %v3024_v33  ;;  %v1316_v32 = vpack.c.b16 %v1300_v28, %v1300_v28  ;;  %v1313_v33 = vpack.c.b16 %v1297_v29, %v1297_v29  ;;  %v3159_v28 = vld [vmem:[%s3749_s27 + $0x198] sm:$0xf] }
  0xb0   : > { %1050 = vmatpush.bf16.msra.mxu0 %v3012_v34  ;;  %1063 = vmatpush.bf16.msra.mxu1 %v3016_v35  ;;  %v1314_v34 = vpack.c.b16 %v1298_v30, %v1298_v30  ;;  %v3097_v35 = vld [vmem:[%s3749_s27 + $0x138] sm:$0xf]  ;;  %v1344_v39 = vsel %vm428_vm0, %v1315_v31, 0  ;;  %v3410_v30 = vld [vmem:[%s3749_s27 + $0x19c] sm:$0xf] }
  0xb1   : > { %v1347_v40 = vsel %vm428_vm0, %v1316_v32, 0  ;;  %v1338_v43 = vsel %vm428_vm0, %v1313_v33, 0  ;;  %v3098_v47 = vor.u32 %v3406_v36, %v3097_v35  ;;  %v3414_v29 = vld [vmem:[%s3749_s27 + $0x1b4] sm:$0xf0]  ;;  %v3161_v31 = vld [vmem:[%s3749_s27 + $0x1b8] sm:$0xf0] }
  0xb2   : > { %v1341_v44 = vsel %vm428_vm0, %v1314_v34, 0  ;;  %v3151_v32 = vld [vmem:[%s3749_s27 + $0x190] sm:$0xf]  ;;  %v3409_v34 = vld [vmem:[%s3749_s27 + $0x194] sm:$0xf]  ;;  %v3160_v36 = vor.u32 %v3414_v29, %v3159_v28  ;;  %v3164_v37 = vor.u32 %v3410_v30, %v3161_v31 }
  0xb3   : > { %v3413_v33 = vld [vmem:[%s3749_s27 + $0x1ac] sm:$0xf0]  ;;  %v3153_v35 = vld [vmem:[%s3749_s27 + $0x1b0] sm:$0xf0] }
  0xb4   : > { %v3152_v38 = vor.u32 %v3413_v33, %v3151_v32 }
  0xb9   : > { %2983 = vmatmul.msk.bf16.vlgmr.msrb.gmra.mxu0 %vm424_vm1, %v3778_v15  ;;  %2984 = vmatmul.msk.bf16.vlgmr.msrb.gmra.mxu1 %vm424_vm1, %v3778_v15 }
  0xba   : > { %2985 = vmatmul.msk.bf16.vlgmr.msrb.gmra.mxu2 %vm424_vm1, %v3778_v15  ;;  %2986 = vmatmul.msk.bf16.vlgmr.msrb.gmra.mxu3 %vm424_vm1, %v3778_v15 }
  0xbb   : > { %1127 = vmatpush.bf16.msrb.mxu2 %v1038_v50  ;;  %1140 = vmatpush.bf16.msrb.mxu3 %v1041_v51  ;;  %v3094_v50 = vor.u32 %v3401_v45, %v3091_v46  ;;  %v3130_v51 = vld [vmem:[%s3749_s27 + $0x1c8] sm:$0x11]  ;;  %v1906_v45 = vunpack.c.h.b16 %v3191_v41 }
  0xbc   : > { %1101 = vmatpush.bf16.msrb.mxu0 %v1032_v54  ;;  %1114 = vmatpush.bf16.msrb.mxu1 %v1035_v55  ;;  %v1601_v53 = vunpack.c.l.b16 %v3130_v51  ;;  %v1602_v54 = vunpack.c.h.b16 %v3130_v51  ;;  %v1599_v55 = vunpack.c.l.b16 %v3129_v52 }
  0xbe   : > { %v1617_v57 = vpack.c.b16 %v1601_v53, %v1601_v53 }
  0xbf   : > { %1128 = vmatpush.bf16.msrb.mxu2 %v3036_v58  ;;  %1141 = vmatpush.bf16.msrb.mxu3 %v3040_v59  ;;  %v1618_v58 = vpack.c.b16 %v1602_v54, %v1602_v54  ;;  %v1615_v59 = vpack.c.b16 %v1599_v55, %v1599_v55 }
  0xc0   : > { %1102 = vmatpush.bf16.msrb.mxu0 %v3028_v60  ;;  %1115 = vmatpush.bf16.msrb.mxu1 %v3032_v61  ;;  %v1616_v60 = vpack.c.b16 %v1600_v56, %v1600_v56  ;;  %v3143_v61 = vld [vmem:[%s3749_s27 + $0x188] sm:$0xf]  ;;  %v1638_v1 = vsel %vm428_vm0, %v1617_v57, 0 }
  0xc1   : > { %v1641_v2 = vsel %vm428_vm0, %v1618_v58, 0  ;;  %v1632_v3 = vsel %vm428_vm0, %v1615_v59, 0  ;;  %v3144_v9 = vor.u32 %v3412_v62, %v3143_v61  ;;  %v3205_v56 = vld [vmem:[%s3749_s27 + $0x1e8] sm:$0xf]  ;;  %v3416_v58 = vld [vmem:[%s3749_s27 + $0x1ec] sm:$0xf] }
  0xc2   : > { %v1635_v4 = vsel %vm428_vm0, %v1616_v60, 0  ;;  %v3420_v57 = vld [vmem:[%s3749_s27 + $0x204] sm:$0xf0]  ;;  %v3207_v59 = vld [vmem:[%s3749_s27 + $0x208] sm:$0xf0] }
  0xc3   : > { %v3197_v60 = vld [vmem:[%s3749_s27 + $0x1e0] sm:$0xf]  ;;  %v3415_v62 = vld [vmem:[%s3749_s27 + $0x1e4] sm:$0xf] }
  0xc4   : > { %v3419_v61 = vld [vmem:[%s3749_s27 + $0x1fc] sm:$0xf0] }
  0xc5   : > { %v3198_v6 = vor.u32 %v3419_v61, %v3197_v60 }
  0xc9   : > { %3041 = vmatmul.msk.bf16.vlgmr.msra.gmra.mxu0 %vm424_vm1, %v3778_v15  ;;  %3042 = vmatmul.msk.bf16.vlgmr.msra.gmra.mxu1 %vm424_vm1, %v3778_v15 }
  0xca   : > { %3043 = vmatmul.msk.bf16.vlgmr.msra.gmra.mxu2 %vm424_vm1, %v3778_v15  ;;  %3044 = vmatmul.msk.bf16.vlgmr.msra.gmra.mxu3 %vm424_vm1, %v3778_v15 }
  0xcb   : > { %1381 = vmatpush.bf16.msra.mxu2 %v1332_v12  ;;  %1394 = vmatpush.bf16.msra.mxu3 %v1335_v13  ;;  %v3140_v12 = vor.u32 %v3407_v7, %v3137_v8  ;;  %v3132_v13 = vld [vmem:[%s3749_s27 + $0x1d8] sm:$0x11]  ;;  %v3202_v7 = vor.u32 %v3415_v62, %v3199_v63  ;;  %v3254_v63 = vld [vmem:[%s3749_s27 + $0x288] sm:$0x11] }
  0xcc   : > { %1355 = vmatpush.bf16.msra.mxu0 %v1326_v17  ;;  %1368 = vmatpush.bf16.msra.mxu1 %v1329_v18  ;;  %v1605_v16 = vunpack.c.l.b16 %v3132_v13  ;;  %v1606_v17 = vunpack.c.h.b16 %v3132_v13  ;;  %v1603_v18 = vunpack.c.l.b16 %v3131_v14 }
  0xce   : > { %v1621_v20 = vpack.c.b16 %v1605_v16, %v1605_v16  ;;  %v3193_v16 = vld [vmem:[%s3749_s27 + $0x230] sm:$0x11] }
  0xcf   : > { %1382 = vmatpush.bf16.msra.mxu2 %v3082_v21  ;;  %1395 = vmatpush.bf16.msra.mxu3 %v3086_v22  ;;  %v1622_v21 = vpack.c.b16 %v1606_v17, %v1606_v17  ;;  %v1619_v22 = vpack.c.b16 %v1603_v18, %v1603_v18 }
  0xd0   : > { %1356 = vmatpush.bf16.msra.mxu0 %v3074_v23  ;;  %1369 = vmatpush.bf16.msra.mxu1 %v3078_v24  ;;  %v1620_v23 = vpack.c.b16 %v1604_v19, %v1604_v19  ;;  %v1650_v24 = vsel %vm428_vm0, %v1621_v20, 0 }
  0xd1   : > { %v1653_v25 = vsel %vm428_vm0, %v1622_v21, 0  ;;  %v1644_v26 = vsel %vm428_vm0, %v1619_v22, 0  ;;  %v1909_v21 = vunpack.c.l.b16 %v3193_v16  ;;  %v1910_v22 = vunpack.c.h.b16 %v3193_v16 }
  0xd2   : > { %v1647_v27 = vsel %vm428_vm0, %v1620_v23, 0 }
  0xd3   : > { %v1926_v28 = vpack.c.b16 %v1910_v22, %v1910_v22 }
  0xd9   : > { %3045 = vmatmul.msk.bf16.vlgmr.msrb.gmra.mxu0 %vm424_vm1, %v3778_v15  ;;  %3046 = vmatmul.msk.bf16.vlgmr.msrb.gmra.mxu1 %vm424_vm1, %v3778_v15 }
  0xda   : > { %3047 = vmatmul.msk.bf16.vlgmr.msrb.gmra.mxu2 %vm424_vm1, %v3778_v15  ;;  %3048 = vmatmul.msk.bf16.vlgmr.msrb.gmra.mxu3 %vm424_vm1, %v3778_v15 }
  0xdb   : > { %1433 = vmatpush.bf16.msrb.mxu2 %v1344_v39  ;;  %1446 = vmatpush.bf16.msrb.mxu3 %v1347_v40  ;;  %v3156_v39 = vor.u32 %v3409_v34, %v3153_v35  ;;  %v3192_v40 = vld [vmem:[%s3749_s27 + $0x228] sm:$0x11] }
  0xdc   : > { %1407 = vmatpush.bf16.msrb.mxu0 %v1338_v43  ;;  %1420 = vmatpush.bf16.msrb.mxu1 %v1341_v44  ;;  %v1907_v42 = vunpack.c.l.b16 %v3192_v40  ;;  %v1908_v43 = vunpack.c.h.b16 %v3192_v40  ;;  %v1905_v44 = vunpack.c.l.b16 %v3191_v41  ;;  %v3221_v40 = vld [vmem:[%s3749_s27 + $0x1f8] sm:$0xf] }
  0xdd   : > { %v3422_v41 = vld [vmem:[%s3749_s27 + $0x214] sm:$0xf0] }
  0xde   : > { %v1923_v46 = vpack.c.b16 %v1907_v42, %v1907_v42  ;;  %v3418_v42 = vld [vmem:[%s3749_s27 + $0x1fc] sm:$0xf] }
  0xdf   : > { %1434 = vmatpush.bf16.msrb.mxu2 %v3098_v47  ;;  %1447 = vmatpush.bf16.msrb.mxu3 %v3102_v48  ;;  %v1924_v47 = vpack.c.b16 %v1908_v43, %v1908_v43  ;;  %v1921_v48 = vpack.c.b16 %v1905_v44, %v1905_v44  ;;  %v3223_v43 = vld [vmem:[%s3749_s27 + $0x218] sm:$0xf0]  ;;  %v3213_v44 = vld [vmem:[%s3749_s27 + $0x1f0] sm:$0xf] }
  0xe0   : > { %1408 = vmatpush.bf16.msrb.mxu0 %v3090_v49  ;;  %1421 = vmatpush.bf16.msrb.mxu1 %v3094_v50  ;;  %v1922_v49 = vpack.c.b16 %v1906_v45, %v1906_v45  ;;  %v1944_v52 = vsel %vm428_vm0, %v1923_v46, 0  ;;  %v3421_v45 = vld [vmem:[%s3749_s27 + $0x20c] sm:$0xf0]  ;;  %v3417_v46 = vld [vmem:[%s3749_s27 + $0x1f4] sm:$0xf] }
  0xe1   : > { %v1947_v53 = vsel %vm428_vm0, %v1924_v47, 0  ;;  %v1938_v54 = vsel %vm428_vm0, %v1921_v48, 0  ;;  %v3215_v47 = vld [vmem:[%s3749_s27 + $0x210] sm:$0xf0] }
  0xe2   : > { %v1941_v55 = vsel %vm428_vm0, %v1922_v49, 0 }
  0xe9   : > { %3103 = vmatmul.msk.bf16.vlgmr.msra.gmra.mxu0 %vm424_vm1, %v3778_v15  ;;  %3104 = vmatmul.msk.bf16.vlgmr.msra.gmra.mxu1 %vm424_vm1, %v3778_v15 }
  0xea   : > { %3105 = vmatmul.msk.bf16.vlgmr.msra.gmra.mxu2 %vm424_vm1, %v3778_v15  ;;  %3106 = vmatmul.msk.bf16.vlgmr.msra.gmra.mxu3 %vm424_vm1, %v3778_v15 }
  0xeb   : > { %1687 = vmatpush.bf16.msra.mxu2 %v1638_v1  ;;  %1700 = vmatpush.bf16.msra.mxu3 %v1641_v2 }
  0xec   : > { %1661 = vmatpush.bf16.msra.mxu0 %v1632_v3  ;;  %1674 = vmatpush.bf16.msra.mxu1 %v1635_v4  ;;  %v3206_v3 = vor.u32 %v3420_v57, %v3205_v56  ;;  %v3210_v4 = vor.u32 %v3416_v58, %v3207_v59  ;;  %v3214_v56 = vor.u32 %v3421_v45, %v3213_v44  ;;  %v3424_v44 = vld [vmem:[%s3749_s27 + $0x24c] sm:$0xf] }
  0xed   : > { %v3218_v57 = vor.u32 %v3417_v46, %v3215_v47  ;;  %v3269_v45 = vld [vmem:[%s3749_s27 + $0x268] sm:$0xf0]  ;;  %v3259_v46 = vld [vmem:[%s3749_s27 + $0x240] sm:$0xf] }
  0xef   : > { %1688 = vmatpush.bf16.msra.mxu2 %v3144_v9  ;;  %1701 = vmatpush.bf16.msra.mxu3 %v3148_v10  ;;  %v3194_v10 = vld [vmem:[%s3749_s27 + $0x238] sm:$0x11] }
  0xf0   : > { %1662 = vmatpush.bf16.msra.mxu0 %v3136_v11  ;;  %1675 = vmatpush.bf16.msra.mxu1 %v3140_v12  ;;  %v1911_v13 = vunpack.c.l.b16 %v3194_v10  ;;  %v1912_v14 = vunpack.c.h.b16 %v3194_v10 }
  0xf9   : > { %3107 = vmatmul.msk.bf16.vlgmr.msrb.gmra.mxu0 %vm424_vm1, %v3778_v15  ;;  %3108 = vmatmul.msk.bf16.vlgmr.msrb.gmra.mxu1 %vm424_vm1, %v3778_v15 }
  0xfa   : > { %3109 = vmatmul.msk.bf16.vlgmr.msrb.gmra.mxu2 %vm424_vm1, %v3778_v15  ;;  %3110 = vmatmul.msk.bf16.vlgmr.msrb.gmra.mxu3 %vm424_vm1, %v3778_v15 }
  0xfb   : > { %1739 = vmatpush.bf16.msrb.mxu2 %v1650_v24  ;;  %1752 = vmatpush.bf16.msrb.mxu3 %v1653_v25  ;;  %v1927_v25 = vpack.c.b16 %v1911_v13, %v1911_v13 }
  0xfc   : > { %1713 = vmatpush.bf16.msrb.mxu0 %v1644_v26  ;;  %1726 = vmatpush.bf16.msrb.mxu1 %v1647_v27  ;;  %v1928_v26 = vpack.c.b16 %v1912_v14, %v1912_v14  ;;  %v1925_v27 = vpack.c.b16 %v1909_v21, %v1909_v21 }
  0xff   : > { %1740 = vmatpush.bf16.msrb.mxu2 %v3160_v36  ;;  %1753 = vmatpush.bf16.msrb.mxu3 %v3164_v37  ;;  %v1956_v36 = vsel %vm428_vm0, %v1927_v25, 0  ;;  %v1959_v37 = vsel %vm428_vm0, %v1928_v26, 0 }
 0x100   : > { %1714 = vmatpush.bf16.msrb.mxu0 %v3152_v38  ;;  %1727 = vmatpush.bf16.msrb.mxu1 %v3156_v39  ;;  %v1950_v38 = vsel %vm428_vm0, %v1925_v27, 0  ;;  %v1953_v39 = vsel %vm428_vm0, %v1926_v28, 0 }
 0x106   : > { %v3962_v50 = vpop.f32.mrf.mxu0  ;;  %v3964_v51 = vpop.f32.mrf.mxu1 }
 0x107   : > { %vm565_vm2 = vcmp.ge.f32.partialorder %v3962_v50, 1.0  ;;  %vm566_vm3 = vcmp.ge.f32.partialorder %v3964_v51, 1.0  ;;  %v841_v21 = vmul.f32 0.7, %v3962_v50  ;;  %v842_v27 = vmul.f32 0.7, %v3964_v51 }
 0x108   : > { %v3989_v1 = vsel %vm565_vm2, 1.0, %v3492_v0  ;;  %v3992_v2 = vsel %vm566_vm3, 1.0, %v3492_v0 }
 0x109   : > { %3165 = vmatmul.msk.bf16.vlgmr.msra.gmra.mxu0 %vm424_vm1, %v3778_v15  ;;  %3166 = vmatmul.msk.bf16.vlgmr.msra.gmra.mxu1 %vm424_vm1, %v3778_v15  ;;  %v605_v5 = vpack.c.bf16 %v3992_v2, %v3989_v1  ;;  %v590_v58 = vsub.f32 1.0, %v3992_v2  ;;  %v2213_v2 = vunpack.c.l.b16 %v3254_v63 }
 0x10a   : > { %3167 = vmatmul.msk.bf16.vlgmr.msra.gmra.mxu2 %vm424_vm1, %v3778_v15  ;;  %3168 = vmatmul.msk.bf16.vlgmr.msra.gmra.mxu3 %vm424_vm1, %v3778_v15 }
 0x10b   : > { %1993 = vmatpush.bf16.msra.mxu2 %v1944_v52  ;;  %2006 = vmatpush.bf16.msra.mxu3 %v1947_v53  ;;  %v613_v19 = vrot.slane %v605_v5, 2  ;;  %v3222_v52 = vor.u32 %v3422_v41, %v3221_v40  ;;  %v3226_v53 = vor.u32 %v3418_v42, %v3223_v43  ;;  %v3267_v43 = vld [vmem:[%s3749_s27 + $0x248] sm:$0xf] }
 0x10c   : > { %1967 = vmatpush.bf16.msra.mxu0 %v1938_v54  ;;  %1980 = vmatpush.bf16.msra.mxu1 %v1941_v55  ;;  %v589_v54 = vsub.f32 1.0, %v3989_v1 }
 0x10d   : > { %v3996_v8 = vpop.f32.mrf.mxu2  ;;  %v3998_v9 = vpop.f32.mrf.mxu3  ;;  %v622_v29 = vsel %vm619_vm6, %v605_v5, %v613_v19  ;;  %v3253_v5 = vld [vmem:[%s3749_s27 + $0x280] sm:$0x11]  ;;  %v2229_v19 = vpack.c.b16 %v2213_v2, %v2213_v2 }
 0x10e   : > { %vm567_vm4 = vcmp.ge.f32.partialorder %v3996_v8, 1.0  ;;  %vm568_vm5 = vcmp.ge.f32.partialorder %v3998_v9, 1.0  ;;  %v464_v11 = vpop.f32.mrf.mxu0  ;;  %v477_v12 = vpop.f32.mrf.mxu1  ;;  %v2212_v13 = vunpack.c.h.b16 %v3253_v5 }
 0x10f   : > { %v4005_v17 = vsel %vm567_vm4, 1.0, %v3492_v0  ;;  %v4008_v18 = vsel %vm568_vm5, 1.0, %v3492_v0  ;;  %1994 = vmatpush.bf16.msra.mxu2 %v3206_v3  ;;  %2007 = vmatpush.bf16.msra.mxu3 %v3210_v4  ;;  %v2214_v4 = vunpack.c.h.b16 %v3254_v63  ;;  %v598_v11 = vmul.f32 %v590_v58, %v3964_v51 }
 0x110   : > { %v606_v20 = vpack.c.bf16 %v4008_v18, %v4005_v17  ;;  %1968 = vmatpush.bf16.msra.mxu0 %v3198_v6  ;;  %1981 = vmatpush.bf16.msra.mxu1 %v3202_v7  ;;  %v597_v6 = vmul.f32 %v589_v54, %v3962_v50  ;;  %v2211_v12 = vunpack.c.l.b16 %v3253_v5  ;;  %v844_v50 = vmul.f32 0.7, %v3998_v9  ;;  %v3423_v54 = vld [vmem:[%s3749_s27 + $0x244] sm:$0xf] }
 0x111   : > { %v858_v28 = vmul.f32 0.75, %v598_v11 }
 0x112   : > { %v614_v23 = vrot.slane %v606_v20, 4  ;;  %v615_v24 = vrot.slane %v606_v20, 6  ;;  %v2230_v20 = vpack.c.b16 %v2214_v4, %v2214_v4  ;;  %v2227_v22 = vpack.c.b16 %v2211_v12, %v2211_v12 }
 0x114   : > { %v626_v30 = vsel %vm623_vm7, %v614_v23, %v615_v24  ;;  %v2228_v23 = vpack.c.b16 %v2212_v13, %v2212_v13  ;;  %v857_v24 = vmul.f32 0.75, %v597_v6  ;;  %v2244_v42 = vsel %vm428_vm0, %v2227_v22, 0 }
 0x115   : > { %v628_v31 = vsel %vm627_vm8, %v622_v29, %v626_v30  ;;  %v490_v32 = vpop.f32.mrf.mxu2  ;;  %v503_v33 = vpop.f32.mrf.mxu3 }
 0x116   : > { %638 = vst [vmem:[%s4017_s3] sm:$0xff] %v628_v31  ;;  %v4020_v34 = vpop.f32.mrf.mxu0  ;;  %v4022_v35 = vpop.f32.mrf.mxu1  ;;  %v843_v32 = vmul.f32 0.7, %v3996_v8  ;;  %v591_v33 = vsub.f32 1.0, %v4005_v17  ;;  %v2247_v17 = vsel %vm428_vm0, %v2228_v23, 0  ;;  %v3255_v23 = vld [vmem:[%s3749_s27 + $0x290] sm:$0x11] }
 0x117   : > { %vm569_vm9 = vcmp.ge.f32.partialorder %v4020_v34, 1.0  ;;  %vm570_vm10 = vcmp.ge.f32.partialorder %v4022_v35, 1.0 }
 0x118   : > { %v4047_v48 = vsel %vm569_vm9, 1.0, %v3492_v0  ;;  %v4050_v49 = vsel %vm570_vm10, 1.0, %v3492_v0 }
 0x119   : > { %3169 = vmatmul.msk.bf16.vlgmr.msrb.gmra.mxu0 %vm424_vm1, %v3778_v15  ;;  %3170 = vmatmul.msk.bf16.vlgmr.msrb.gmra.mxu1 %vm424_vm1, %v3778_v15  ;;  %v607_v55 = vpack.c.bf16 %v4050_v49, %v4047_v48  ;;  %v593_v58 = vsub.f32 1.0, %v4047_v48 }
 0x11a   : > { %3171 = vmatmul.msk.bf16.vlgmr.msrb.gmra.mxu2 %vm424_vm1, %v3778_v15  ;;  %3172 = vmatmul.msk.bf16.vlgmr.msrb.gmra.mxu3 %vm424_vm1, %v3778_v15 }
 0x11b   : > { %2045 = vmatpush.bf16.msrb.mxu2 %v1956_v36  ;;  %2058 = vmatpush.bf16.msrb.mxu3 %v1959_v37  ;;  %v616_v7 = vrot.slane %v607_v55, 2  ;;  %v592_v36 = vsub.f32 1.0, %v4008_v18  ;;  %v3428_v18 = vld [vmem:[%s3749_s27 + $0x264] sm:$0xf0]  ;;  %v601_v12 = vmul.f32 %v593_v58, %v4020_v34  ;;  %v3285_v58 = vld [vmem:[%s3749_s27 + $0x278] sm:$0xf0] }
 0x11c   : > { %2019 = vmatpush.bf16.msrb.mxu0 %v1950_v38  ;;  %2032 = vmatpush.bf16.msrb.mxu1 %v1953_v39  ;;  %v2250_v38 = vsel %vm428_vm0, %v2229_v19, 0  ;;  %v2253_v39 = vsel %vm428_vm0, %v2230_v20, 0 }
 0x11d   : > { %v4056_v59 = vpop.f32.mrf.mxu2  ;;  %v4058_v60 = vpop.f32.mrf.mxu3  ;;  %v631_v25 = vsel %vm619_vm6, %v607_v55, %v616_v7  ;;  %v3261_v55 = vld [vmem:[%s3749_s27 + $0x260] sm:$0xf0] }
 0x11e   : > { %vm571_vm11 = vcmp.ge.f32.partialorder %v4056_v59, 1.0  ;;  %vm572_vm12 = vcmp.ge.f32.partialorder %v4058_v60, 1.0  ;;  %v516_v61 = vpop.f32.mrf.mxu0  ;;  %v529_v62 = vpop.f32.mrf.mxu1  ;;  %v3264_v63 = vor.u32 %v3423_v54, %v3261_v55 }
 0x11f   : > { %v4064_v1 = vsel %vm571_vm11, 1.0, %v3492_v0  ;;  %v4067_v3 = vsel %vm572_vm12, 1.0, %v3492_v0  ;;  %2046 = vmatpush.bf16.msrb.mxu2 %v3222_v52  ;;  %2059 = vmatpush.bf16.msrb.mxu3 %v3226_v53  ;;  %v3427_v53 = vld [vmem:[%s3749_s27 + $0x25c] sm:$0xf0]  ;;  %v594_v61 = vsub.f32 1.0, %v4050_v49  ;;  %v3268_v62 = vor.u32 %v3428_v18, %v3267_v43 }
 0x120   : > { %v608_v10 = vpack.c.bf16 %v4067_v3, %v4064_v1  ;;  %2020 = vmatpush.bf16.msrb.mxu0 %v3214_v56  ;;  %2033 = vmatpush.bf16.msrb.mxu1 %v3218_v57  ;;  %v599_v56 = vmul.f32 %v591_v33, %v3996_v8  ;;  %v600_v57 = vmul.f32 %v592_v36, %v3998_v9  ;;  %v595_v33 = vsub.f32 1.0, %v4064_v1 }
 0x121   : > { %v3272_v8 = vor.u32 %v3424_v44, %v3269_v45  ;;  %v3260_v49 = vor.u32 %v3427_v53, %v3259_v46  ;;  %v602_v13 = vmul.f32 %v594_v61, %v4022_v35  ;;  %v596_v36 = vsub.f32 1.0, %v4067_v3  ;;  %v3283_v53 = vld [vmem:[%s3749_s27 + $0x258] sm:$0xf] }
 0x122   : > { %v617_v14 = vrot.slane %v608_v10, 4  ;;  %v618_v16 = vrot.slane %v608_v10, 6  ;;  %v859_v4 = vmul.f32 0.75, %v599_v56  ;;  %v860_v5 = vmul.f32 0.75, %v600_v57  ;;  %v3430_v56 = vld [vmem:[%s3749_s27 + $0x274] sm:$0xf0] }
 0x123   : > { %v3426_v57 = vld [vmem:[%s3749_s27 + $0x25c] sm:$0xf] }
 0x124   : > { %v634_v26 = vsel %vm623_vm7, %v617_v14, %v618_v16  ;;  %v3256_v16 = vld [vmem:[%s3749_s27 + $0x298] sm:$0x11] }
 0x125   : > { %v635_v29 = vsel %vm627_vm8, %v631_v25, %v634_v26  ;;  %v542_v30 = vpop.f32.mrf.mxu2  ;;  %v555_v31 = vpop.f32.mrf.mxu3  ;;  %v2218_v22 = vunpack.c.h.b16 %v3256_v16 }
 0x126   : > { %639 = vst [vmem:[%s4017_s3 + $0x8] sm:$0xff] %v635_v29  ;;  %v746_v51 = vpop.f32.mrf.mxu0  ;;  %v759_v37 = vpop.f32.mrf.mxu1  ;;  %v846_v29 = vmul.f32 0.7, %v4022_v35  ;;  %v2215_v30 = vunpack.c.l.b16 %v3255_v23  ;;  %v861_v31 = vmul.f32 0.75, %v601_v12  ;;  %v3288_v12 = vor.u32 %v3426_v57, %v3285_v58 }
 0x127   : > { %v4086_v40 = vadd.f32 %v841_v21, %v746_v51  ;;  %v4088_v41 = vadd.f32 %v842_v27, %v759_v37  ;;  %v2217_v21 = vunpack.c.l.b16 %v3256_v16  ;;  %v2234_v26 = vpack.c.b16 %v2218_v22, %v2218_v22 }
 0x128   : > { %v847_v16 = vmul.f32 0.7, %v4056_v59 }
 0x129   : > { %v4098_v47 = vadd.f32 %v857_v24, %v4086_v40  ;;  %v4101_v52 = vadd.f32 %v858_v28, %v4088_v41  ;;  %3227 = vmatmul.msk.bf16.vlgmr.msra.gmra.mxu0 %vm424_vm1, %v3778_v15  ;;  %3228 = vmatmul.msk.bf16.vlgmr.msra.gmra.mxu1 %vm424_vm1, %v3778_v15  ;;  %v845_v24 = vmul.f32 0.7, %v4020_v34  ;;  %v2233_v25 = vpack.c.b16 %v2217_v21, %v2217_v21 }
 0x12a   : > { %3229 = vmatmul.msk.bf16.vlgmr.msra.gmra.mxu2 %vm424_vm1, %v3778_v15  ;;  %3230 = vmatmul.msk.bf16.vlgmr.msra.gmra.mxu3 %vm424_vm1, %v3778_v15  ;;  %v2265_v44 = vsel %vm428_vm0, %v2234_v26, 0 }
 0x12b   : > { %vm873_vm13 = vcmp.ge.f32.partialorder %v4098_v47, 1.0  ;;  %vm874_vm14 = vcmp.ge.f32.partialorder %v4101_v52, 1.0  ;;  %2299 = vmatpush.bf16.msra.mxu2 %v2250_v38  ;;  %2312 = vmatpush.bf16.msra.mxu3 %v2253_v39  ;;  %v2231_v38 = vpack.c.b16 %v2215_v30, %v2215_v30  ;;  %v2216_v39 = vunpack.c.h.b16 %v3255_v23 }
 0x12c   : > { %v4121_v9 = vsel %vm873_vm13, 1.0, %v3492_v0  ;;  %v4124_v48 = vsel %vm874_vm14, 1.0, %v3492_v0  ;;  %2273 = vmatpush.bf16.msra.mxu0 %v2244_v42  ;;  %2286 = vmatpush.bf16.msra.mxu1 %v2247_v17  ;;  %v2262_v18 = vsel %vm428_vm0, %v2233_v25, 0 }
 0x12d   : > { %v772_v15 = vpop.f32.mrf.mxu2  ;;  %v785_v2 = vpop.f32.mrf.mxu3  ;;  %v913_v14 = vpack.c.bf16 %v4124_v48, %v4121_v9  ;;  %v2256_v3 = vsel %vm428_vm0, %v2231_v38, 0  ;;  %v2232_v46 = vpack.c.b16 %v2216_v39, %v2216_v39  ;;  %v898_v23 = vsub.f32 1.0, %v4124_v48 }
 0x12e   : > { %v4126_v6 = vadd.f32 %v843_v32, %v772_v15  ;;  %v4128_v7 = vadd.f32 %v844_v50, %v785_v2  ;;  %v748_v10 = vpop.f32.mrf.mxu0  ;;  %v761_v11 = vpop.f32.mrf.mxu1  ;;  %v862_v32 = vmul.f32 0.75, %v602_v13  ;;  %v3275_v15 = vld [vmem:[%s3749_s27 + $0x250] sm:$0xf]  ;;  %v3425_v13 = vld [vmem:[%s3749_s27 + $0x254] sm:$0xf] }
 0x12f   : > { %2300 = vmatpush.bf16.msra.mxu2 %v3268_v62  ;;  %2313 = vmatpush.bf16.msra.mxu3 %v3272_v8  ;;  %v921_v50 = vrot.slane %v913_v14, 2  ;;  %v3429_v2 = vld [vmem:[%s3749_s27 + $0x26c] sm:$0xf0]  ;;  %v897_v10 = vsub.f32 1.0, %v4121_v9  ;;  %v3284_v11 = vor.u32 %v3430_v56, %v3283_v53  ;;  %v848_v9 = vmul.f32 0.7, %v4058_v60 }
 0x130   : > { %v4136_v19 = vadd.f32 %v859_v4, %v4126_v6  ;;  %v4139_v20 = vadd.f32 %v860_v5, %v4128_v7  ;;  %2274 = vmatpush.bf16.msra.mxu0 %v3260_v49  ;;  %2287 = vmatpush.bf16.msra.mxu1 %v3264_v63  ;;  %v4179_v49 = vld [vmem:[%s4927_s1] sm:$0x3]  ;;  %v2259_v63 = vsel %vm428_vm0, %v2232_v46, 0  ;;  %v603_v4 = vmul.f32 %v595_v33, %v4056_v59 }
 0x131   : > { %v929_v54 = vsel %vm619_vm6, %v913_v14, %v921_v50  ;;  %v604_v5 = vmul.f32 %v596_v36, %v4058_v60  ;;  %v3277_v14 = vld [vmem:[%s3749_s27 + $0x270] sm:$0xf0]  ;;  %v3276_v21 = vor.u32 %v3429_v2, %v3275_v15  ;;  %v905_v48 = vmul.f32 %v897_v10, %v4098_v47 }
 0x132   : > { %vm875_vm15 = vcmp.ge.f32.partialorder %v4136_v19, 1.0  ;;  %vm876_vm2 = vcmp.ge.f32.partialorder %v4139_v20, 1.0  ;;  %v3280_v22 = vor.u32 %v3425_v13, %v3277_v14  ;;  %v863_v30 = vmul.f32 0.75, %v603_v4  ;;  %v3329_v14 = vld [vmem:[%s3749_s27 + $0x2a8] sm:$0xf] }
 0x133   : > { %v4146_v27 = vsel %vm875_vm15, 1.0, %v3492_v0  ;;  %v4149_v28 = vsel %vm876_vm2, 1.0, %v3492_v0  ;;  %v1147_v38 = vmul.f32 0.7, %v4086_v40  ;;  %v1148_v47 = vmul.f32 0.7, %v4088_v41 }
 0x134   : > { %v914_v34 = vpack.c.bf16 %v4149_v28, %v4146_v27  ;;  %v1163_v41 = vmul.f32 0.75, %v905_v48  ;;  %v899_v53 = vsub.f32 1.0, %v4146_v27  ;;  %v3435_v48 = vld [vmem:[%s3749_s27 + $0x2bc] sm:$0xf0] }
 0x135   : > { %v774_v51 = vpop.f32.mrf.mxu2  ;;  %v787_v37 = vpop.f32.mrf.mxu3 }
 0x136   : > { %v922_v35 = vrot.slane %v914_v34, 4  ;;  %v923_v42 = vrot.slane %v914_v34, 6  ;;  %v798_v17 = vpop.f32.mrf.mxu0  ;;  %v811_v43 = vpop.f32.mrf.mxu1  ;;  %v3316_v51 = vld [vmem:[%s3749_s27 + $0x2e8] sm:$0x11]  ;;  %v906_v37 = vmul.f32 %v898_v23, %v4101_v52 }
 0x137   : > { %v4158_v45 = vadd.f32 %v845_v24, %v798_v17  ;;  %v4160_v1 = vadd.f32 %v846_v29, %v811_v43  ;;  %v2519_v39 = vunpack.c.l.b16 %v3316_v51 }
 0x138   : > { %v932_v55 = vsel %vm623_vm7, %v922_v35, %v923_v42  ;;  %v3315_v35 = vld [vmem:[%s3749_s27 + $0x2e0] sm:$0x11]  ;;  %v2520_v42 = vunpack.c.h.b16 %v3316_v51  ;;  %v1164_v56 = vmul.f32 0.75, %v906_v37  ;;  %v1150_v37 = vmul.f32 0.7, %v4128_v7 }
 0x139   : > { %v933_v61 = vsel %vm627_vm8, %v929_v54, %v932_v55  ;;  %v4171_v62 = vadd.f32 %v861_v31, %v4158_v45  ;;  %v4174_v8 = vadd.f32 %v862_v32, %v4160_v1  ;;  %3231 = vmatmul.msk.bf16.vlgmr.msrb.gmra.mxu0 %vm424_vm1, %v4179_v49  ;;  %3232 = vmatmul.msk.bf16.vlgmr.msrb.gmra.mxu1 %vm424_vm1, %v4179_v49  ;;  %v864_v31 = vmul.f32 0.75, %v604_v5  ;;  %v3431_v51 = vld [vmem:[%s3749_s27 + $0x2a4] sm:$0xf] }
 0x13a   : > { %2995 = vst [vmem:[%s4017_s3 + $0x10] sm:$0xff] %v933_v61  ;;  %3233 = vmatmul.msk.bf16.vlgmr.msrb.gmra.mxu2 %vm424_vm1, %v4179_v49  ;;  %3234 = vmatmul.msk.bf16.vlgmr.msrb.gmra.mxu3 %vm424_vm1, %v4179_v49  ;;  %v2517_v17 = vunpack.c.l.b16 %v3315_v35  ;;  %v2518_v52 = vunpack.c.h.b16 %v3315_v35  ;;  %v2536_v46 = vpack.c.b16 %v2520_v42, %v2520_v42  ;;  %v900_v61 = vsub.f32 1.0, %v4149_v28 }
 0x13b   : > { %vm877_vm3 = vcmp.ge.f32.partialorder %v4171_v62, 1.0  ;;  %vm878_vm4 = vcmp.ge.f32.partialorder %v4174_v8, 1.0  ;;  %2351 = vmatpush.bf16.msrb.mxu2 %v2262_v18  ;;  %2364 = vmatpush.bf16.msrb.mxu3 %v2265_v44  ;;  %v2535_v44 = vpack.c.b16 %v2519_v39, %v2519_v39 }
 0x13c   : > { %2325 = vmatpush.bf16.msrb.mxu0 %v2256_v3  ;;  %2338 = vmatpush.bf16.msrb.mxu1 %v2259_v63  ;;  %v4204_v24 = vsel %vm877_vm3, 1.0, %v3492_v0  ;;  %v4207_v25 = vsel %vm878_vm4, 1.0, %v3492_v0  ;;  %v2533_v57 = vpack.c.b16 %v2517_v17, %v2517_v17  ;;  %v2534_v58 = vpack.c.b16 %v2518_v52, %v2518_v52 }
 0x13d   : > { %v824_v26 = vpop.f32.mrf.mxu2  ;;  %v837_v29 = vpop.f32.mrf.mxu3  ;;  %v915_v34 = vpack.c.bf16 %v4207_v25, %v4204_v24  ;;  %v2556_v5 = vsel %vm428_vm0, %v2535_v44, 0  ;;  %v902_v39 = vsub.f32 1.0, %v4207_v25 }
 0x13e   : > { %v4209_v59 = vadd.f32 %v847_v16, %v824_v26  ;;  %v4211_v60 = vadd.f32 %v848_v9, %v837_v29  ;;  %v800_v32 = vpop.f32.mrf.mxu0  ;;  %v813_v50 = vpop.f32.mrf.mxu1  ;;  %v3436_v16 = vld [vmem:[%s3749_s27 + $0x2c4] sm:$0xf0]  ;;  %v3432_v9 = vld [vmem:[%s3749_s27 + $0x2ac] sm:$0xf]  ;;  %v2553_v26 = vsel %vm428_vm0, %v2534_v58, 0 }
 0x13f   : > { %2352 = vmatpush.bf16.msrb.mxu2 %v3284_v11  ;;  %2365 = vmatpush.bf16.msrb.mxu3 %v3288_v12  ;;  %v924_v3 = vrot.slane %v915_v34, 2  ;;  %v2559_v11 = vsel %vm428_vm0, %v2536_v46, 0  ;;  %v2550_v12 = vsel %vm428_vm0, %v2533_v57, 0  ;;  %v3331_v29 = vld [vmem:[%s3749_s27 + $0x2c8] sm:$0xf0]  ;;  %v908_v32 = vmul.f32 %v900_v61, %v4139_v20 }
 0x140   : > { %v4217_v33 = vadd.f32 %v863_v30, %v4209_v59  ;;  %v4220_v36 = vadd.f32 %v864_v31, %v4211_v60  ;;  %2326 = vmatpush.bf16.msrb.mxu0 %v3276_v21  ;;  %2339 = vmatpush.bf16.msrb.mxu1 %v3280_v22  ;;  %v3321_v30 = vld [vmem:[%s3749_s27 + $0x2a0] sm:$0xf]  ;;  %v907_v31 = vmul.f32 %v899_v53, %v4136_v19  ;;  %v901_v50 = vsub.f32 1.0, %v4204_v24  ;;  %v3323_v20 = vld [vmem:[%s3749_s27 + $0x2c0] sm:$0xf0] }
 0x141   : > { %v936_v13 = vsel %vm619_vm6, %v915_v34, %v924_v3  ;;  %v3330_v34 = vor.u32 %v3436_v16, %v3329_v14  ;;  %v3334_v19 = vor.u32 %v3432_v9, %v3331_v29  ;;  %v1149_v24 = vmul.f32 0.7, %v4126_v6  ;;  %v3317_v61 = vld [vmem:[%s3749_s27 + $0x2f0] sm:$0x11] }
 0x142   : > { %vm879_vm5 = vcmp.ge.f32.partialorder %v4217_v33, 1.0  ;;  %vm880_vm9 = vcmp.ge.f32.partialorder %v4220_v36, 1.0  ;;  %v1165_v6 = vmul.f32 0.75, %v907_v31  ;;  %v1166_v7 = vmul.f32 0.75, %v908_v32 }
 0x143   : > { %v4230_v43 = vsel %vm879_vm5, 1.0, %v3492_v0  ;;  %v4233_v18 = vsel %vm880_vm9, 1.0, %v3492_v0  ;;  %v909_v25 = vmul.f32 %v901_v50, %v4171_v62  ;;  %v1151_v57 = vmul.f32 0.7, %v4158_v45 }
 0x144   : > { %v916_v40 = vpack.c.bf16 %v4233_v18, %v4230_v43  ;;  %v1152_v62 = vmul.f32 0.7, %v4160_v1 }
 0x145   : > { %v826_v54 = vpop.f32.mrf.mxu2  ;;  %v839_v55 = vpop.f32.mrf.mxu3  ;;  %v1167_v1 = vmul.f32 0.75, %v909_v25 }
 0x146   : > { %v925_v63 = vrot.slane %v916_v40, 4  ;;  %v926_v15 = vrot.slane %v916_v40, 6  ;;  %v1052_v2 = vpop.f32.mrf.mxu0  ;;  %v1065_v4 = vpop.f32.mrf.mxu1  ;;  %v3318_v55 = vld [vmem:[%s3749_s27 + $0x2f8] sm:$0x11] }
 0x147   : > { %v4240_v10 = vadd.f32 %v1147_v38, %v1052_v2  ;;  %v4242_v27 = vadd.f32 %v1148_v47, %v1065_v4  ;;  %v3322_v38 = vor.u32 %v3435_v48, %v3321_v30  ;;  %v3326_v47 = vor.u32 %v3431_v51, %v3323_v20  ;;  %v3345_v20 = vld [vmem:[%s3749_s27 + $0x2b8] sm:$0xf] }
 0x148   : > { %v939_v28 = vsel %vm623_vm7, %v925_v63, %v926_v15  ;;  %v2523_v58 = vunpack.c.l.b16 %v3318_v55  ;;  %v2524_v63 = vunpack.c.h.b16 %v3318_v55  ;;  %v2521_v15 = vunpack.c.l.b16 %v3317_v61  ;;  %v3433_v55 = vld [vmem:[%s3749_s27 + $0x2b4] sm:$0xf] }
 0x149   : > { %v940_v21 = vsel %vm627_vm8, %v936_v13, %v939_v28  ;;  %v4253_v22 = vadd.f32 %v1163_v41, %v4240_v10  ;;  %v4256_v23 = vadd.f32 %v1164_v56, %v4242_v27  ;;  %3289 = vmatmul.msk.bf16.vlgmr.msra.gmra.mxu0 %vm424_vm1, %v4179_v49  ;;  %3290 = vmatmul.msk.bf16.vlgmr.msra.gmra.mxu1 %vm424_vm1, %v4179_v49  ;;  %v903_v13 = vsub.f32 1.0, %v4230_v43 }
 0x14a   : > { %2996 = vst [vmem:[%s4017_s3 + $0x18] sm:$0xff] %v940_v21  ;;  %3291 = vmatmul.msk.bf16.vlgmr.msra.gmra.mxu2 %vm424_vm1, %v4179_v49  ;;  %3292 = vmatmul.msk.bf16.vlgmr.msra.gmra.mxu3 %vm424_vm1, %v4179_v49  ;;  %v910_v56 = vmul.f32 %v902_v39, %v4174_v8  ;;  %v2522_v8 = vunpack.c.h.b16 %v3317_v61  ;;  %v2537_v9 = vpack.c.b16 %v2521_v15, %v2521_v15 }
 0x14b   : > { %vm1179_vm10 = vcmp.ge.f32.partialorder %v4253_v22, 1.0  ;;  %vm1180_vm11 = vcmp.ge.f32.partialorder %v4256_v23, 1.0  ;;  %2605 = vmatpush.bf16.msra.mxu2 %v2556_v5  ;;  %2618 = vmatpush.bf16.msra.mxu3 %v2559_v11  ;;  %v2539_v5 = vpack.c.b16 %v2523_v58, %v2523_v58 }
 0x14c   : > { %2579 = vmatpush.bf16.msra.mxu0 %v2550_v12  ;;  %2592 = vmatpush.bf16.msra.mxu1 %v2553_v26  ;;  %v4282_v35 = vsel %vm1179_vm10, 1.0, %v3492_v0  ;;  %v4285_v42 = vsel %vm1180_vm11, 1.0, %v3492_v0  ;;  %v2540_v12 = vpack.c.b16 %v2524_v63, %v2524_v63  ;;  %v1168_v16 = vmul.f32 0.75, %v910_v56 }
 0x14d   : > { %v1078_v17 = vpop.f32.mrf.mxu2  ;;  %v1091_v44 = vpop.f32.mrf.mxu3  ;;  %v1219_v46 = vpack.c.bf16 %v4285_v42, %v4282_v35  ;;  %v2538_v21 = vpack.c.b16 %v2522_v8, %v2522_v8  ;;  %v904_v26 = vsub.f32 1.0, %v4233_v18  ;;  %v2568_v50 = vsel %vm428_vm0, %v2539_v5, 0 }
 0x14e   : > { %v4287_v52 = vadd.f32 %v1149_v24, %v1078_v17  ;;  %v4289_v3 = vadd.f32 %v1150_v37, %v1091_v44  ;;  %v1054_v40 = vpop.f32.mrf.mxu0  ;;  %v1067_v41 = vpop.f32.mrf.mxu1  ;;  %v3438_v24 = vld [vmem:[%s3749_s27 + $0x2d4] sm:$0xf0]  ;;  %v3434_v37 = vld [vmem:[%s3749_s27 + $0x2bc] sm:$0xf]  ;;  %v1154_v56 = vmul.f32 0.7, %v4211_v60 }
 0x14f   : > { %2606 = vmatpush.bf16.msra.mxu2 %v3330_v34  ;;  %2619 = vmatpush.bf16.msra.mxu3 %v3334_v19  ;;  %v1227_v11 = vrot.slane %v1219_v46, 2  ;;  %v2571_v34 = vsel %vm428_vm0, %v2540_v12, 0  ;;  %v2562_v19 = vsel %vm428_vm0, %v2537_v9, 0  ;;  %v2565_v17 = vsel %vm428_vm0, %v2538_v21, 0  ;;  %v3347_v44 = vld [vmem:[%s3749_s27 + $0x2d8] sm:$0xf0] }
 0x150   : > { %v4295_v53 = vadd.f32 %v1165_v6, %v4287_v52  ;;  %v4298_v54 = vadd.f32 %v1166_v7, %v4289_v3  ;;  %2580 = vmatpush.bf16.msra.mxu0 %v3322_v38  ;;  %2593 = vmatpush.bf16.msra.mxu1 %v3326_v47  ;;  %v3337_v6 = vld [vmem:[%s3749_s27 + $0x2b0] sm:$0xf]  ;;  %v911_v7 = vmul.f32 %v903_v13, %v4217_v33  ;;  %v3339_v33 = vld [vmem:[%s3749_s27 + $0x2d0] sm:$0xf0]  ;;  %v1204_v12 = vsub.f32 1.0, %v4285_v42 }
 0x151   : > { %v1235_v51 = vsel %vm619_vm6, %v1219_v46, %v1227_v11  ;;  %v912_v40 = vmul.f32 %v904_v26, %v4220_v36  ;;  %v3437_v41 = vld [vmem:[%s3749_s27 + $0x2cc] sm:$0xf0]  ;;  %v3346_v25 = vor.u32 %v3438_v24, %v3345_v20  ;;  %v3350_v46 = vor.u32 %v3434_v37, %v3347_v44 }
 0x152   : > { %vm1181_vm12 = vcmp.ge.f32.partialorder %v4295_v53, 1.0  ;;  %vm1182_vm13 = vcmp.ge.f32.partialorder %v4298_v54, 1.0  ;;  %v1153_v36 = vmul.f32 0.7, %v4209_v59  ;;  %v1169_v8 = vmul.f32 0.75, %v911_v7 }
 0x153   : > { %v4308_v2 = vsel %vm1181_vm12, 1.0, %v3492_v0  ;;  %v4311_v4 = vsel %vm1182_vm13, 1.0, %v3492_v0  ;;  %v1170_v59 = vmul.f32 0.75, %v912_v40  ;;  %v1212_v42 = vmul.f32 %v1204_v12, %v4256_v23 }
 0x154   : > { %v1220_v45 = vpack.c.bf16 %v4311_v4, %v4308_v2  ;;  %v1206_v23 = vsub.f32 1.0, %v4311_v4  ;;  %v1456_v7 = vmul.f32 0.7, %v4289_v3 }
 0x155   : > { %v1080_v28 = vpop.f32.mrf.mxu2  ;;  %v1093_v14 = vpop.f32.mrf.mxu3  ;;  %v1470_v37 = vmul.f32 0.75, %v1212_v42 }
 0x156   : > { %v1228_v29 = vrot.slane %v1220_v45, 4  ;;  %v1229_v30 = vrot.slane %v1220_v45, 6  ;;  %v1104_v31 = vpop.f32.mrf.mxu0  ;;  %v1117_v32 = vpop.f32.mrf.mxu1  ;;  %v1214_v44 = vmul.f32 %v1206_v23, %v4298_v54 }
 0x157   : > { %v4318_v48 = vadd.f32 %v1151_v57, %v1104_v31  ;;  %v4320_v43 = vadd.f32 %v1152_v62, %v1117_v32  ;;  %v3338_v57 = vor.u32 %v3437_v41, %v3337_v6  ;;  %v3342_v62 = vor.u32 %v3433_v55, %v3339_v33 }
 0x158   : > { %v1238_v18 = vsel %vm623_vm7, %v1228_v29, %v1229_v30  ;;  %v1453_v31 = vmul.f32 0.7, %v4240_v10  ;;  %v1454_v32 = vmul.f32 0.7, %v4242_v27  ;;  %v1455_v6 = vmul.f32 0.7, %v4287_v52 }
 0x159   : > { %v1239_v38 = vsel %vm627_vm8, %v1235_v51, %v1238_v18  ;;  %v4331_v47 = vadd.f32 %v1167_v1, %v4318_v48  ;;  %v4334_v39 = vadd.f32 %v1168_v16, %v4320_v43  ;;  %3293 = vmatmul.msk.bf16.vlgmr.msrb.gmra.mxu0 %vm424_vm1, %v4179_v49  ;;  %3294 = vmatmul.msk.bf16.vlgmr.msrb.gmra.mxu1 %vm424_vm1, %v4179_v49  ;;  %v1203_v1 = vsub.f32 1.0, %v4282_v35 }
 0x15a   : > { %3057 = vst [vmem:[%s4017_s3 + $0x20] sm:$0xff] %v1239_v38  ;;  %3295 = vmatmul.msk.bf16.vlgmr.msrb.gmra.mxu2 %vm424_vm1, %v4179_v49  ;;  %3296 = vmatmul.msk.bf16.vlgmr.msrb.gmra.mxu3 %vm424_vm1, %v4179_v49  ;;  %v1472_v33 = vmul.f32 0.75, %v1214_v44  ;;  %v1457_v12 = vmul.f32 0.7, %v4318_v48 }
 0x15b   : > { %vm1183_vm14 = vcmp.ge.f32.partialorder %v4331_v47, 1.0  ;;  %vm1184_vm15 = vcmp.ge.f32.partialorder %v4334_v39, 1.0  ;;  %2657 = vmatpush.bf16.msrb.mxu2 %v2568_v50  ;;  %2670 = vmatpush.bf16.msrb.mxu3 %v2571_v34  ;;  %v1211_v35 = vmul.f32 %v1203_v1, %v4253_v22  ;;  %v1205_v22 = vsub.f32 1.0, %v4308_v2 }
 0x15c   : > { %2631 = vmatpush.bf16.msrb.mxu0 %v2562_v19  ;;  %2644 = vmatpush.bf16.msrb.mxu1 %v2565_v17  ;;  %v4358_v58 = vsel %vm1183_vm14, 1.0, %v3492_v0  ;;  %v4361_v61 = vsel %vm1184_vm15, 1.0, %v3492_v0 }
 0x15d   : > { %v1130_v63 = vpop.f32.mrf.mxu2  ;;  %v1143_v15 = vpop.f32.mrf.mxu3  ;;  %v1221_v13 = vpack.c.bf16 %v4361_v61, %v4358_v58  ;;  %v1469_v20 = vmul.f32 0.75, %v1211_v35  ;;  %v1213_v17 = vmul.f32 %v1205_v22, %v4295_v53  ;;  %v1207_v52 = vsub.f32 1.0, %v4358_v58 }
 0x15e   : > { %v4363_v5 = vadd.f32 %v1153_v36, %v1130_v63  ;;  %v4365_v11 = vadd.f32 %v1154_v56, %v1143_v15  ;;  %v1106_v45 = vpop.f32.mrf.mxu0  ;;  %v1119_v60 = vpop.f32.mrf.mxu1  ;;  %v1208_v3 = vsub.f32 1.0, %v4361_v61 }
 0x15f   : > { %2658 = vmatpush.bf16.msrb.mxu2 %v3346_v25  ;;  %2671 = vmatpush.bf16.msrb.mxu3 %v3350_v46  ;;  %v1230_v21 = vrot.slane %v1221_v13, 2  ;;  %v1471_v46 = vmul.f32 0.75, %v1213_v17  ;;  %v1215_v15 = vmul.f32 %v1207_v52, %v4331_v47 }
 0x160   : > { %v4372_v28 = vadd.f32 %v1169_v8, %v4363_v5  ;;  %v4375_v14 = vadd.f32 %v1170_v59, %v4365_v11  ;;  %2632 = vmatpush.bf16.msrb.mxu0 %v3338_v57  ;;  %2645 = vmatpush.bf16.msrb.mxu1 %v3342_v62  ;;  %v1216_v8 = vmul.f32 %v1208_v3, %v4334_v39 }
 0x161   : > { %v1242_v38 = vsel %vm619_vm6, %v1221_v13, %v1230_v21  ;;  %v1458_v13 = vmul.f32 0.7, %v4320_v43 }
 0x162   : > { %vm1185_vm0 = vcmp.ge.f32.partialorder %v4372_v28, 1.0  ;;  %vm1186_vm2 = vcmp.ge.f32.partialorder %v4375_v14, 1.0 }
 0x163   : > { %v4382_v16 = vsel %vm1185_vm0, 1.0, %v3492_v0  ;;  %v4385_v9 = vsel %vm1186_vm2, 1.0, %v3492_v0 }
 0x164   : > { %v1222_v26 = vpack.c.bf16 %v4385_v9, %v4382_v16  ;;  %v1209_v47 = vsub.f32 1.0, %v4382_v16  ;;  %v1210_v39 = vsub.f32 1.0, %v4385_v9 }
 0x165   : > { %v1132_v29 = vpop.f32.mrf.mxu2  ;;  %v1145_v30 = vpop.f32.mrf.mxu3 }
 0x166   : > { %v1231_v50 = vrot.slane %v1222_v26, 4  ;;  %v1232_v34 = vrot.slane %v1222_v26, 6  ;;  %v1358_v19 = vpop.f32.mrf.mxu0  ;;  %v1371_v51 = vpop.f32.mrf.mxu1  ;;  %v1473_v30 = vmul.f32 0.75, %v1215_v15  ;;  %v1217_v23 = vmul.f32 %v1209_v47, %v4372_v28 }
 0x167   : > { %v4393_v18 = vadd.f32 %v1453_v31, %v1358_v19  ;;  %v4395_v24 = vadd.f32 %v1454_v32, %v1371_v51  ;;  %v1474_v32 = vmul.f32 0.75, %v1216_v8  ;;  %v1460_v19 = vmul.f32 0.7, %v4365_v11 }
 0x168   : > { %v1245_v10 = vsel %vm623_vm7, %v1231_v50, %v1232_v34  ;;  %v1218_v50 = vmul.f32 %v1210_v39, %v4375_v14  ;;  %v1459_v34 = vmul.f32 0.7, %v4363_v5 }
 0x169   : > { %v1246_v27 = vsel %vm627_vm8, %v1242_v38, %v1245_v10  ;;  %v4401_v2 = vadd.f32 %v1469_v20, %v4393_v18  ;;  %v4404_v4 = vadd.f32 %v1470_v37, %v4395_v24  ;;  %3351 = vmatmul.msk.bf16.vlgmr.msra.gmra.mxu0 %vm424_vm1, %v4179_v49  ;;  %3352 = vmatmul.msk.bf16.vlgmr.msra.gmra.mxu1 %vm424_vm1, %v4179_v49  ;;  %v1475_v38 = vmul.f32 0.75, %v1217_v23 }
 0x16a   : > { %3058 = vst [vmem:[%s4017_s3 + $0x28] sm:$0xff] %v1246_v27  ;;  %3353 = vmatmul.msk.bf16.vlgmr.msra.gmra.mxu2 %vm424_vm1, %v4179_v49  ;;  %3354 = vmatmul.msk.bf16.vlgmr.msra.gmra.mxu3 %vm424_vm1, %v4179_v49  ;;  %v1476_v10 = vmul.f32 0.75, %v1218_v50  ;;  %v1759_v52 = vmul.f32 0.7, %v4393_v18  ;;  %v1760_v3 = vmul.f32 0.7, %v4395_v24 }
 0x16b   : > { %vm1485_vm3 = vcmp.ge.f32.partialorder %v4401_v2, 1.0  ;;  %vm1486_vm4 = vcmp.ge.f32.partialorder %v4404_v4, 1.0 }
 0x16c   : > { %v4422_v40 = vsel %vm1485_vm3, 1.0, %v3492_v0  ;;  %v4425_v53 = vsel %vm1486_vm4, 1.0, %v3492_v0 }
 0x16d   : > { %v1384_v54 = vpop.f32.mrf.mxu2  ;;  %v1397_v41 = vpop.f32.mrf.mxu3  ;;  %v1525_v57 = vpack.c.bf16 %v4425_v53, %v4422_v40  ;;  %v1509_v5 = vsub.f32 1.0, %v4422_v40  ;;  %v1510_v11 = vsub.f32 1.0, %v4425_v53 }
 0x16e   : > { %v4427_v25 = vadd.f32 %v1455_v6, %v1384_v54  ;;  %v4429_v55 = vadd.f32 %v1456_v7, %v1397_v41  ;;  %v1360_v36 = vpop.f32.mrf.mxu0  ;;  %v1373_v56 = vpop.f32.mrf.mxu1 }
 0x16f   : > { %v1533_v59 = vrot.slane %v1525_v57, 2  ;;  %v1517_v54 = vmul.f32 %v1509_v5, %v4401_v2  ;;  %v1518_v41 = vmul.f32 %v1510_v11, %v4404_v4 }
 0x170   : > { %v4436_v62 = vadd.f32 %v1471_v46, %v4427_v25  ;;  %v4439_v63 = vadd.f32 %v1472_v33, %v4429_v55 }
 0x171   : > { %v1541_v22 = vsel %vm619_vm6, %v1525_v57, %v1533_v59 }
 0x172   : > { %vm1487_vm5 = vcmp.ge.f32.partialorder %v4436_v62, 1.0  ;;  %vm1488_vm9 = vcmp.ge.f32.partialorder %v4439_v63, 1.0 }
 0x173   : > { %v4446_v58 = vsel %vm1487_vm5, 1.0, %v3492_v0  ;;  %v4449_v61 = vsel %vm1488_vm9, 1.0, %v3492_v0 }
 0x174   : > { %v1526_v45 = vpack.c.bf16 %v4449_v61, %v4446_v58  ;;  %v1511_v2 = vsub.f32 1.0, %v4446_v58  ;;  %v1512_v4 = vsub.f32 1.0, %v4449_v61 }
 0x175   : > { %v1386_v60 = vpop.f32.mrf.mxu2  ;;  %v1399_v1 = vpop.f32.mrf.mxu3 }
 0x176   : > { %v1534_v35 = vrot.slane %v1526_v45, 4  ;;  %v1535_v42 = vrot.slane %v1526_v45, 6  ;;  %v1410_v21 = vpop.f32.mrf.mxu0  ;;  %v1423_v26 = vpop.f32.mrf.mxu1  ;;  %v1775_v60 = vmul.f32 0.75, %v1517_v54  ;;  %v1519_v47 = vmul.f32 %v1511_v2, %v4436_v62 }
 0x177   : > { %v4457_v29 = vadd.f32 %v1457_v12, %v1410_v21  ;;  %v4459_v31 = vadd.f32 %v1458_v13, %v1423_v26  ;;  %v1776_v12 = vmul.f32 0.75, %v1518_v41  ;;  %v1520_v39 = vmul.f32 %v1512_v4, %v4439_v63 }
 0x178   : > { %v1544_v48 = vsel %vm623_vm7, %v1534_v35, %v1535_v42  ;;  %v1761_v35 = vmul.f32 0.7, %v4427_v25  ;;  %v1762_v42 = vmul.f32 0.7, %v4429_v55  ;;  %v1777_v63 = vmul.f32 0.75, %v1519_v47 }
 0x179   : > { %v1545_v43 = vsel %vm627_vm8, %v1541_v22, %v1544_v48  ;;  %v4465_v16 = vadd.f32 %v1473_v30, %v4457_v29  ;;  %v4468_v9 = vadd.f32 %v1474_v32, %v4459_v31  ;;  %3355 = vmatmul.msk.bf16.vlgmr.msrb.gmra.mxu0 %vm424_vm1, %v4179_v49  ;;  %3356 = vmatmul.msk.bf16.vlgmr.msrb.gmra.mxu1 %vm424_vm1, %v4179_v49  ;;  %v1778_v48 = vmul.f32 0.75, %v1520_v39 }
 0x17a   : > { %3119 = vst [vmem:[%s4017_s3 + $0x30] sm:$0xff] %v1545_v43  ;;  %3357 = vmatmul.msk.bf16.vlgmr.msrb.gmra.mxu2 %vm424_vm1, %v4179_v49  ;;  %3358 = vmatmul.msk.bf16.vlgmr.msrb.gmra.mxu3 %vm424_vm1, %v4179_v49  ;;  %v1763_v5 = vmul.f32 0.7, %v4457_v29  ;;  %v1764_v11 = vmul.f32 0.7, %v4459_v31 }
 0x17b   : > { %vm1489_vm10 = vcmp.ge.f32.partialorder %v4465_v16, 1.0  ;;  %vm1490_vm11 = vcmp.ge.f32.partialorder %v4468_v9, 1.0 }
 0x17c   : > { %v4486_v51 = vsel %vm1489_vm10, 1.0, %v3492_v0  ;;  %v4489_v28 = vsel %vm1490_vm11, 1.0, %v3492_v0 }
 0x17d   : > { %v1436_v14 = vpop.f32.mrf.mxu2  ;;  %v1449_v20 = vpop.f32.mrf.mxu3  ;;  %v1527_v44 = vpack.c.bf16 %v4489_v28, %v4486_v51  ;;  %v1513_v25 = vsub.f32 1.0, %v4486_v51  ;;  %v1514_v55 = vsub.f32 1.0, %v4489_v28 }
 0x17e   : > { %v4491_v37 = vadd.f32 %v1459_v34, %v1436_v14  ;;  %v4493_v49 = vadd.f32 %v1460_v19, %v1449_v20  ;;  %v1412_v27 = vpop.f32.mrf.mxu0  ;;  %v1425_v17 = vpop.f32.mrf.mxu1 }
 0x17f   : > { %v1536_v46 = vrot.slane %v1527_v44, 2  ;;  %v1521_v14 = vmul.f32 %v1513_v25, %v4465_v16  ;;  %v1522_v20 = vmul.f32 %v1514_v55, %v4468_v9 }
 0x180   : > { %v4500_v6 = vadd.f32 %v1475_v38, %v4491_v37  ;;  %v4503_v7 = vadd.f32 %v1476_v10, %v4493_v49 }
 0x181   : > { %v1548_v13 = vsel %vm619_vm6, %v1527_v44, %v1536_v46 }
 0x182   : > { %vm1491_vm1 = vcmp.ge.f32.partialorder %v4500_v6, 1.0  ;;  %vm1492_vm12 = vcmp.ge.f32.partialorder %v4503_v7, 1.0 }
 0x183   : > { %v4510_v40 = vsel %vm1491_vm1, 1.0, %v3492_v0  ;;  %v4513_v53 = vsel %vm1492_vm12, 1.0, %v3492_v0 }
 0x184   : > { %v1528_v33 = vpack.c.bf16 %v4513_v53, %v4510_v40  ;;  %v1515_v16 = vsub.f32 1.0, %v4510_v40  ;;  %v1516_v9 = vsub.f32 1.0, %v4513_v53 }
 0x185   : > { %v1438_v36 = vpop.f32.mrf.mxu2  ;;  %v1451_v56 = vpop.f32.mrf.mxu3 }
 0x186   : > { %v1537_v57 = vrot.slane %v1528_v33, 4  ;;  %v1538_v15 = vrot.slane %v1528_v33, 6  ;;  %v1664_v8 = vpop.f32.mrf.mxu0  ;;  %v1677_v59 = vpop.f32.mrf.mxu1  ;;  %v1779_v36 = vmul.f32 0.75, %v1521_v14  ;;  %v1523_v2 = vmul.f32 %v1515_v16, %v4500_v6 }
 0x187   : > { %v4521_v45 = vadd.f32 %v1759_v52, %v1664_v8  ;;  %v4523_v1 = vadd.f32 %v1760_v3, %v1677_v59  ;;  %v1780_v52 = vmul.f32 0.75, %v1522_v20  ;;  %v1524_v4 = vmul.f32 %v1516_v9, %v4503_v7 }
 0x188   : > { %v1551_v18 = vsel %vm623_vm7, %v1537_v57, %v1538_v15  ;;  %v1765_v57 = vmul.f32 0.7, %v4491_v37  ;;  %v1766_v15 = vmul.f32 0.7, %v4493_v49  ;;  %v1781_v7 = vmul.f32 0.75, %v1523_v2 }
 0x189   : > { %v1552_v24 = vsel %vm627_vm8, %v1548_v13, %v1551_v18  ;;  %v4529_v58 = vadd.f32 %v1775_v60, %v4521_v45  ;;  %v4532_v61 = vadd.f32 %v1776_v12, %v4523_v1  ;;  %v1782_v18 = vmul.f32 0.75, %v1524_v4 }
 0x18a   : > { %3120 = vst [vmem:[%s4017_s3 + $0x38] sm:$0xff] %v1552_v24  ;;  %v2065_v25 = vmul.f32 0.7, %v4521_v45  ;;  %v2066_v55 = vmul.f32 0.7, %v4523_v1 }
 0x18b   : > { %vm1791_vm13 = vcmp.ge.f32.partialorder %v4529_v58, 1.0  ;;  %vm1792_vm14 = vcmp.ge.f32.partialorder %v4532_v61, 1.0 }
 0x18c   : > { %v4542_v21 = vsel %vm1791_vm13, 1.0, %v3492_v0  ;;  %v4545_v26 = vsel %vm1792_vm14, 1.0, %v3492_v0 }
 0x18d   : > { %v1690_v30 = vpop.f32.mrf.mxu2  ;;  %v1703_v32 = vpop.f32.mrf.mxu3  ;;  %v1831_v50 = vpack.c.bf16 %v4545_v26, %v4542_v21  ;;  %v1815_v37 = vsub.f32 1.0, %v4542_v21  ;;  %v1816_v49 = vsub.f32 1.0, %v4545_v26 }
 0x18e   : > { %v4547_v62 = vadd.f32 %v1761_v35, %v1690_v30  ;;  %v4549_v22 = vadd.f32 %v1762_v42, %v1703_v32  ;;  %v1666_v43 = vpop.f32.mrf.mxu0  ;;  %v1679_v23 = vpop.f32.mrf.mxu1 }
 0x18f   : > { %v1839_v38 = vrot.slane %v1831_v50, 2  ;;  %v1823_v30 = vmul.f32 %v1815_v37, %v4529_v58  ;;  %v1824_v32 = vmul.f32 %v1816_v49, %v4532_v61 }
 0x190   : > { %v4556_v34 = vadd.f32 %v1777_v63, %v4547_v62  ;;  %v4559_v19 = vadd.f32 %v1778_v48, %v4549_v22 }
 0x191   : > { %v1847_v3 = vsel %vm619_vm6, %v1831_v50, %v1839_v38 }
 0x192   : > { %vm1793_vm15 = vcmp.ge.f32.partialorder %v4556_v34, 1.0  ;;  %vm1794_vm0 = vcmp.ge.f32.partialorder %v4559_v19, 1.0 }
 0x193   : > { %v4566_v51 = vsel %vm1793_vm15, 1.0, %v3492_v0  ;;  %v4569_v28 = vsel %vm1794_vm0, 1.0, %v3492_v0 }
 0x194   : > { %v1832_v10 = vpack.c.bf16 %v4569_v28, %v4566_v51  ;;  %v1817_v58 = vsub.f32 1.0, %v4566_v51  ;;  %v1818_v61 = vsub.f32 1.0, %v4569_v28 }
 0x195   : > { %v1692_v27 = vpop.f32.mrf.mxu2  ;;  %v1705_v17 = vpop.f32.mrf.mxu3 }
 0x196   : > { %v1840_v44 = vrot.slane %v1832_v10, 4  ;;  %v1841_v54 = vrot.slane %v1832_v10, 6  ;;  %v1716_v41 = vpop.f32.mrf.mxu0  ;;  %v1729_v46 = vpop.f32.mrf.mxu1  ;;  %v2081_v27 = vmul.f32 0.75, %v1823_v30  ;;  %v1825_v16 = vmul.f32 %v1817_v58, %v4556_v34 }
 0x197   : > { %v4577_v33 = vadd.f32 %v1763_v5, %v1716_v41  ;;  %v4579_v56 = vadd.f32 %v1764_v11, %v1729_v46  ;;  %v2082_v5 = vmul.f32 0.75, %v1824_v32  ;;  %v1826_v9 = vmul.f32 %v1818_v61, %v4559_v19 }
 0x198   : > { %v1850_v29 = vsel %vm623_vm7, %v1840_v44, %v1841_v54  ;;  %v2067_v44 = vmul.f32 0.7, %v4547_v62  ;;  %v2068_v54 = vmul.f32 0.7, %v4549_v22  ;;  %v2083_v19 = vmul.f32 0.75, %v1825_v16 }
 0x199   : > { %v1851_v31 = vsel %vm627_vm8, %v1847_v3, %v1850_v29  ;;  %v4585_v40 = vadd.f32 %v1779_v36, %v4577_v33  ;;  %v4588_v53 = vadd.f32 %v1780_v52, %v4579_v56  ;;  %v2084_v29 = vmul.f32 0.75, %v1826_v9 }
 0x19a   : > { %3181 = vst [vmem:[%s4017_s3 + $0x40] sm:$0xff] %v1851_v31  ;;  %v2069_v37 = vmul.f32 0.7, %v4577_v33  ;;  %v2070_v49 = vmul.f32 0.7, %v4579_v56 }
 0x19b   : > { %vm1795_vm2 = vcmp.ge.f32.partialorder %v4585_v40, 1.0  ;;  %vm1796_vm3 = vcmp.ge.f32.partialorder %v4588_v53, 1.0 }
 0x19c   : > { %v4598_v8 = vsel %vm1795_vm2, 1.0, %v3492_v0  ;;  %v4601_v59 = vsel %vm1796_vm3, 1.0, %v3492_v0 }
 0x19d   : > { %v1742_v60 = vpop.f32.mrf.mxu2  ;;  %v1755_v12 = vpop.f32.mrf.mxu3  ;;  %v1833_v39 = vpack.c.bf16 %v4601_v59, %v4598_v8  ;;  %v1819_v62 = vsub.f32 1.0, %v4598_v8  ;;  %v1820_v22 = vsub.f32 1.0, %v4601_v59 }
 0x19e   : > { %v4603_v6 = vadd.f32 %v1765_v57, %v1742_v60  ;;  %v4605_v13 = vadd.f32 %v1766_v15, %v1755_v12  ;;  %v1718_v24 = vpop.f32.mrf.mxu0  ;;  %v1731_v47 = vpop.f32.mrf.mxu1 }
 0x19f   : > { %v1842_v63 = vrot.slane %v1833_v39, 2  ;;  %v1827_v60 = vmul.f32 %v1819_v62, %v4585_v40  ;;  %v1828_v12 = vmul.f32 %v1820_v22, %v4588_v53 }
 0x1a0   : > { %v4612_v35 = vadd.f32 %v1781_v7, %v4603_v6  ;;  %v4615_v42 = vadd.f32 %v1782_v18, %v4605_v13 }
 0x1a1   : > { %v1854_v11 = vsel %vm619_vm6, %v1833_v39, %v1842_v63 }
 0x1a2   : > { %vm1797_vm4 = vcmp.ge.f32.partialorder %v4612_v35, 1.0  ;;  %vm1798_vm5 = vcmp.ge.f32.partialorder %v4615_v42, 1.0 }
 0x1a3   : > { %v4622_v21 = vsel %vm1797_vm4, 1.0, %v3492_v0  ;;  %v4625_v26 = vsel %vm1798_vm5, 1.0, %v3492_v0 }
 0x1a4   : > { %v1834_v48 = vpack.c.bf16 %v4625_v26, %v4622_v21  ;;  %v1821_v40 = vsub.f32 1.0, %v4622_v21  ;;  %v1822_v53 = vsub.f32 1.0, %v4625_v26 }
 0x1a5   : > { %v1744_v43 = vpop.f32.mrf.mxu2  ;;  %v1757_v23 = vpop.f32.mrf.mxu3 }
 0x1a6   : > { %v1843_v50 = vrot.slane %v1834_v48, 4  ;;  %v1844_v14 = vrot.slane %v1834_v48, 6  ;;  %v1970_v20 = vpop.f32.mrf.mxu0  ;;  %v1983_v38 = vpop.f32.mrf.mxu1  ;;  %v2085_v43 = vmul.f32 0.75, %v1827_v60  ;;  %v1829_v58 = vmul.f32 %v1821_v40, %v4612_v35 }
 0x1a7   : > { %v4633_v10 = vadd.f32 %v2065_v25, %v1970_v20  ;;  %v4635_v17 = vadd.f32 %v2066_v55, %v1983_v38  ;;  %v2086_v25 = vmul.f32 0.75, %v1828_v12  ;;  %v1830_v61 = vmul.f32 %v1822_v53, %v4615_v42 }
 0x1a8   : > { %v1857_v45 = vsel %vm623_vm7, %v1843_v50, %v1844_v14  ;;  %v2071_v50 = vmul.f32 0.7, %v4603_v6  ;;  %v2072_v14 = vmul.f32 0.7, %v4605_v13  ;;  %v2087_v42 = vmul.f32 0.75, %v1829_v58 }
 0x1a9   : > { %v1858_v1 = vsel %vm627_vm8, %v1854_v11, %v1857_v45  ;;  %v4641_v51 = vadd.f32 %v2081_v27, %v4633_v10  ;;  %v4644_v28 = vadd.f32 %v2082_v5, %v4635_v17  ;;  %v2088_v45 = vmul.f32 0.75, %v1830_v61 }
 0x1aa   : > { %3182 = vst [vmem:[%s4017_s3 + $0x48] sm:$0xff] %v1858_v1  ;;  %v2371_v62 = vmul.f32 0.7, %v4633_v10  ;;  %v2372_v22 = vmul.f32 0.7, %v4635_v17 }
 0x1ab   : > { %vm2097_vm9 = vcmp.ge.f32.partialorder %v4641_v51, 1.0  ;;  %vm2098_vm10 = vcmp.ge.f32.partialorder %v4644_v28, 1.0 }
 0x1ac   : > { %v4654_v41 = vsel %vm2097_vm9, 1.0, %v3492_v0  ;;  %v4657_v46 = vsel %vm2098_vm10, 1.0, %v3492_v0 }
 0x1ad   : > { %v1996_v36 = vpop.f32.mrf.mxu2  ;;  %v2009_v52 = vpop.f32.mrf.mxu3  ;;  %v2137_v4 = vpack.c.bf16 %v4657_v46, %v4654_v41  ;;  %v2121_v6 = vsub.f32 1.0, %v4654_v41  ;;  %v2122_v13 = vsub.f32 1.0, %v4657_v46 }
 0x1ae   : > { %v4659_v34 = vadd.f32 %v2067_v44, %v1996_v36  ;;  %v4661_v3 = vadd.f32 %v2068_v54, %v2009_v52  ;;  %v1972_v31 = vpop.f32.mrf.mxu0  ;;  %v1985_v2 = vpop.f32.mrf.mxu1 }
 0x1af   : > { %v2145_v7 = vrot.slane %v2137_v4, 2  ;;  %v2129_v36 = vmul.f32 %v2121_v6, %v4641_v51  ;;  %v2130_v52 = vmul.f32 %v2122_v13, %v4644_v28 }
 0x1b0   : > { %v4668_v57 = vadd.f32 %v2083_v19, %v4659_v34  ;;  %v4671_v15 = vadd.f32 %v2084_v29, %v4661_v3 }
 0x1b1   : > { %v2153_v55 = vsel %vm619_vm6, %v2137_v4, %v2145_v7 }
 0x1b2   : > { %vm2099_vm11 = vcmp.ge.f32.partialorder %v4668_v57, 1.0  ;;  %vm2100_vm1 = vcmp.ge.f32.partialorder %v4671_v15, 1.0 }
 0x1b3   : > { %v4678_v8 = vsel %vm2099_vm11, 1.0, %v3492_v0  ;;  %v4681_v59 = vsel %vm2100_vm1, 1.0, %v3492_v0 }
 0x1b4   : > { %v2138_v18 = vpack.c.bf16 %v4681_v59, %v4678_v8  ;;  %v2123_v51 = vsub.f32 1.0, %v4678_v8  ;;  %v2124_v28 = vsub.f32 1.0, %v4681_v59 }
 0x1b5   : > { %v1998_v24 = vpop.f32.mrf.mxu2  ;;  %v2011_v47 = vpop.f32.mrf.mxu3 }
 0x1b6   : > { %v2146_v39 = vrot.slane %v2138_v18, 4  ;;  %v2147_v30 = vrot.slane %v2138_v18, 6  ;;  %v2022_v32 = vpop.f32.mrf.mxu0  ;;  %v2035_v63 = vpop.f32.mrf.mxu1  ;;  %v2387_v24 = vmul.f32 0.75, %v2129_v36  ;;  %v2131_v40 = vmul.f32 %v2123_v51, %v4668_v57 }
 0x1b7   : > { %v4689_v48 = vadd.f32 %v2069_v37, %v2022_v32  ;;  %v4691_v23 = vadd.f32 %v2070_v49, %v2035_v63  ;;  %v2388_v37 = vmul.f32 0.75, %v2130_v52  ;;  %v2132_v53 = vmul.f32 %v2124_v28, %v4671_v15 }
 0x1b8   : > { %v2156_v33 = vsel %vm623_vm7, %v2146_v39, %v2147_v30  ;;  %v2373_v39 = vmul.f32 0.7, %v4659_v34  ;;  %v2374_v30 = vmul.f32 0.7, %v4661_v3  ;;  %v2389_v15 = vmul.f32 0.75, %v2131_v40 }
 0x1b9   : > { %v2157_v56 = vsel %vm627_vm8, %v2153_v55, %v2156_v33  ;;  %v4697_v21 = vadd.f32 %v2085_v43, %v4689_v48  ;;  %v4700_v26 = vadd.f32 %v2086_v25, %v4691_v23  ;;  %v2390_v33 = vmul.f32 0.75, %v2132_v53 }
 0x1ba   : > { %3243 = vst [vmem:[%s4017_s3 + $0x50] sm:$0xff] %v2157_v56  ;;  %v2375_v6 = vmul.f32 0.7, %v4689_v48  ;;  %v2376_v13 = vmul.f32 0.7, %v4691_v23 }
 0x1bb   : > { %vm2101_vm12 = vcmp.ge.f32.partialorder %v4697_v21, 1.0  ;;  %vm2102_vm13 = vcmp.ge.f32.partialorder %v4700_v26, 1.0 }
 0x1bc   : > { %v4710_v20 = vsel %vm2101_vm12, 1.0, %v3492_v0  ;;  %v4713_v38 = vsel %vm2102_vm13, 1.0, %v3492_v0 }
 0x1bd   : > { %v2048_v27 = vpop.f32.mrf.mxu2  ;;  %v2061_v5 = vpop.f32.mrf.mxu3  ;;  %v2139_v9 = vpack.c.bf16 %v4713_v38, %v4710_v20  ;;  %v2125_v34 = vsub.f32 1.0, %v4710_v20  ;;  %v2126_v3 = vsub.f32 1.0, %v4713_v38 }
 0x1be   : > { %v4715_v35 = vadd.f32 %v2071_v50, %v2048_v27  ;;  %v4717_v11 = vadd.f32 %v2072_v14, %v2061_v5  ;;  %v2024_v1 = vpop.f32.mrf.mxu0  ;;  %v2037_v16 = vpop.f32.mrf.mxu1 }
 0x1bf   : > { %v2148_v19 = vrot.slane %v2139_v9, 2  ;;  %v2133_v27 = vmul.f32 %v2125_v34, %v4697_v21  ;;  %v2134_v5 = vmul.f32 %v2126_v3, %v4700_v26 }
 0x1c0   : > { %v4724_v44 = vadd.f32 %v2087_v42, %v4715_v35  ;;  %v4727_v54 = vadd.f32 %v2088_v45, %v4717_v11 }
 0x1c1   : > { %v2160_v49 = vsel %vm619_vm6, %v2139_v9, %v2148_v19 }
 0x1c2   : > { %vm2103_vm14 = vcmp.ge.f32.partialorder %v4724_v44, 1.0  ;;  %vm2104_vm15 = vcmp.ge.f32.partialorder %v4727_v54, 1.0 }
 0x1c3   : > { %v4734_v41 = vsel %vm2103_vm14, 1.0, %v3492_v0  ;;  %v4737_v46 = vsel %vm2104_vm15, 1.0, %v3492_v0 }
 0x1c4   : > { %v2140_v29 = vpack.c.bf16 %v4737_v46, %v4734_v41  ;;  %v2127_v21 = vsub.f32 1.0, %v4734_v41  ;;  %v2128_v26 = vsub.f32 1.0, %v4737_v46 }
 0x1c5   : > { %v2050_v31 = vpop.f32.mrf.mxu2  ;;  %v2063_v2 = vpop.f32.mrf.mxu3 }
 0x1c6   : > { %v2149_v4 = vrot.slane %v2140_v29, 4  ;;  %v2150_v60 = vrot.slane %v2140_v29, 6  ;;  %v2276_v12 = vpop.f32.mrf.mxu0  ;;  %v2289_v7 = vpop.f32.mrf.mxu1  ;;  %v2391_v31 = vmul.f32 0.75, %v2133_v27  ;;  %v2135_v51 = vmul.f32 %v2127_v21, %v4724_v44 }
 0x1c7   : > { %v4745_v18 = vadd.f32 %v2371_v62, %v2276_v12  ;;  %v4747_v47 = vadd.f32 %v2372_v22, %v2289_v7  ;;  %v2392_v62 = vmul.f32 0.75, %v2134_v5  ;;  %v2136_v28 = vmul.f32 %v2128_v26, %v4727_v54 }
 0x1c8   : > { %v2163_v10 = vsel %vm623_vm7, %v2149_v4, %v2150_v60  ;;  %v2377_v4 = vmul.f32 0.7, %v4715_v35  ;;  %v2378_v60 = vmul.f32 0.7, %v4717_v11  ;;  %v2393_v54 = vmul.f32 0.75, %v2135_v51 }
 0x1c9   : > { %v2164_v17 = vsel %vm627_vm8, %v2160_v49, %v2163_v10  ;;  %v4753_v8 = vadd.f32 %v2387_v24, %v4745_v18  ;;  %v4756_v59 = vadd.f32 %v2388_v37, %v4747_v47  ;;  %v2394_v10 = vmul.f32 0.75, %v2136_v28 }
 0x1ca   : > { %3244 = vst [vmem:[%s4017_s3 + $0x58] sm:$0xff] %v2164_v17  ;;  %v2677_v34 = vmul.f32 0.7, %v4745_v18  ;;  %v2678_v3 = vmul.f32 0.7, %v4747_v47 }
 0x1cb   : > { %vm2403_vm0 = vcmp.ge.f32.partialorder %v4753_v8, 1.0  ;;  %vm2404_vm2 = vcmp.ge.f32.partialorder %v4756_v59, 1.0 }
 0x1cc   : > { %v4766_v32 = vsel %vm2403_vm0, 1.0, %v3492_v0  ;;  %v4769_v63 = vsel %vm2404_vm2, 1.0, %v3492_v0 }
 0x1cd   : > { %v2302_v43 = vpop.f32.mrf.mxu2  ;;  %v2315_v25 = vpop.f32.mrf.mxu3  ;;  %v2443_v61 = vpack.c.bf16 %v4769_v63, %v4766_v32  ;;  %v2427_v35 = vsub.f32 1.0, %v4766_v32  ;;  %v2428_v11 = vsub.f32 1.0, %v4769_v63 }
 0x1ce   : > { %v4771_v57 = vadd.f32 %v2373_v39, %v2302_v43  ;;  %v4773_v55 = vadd.f32 %v2374_v30, %v2315_v25  ;;  %v2278_v56 = vpop.f32.mrf.mxu0  ;;  %v2291_v58 = vpop.f32.mrf.mxu1 }
 0x1cf   : > { %v2451_v42 = vrot.slane %v2443_v61, 2  ;;  %v2435_v43 = vmul.f32 %v2427_v35, %v4753_v8  ;;  %v2436_v25 = vmul.f32 %v2428_v11, %v4756_v59 }
 0x1d0   : > { %v4780_v50 = vadd.f32 %v2389_v15, %v4771_v57  ;;  %v4783_v14 = vadd.f32 %v2390_v33, %v4773_v55 }
 0x1d1   : > { %v2459_v22 = vsel %vm619_vm6, %v2443_v61, %v2451_v42 }
 0x1d2   : > { %vm2405_vm3 = vcmp.ge.f32.partialorder %v4780_v50, 1.0  ;;  %vm2406_vm4 = vcmp.ge.f32.partialorder %v4783_v14, 1.0 }
 0x1d3   : > { %v4790_v20 = vsel %vm2405_vm3, 1.0, %v3492_v0  ;;  %v4793_v38 = vsel %vm2406_vm4, 1.0, %v3492_v0 }
 0x1d4   : > { %v2444_v45 = vpack.c.bf16 %v4793_v38, %v4790_v20  ;;  %v2429_v8 = vsub.f32 1.0, %v4790_v20  ;;  %v2430_v59 = vsub.f32 1.0, %v4793_v38 }
 0x1d5   : > { %v2304_v1 = vpop.f32.mrf.mxu2  ;;  %v2317_v16 = vpop.f32.mrf.mxu3 }
 0x1d6   : > { %v2452_v9 = vrot.slane %v2444_v45, 4  ;;  %v2453_v36 = vrot.slane %v2444_v45, 6  ;;  %v2328_v52 = vpop.f32.mrf.mxu0  ;;  %v2341_v19 = vpop.f32.mrf.mxu1  ;;  %v2693_v1 = vmul.f32 0.75, %v2435_v43  ;;  %v2437_v20 = vmul.f32 %v2429_v8, %v4780_v50 }
 0x1d7   : > { %v4801_v29 = vadd.f32 %v2375_v6, %v2328_v52  ;;  %v4803_v2 = vadd.f32 %v2376_v13, %v2341_v19  ;;  %v2694_v6 = vmul.f32 0.75, %v2436_v25  ;;  %v2438_v38 = vmul.f32 %v2430_v59, %v4783_v14 }
 0x1d8   : > { %v2462_v48 = vsel %vm623_vm7, %v2452_v9, %v2453_v36  ;;  %v2679_v9 = vmul.f32 0.7, %v4771_v57  ;;  %v2680_v36 = vmul.f32 0.7, %v4773_v55 }
 0x1d9   : > { %v2463_v23 = vsel %vm627_vm8, %v2459_v22, %v2462_v48  ;;  %v4809_v41 = vadd.f32 %v2391_v31, %v4801_v29  ;;  %v4812_v46 = vadd.f32 %v2392_v62, %v4803_v2  ;;  %v2695_v48 = vmul.f32 0.75, %v2437_v20 }
 0x1da   : > { %3305 = vst [vmem:[%s4017_s3 + $0x60] sm:$0xff] %v2463_v23  ;;  %v2696_v51 = vmul.f32 0.75, %v2438_v38 }
 0x1db   : > { %vm2407_vm5 = vcmp.ge.f32.partialorder %v4809_v41, 1.0  ;;  %vm2408_vm9 = vcmp.ge.f32.partialorder %v4812_v46, 1.0 }
 0x1dc   : > { %v4822_v12 = vsel %vm2407_vm5, 1.0, %v3492_v0  ;;  %v4825_v7 = vsel %vm2408_vm9, 1.0, %v3492_v0 }
 0x1dd   : > { %v2354_v24 = vpop.f32.mrf.mxu2  ;;  %v2367_v37 = vpop.f32.mrf.mxu3  ;;  %v2445_v53 = vpack.c.bf16 %v4825_v7, %v4822_v12  ;;  %v2431_v14 = vsub.f32 1.0, %v4822_v12  ;;  %v2681_v12 = vmul.f32 0.7, %v4801_v29 }
 0x1de   : > { %v4827_v44 = vadd.f32 %v2377_v4, %v2354_v24  ;;  %v4829_v49 = vadd.f32 %v2378_v60, %v2367_v37  ;;  %v2330_v17 = vpop.f32.mrf.mxu0  ;;  %v2343_v40 = vpop.f32.mrf.mxu1  ;;  %v2432_v4 = vsub.f32 1.0, %v4825_v7  ;;  %v2682_v7 = vmul.f32 0.7, %v4803_v2 }
 0x1df   : > { %v2454_v15 = vrot.slane %v2445_v53, 2  ;;  %v2439_v55 = vmul.f32 %v2431_v14, %v4809_v41  ;;  %v2800_v14 = vld [vmem:[%s4017_s3 + $0x30] sm:$0xff] (%p3538_p5) }
 0x1e0   : > { %v4836_v39 = vadd.f32 %v2393_v54, %v4827_v44  ;;  %v4839_v30 = vadd.f32 %v2394_v10, %v4829_v49  ;;  %v2440_v37 = vmul.f32 %v2432_v4, %v4812_v46  ;;  %v2802_v4 = vld [vmem:[%s4017_s3 + $0x38] sm:$0xff] (%p3538_p5)  ;;  %2801 = vst [vmem:[%s2775_s9 + $0x180] sm:$0xff] (%p3538_p5), %v2800_v14 }
 0x1e1   : > { %v2466_v13 = vsel %vm619_vm6, %v2445_v53, %v2454_v15  ;;  %2803 = vst [vmem:[%s2775_s9 + $0x188] sm:$0xff] (%p3538_p5), %v2802_v4 }
 0x1e2   : > { %vm2409_vm10 = vcmp.ge.f32.partialorder %v4836_v39, 1.0  ;;  %vm2410_vm11 = vcmp.ge.f32.partialorder %v4839_v30, 1.0 }
 0x1e3   : > { %v4846_v32 = vsel %vm2409_vm10, 1.0, %v3492_v0  ;;  %v4849_v63 = vsel %vm2410_vm11, 1.0, %v3492_v0 }
 0x1e4   : > { %v2446_v33 = vpack.c.bf16 %v4849_v63, %v4846_v32  ;;  %v2433_v53 = vsub.f32 1.0, %v4846_v32  ;;  %v2434_v43 = vsub.f32 1.0, %v4849_v63 }
 0x1e5   : > { %v2356_v56 = vpop.f32.mrf.mxu2  ;;  %v2369_v58 = vpop.f32.mrf.mxu3 }
 0x1e6   : > { %v2455_v61 = vrot.slane %v2446_v33, 4  ;;  %v2456_v27 = vrot.slane %v2446_v33, 6  ;;  %v2582_v5 = vpop.f32.mrf.mxu0  ;;  %v2595_v42 = vpop.f32.mrf.mxu1  ;;  %v2697_v56 = vmul.f32 0.75, %v2439_v55  ;;  %v2441_v32 = vmul.f32 %v2433_v53, %v4836_v39  ;;  %v2810_v55 = vld [vmem:[%s4017_s3 + $0x58] sm:$0xff] (%p3538_p5) }
 0x1e7   : > { %v2685_v45 = vadd.f32 %v2677_v34, %v2582_v5  ;;  %v2686_v16 = vadd.f32 %v2678_v3, %v2595_v42  ;;  %v2698_v34 = vmul.f32 0.75, %v2440_v37  ;;  %v2442_v63 = vmul.f32 %v2434_v43, %v4839_v30  ;;  %v2812_v37 = vld [vmem:[%s4017_s3 + $0x60] sm:$0xff] (%p3538_p5)  ;;  %2811 = vst [vmem:[%s2775_s9 + $0x288] sm:$0xff] (%p3538_p5), %v2810_v55 }
 0x1e8   : > { %v2469_v21 = vsel %vm623_vm7, %v2455_v61, %v2456_v27  ;;  %v2683_v61 = vmul.f32 0.7, %v4827_v44  ;;  %v2684_v27 = vmul.f32 0.7, %v4829_v49  ;;  %2813 = vst [vmem:[%s2775_s9 + $0x300] sm:$0xff] (%p3538_p5), %v2812_v37 }
 0x1e9   : > { %v2470_v18 = vsel %vm627_vm8, %v2466_v13, %v2469_v21  ;;  %v2701_v47 = vadd.f32 %v2693_v1, %v2685_v45  ;;  %v2702_v26 = vadd.f32 %v2694_v6, %v2686_v16  ;;  %v2699_v6 = vmul.f32 0.75, %v2441_v32 }
 0x1ea   : > { %3306 = vst [vmem:[%s4017_s3 + $0x68] sm:$0xff] %v2470_v18  ;;  %v2700_v21 = vmul.f32 0.75, %v2442_v63 }
 0x1eb   : > { %vm2709_vm1 = vcmp.ge.f32.partialorder %v2701_v47, 1.0  ;;  %vm2710_vm12 = vcmp.ge.f32.partialorder %v2702_v26, 1.0 }
 0x1ec   : > { %v3359_v52 = vsel %vm2709_vm1, 1.0, %v3492_v0  ;;  %v3360_v19 = vsel %vm2710_vm12, 1.0, %v3492_v0 }
 0x1ed   : > { %v2608_v31 = vpop.f32.mrf.mxu2  ;;  %v2621_v62 = vpop.f32.mrf.mxu3  ;;  %v2733_v60 = vpack.c.bf16 %v3360_v19, %v3359_v52 }
 0x1ee   : > { %v2687_v22 = vadd.f32 %v2679_v9, %v2608_v31  ;;  %v2688_v23 = vadd.f32 %v2680_v36, %v2621_v62  ;;  %v2584_v50 = vpop.f32.mrf.mxu0  ;;  %v2597_v28 = vpop.f32.mrf.mxu1 }
 0x1ef   : > { %v2741_v17 = vrot.slane %v2733_v60, 2  ;;  %v2796_v50 = vld [vmem:[%s4017_s3 + $0x20] sm:$0xff] (%p3538_p5)  ;;  %v2798_v28 = vld [vmem:[%s4017_s3 + $0x28] sm:$0xff] (%p3538_p5) }
 0x1f0   : > { %v2703_v57 = vadd.f32 %v2695_v48, %v2687_v22  ;;  %v2704_v24 = vadd.f32 %v2696_v51, %v2688_v23  ;;  %v2790_v48 = vld [vmem:[%s4017_s3 + $0x8] sm:$0xff] (%p3538_p5)  ;;  %v2792_v23 = vld [vmem:[%s4017_s3 + $0x10] sm:$0xff] (%p3538_p5)  ;;  %v2794_v51 = vld [vmem:[%s4017_s3 + $0x18] sm:$0xff] (%p3538_p5)  ;;  %2797 = vst [vmem:[%s2775_s9 + $0x100] sm:$0xff] (%p3538_p5), %v2796_v50 }
 0x1f1   : > { %v2749_v3 = vsel %vm619_vm6, %v2733_v60, %v2741_v17  ;;  %2791 = vst [vmem:[%s2775_s9 + $0x8] sm:$0xff] (%p3538_p5), %v2790_v48  ;;  %v2804_v60 = vld [vmem:[%s4017_s3 + $0x40] sm:$0xff] (%p3538_p5) }
 0x1f2   : > { %vm2711_vm13 = vcmp.ge.f32.partialorder %v2703_v57, 1.0  ;;  %vm2712_vm14 = vcmp.ge.f32.partialorder %v2704_v24, 1.0  ;;  %2793 = vst [vmem:[%s2775_s9 + $0x80] sm:$0xff] (%p3538_p5), %v2792_v23  ;;  %v2806_v57 = vld [vmem:[%s4017_s3 + $0x48] sm:$0xff] (%p3538_p5)  ;;  %v2808_v24 = vld [vmem:[%s4017_s3 + $0x50] sm:$0xff] (%p3538_p5) }
 0x1f3   : > { %v3361_v54 = vsel %vm2711_vm13, 1.0, %v3492_v0  ;;  %v3362_v10 = vsel %vm2712_vm14, 1.0, %v3492_v0  ;;  %2795 = vst [vmem:[%s2775_s9 + $0x88] sm:$0xff] (%p3538_p5), %v2794_v51 }
 0x1f4   : > { %v2734_v40 = vpack.c.bf16 %v3362_v10, %v3361_v54  ;;  %2799 = vst [vmem:[%s2775_s9 + $0x108] sm:$0xff] (%p3538_p5), %v2798_v28  ;;  %v2814_v54 = vld [vmem:[%s4017_s3 + $0x68] sm:$0xff] (%p3538_p5) }
 0x1f5   : > { %v2610_v35 = vpop.f32.mrf.mxu2  ;;  %v2623_v11 = vpop.f32.mrf.mxu3  ;;  %2805 = vst [vmem:[%s2775_s9 + $0x200] sm:$0xff] (%p3538_p5), %v2804_v60 }
 0x1f6   : > { %v2742_v41 = vrot.slane %v2734_v40, 4  ;;  %v2743_v25 = vrot.slane %v2734_v40, 6  ;;  %v2634_v46 = vpop.f32.mrf.mxu0  ;;  %v2647_v15 = vpop.f32.mrf.mxu1  ;;  %2807 = vst [vmem:[%s2775_s9 + $0x208] sm:$0xff] (%p3538_p5), %v2806_v57 }
 0x1f7   : > { %v2689_v33 = vadd.f32 %v2681_v12, %v2634_v46  ;;  %v2690_v58 = vadd.f32 %v2682_v7, %v2647_v15  ;;  %2809 = vst [vmem:[%s2775_s9 + $0x280] sm:$0xff] (%p3538_p5), %v2808_v24 }
 0x1f8   : > { %v2752_v8 = vsel %vm623_vm7, %v2742_v41, %v2743_v25  ;;  %2815 = vst [vmem:[%s2775_s9 + $0x308] sm:$0xff] (%p3538_p5), %v2814_v54 }
 0x1f9   : > { %v2753_v29 = vsel %vm627_vm8, %v2749_v3, %v2752_v8  ;;  %v2705_v2 = vadd.f32 %v2697_v56, %v2689_v33  ;;  %v2706_v59 = vadd.f32 %v2698_v34, %v2690_v58 }
 0x1fa   : > { %3367 = vst [vmem:[%s4017_s3 + $0x70] sm:$0xff] %v2753_v29 }
 0x1fb   : > { %vm2713_vm15 = vcmp.ge.f32.partialorder %v2705_v2, 1.0  ;;  %vm2714_vm0 = vcmp.ge.f32.partialorder %v2706_v59, 1.0 }
 0x1fc   : > { %v3363_v5 = vsel %vm2713_vm15, 1.0, %v3492_v0  ;;  %v3364_v42 = vsel %vm2714_vm0, 1.0, %v3492_v0 }
 0x1fd   : > { %v2660_v45 = vpop.f32.mrf.mxu2  ;;  %v2673_v1 = vpop.f32.mrf.mxu3  ;;  %v2735_v30 = vpack.c.bf16 %v3364_v42, %v3363_v5 }
 0x1fe   : > { %v2691_v16 = vadd.f32 %v2683_v61, %v2660_v45  ;;  %v2692_v13 = vadd.f32 %v2684_v27, %v2673_v1  ;;  %v2636_v39 = vpop.f32.mrf.mxu0  ;;  %v2649_v18 = vpop.f32.mrf.mxu1 }
 0x1ff   : > { %v2744_v20 = vrot.slane %v2735_v30, 2 }
 0x200   : > { %v2707_v47 = vadd.f32 %v2699_v6, %v2691_v16  ;;  %v2708_v26 = vadd.f32 %v2700_v21, %v2692_v13 }
 0x201   : > { %v2756_v31 = vsel %vm619_vm6, %v2735_v30, %v2744_v20  ;;  %v2816_v10 = vld [vmem:[%s4017_s3 + $0x70] sm:$0xff] (%p3538_p5) }
 0x202   : > { %vm2715_vm2 = vcmp.ge.f32.partialorder %v2707_v47, 1.0  ;;  %vm2716_vm3 = vcmp.ge.f32.partialorder %v2708_v26, 1.0  ;;  %2817 = vst [vmem:[%s2775_s9 + $0x380] sm:$0xff] (%p3538_p5), %v2816_v10 }
 0x203   : > { %v3365_v44 = vsel %vm2715_vm2, 1.0, %v3492_v0  ;;  %v3366_v49 = vsel %vm2716_vm3, 1.0, %v3492_v0  ;;  %v2788_v0 = vld [vmem:[%s4017_s3] sm:$0xff] (%p3538_p5) }
 0x204   : > { %v2736_v38 = vpack.c.bf16 %v3366_v49, %v3365_v44  ;;  %2789 = vst [vmem:[%s2775_s9] sm:$0xff] (%p3538_p5), %v2788_v0 }
 0x205   : > { %v2662_v9 = vpop.f32.mrf.mxu2  ;;  %v2675_v36 = vpop.f32.mrf.mxu3 }
 0x206   : > { %v2745_v52 = vrot.slane %v2736_v38, 4  ;;  %v2746_v19 = vrot.slane %v2736_v38, 6  ;;  %2772 = sbr.rel (!%p3538_p5) target bundleno = 531 (0x213), region = 55 }
 0x208   : > { %v2759_v62 = vsel %vm623_vm7, %v2745_v52, %v2746_v19 }
 0x209   : > { %v2760_v22 = vsel %vm627_vm8, %v2756_v31, %v2759_v62 }
 0x20a   : > { %3368 = vst [vmem:[%s4017_s3 + $0x78] sm:$0xff] %v2760_v22 }
 0x211   : > { %v2818_v17 = vld [vmem:[%s4017_s3 + $0x78] sm:$0xff] }
 0x212   : > { %2819 = vst [vmem:[%s2775_s9 + $0x388] sm:$0xff] %v2818_v17 }
 0x213 PF: > { %p9_p10 = scmp.ge.s32.totalorder %s3525_s13, 10   ;;  %s4930_s9 = smov %s3486_s10 }
 0x214   : > { %s4931_s10 = smov %s3536_s16  ;;  %s4932_s11 = smov %s3525_s13 }
 0x215   :  { %11 = sbr.rel (!%p9_p10) target bundleno = 2 (0x2), region = 123 }

// kernel: hnn_forward.10
= control target key start
LH: loop header
LB: loop body
LE: loop exit
PB: predicated region body
PF: predicated region fallthrough
CT: control target
= control target key end

     0   :  { %s2612_s9 = smov 0   ;;  %s2614_s10 = smov 0   ;;  %s3575_s0 = inlined_call_operand.vmem [shape: bf16[8,36,2048], index: 0, kind: input, shape index: {}]   ;;  %s3576_s1 = inlined_call_operand.vmem [shape: bf16[8,36], index: 1, kind: input, shape index: {}]   ;;  %s3577_s2 = inlined_call_operand.vmem [shape: bf16[2,8,2048], index: 2, kind: output, shape index: {}]  }
   0x1   :  { %s2616_s11 = smov 0  }
   0x2 LB: > { %s1818_s12 = sadd.s32 4294967295, %s2594_s11   ;;  %s2629_s13 = sadd.s32 1, %s2594_s11   ;;  %s2594_s11 = sphi %s2616_s11, %s3625_s11   ;;  %s2590_s10 = sphi %s2614_s10, %s3624_s10   ;;  %s2586_s9 = sphi %s2612_s9, %s3623_s9  }
   0x3   : > { %s16_s14 = ssub.s32 %s2594_s11, %s2629_s13  ;;  %s19_s15 = sadd.s32 1, %s2590_s10 }
   0x4   : > { %p17_p0 = scmp.eq.s32.totalorder %s16_s14, 0  ;;  %p26_p1 = scmp.ne.s32.totalorder %s2590_s10, %s2586_s9 }
   0x5   : > { %p27_p2 = scmp.eq.s32.totalorder %s2594_s11, 0  ;;  %p77_p3 = scmp.eq.s32.totalorder %s1818_s12, 3 }
   0x6   : > { %s2640_s16 = scalar_select %p17_p0, %s2590_s10, %s19_s15  }
   0x7   : > { %p28_p4 = por %p27_p2, %p26_p1  ;;  %p2642_p5 = por %p77_p3, %p26_p1 }
   0x8   : > { %p1821_p6 = scmp.ge.s32.totalorder %s2594_s11, 4 }
   0xa   : > { %102 = sbr.rel (%p1821_p6) target bundleno = 99 (0x63), region = 20 }
   0xf   : > { %105 = sbr.rel (!%p28_p4) target bundleno = 99 (0x63), region = 24  ;;  %s107_s18 = sand.u32 (%p28_p4), 1, %s2590_s10  }
  0x10   : > { %s2223_s19 = sshll.u32 (%p28_p4), %s2594_s11, 4  ;;  %s2289_s20 = smul.u32 (%p28_p4), 640, %s107_s18 }
  0x11   : > { %s2652_s23 = scalar_lea.vmem (%p28_p4), %s3575_s0, %s2223_s19 }
  0x12   : > { %v125_v0 = vld [vmem:[%s2652_s23] sm:$0xff] (%p28_p4)  ;;  %v127_v1 = vld [vmem:[%s2652_s23 + $0x8] sm:$0xff] (%p28_p4)  ;;  %s2657_s24 = scalar_lea.vmem (%p28_p4), [#allocation2], %s2289_s20 }
  0x13   : > { %v129_v2 = vld [vmem:[%s2652_s23 + $0x40] sm:$0xff] (%p28_p4)  ;;  %126 = vst [vmem:[%s2657_s24] sm:$0xff] (%p28_p4), %v125_v0  ;;  %v131_v3 = vld [vmem:[%s2652_s23 + $0x48] sm:$0xff] (%p28_p4) }
  0x14   : > { %128 = vst [vmem:[%s2657_s24 + $0x8] sm:$0xff] %v127_v1  ;;  %v133_v4 = vld [vmem:[%s2652_s23 + $0x80] sm:$0xff]  ;;  %v135_v5 = vld [vmem:[%s2652_s23 + $0x88] sm:$0xff] }
  0x15   : > { %130 = vst [vmem:[%s2657_s24 + $0x10] sm:$0xff] %v129_v2  ;;  %v137_v6 = vld [vmem:[%s2652_s23 + $0xc0] sm:$0xff]  ;;  %v139_v7 = vld [vmem:[%s2652_s23 + $0xc8] sm:$0xff] }
  0x16   : > { %132 = vst [vmem:[%s2657_s24 + $0x18] sm:$0xff] %v131_v3  ;;  %v141_v8 = vld [vmem:[%s2652_s23 + $0x100] sm:$0xff]  ;;  %v143_v9 = vld [vmem:[%s2652_s23 + $0x108] sm:$0xff] }
  0x17   : > { %134 = vst [vmem:[%s2657_s24 + $0x20] sm:$0xff] %v133_v4  ;;  %v145_v10 = vld [vmem:[%s2652_s23 + $0x140] sm:$0xff]  ;;  %v147_v11 = vld [vmem:[%s2652_s23 + $0x148] sm:$0xff] }
  0x18   : > { %136 = vst [vmem:[%s2657_s24 + $0x28] sm:$0xff] %v135_v5  ;;  %v149_v12 = vld [vmem:[%s2652_s23 + $0x180] sm:$0xff]  ;;  %v151_v13 = vld [vmem:[%s2652_s23 + $0x188] sm:$0xff] }
  0x19   : > { %138 = vst [vmem:[%s2657_s24 + $0x30] sm:$0xff] %v137_v6  ;;  %v153_v14 = vld [vmem:[%s2652_s23 + $0x1c0] sm:$0xff]  ;;  %v155_v15 = vld [vmem:[%s2652_s23 + $0x1c8] sm:$0xff] }
  0x1a   : > { %140 = vst [vmem:[%s2657_s24 + $0x38] sm:$0xff] %v139_v7  ;;  %v157_v16 = vld [vmem:[%s2652_s23 + $0x200] sm:$0xff]  ;;  %v159_v17 = vld [vmem:[%s2652_s23 + $0x208] sm:$0xff] }
  0x1b   : > { %142 = vst [vmem:[%s2657_s24 + $0x40] sm:$0xff] %v141_v8  ;;  %v161_v18 = vld [vmem:[%s2652_s23 + $0x240] sm:$0xff]  ;;  %v163_v19 = vld [vmem:[%s2652_s23 + $0x248] sm:$0xff] }
  0x1c   : > { %144 = vst [vmem:[%s2657_s24 + $0x48] sm:$0xff] %v143_v9  ;;  %v165_v20 = vld [vmem:[%s2652_s23 + $0x280] sm:$0xff]  ;;  %v167_v21 = vld [vmem:[%s2652_s23 + $0x288] sm:$0xff] }
  0x1d   : > { %146 = vst [vmem:[%s2657_s24 + $0x50] sm:$0xff] %v145_v10  ;;  %v169_v22 = vld [vmem:[%s2652_s23 + $0x2c0] sm:$0xff]  ;;  %v171_v23 = vld [vmem:[%s2652_s23 + $0x2c8] sm:$0xff] }
  0x1e   : > { %148 = vst [vmem:[%s2657_s24 + $0x58] sm:$0xff] %v147_v11  ;;  %v173_v24 = vld [vmem:[%s2652_s23 + $0x300] sm:$0xff]  ;;  %v175_v25 = vld [vmem:[%s2652_s23 + $0x308] sm:$0xff] }
  0x1f   : > { %150 = vst [vmem:[%s2657_s24 + $0x60] sm:$0xff] %v149_v12  ;;  %v177_v26 = vld [vmem:[%s2652_s23 + $0x340] sm:$0xff]  ;;  %v179_v27 = vld [vmem:[%s2652_s23 + $0x348] sm:$0xff] }
  0x20   : > { %152 = vst [vmem:[%s2657_s24 + $0x68] sm:$0xff] %v151_v13  ;;  %v181_v28 = vld [vmem:[%s2652_s23 + $0x380] sm:$0xff]  ;;  %v183_v29 = vld [vmem:[%s2652_s23 + $0x388] sm:$0xff] }
  0x21   : > { %154 = vst [vmem:[%s2657_s24 + $0x70] sm:$0xff] %v153_v14  ;;  %v185_v30 = vld [vmem:[%s2652_s23 + $0x3c0] sm:$0xff]  ;;  %v187_v31 = vld [vmem:[%s2652_s23 + $0x3c8] sm:$0xff] }
  0x22   : > { %156 = vst [vmem:[%s2657_s24 + $0x78] sm:$0xff] %v155_v15  ;;  %v189_v32 = vld [vmem:[%s2652_s23 + $0x400] sm:$0xff]  ;;  %v191_v33 = vld [vmem:[%s2652_s23 + $0x408] sm:$0xff] }
  0x23   : > { %158 = vst [vmem:[%s2657_s24 + $0x80] sm:$0xff] %v157_v16  ;;  %v193_v34 = vld [vmem:[%s2652_s23 + $0x440] sm:$0xff]  ;;  %v195_v35 = vld [vmem:[%s2652_s23 + $0x448] sm:$0xff] }
  0x24   : > { %160 = vst [vmem:[%s2657_s24 + $0x88] sm:$0xff] %v159_v17  ;;  %v197_v36 = vld [vmem:[%s2652_s23 + $0x480] sm:$0xff]  ;;  %v199_v37 = vld [vmem:[%s2652_s23 + $0x488] sm:$0xff] }
  0x25   : > { %162 = vst [vmem:[%s2657_s24 + $0x90] sm:$0xff] %v161_v18  ;;  %v201_v38 = vld [vmem:[%s2652_s23 + $0x4c0] sm:$0xff]  ;;  %v203_v39 = vld [vmem:[%s2652_s23 + $0x4c8] sm:$0xff] }
  0x26   : > { %164 = vst [vmem:[%s2657_s24 + $0x98] sm:$0xff] %v163_v19  ;;  %v205_v40 = vld [vmem:[%s2652_s23 + $0x500] sm:$0xff]  ;;  %v207_v41 = vld [vmem:[%s2652_s23 + $0x508] sm:$0xff] }
  0x27   : > { %166 = vst [vmem:[%s2657_s24 + $0xa0] sm:$0xff] %v165_v20  ;;  %v209_v42 = vld [vmem:[%s2652_s23 + $0x540] sm:$0xff]  ;;  %v211_v43 = vld [vmem:[%s2652_s23 + $0x548] sm:$0xff] }
  0x28   : > { %168 = vst [vmem:[%s2657_s24 + $0xa8] sm:$0xff] %v167_v21  ;;  %v213_v44 = vld [vmem:[%s2652_s23 + $0x580] sm:$0xff]  ;;  %v215_v45 = vld [vmem:[%s2652_s23 + $0x588] sm:$0xff] }
  0x29   : > { %170 = vst [vmem:[%s2657_s24 + $0xb0] sm:$0xff] %v169_v22  ;;  %v217_v46 = vld [vmem:[%s2652_s23 + $0x5c0] sm:$0xff]  ;;  %v219_v47 = vld [vmem:[%s2652_s23 + $0x5c8] sm:$0xff] }
  0x2a   : > { %172 = vst [vmem:[%s2657_s24 + $0xb8] sm:$0xff] %v171_v23  ;;  %v221_v48 = vld [vmem:[%s2652_s23 + $0x600] sm:$0xff]  ;;  %v223_v49 = vld [vmem:[%s2652_s23 + $0x608] sm:$0xff] }
  0x2b   : > { %174 = vst [vmem:[%s2657_s24 + $0xc0] sm:$0xff] %v173_v24  ;;  %v225_v50 = vld [vmem:[%s2652_s23 + $0x640] sm:$0xff]  ;;  %v227_v51 = vld [vmem:[%s2652_s23 + $0x648] sm:$0xff] }
  0x2c   : > { %176 = vst [vmem:[%s2657_s24 + $0xc8] sm:$0xff] %v175_v25  ;;  %v229_v52 = vld [vmem:[%s2652_s23 + $0x680] sm:$0xff]  ;;  %v231_v53 = vld [vmem:[%s2652_s23 + $0x688] sm:$0xff] }
  0x2d   : > { %178 = vst [vmem:[%s2657_s24 + $0xd0] sm:$0xff] %v177_v26  ;;  %v233_v54 = vld [vmem:[%s2652_s23 + $0x6c0] sm:$0xff]  ;;  %v235_v55 = vld [vmem:[%s2652_s23 + $0x6c8] sm:$0xff] }
  0x2e   : > { %180 = vst [vmem:[%s2657_s24 + $0xd8] sm:$0xff] %v179_v27  ;;  %v237_v56 = vld [vmem:[%s2652_s23 + $0x700] sm:$0xff]  ;;  %v239_v57 = vld [vmem:[%s2652_s23 + $0x708] sm:$0xff] }
  0x2f   : > { %182 = vst [vmem:[%s2657_s24 + $0xe0] sm:$0xff] %v181_v28  ;;  %v241_v58 = vld [vmem:[%s2652_s23 + $0x740] sm:$0xff]  ;;  %v243_v59 = vld [vmem:[%s2652_s23 + $0x748] sm:$0xff] }
  0x30   : > { %184 = vst [vmem:[%s2657_s24 + $0xe8] sm:$0xff] %v183_v29  ;;  %v245_v60 = vld [vmem:[%s2652_s23 + $0x780] sm:$0xff]  ;;  %v247_v61 = vld [vmem:[%s2652_s23 + $0x788] sm:$0xff] }
  0x31   : > { %186 = vst [vmem:[%s2657_s24 + $0xf0] sm:$0xff] %v185_v30  ;;  %v249_v62 = vld [vmem:[%s2652_s23 + $0x7c0] sm:$0xff]  ;;  %v251_v63 = vld [vmem:[%s2652_s23 + $0x7c8] sm:$0xff] }
  0x32   : > { %188 = vst [vmem:[%s2657_s24 + $0xf8] sm:$0xff] %v187_v31  ;;  %v253_v0 = vld [vmem:[%s2652_s23 + $0x800] sm:$0xff]  ;;  %v255_v1 = vld [vmem:[%s2652_s23 + $0x808] sm:$0xff] }
  0x33   : > { %190 = vst [vmem:[%s2657_s24 + $0x100] sm:$0xff] %v189_v32  ;;  %v257_v2 = vld [vmem:[%s2652_s23 + $0x840] sm:$0xff]  ;;  %v259_v3 = vld [vmem:[%s2652_s23 + $0x848] sm:$0xff] }
  0x34   : > { %192 = vst [vmem:[%s2657_s24 + $0x108] sm:$0xff] %v191_v33  ;;  %v261_v4 = vld [vmem:[%s2652_s23 + $0x880] sm:$0xff]  ;;  %v263_v5 = vld [vmem:[%s2652_s23 + $0x888] sm:$0xff] }
  0x35   : > { %194 = vst [vmem:[%s2657_s24 + $0x110] sm:$0xff] %v193_v34  ;;  %v265_v6 = vld [vmem:[%s2652_s23 + $0x8c0] sm:$0xff]  ;;  %v267_v7 = vld [vmem:[%s2652_s23 + $0x8c8] sm:$0xff] }
  0x36   : > { %196 = vst [vmem:[%s2657_s24 + $0x118] sm:$0xff] %v195_v35  ;;  %v269_v8 = vld [vmem:[%s2652_s23 + $0x900] sm:$0xff]  ;;  %v271_v9 = vld [vmem:[%s2652_s23 + $0x908] sm:$0xff] }
  0x37   : > { %198 = vst [vmem:[%s2657_s24 + $0x120] sm:$0xff] %v197_v36  ;;  %v273_v10 = vld [vmem:[%s2652_s23 + $0x940] sm:$0xff]  ;;  %v275_v11 = vld [vmem:[%s2652_s23 + $0x948] sm:$0xff] }
  0x38   : > { %200 = vst [vmem:[%s2657_s24 + $0x128] sm:$0xff] %v199_v37  ;;  %v277_v12 = vld [vmem:[%s2652_s23 + $0x980] sm:$0xff]  ;;  %v279_v13 = vld [vmem:[%s2652_s23 + $0x988] sm:$0xff] }
  0x39   : > { %202 = vst [vmem:[%s2657_s24 + $0x130] sm:$0xff] %v201_v38  ;;  %v281_v14 = vld [vmem:[%s2652_s23 + $0x9c0] sm:$0xff]  ;;  %v283_v15 = vld [vmem:[%s2652_s23 + $0x9c8] sm:$0xff] }
  0x3a   : > { %204 = vst [vmem:[%s2657_s24 + $0x138] sm:$0xff] %v203_v39 }
  0x3b   : > { %206 = vst [vmem:[%s2657_s24 + $0x140] sm:$0xff] %v205_v40 }
  0x3c   : > { %208 = vst [vmem:[%s2657_s24 + $0x148] sm:$0xff] %v207_v41 }
  0x3d   : > { %210 = vst [vmem:[%s2657_s24 + $0x150] sm:$0xff] %v209_v42 }
  0x3e   : > { %212 = vst [vmem:[%s2657_s24 + $0x158] sm:$0xff] %v211_v43 }
  0x3f   : > { %214 = vst [vmem:[%s2657_s24 + $0x160] sm:$0xff] %v213_v44 }
  0x40   : > { %216 = vst [vmem:[%s2657_s24 + $0x168] sm:$0xff] %v215_v45 }
  0x41   : > { %218 = vst [vmem:[%s2657_s24 + $0x170] sm:$0xff] %v217_v46 }
  0x42   : > { %220 = vst [vmem:[%s2657_s24 + $0x178] sm:$0xff] %v219_v47 }
  0x43   : > { %222 = vst [vmem:[%s2657_s24 + $0x180] sm:$0xff] %v221_v48 }
  0x44   : > { %224 = vst [vmem:[%s2657_s24 + $0x188] sm:$0xff] %v223_v49 }
  0x45   : > { %226 = vst [vmem:[%s2657_s24 + $0x190] sm:$0xff] %v225_v50 }
  0x46   : > { %228 = vst [vmem:[%s2657_s24 + $0x198] sm:$0xff] %v227_v51 }
  0x47   : > { %230 = vst [vmem:[%s2657_s24 + $0x1a0] sm:$0xff] %v229_v52 }
  0x48   : > { %232 = vst [vmem:[%s2657_s24 + $0x1a8] sm:$0xff] %v231_v53 }
  0x49   : > { %234 = vst [vmem:[%s2657_s24 + $0x1b0] sm:$0xff] %v233_v54 }
  0x4a   : > { %236 = vst [vmem:[%s2657_s24 + $0x1b8] sm:$0xff] %v235_v55 }
  0x4b   : > { %238 = vst [vmem:[%s2657_s24 + $0x1c0] sm:$0xff] %v237_v56 }
  0x4c   : > { %240 = vst [vmem:[%s2657_s24 + $0x1c8] sm:$0xff] %v239_v57 }
  0x4d   : > { %242 = vst [vmem:[%s2657_s24 + $0x1d0] sm:$0xff] %v241_v58 }
  0x4e   : > { %244 = vst [vmem:[%s2657_s24 + $0x1d8] sm:$0xff] %v243_v59 }
  0x4f   : > { %246 = vst [vmem:[%s2657_s24 + $0x1e0] sm:$0xff] %v245_v60 }
  0x50   : > { %248 = vst [vmem:[%s2657_s24 + $0x1e8] sm:$0xff] %v247_v61 }
  0x51   : > { %250 = vst [vmem:[%s2657_s24 + $0x1f0] sm:$0xff] %v249_v62 }
  0x52   : > { %252 = vst [vmem:[%s2657_s24 + $0x1f8] sm:$0xff] %v251_v63 }
  0x53   : > { %254 = vst [vmem:[%s2657_s24 + $0x200] sm:$0xff] %v253_v0 }
  0x54   : > { %256 = vst [vmem:[%s2657_s24 + $0x208] sm:$0xff] %v255_v1 }
  0x55   : > { %258 = vst [vmem:[%s2657_s24 + $0x210] sm:$0xff] %v257_v2 }
  0x56   : > { %260 = vst [vmem:[%s2657_s24 + $0x218] sm:$0xff] %v259_v3 }
  0x57   : > { %262 = vst [vmem:[%s2657_s24 + $0x220] sm:$0xff] %v261_v4 }
  0x58   : > { %264 = vst [vmem:[%s2657_s24 + $0x228] sm:$0xff] %v263_v5 }
  0x59   : > { %266 = vst [vmem:[%s2657_s24 + $0x230] sm:$0xff] %v265_v6 }
  0x5a   : > { %268 = vst [vmem:[%s2657_s24 + $0x238] sm:$0xff] %v267_v7 }
  0x5b   : > { %270 = vst [vmem:[%s2657_s24 + $0x240] sm:$0xff] %v269_v8 }
  0x5c   : > { %272 = vst [vmem:[%s2657_s24 + $0x248] sm:$0xff] %v271_v9 }
  0x5d   : > { %274 = vst [vmem:[%s2657_s24 + $0x250] sm:$0xff] %v273_v10 }
  0x5e   : > { %276 = vst [vmem:[%s2657_s24 + $0x258] sm:$0xff] %v275_v11 }
  0x5f   : > { %278 = vst [vmem:[%s2657_s24 + $0x260] sm:$0xff] %v277_v12 }
  0x60   : > { %280 = vst [vmem:[%s2657_s24 + $0x268] sm:$0xff] %v279_v13 }
  0x61   : > { %282 = vst [vmem:[%s2657_s24 + $0x270] sm:$0xff] %v281_v14 }
  0x62   : > { %284 = vst [vmem:[%s2657_s24 + $0x278] sm:$0xff] %v283_v15 }
  0x63 PF: > { %p1824_p7 = scmp.ge.s32.totalorder %s2594_s11, 1  ;;  %p289_p8 = scmp.lt.s32.totalorder %s2594_s11, 5 }
  0x65   : > { %p290_p9 = pnand %p1824_p7, %p289_p8 }
  0x66   : > { %s296_s25 = sand.u32 (!%p290_p9), 1, %s2586_s9  }
  0x67   : > { %293 = sbr.rel (%p290_p9) target bundleno = 417 (0x1a1), region = 47  ;;  %s1825_s30 = sshll.u32 (!%p290_p9), %s296_s25, 5 }
  0x68   : > { %s2290_s26 = smul.u32 (!%p290_p9), 640, %s296_s25  ;;  %s3293_s3 = scalar_lea.vmem (!%p290_p9), [#allocation3], %s1825_s30 }
  0x6a   : > { %s2821_s27 = scalar_lea.vmem (!%p290_p9), [#allocation2], %s2290_s26 }
  0x6c   : > { %v328_v16 = vld [vmem:[%s2821_s27 + $0x40] sm:$0x33]  ;;  %v329_v17 = vld [vmem:[%s2821_s27 + $0x48] sm:$0x33]  ;;  %vm384_vm0 = vcmask 1041408   ;;  %vm380_vm1 = vcmask 293888  }
  0x6d   : > { %v356_v18 = vunpack.c.l.b16 %v328_v16  ;;  %v357_v19 = vunpack.c.h.b16 %v328_v16  ;;  %v358_v20 = vunpack.c.l.b16 %v329_v17  ;;  %v359_v21 = vunpack.c.h.b16 %v329_v17  ;;  %v1844_v22 = vld [vmem:[%s2821_s27 + $0x20] sm:$0xf]  ;;  %v2230_v23 = vld [vmem:[%s2821_s27 + $0x2c] sm:$0xf0]  ;;  %v2228_v28 = vld [vmem:[%s2821_s27 + $0x24] sm:$0xf] }
  0x6e   : > { %v1846_v29 = vld [vmem:[%s2821_s27 + $0x30] sm:$0xf0]  ;;  %v1852_v30 = vld [vmem:[%s2821_s27 + $0x28] sm:$0xf]  ;;  %v2231_v31 = vld [vmem:[%s2821_s27 + $0x34] sm:$0xf0]  ;;  %v1845_v39 = vor.u32 %v2230_v23, %v1844_v22 }
  0x6f   : > { %v368_v24 = vpack.c.b16 %v356_v18, %v356_v18  ;;  %v369_v25 = vpack.c.b16 %v357_v19, %v357_v19  ;;  %v370_v26 = vpack.c.b16 %v358_v20, %v358_v20  ;;  %v371_v27 = vpack.c.b16 %v359_v21, %v359_v21  ;;  %v2229_v32 = vld [vmem:[%s2821_s27 + $0x2c] sm:$0xf]  ;;  %v1854_v33 = vld [vmem:[%s2821_s27 + $0x38] sm:$0xf0]  ;;  %v1828_v38 = vld [vmem:[%s2821_s27] sm:$0xf] }
  0x70   : > { %v1849_v40 = vor.u32 %v2228_v28, %v1846_v29  ;;  %v2226_v41 = vld [vmem:[%s2821_s27 + $0xc] sm:$0xf0]  ;;  %v2224_v42 = vld [vmem:[%s2821_s27 + $0x4] sm:$0xf]  ;;  %v1875_v43 = vld [vmem:[%s2821_s27 + $0x98] sm:$0x33]  ;;  %v1853_v44 = vor.u32 %v2231_v31, %v1852_v30  ;;  %v1857_v45 = vor.u32 %v2229_v32, %v1854_v33 }
  0x71   : > { %v386_v34 = vsel %vm384_vm0, %v368_v24, 0  ;;  %v389_v35 = vsel %vm384_vm0, %v369_v25, 0  ;;  %v392_v36 = vsel %vm384_vm0, %v370_v26, 0  ;;  %v395_v37 = vsel %vm384_vm0, %v371_v27, 0  ;;  %v1830_v46 = vld [vmem:[%s2821_s27 + $0x10] sm:$0xf0] }
  0x72   : > { %402 = vmatpush.bf16.msra.mxu0 %v386_v34  ;;  %415 = vmatpush.bf16.msra.mxu1 %v389_v35  ;;  %v1836_v47 = vld [vmem:[%s2821_s27 + $0x8] sm:$0xf]  ;;  %v528_v48 = vunpack.c.l.b16 %v1875_v43  ;;  %v529_v49 = vunpack.c.h.b16 %v1875_v43  ;;  %v1874_v50 = vld [vmem:[%s2821_s27 + $0x90] sm:$0x33]  ;;  %v2227_v51 = vld [vmem:[%s2821_s27 + $0x14] sm:$0xf0]  ;;  %v1829_v58 = vor.u32 %v2226_v41, %v1828_v38  ;;  %v1833_v59 = vor.u32 %v2224_v42, %v1830_v46 }
  0x73   : > { %428 = vmatpush.bf16.msra.mxu2 %v392_v36  ;;  %441 = vmatpush.bf16.msra.mxu3 %v395_v37  ;;  %v2225_v52 = vld [vmem:[%s2821_s27 + $0xc] sm:$0xf]  ;;  %v1838_v53 = vld [vmem:[%s2821_s27 + $0x18] sm:$0xf0]  ;;  %v526_v54 = vunpack.c.l.b16 %v1874_v50  ;;  %v527_v55 = vunpack.c.h.b16 %v1874_v50  ;;  %v1837_v60 = vor.u32 %v2227_v51, %v1836_v47  ;;  %v1902_v0 = vld [vmem:[%s2821_s27 + $0x78] sm:$0xf] }
  0x74   : > { %v540_v56 = vpack.c.b16 %v528_v48, %v528_v48  ;;  %v541_v57 = vpack.c.b16 %v529_v49, %v529_v49  ;;  %v1841_v61 = vor.u32 %v2225_v52, %v1838_v53  ;;  %v2239_v1 = vld [vmem:[%s2821_s27 + $0x84] sm:$0xf0]  ;;  %v2237_v2 = vld [vmem:[%s2821_s27 + $0x7c] sm:$0xf]  ;;  %v1904_v5 = vld [vmem:[%s2821_s27 + $0x88] sm:$0xf0] }
  0x75   : > { %v538_v62 = vpack.c.b16 %v526_v54, %v526_v54  ;;  %v539_v63 = vpack.c.b16 %v527_v55, %v527_v55  ;;  %v1925_v6 = vld [vmem:[%s2821_s27 + $0xe8] sm:$0x33]  ;;  %v2857_v7 = vld [vmem:[%s3576_s1] sm:$0xf]  ;;  %v1894_v11 = vld [vmem:[%s2821_s27 + $0x70] sm:$0xf]  ;;  %v1903_v16 = vor.u32 %v2239_v1, %v1902_v0  ;;  %v1907_v17 = vor.u32 %v2237_v2, %v1904_v5 }
  0x76   : > { %403 = vmatpush.bf16.msra.mxu0 %v1845_v39  ;;  %416 = vmatpush.bf16.msra.mxu1 %v1849_v40  ;;  %v557_v3 = vsel %vm384_vm0, %v540_v56, 0  ;;  %v560_v4 = vsel %vm384_vm0, %v541_v57, 0  ;;  %v705_v8 = vunpack.c.l.b16 %v1925_v6  ;;  %v706_v9 = vunpack.c.h.b16 %v1925_v6  ;;  %v1924_v10 = vld [vmem:[%s2821_s27 + $0xe0] sm:$0x33]  ;;  %v2236_v13 = vld [vmem:[%s2821_s27 + $0x74] sm:$0xf] }
  0x77   : > { %429 = vmatpush.bf16.msra.mxu2 %v1853_v44  ;;  %442 = vmatpush.bf16.msra.mxu3 %v1857_v45  ;;  %v2238_v12 = vld [vmem:[%s2821_s27 + $0x7c] sm:$0xf0]  ;;  %v551_v14 = vsel %vm384_vm0, %v538_v62, 0  ;;  %v554_v15 = vsel %vm384_vm0, %v539_v63, 0  ;;  %v1896_v18 = vld [vmem:[%s2821_s27 + $0x80] sm:$0xf0]  ;;  %v703_v23 = vunpack.c.l.b16 %v1924_v10  ;;  %v704_v24 = vunpack.c.h.b16 %v1924_v10 }
  0x78   : > { %v1886_v19 = vld [vmem:[%s2821_s27 + $0x58] sm:$0xf]  ;;  %v2235_v20 = vld [vmem:[%s2821_s27 + $0x64] sm:$0xf0]  ;;  %v2233_v21 = vld [vmem:[%s2821_s27 + $0x5c] sm:$0xf]  ;;  %v717_v25 = vpack.c.b16 %v705_v8, %v705_v8  ;;  %v718_v26 = vpack.c.b16 %v706_v9, %v706_v9  ;;  %v1895_v27 = vor.u32 %v2238_v12, %v1894_v11  ;;  %v1899_v28 = vor.u32 %v2236_v13, %v1896_v18 }
  0x79   : > { %v1888_v22 = vld [vmem:[%s2821_s27 + $0x68] sm:$0xf0]  ;;  %v1878_v29 = vld [vmem:[%s2821_s27 + $0x50] sm:$0xf]  ;;  %v1887_v30 = vor.u32 %v2235_v20, %v1886_v19  ;;  %v2234_v32 = vld [vmem:[%s2821_s27 + $0x5c] sm:$0xf0]  ;;  %v715_v35 = vpack.c.b16 %v703_v23, %v703_v23  ;;  %v716_v36 = vpack.c.b16 %v704_v24, %v704_v24 }
  0x7a   : > { %404 = vmatpush.bf16.msra.mxu0 %v1829_v58  ;;  %417 = vmatpush.bf16.msra.mxu1 %v1833_v59  ;;  %v1891_v31 = vor.u32 %v2233_v21, %v1888_v22  ;;  %v2232_v33 = vld [vmem:[%s2821_s27 + $0x54] sm:$0xf]  ;;  %v1880_v34 = vld [vmem:[%s2821_s27 + $0x60] sm:$0xf0]  ;;  %v1952_v37 = vld [vmem:[%s2821_s27 + $0xc8] sm:$0xf]  ;;  %v1879_v43 = vor.u32 %v2234_v32, %v1878_v29 }
  0x7b   : > { %430 = vmatpush.bf16.msra.mxu2 %v1837_v60  ;;  %443 = vmatpush.bf16.msra.mxu3 %v1841_v61  ;;  %v2247_v38 = vld [vmem:[%s2821_s27 + $0xd4] sm:$0xf0]  ;;  %v734_v39 = vsel %vm384_vm0, %v717_v25, 0  ;;  %v737_v40 = vsel %vm384_vm0, %v718_v26, 0  ;;  %v2245_v41 = vld [vmem:[%s2821_s27 + $0xcc] sm:$0xf]  ;;  %v1883_v44 = vor.u32 %v2232_v33, %v1880_v34 }
  0x7c   : > { %v1954_v42 = vld [vmem:[%s2821_s27 + $0xd8] sm:$0xf0]  ;;  %v1944_v46 = vld [vmem:[%s2821_s27 + $0xc0] sm:$0xf]  ;;  %v2246_v47 = vld [vmem:[%s2821_s27 + $0xcc] sm:$0xf0]  ;;  %v1953_v51 = vor.u32 %v2247_v38, %v1952_v37 }
  0x7d   : > { %1858 = vmatmul.msk.bf16.vlgmr.msra.gmra.mxu0 %vm380_vm1, %v2857_v7  ;;  %1859 = vmatmul.msk.bf16.vlgmr.msra.gmra.mxu1 %vm380_vm1, %v2857_v7  ;;  %v1975_v45 = vld [vmem:[%s2821_s27 + $0x138] sm:$0x33]  ;;  %v1974_v48 = vld [vmem:[%s2821_s27 + $0x130] sm:$0x33]  ;;  %v728_v49 = vsel %vm384_vm0, %v715_v35, 0  ;;  %v731_v50 = vsel %vm384_vm0, %v716_v36, 0  ;;  %v1957_v52 = vor.u32 %v2245_v41, %v1954_v42  ;;  %v1945_v61 = vor.u32 %v2246_v47, %v1944_v46 }
  0x7e   : > { %1860 = vmatmul.msk.bf16.vlgmr.msra.gmra.mxu2 %vm380_vm1, %v2857_v7  ;;  %1861 = vmatmul.msk.bf16.vlgmr.msra.gmra.mxu3 %vm380_vm1, %v2857_v7  ;;  %v2244_v53 = vld [vmem:[%s2821_s27 + $0xc4] sm:$0xf]  ;;  %v1946_v54 = vld [vmem:[%s2821_s27 + $0xd0] sm:$0xf0]  ;;  %v882_v55 = vunpack.c.l.b16 %v1975_v45  ;;  %v883_v56 = vunpack.c.h.b16 %v1975_v45  ;;  %v1936_v57 = vld [vmem:[%s2821_s27 + $0xa8] sm:$0xf]  ;;  %v880_v59 = vunpack.c.l.b16 %v1974_v48  ;;  %v881_v60 = vunpack.c.h.b16 %v1974_v48 }
  0x7f   : > { %593 = vmatpush.bf16.msrb.mxu2 %v557_v3  ;;  %606 = vmatpush.bf16.msrb.mxu3 %v560_v4  ;;  %v2243_v58 = vld [vmem:[%s2821_s27 + $0xb4] sm:$0xf0]  ;;  %v1949_v62 = vor.u32 %v2244_v53, %v1946_v54  ;;  %v2241_v63 = vld [vmem:[%s2821_s27 + $0xac] sm:$0xf]  ;;  %v1938_v0 = vld [vmem:[%s2821_s27 + $0xb8] sm:$0xf0] }
  0x80   : > { %567 = vmatpush.bf16.msrb.mxu0 %v551_v14  ;;  %580 = vmatpush.bf16.msrb.mxu1 %v554_v15  ;;  %v1928_v1 = vld [vmem:[%s2821_s27 + $0xa0] sm:$0xf]  ;;  %v2242_v2 = vld [vmem:[%s2821_s27 + $0xac] sm:$0xf0]  ;;  %v2240_v3 = vld [vmem:[%s2821_s27 + $0xa4] sm:$0xf]  ;;  %v894_v5 = vpack.c.b16 %v882_v55, %v882_v55  ;;  %v895_v6 = vpack.c.b16 %v883_v56, %v883_v56  ;;  %v1937_v8 = vor.u32 %v2243_v58, %v1936_v57 }
  0x81   : > { %v1930_v4 = vld [vmem:[%s2821_s27 + $0xb0] sm:$0xf0]  ;;  %v1941_v9 = vor.u32 %v2241_v63, %v1938_v0  ;;  %v892_v10 = vpack.c.b16 %v880_v59, %v880_v59  ;;  %v893_v11 = vpack.c.b16 %v881_v60, %v881_v60  ;;  %v1929_v12 = vor.u32 %v2242_v2, %v1928_v1  ;;  %v2002_v14 = vld [vmem:[%s2821_s27 + $0x118] sm:$0xf]  ;;  %v2255_v15 = vld [vmem:[%s2821_s27 + $0x124] sm:$0xf0] }
  0x82   : > { %v1933_v13 = vor.u32 %v2240_v3, %v1930_v4  ;;  %v911_v18 = vsel %vm384_vm0, %v894_v5, 0  ;;  %v914_v19 = vsel %vm384_vm0, %v895_v6, 0  ;;  %v1994_v20 = vld [vmem:[%s2821_s27 + $0x110] sm:$0xf]  ;;  %v2254_v21 = vld [vmem:[%s2821_s27 + $0x11c] sm:$0xf0] }
  0x83   : > { %594 = vmatpush.bf16.msrb.mxu2 %v1903_v16  ;;  %607 = vmatpush.bf16.msrb.mxu3 %v1907_v17  ;;  %v2253_v16 = vld [vmem:[%s2821_s27 + $0x11c] sm:$0xf]  ;;  %v2004_v17 = vld [vmem:[%s2821_s27 + $0x128] sm:$0xf0]  ;;  %v905_v22 = vsel %vm384_vm0, %v892_v10, 0  ;;  %v908_v23 = vsel %vm384_vm0, %v893_v11, 0  ;;  %v1995_v32 = vor.u32 %v2254_v21, %v1994_v20 }
  0x84   : > { %568 = vmatpush.bf16.msrb.mxu0 %v1895_v27  ;;  %581 = vmatpush.bf16.msrb.mxu1 %v1899_v28  ;;  %v2252_v24 = vld [vmem:[%s2821_s27 + $0x114] sm:$0xf]  ;;  %v1996_v25 = vld [vmem:[%s2821_s27 + $0x120] sm:$0xf0]  ;;  %v1986_v26 = vld [vmem:[%s2821_s27 + $0xf8] sm:$0xf]  ;;  %v2003_v27 = vor.u32 %v2255_v15, %v2002_v14  ;;  %v2007_v28 = vor.u32 %v2253_v16, %v2004_v17 }
  0x85   : > { %v2251_v29 = vld [vmem:[%s2821_s27 + $0x104] sm:$0xf0]  ;;  %v1999_v33 = vor.u32 %v2252_v24, %v1996_v25  ;;  %v1988_v34 = vld [vmem:[%s2821_s27 + $0x108] sm:$0xf0]  ;;  %v1978_v35 = vld [vmem:[%s2821_s27 + $0xf0] sm:$0xf] }
  0x86   : > { %v2024_v36 = vld [vmem:[%s2821_s27 + $0x180] sm:$0x33]  ;;  %v2248_v38 = vld [vmem:[%s2821_s27 + $0xf4] sm:$0xf]  ;;  %v1987_v42 = vor.u32 %v2251_v29, %v1986_v26  ;;  %v2263_v53 = vld [vmem:[%s2821_s27 + $0x174] sm:$0xf0] }
  0x87   : > { %595 = vmatpush.bf16.msrb.mxu2 %v1887_v30  ;;  %608 = vmatpush.bf16.msrb.mxu3 %v1891_v31  ;;  %v2249_v30 = vld [vmem:[%s2821_s27 + $0xfc] sm:$0xf]  ;;  %v2025_v31 = vld [vmem:[%s2821_s27 + $0x188] sm:$0x33]  ;;  %v2250_v37 = vld [vmem:[%s2821_s27 + $0xfc] sm:$0xf0]  ;;  %v1062_v45 = vunpack.c.h.b16 %v2024_v36 }
  0x88   : > { %569 = vmatpush.bf16.msrb.mxu0 %v1879_v43  ;;  %582 = vmatpush.bf16.msrb.mxu1 %v1883_v44  ;;  %v1064_v41 = vunpack.c.h.b16 %v2025_v31  ;;  %v1991_v43 = vor.u32 %v2249_v30, %v1988_v34  ;;  %v1061_v44 = vunpack.c.l.b16 %v2024_v36  ;;  %v1979_v46 = vor.u32 %v2250_v37, %v1978_v35  ;;  %v2261_v54 = vld [vmem:[%s2821_s27 + $0x16c] sm:$0xf]  ;;  %v2054_v55 = vld [vmem:[%s2821_s27 + $0x178] sm:$0xf0]  ;;  %v2044_v58 = vld [vmem:[%s2821_s27 + $0x160] sm:$0xf] }
  0x89   : > { %v2262_v59 = vld [vmem:[%s2821_s27 + $0x16c] sm:$0xf0]  ;;  %v2046_v63 = vld [vmem:[%s2821_s27 + $0x170] sm:$0xf0]  ;;  %v2057_v1 = vor.u32 %v2261_v54, %v2054_v55  ;;  %v2036_v2 = vld [vmem:[%s2821_s27 + $0x148] sm:$0xf] }
  0x8a   : > { %v2259_v3 = vld [vmem:[%s2821_s27 + $0x154] sm:$0xf0]  ;;  %v2257_v4 = vld [vmem:[%s2821_s27 + $0x14c] sm:$0xf]  ;;  %v2045_v5 = vor.u32 %v2262_v59, %v2044_v58  ;;  %v2258_v10 = vld [vmem:[%s2821_s27 + $0x14c] sm:$0xf0] }
  0x8b   : > { %770 = vmatpush.bf16.msra.mxu2 %v734_v39  ;;  %783 = vmatpush.bf16.msra.mxu3 %v737_v40  ;;  %v1980_v39 = vld [vmem:[%s2821_s27 + $0x100] sm:$0xf0]  ;;  %v1063_v40 = vunpack.c.l.b16 %v2025_v31  ;;  %v2074_v14 = vld [vmem:[%s2821_s27 + $0x1d0] sm:$0x33]  ;;  %v2037_v15 = vor.u32 %v2259_v3, %v2036_v2  ;;  %v2269_v29 = vld [vmem:[%s2821_s27 + $0x1bc] sm:$0xf] }
  0x8c   : > { %744 = vmatpush.bf16.msra.mxu0 %v728_v49  ;;  %757 = vmatpush.bf16.msra.mxu1 %v731_v50  ;;  %v1983_v47 = vor.u32 %v2248_v38, %v1980_v39  ;;  %v1076_v49 = vpack.c.b16 %v1064_v41, %v1064_v41  ;;  %v1073_v50 = vpack.c.b16 %v1061_v44, %v1061_v44  ;;  %v2256_v11 = vld [vmem:[%s2821_s27 + $0x144] sm:$0xf]  ;;  %v1238_v21 = vunpack.c.l.b16 %v2074_v14  ;;  %v2104_v30 = vld [vmem:[%s2821_s27 + $0x1c8] sm:$0xf0]  ;;  %v2270_v34 = vld [vmem:[%s2821_s27 + $0x1bc] sm:$0xf0] }
  0x8d   : > { %1908 = vmatmul.msk.bf16.vlgmr.msrb.gmra.mxu0 %vm380_vm1, %v2857_v7  ;;  %1909 = vmatmul.msk.bf16.vlgmr.msrb.gmra.mxu1 %vm380_vm1, %v2857_v7  ;;  %v1075_v48 = vpack.c.b16 %v1063_v40, %v1063_v40  ;;  %v2268_v37 = vld [vmem:[%s2821_s27 + $0x1b4] sm:$0xf]  ;;  %v2096_v38 = vld [vmem:[%s2821_s27 + $0x1c0] sm:$0xf0]  ;;  %v2107_v40 = vor.u32 %v2269_v29, %v2104_v30  ;;  %v2086_v41 = vld [vmem:[%s2821_s27 + $0x198] sm:$0xf] }
  0x8e   : > { %1910 = vmatmul.msk.bf16.vlgmr.msrb.gmra.mxu2 %vm380_vm1, %v2857_v7  ;;  %1911 = vmatmul.msk.bf16.vlgmr.msrb.gmra.mxu3 %vm380_vm1, %v2857_v7  ;;  %v1095_v57 = vsel %vm384_vm0, %v1076_v49, 0  ;;  %v1086_v60 = vsel %vm384_vm0, %v1073_v50, 0  ;;  %v1250_v25 = vpack.c.b16 %v1238_v21, %v1238_v21  ;;  %v2264_v49 = vld [vmem:[%s2821_s27 + $0x194] sm:$0xf]  ;;  %v2080_v50 = vld [vmem:[%s2821_s27 + $0x1a0] sm:$0xf0] }
  0x8f   : > { %771 = vmatpush.bf16.msra.mxu2 %v1953_v51  ;;  %784 = vmatpush.bf16.msra.mxu3 %v1957_v52  ;;  %v1074_v51 = vpack.c.b16 %v1062_v45, %v1062_v45  ;;  %v2052_v52 = vld [vmem:[%s2821_s27 + $0x168] sm:$0xf]  ;;  %v1092_v56 = vsel %vm384_vm0, %v1075_v48, 0  ;;  %v2099_v45 = vor.u32 %v2268_v37, %v2096_v38  ;;  %v2266_v48 = vld [vmem:[%s2821_s27 + $0x19c] sm:$0xf0]  ;;  %s2288_s4 = sshll.u32 (%p2642_p5), %s1818_s12, 4 }
  0x90   : > { %745 = vmatpush.bf16.msra.mxu0 %v1945_v61  ;;  %758 = vmatpush.bf16.msra.mxu1 %v1949_v62  ;;  %v2260_v62 = vld [vmem:[%s2821_s27 + $0x164] sm:$0xf]  ;;  %v2053_v0 = vor.u32 %v2263_v53, %v2052_v52  ;;  %v1263_v35 = vsel %vm384_vm0, %v1250_v25, 0  ;;  %v2279_v2 = vld [vmem:[%s2821_s27 + $0x214] sm:$0xf0]  ;;  %s1738_s7 = scalar_lea.vmem (%p2642_p5), %s3577_s2, %s2288_s4 }
  0x91   : > { %v1089_v61 = vsel %vm384_vm0, %v1074_v51, 0  ;;  %v2049_v6 = vor.u32 %v2260_v62, %v2046_v63  ;;  %v2125_v51 = vld [vmem:[%s2821_s27 + $0x228] sm:$0x33]  ;;  %v2124_v52 = vld [vmem:[%s2821_s27 + $0x220] sm:$0x33] }
  0x92   : > { %v1418_v58 = vunpack.c.h.b16 %v2125_v51  ;;  %v1415_v59 = vunpack.c.l.b16 %v2124_v52  ;;  %v2277_v3 = vld [vmem:[%s2821_s27 + $0x20c] sm:$0xf]  ;;  %v2138_v21 = vld [vmem:[%s2821_s27 + $0x1f8] sm:$0xf0]  ;;  %v2130_v25 = vld [vmem:[%s2821_s27 + $0x1f0] sm:$0xf0] }
  0x93   : > { %772 = vmatpush.bf16.msra.mxu2 %v1937_v8  ;;  %785 = vmatpush.bf16.msra.mxu3 %v1941_v9  ;;  %v2038_v8 = vld [vmem:[%s2821_s27 + $0x158] sm:$0xf0]  ;;  %v2028_v9 = vld [vmem:[%s2821_s27 + $0x140] sm:$0xf] }
  0x94   : > { %746 = vmatpush.bf16.msra.mxu0 %v1929_v12  ;;  %759 = vmatpush.bf16.msra.mxu1 %v1933_v13  ;;  %v2030_v12 = vld [vmem:[%s2821_s27 + $0x150] sm:$0xf0]  ;;  %v2075_v13 = vld [vmem:[%s2821_s27 + $0x1d8] sm:$0x33]  ;;  %v2041_v16 = vor.u32 %v2257_v4, %v2038_v8  ;;  %v2029_v17 = vor.u32 %v2258_v10, %v2028_v9  ;;  %v1430_v62 = vpack.c.b16 %v1418_v58, %v1418_v58  ;;  %v2144_v8 = vld [vmem:[%s2821_s27 + $0x200] sm:$0xf] }
  0x95   : > { %v1241_v20 = vunpack.c.h.b16 %v2075_v13  ;;  %v1427_v63 = vpack.c.b16 %v1415_v59, %v1415_v59  ;;  %v2154_v4 = vld [vmem:[%s2821_s27 + $0x218] sm:$0xf0]  ;;  %v2278_v9 = vld [vmem:[%s2821_s27 + $0x20c] sm:$0xf0]  ;;  %v2188_v59 = vld [vmem:[%s2821_s27 + $0x248] sm:$0xf0] }
  0x96   : > { %v2281_v58 = vld [vmem:[%s2821_s27 + $0x23c] sm:$0xf] }
  0x97   : > { %947 = vmatpush.bf16.msrb.mxu2 %v911_v18  ;;  %960 = vmatpush.bf16.msrb.mxu3 %v914_v19  ;;  %v2033_v18 = vor.u32 %v2256_v11, %v2030_v12  ;;  %v1240_v19 = vunpack.c.l.b16 %v2075_v13  ;;  %v1253_v24 = vpack.c.b16 %v1241_v20, %v1241_v20  ;;  %v1440_v10 = vsel %vm384_vm0, %v1427_v63, 0  ;;  %v2276_v12 = vld [vmem:[%s2821_s27 + $0x204] sm:$0xf]  ;;  %v2146_v13 = vld [vmem:[%s2821_s27 + $0x210] sm:$0xf0] }
  0x98   : > { %921 = vmatpush.bf16.msrb.mxu0 %v905_v22  ;;  %934 = vmatpush.bf16.msrb.mxu1 %v908_v23  ;;  %v1239_v22 = vunpack.c.h.b16 %v2074_v14  ;;  %v2149_v20 = vor.u32 %v2276_v12, %v2146_v13  ;;  %v2180_v63 = vld [vmem:[%s2821_s27 + $0x240] sm:$0xf0] }
  0x99   : > { %v1252_v23 = vpack.c.b16 %v1240_v19, %v1240_v19  ;;  %v2145_v19 = vor.u32 %v2278_v9, %v2144_v8 }
  0x9a   : > { %v1251_v26 = vpack.c.b16 %v1239_v22, %v1239_v22  ;;  %v2128_v22 = vld [vmem:[%s2821_s27 + $0x1e0] sm:$0xf] }
  0x9b   : > { %948 = vmatpush.bf16.msrb.mxu2 %v2003_v27  ;;  %961 = vmatpush.bf16.msrb.mxu3 %v2007_v28  ;;  %v2102_v27 = vld [vmem:[%s2821_s27 + $0x1b8] sm:$0xf]  ;;  %v2271_v28 = vld [vmem:[%s2821_s27 + $0x1c4] sm:$0xf0]  ;;  %v1269_v31 = vsel %vm384_vm0, %v1252_v23, 0 }
  0x9c   : > { %922 = vmatpush.bf16.msrb.mxu0 %v1995_v32  ;;  %935 = vmatpush.bf16.msrb.mxu1 %v1999_v33  ;;  %v1272_v32 = vsel %vm384_vm0, %v1253_v24, 0  ;;  %v2094_v33 = vld [vmem:[%s2821_s27 + $0x1b0] sm:$0xf]  ;;  %v1266_v36 = vsel %vm384_vm0, %v1251_v26, 0  ;;  %v2103_v39 = vor.u32 %v2271_v28, %v2102_v27  ;;  %v2272_v24 = vld [vmem:[%s2821_s27 + $0x1e4] sm:$0xf] }
  0x9d   : > { %1958 = vmatmul.msk.bf16.vlgmr.msra.gmra.mxu0 %vm380_vm1, %v2857_v7  ;;  %1959 = vmatmul.msk.bf16.vlgmr.msra.gmra.mxu1 %vm380_vm1, %v2857_v7  ;;  %v2095_v44 = vor.u32 %v2270_v34, %v2094_v33  ;;  %v2274_v23 = vld [vmem:[%s2821_s27 + $0x1ec] sm:$0xf0]  ;;  %v2175_v26 = vld [vmem:[%s2821_s27 + $0x278] sm:$0x33] }
  0x9e   : > { %1960 = vmatmul.msk.bf16.vlgmr.msra.gmra.mxu2 %vm380_vm1, %v2857_v7  ;;  %1961 = vmatmul.msk.bf16.vlgmr.msra.gmra.mxu3 %vm380_vm1, %v2857_v7  ;;  %v2174_v27 = vld [vmem:[%s2821_s27 + $0x270] sm:$0x33]  ;;  %v2129_v30 = vor.u32 %v2274_v23, %v2128_v22  ;;  %v1595_v33 = vunpack.c.h.b16 %v2175_v26 }
  0x9f   : > { %949 = vmatpush.bf16.msrb.mxu2 %v1987_v42  ;;  %962 = vmatpush.bf16.msrb.mxu3 %v1991_v43  ;;  %v2267_v42 = vld [vmem:[%s2821_s27 + $0x1a4] sm:$0xf0]  ;;  %v2265_v43 = vld [vmem:[%s2821_s27 + $0x19c] sm:$0xf]  ;;  %v1592_v34 = vunpack.c.l.b16 %v2174_v27 }
  0xa0   : > { %923 = vmatpush.bf16.msrb.mxu0 %v1979_v46  ;;  %936 = vmatpush.bf16.msrb.mxu1 %v1983_v47  ;;  %v2088_v46 = vld [vmem:[%s2821_s27 + $0x1a8] sm:$0xf0]  ;;  %v2078_v47 = vld [vmem:[%s2821_s27 + $0x190] sm:$0xf]  ;;  %v2087_v53 = vor.u32 %v2267_v42, %v2086_v41  ;;  %v1607_v37 = vpack.c.b16 %v1595_v33, %v1595_v33  ;;  %v2287_v41 = vld [vmem:[%s2821_s27 + $0x264] sm:$0xf0] }
  0xa1   : > { %v2091_v54 = vor.u32 %v2265_v43, %v2088_v46  ;;  %v2079_v55 = vor.u32 %v2266_v48, %v2078_v47  ;;  %v1604_v38 = vpack.c.b16 %v1592_v34, %v1592_v34  ;;  %v2285_v42 = vld [vmem:[%s2821_s27 + $0x25c] sm:$0xf]  ;;  %v2204_v43 = vld [vmem:[%s2821_s27 + $0x268] sm:$0xf0]  ;;  %v2194_v46 = vld [vmem:[%s2821_s27 + $0x250] sm:$0xf] }
  0xa2   : > { %v2286_v47 = vld [vmem:[%s2821_s27 + $0x25c] sm:$0xf0] }
  0xa3   : > { %1128 = vmatpush.bf16.msra.mxu2 %v1092_v56  ;;  %1141 = vmatpush.bf16.msra.mxu3 %v1095_v57  ;;  %v2083_v56 = vor.u32 %v2264_v49, %v2080_v50  ;;  %v1417_v57 = vunpack.c.l.b16 %v2125_v51  ;;  %v1617_v48 = vsel %vm384_vm0, %v1604_v38, 0  ;;  %v2284_v50 = vld [vmem:[%s2821_s27 + $0x254] sm:$0xf]  ;;  %v2196_v51 = vld [vmem:[%s2821_s27 + $0x260] sm:$0xf0] }
  0xa4   : > { %1102 = vmatpush.bf16.msra.mxu0 %v1086_v60  ;;  %1115 = vmatpush.bf16.msra.mxu1 %v1089_v61  ;;  %v1416_v60 = vunpack.c.h.b16 %v2124_v52 }
  0xa5   : > { %v1429_v61 = vpack.c.b16 %v1417_v57, %v1417_v57  ;;  %v2199_v57 = vor.u32 %v2284_v50, %v2196_v51 }
  0xa7   : > { %1129 = vmatpush.bf16.msra.mxu2 %v2053_v0  ;;  %1142 = vmatpush.bf16.msra.mxu3 %v2057_v1  ;;  %v1428_v0 = vpack.c.b16 %v1416_v60, %v1416_v60  ;;  %v2152_v1 = vld [vmem:[%s2821_s27 + $0x208] sm:$0xf]  ;;  %v2178_v60 = vld [vmem:[%s2821_s27 + $0x230] sm:$0xf] }
  0xa8   : > { %1103 = vmatpush.bf16.msra.mxu0 %v2045_v5  ;;  %1116 = vmatpush.bf16.msra.mxu1 %v2049_v6  ;;  %v1446_v5 = vsel %vm384_vm0, %v1429_v61, 0  ;;  %v1449_v6 = vsel %vm384_vm0, %v1430_v62, 0  ;;  %v2153_v14 = vor.u32 %v2279_v2, %v2152_v1  ;;  %v2282_v61 = vld [vmem:[%s2821_s27 + $0x23c] sm:$0xf0]  ;;  %v2280_v62 = vld [vmem:[%s2821_s27 + $0x234] sm:$0xf]  ;;  %v2191_v1 = vor.u32 %v2281_v58, %v2188_v59 }
  0xa9   : > { %v1443_v11 = vsel %vm384_vm0, %v1428_v0, 0  ;;  %v2179_v2 = vor.u32 %v2282_v61, %v2178_v60 }
  0xab   : > { %1130 = vmatpush.bf16.msra.mxu2 %v2037_v15  ;;  %1143 = vmatpush.bf16.msra.mxu3 %v2041_v16  ;;  %v2157_v15 = vor.u32 %v2277_v3, %v2154_v4  ;;  %v2136_v16 = vld [vmem:[%s2821_s27 + $0x1e8] sm:$0xf]  ;;  %v2183_v3 = vor.u32 %v2280_v62, %v2180_v63 }
  0xac   : > { %1104 = vmatpush.bf16.msra.mxu0 %v2029_v17  ;;  %1117 = vmatpush.bf16.msra.mxu1 %v2033_v18  ;;  %v2275_v17 = vld [vmem:[%s2821_s27 + $0x1f4] sm:$0xf0]  ;;  %v2273_v18 = vld [vmem:[%s2821_s27 + $0x1ec] sm:$0xf] }
  0xad   : > { %2008 = vmatmul.msk.bf16.vlgmr.msrb.gmra.mxu0 %vm380_vm1, %v2857_v7  ;;  %2009 = vmatmul.msk.bf16.vlgmr.msrb.gmra.mxu1 %vm380_vm1, %v2857_v7  ;;  %v2137_v28 = vor.u32 %v2275_v17, %v2136_v16  ;;  %v2141_v29 = vor.u32 %v2273_v18, %v2138_v21 }
  0xae   : > { %2010 = vmatmul.msk.bf16.vlgmr.msrb.gmra.mxu2 %vm380_vm1, %v2857_v7  ;;  %2011 = vmatmul.msk.bf16.vlgmr.msrb.gmra.mxu3 %vm380_vm1, %v2857_v7 }
  0xaf   : > { %1305 = vmatpush.bf16.msrb.mxu2 %v1269_v31  ;;  %1318 = vmatpush.bf16.msrb.mxu3 %v1272_v32  ;;  %v2133_v31 = vor.u32 %v2272_v24, %v2130_v25  ;;  %v1594_v32 = vunpack.c.l.b16 %v2175_v26 }
  0xb0   : > { %1279 = vmatpush.bf16.msrb.mxu0 %v1263_v35  ;;  %1292 = vmatpush.bf16.msrb.mxu1 %v1266_v36  ;;  %v1593_v35 = vunpack.c.h.b16 %v2174_v27 }
  0xb1   : > { %v1606_v36 = vpack.c.b16 %v1594_v32, %v1594_v32 }
  0xb3   : > { %1306 = vmatpush.bf16.msrb.mxu2 %v2103_v39  ;;  %1319 = vmatpush.bf16.msrb.mxu3 %v2107_v40  ;;  %v1605_v39 = vpack.c.b16 %v1593_v35, %v1593_v35  ;;  %v2202_v40 = vld [vmem:[%s2821_s27 + $0x258] sm:$0xf] }
  0xb4   : > { %1280 = vmatpush.bf16.msrb.mxu0 %v2095_v44  ;;  %1293 = vmatpush.bf16.msrb.mxu1 %v2099_v45  ;;  %v1623_v44 = vsel %vm384_vm0, %v1606_v36, 0  ;;  %v1626_v45 = vsel %vm384_vm0, %v1607_v37, 0  ;;  %v2203_v52 = vor.u32 %v2287_v41, %v2202_v40 }
  0xb5   : > { %v1620_v49 = vsel %vm384_vm0, %v1605_v39, 0 }
  0xb7   : > { %1307 = vmatpush.bf16.msrb.mxu2 %v2087_v53  ;;  %1320 = vmatpush.bf16.msrb.mxu3 %v2091_v54  ;;  %v2207_v53 = vor.u32 %v2285_v42, %v2204_v43  ;;  %v2186_v54 = vld [vmem:[%s2821_s27 + $0x238] sm:$0xf] }
  0xb8   : > { %1281 = vmatpush.bf16.msrb.mxu0 %v2079_v55  ;;  %1294 = vmatpush.bf16.msrb.mxu1 %v2083_v56  ;;  %v2283_v55 = vld [vmem:[%s2821_s27 + $0x244] sm:$0xf0]  ;;  %v2195_v56 = vor.u32 %v2286_v47, %v2194_v46 }
  0xb9   : > { %v2187_v0 = vor.u32 %v2283_v55, %v2186_v54 }
  0xbd   : > { %2058 = vmatmul.msk.bf16.vlgmr.msra.gmra.mxu0 %vm380_vm1, %v2857_v7  ;;  %2059 = vmatmul.msk.bf16.vlgmr.msra.gmra.mxu1 %vm380_vm1, %v2857_v7 }
  0xbe   : > { %2060 = vmatmul.msk.bf16.vlgmr.msra.gmra.mxu2 %vm380_vm1, %v2857_v7  ;;  %2061 = vmatmul.msk.bf16.vlgmr.msra.gmra.mxu3 %vm380_vm1, %v2857_v7 }
  0xbf   : > { %1482 = vmatpush.bf16.msra.mxu2 %v1446_v5  ;;  %1495 = vmatpush.bf16.msra.mxu3 %v1449_v6  ;;  %v2596_v6 = vmov 0.0  }
  0xc0   : > { %1456 = vmatpush.bf16.msra.mxu0 %v1440_v10  ;;  %1469 = vmatpush.bf16.msra.mxu1 %v1443_v11 }
  0xc3   : > { %1483 = vmatpush.bf16.msra.mxu2 %v2153_v14  ;;  %1496 = vmatpush.bf16.msra.mxu3 %v2157_v15 }
  0xc4   : > { %1457 = vmatpush.bf16.msra.mxu0 %v2145_v19  ;;  %1470 = vmatpush.bf16.msra.mxu1 %v2149_v20 }
  0xc7   : > { %1484 = vmatpush.bf16.msra.mxu2 %v2137_v28  ;;  %1497 = vmatpush.bf16.msra.mxu3 %v2141_v29 }
  0xc8   : > { %1458 = vmatpush.bf16.msra.mxu0 %v2129_v30  ;;  %1471 = vmatpush.bf16.msra.mxu1 %v2133_v31 }
  0xcd   : > { %2108 = vmatmul.msk.bf16.vlgmr.msrb.gmra.mxu0 %vm380_vm1, %v2857_v7  ;;  %2109 = vmatmul.msk.bf16.vlgmr.msrb.gmra.mxu1 %vm380_vm1, %v2857_v7 }
  0xce   : > { %2110 = vmatmul.msk.bf16.vlgmr.msrb.gmra.mxu2 %vm380_vm1, %v2857_v7  ;;  %2111 = vmatmul.msk.bf16.vlgmr.msrb.gmra.mxu3 %vm380_vm1, %v2857_v7 }
  0xcf   : > { %1659 = vmatpush.bf16.msrb.mxu2 %v1623_v44  ;;  %1672 = vmatpush.bf16.msrb.mxu3 %v1626_v45 }
  0xd0   : > { %1633 = vmatpush.bf16.msrb.mxu0 %v1617_v48  ;;  %1646 = vmatpush.bf16.msrb.mxu1 %v1620_v49 }
  0xd3   : > { %1660 = vmatpush.bf16.msrb.mxu2 %v2203_v52  ;;  %1673 = vmatpush.bf16.msrb.mxu3 %v2207_v53 }
  0xd4   : > { %1634 = vmatpush.bf16.msrb.mxu0 %v2195_v56  ;;  %1647 = vmatpush.bf16.msrb.mxu1 %v2199_v57 }
  0xd7   : > { %1661 = vmatpush.bf16.msrb.mxu2 %v2187_v0  ;;  %1674 = vmatpush.bf16.msrb.mxu3 %v2191_v1 }
  0xd8   : > { %1635 = vmatpush.bf16.msrb.mxu0 %v2179_v2  ;;  %1648 = vmatpush.bf16.msrb.mxu1 %v2183_v3 }
  0xdd   : > { %2158 = vmatmul.msk.bf16.vlgmr.msra.gmra.mxu0 %vm380_vm1, %v2857_v7  ;;  %2159 = vmatmul.msk.bf16.vlgmr.msra.gmra.mxu1 %vm380_vm1, %v2857_v7 }
  0xde   : > { %2160 = vmatmul.msk.bf16.vlgmr.msra.gmra.mxu2 %vm380_vm1, %v2857_v7  ;;  %2161 = vmatmul.msk.bf16.vlgmr.msra.gmra.mxu3 %vm380_vm1, %v2857_v7 }
  0xed   : > { %2208 = vmatmul.msk.bf16.vlgmr.msrb.gmra.mxu0 %vm380_vm1, %v2857_v7  ;;  %2209 = vmatmul.msk.bf16.vlgmr.msrb.gmra.mxu1 %vm380_vm1, %v2857_v7 }
  0xee   : > { %2210 = vmatmul.msk.bf16.vlgmr.msrb.gmra.mxu2 %vm380_vm1, %v2857_v7  ;;  %2211 = vmatmul.msk.bf16.vlgmr.msrb.gmra.mxu3 %vm380_vm1, %v2857_v7 }
  0xfa   : > { %v406_v4 = vpop.f32.mrf.mxu0  ;;  %v419_v5 = vpop.f32.mrf.mxu1 }
  0xfb   : > { %vm453_vm2 = vcmp.ge.f32.partialorder %v406_v4, 1.0  ;;  %vm454_vm3 = vcmp.ge.f32.partialorder %v419_v5, 1.0  ;;  %v614_v36 = vmul.f32 0.7, %v406_v4  ;;  %v615_v37 = vmul.f32 0.7, %v419_v5 }
  0xfc   : > { %v1862_v8 = vsel %vm453_vm2, 1.0, %v2596_v6  ;;  %v3070_v9 = vsel %vm454_vm3, 1.0, %v2596_v6 }
  0xfd   : > { %v2293_v10 = vcvt.f32.s32 %v1862_v8  ;;  %v2301_v11 = vcvt.f32.s32 %v3070_v9  ;;  %v465_v12 = vsub.f32 1.0, %v1862_v8  ;;  %v466_v7 = vsub.f32 1.0, %v3070_v9 }
  0xfe   : > { %v2291_v22 = vand.u32 2147483647, %v1862_v8  ;;  %v2296_v25 = vand.u32 2147483648, %v1862_v8  ;;  %v2299_v28 = vand.u32 2147483647, %v3070_v9  ;;  %v2304_v30 = vand.u32 2147483648, %v3070_v9 }
  0xff   : > { %v2294_v15 = vcvt.s32.f32 %v2293_v10  ;;  %v2302_v19 = vcvt.s32.f32 %v2301_v11  ;;  %v469_v21 = vmul.f32 %v465_v12, %v406_v4  ;;  %v470_v26 = vmul.f32 %v466_v7, %v419_v5 }
 0x100   : > { %vm3087_vm6 = vcmp.lt.f32.partialorder %v2291_v22, 8388608.0  ;;  %vm3097_vm7 = vcmp.lt.f32.partialorder %v2299_v28, 8388608.0 }
 0x101   : > { %v432_v13 = vpop.f32.mrf.mxu2  ;;  %v3073_v14 = vpop.f32.mrf.mxu3  ;;  %v2295_v24 = vand.u32 2147483647, %v2294_v15  ;;  %v2303_v29 = vand.u32 2147483647, %v2302_v19  ;;  %v622_v33 = vmul.f32 0.75, %v469_v21  ;;  %v623_v39 = vmul.f32 0.75, %v470_v26 }
 0x102   : > { %vm455_vm4 = vcmp.ge.f32.partialorder %v432_v13, 1.0  ;;  %vm456_vm5 = vcmp.ge.f32.partialorder %v3073_v14, 1.0  ;;  %v408_v16 = vpop.f32.mrf.mxu0  ;;  %v421_v17 = vpop.f32.mrf.mxu1  ;;  %v616_v4 = vmul.f32 0.7, %v432_v13 }
 0x103   : > { %v3078_v18 = vsel %vm455_vm4, 1.0, %v2596_v6  ;;  %v3082_v23 = vsel %vm456_vm5, 1.0, %v2596_v6  ;;  %v2297_v38 = vor.u32 %v2296_v25, %v2295_v24  ;;  %v2305_v49 = vor.u32 %v2304_v30, %v2303_v29 }
 0x104   : > { %v2309_v20 = vcvt.f32.s32 %v3078_v18  ;;  %v2317_v31 = vcvt.f32.s32 %v3082_v23  ;;  %v467_v40 = vsub.f32 1.0, %v3078_v18  ;;  %v468_v45 = vsub.f32 1.0, %v3082_v23 }
 0x105   : > { %v2307_v51 = vand.u32 2147483647, %v3078_v18  ;;  %v2312_v52 = vand.u32 2147483648, %v3078_v18  ;;  %v2298_v55 = vsel %vm3087_vm6, %v2297_v38, %v1862_v8  ;;  %v2315_v57 = vand.u32 2147483647, %v3082_v23 }
 0x106   : > { %v2310_v27 = vcvt.s32.f32 %v2309_v20  ;;  %v2318_v41 = vcvt.s32.f32 %v2317_v31  ;;  %v471_v56 = vmul.f32 %v467_v40, %v432_v13  ;;  %v2320_v58 = vand.u32 2147483648, %v3082_v23 }
 0x107   : > { %v472_v60 = vmul.f32 %v468_v45, %v3073_v14  ;;  %v3114_v0 = vmax.f32 %v2298_v55, 0.0  ;;  %v2306_v1 = vsel %vm3097_vm7, %v2305_v49, %v3070_v9  ;;  %vm3119_vm10 = vcmp.lt.f32.partialorder %v2307_v51, 8388608.0 }
 0x108   : > { %v2311_v44 = vand.u32 2147483647, %v2310_v27  ;;  %v2319_v50 = vand.u32 2147483647, %v2318_v41  ;;  %v624_v10 = vmul.f32 0.75, %v471_v56  ;;  %vm3123_vm11 = vcmp.lt.f32.partialorder %v2315_v57, 8388608.0 }
 0x109   : > { %v434_v34 = vpop.f32.mrf.mxu2  ;;  %v447_v35 = vpop.f32.mrf.mxu3  ;;  %v625_v16 = vmul.f32 0.75, %v472_v60  ;;  %v617_v17 = vmul.f32 0.7, %v3073_v14  ;;  %v481_v28 = vmin.f32 %v3114_v0, 255.0  ;;  %v3138_v29 = vmax.f32 %v2306_v1, 0.0 }
 0x10a   : > { %v571_v42 = vpop.f32.mrf.mxu0  ;;  %v584_v43 = vpop.f32.mrf.mxu1  ;;  %v2313_v59 = vor.u32 %v2312_v52, %v2311_v44  ;;  %v2321_v61 = vor.u32 %v2320_v58, %v2319_v50 }
 0x10b   : > { %v3093_v46 = vadd.f32 %v614_v36, %v571_v42  ;;  %v3095_v47 = vadd.f32 %v615_v37, %v584_v43  ;;  %v482_v41 = vmin.f32 %v3138_v29, 255.0 }
 0x10c   : > { %v2314_v9 = vsel %vm3119_vm10, %v2313_v59, %v3078_v18  ;;  %v2322_v19 = vsel %vm3123_vm11, %v2321_v61, %v3082_v23 }
 0x10d   : > { %v626_v53 = vadd.f32 %v622_v33, %v3093_v46  ;;  %v627_v54 = vadd.f32 %v623_v39, %v3095_v47  ;;  %v3143_v33 = vmax.f32 %v2314_v9, 0.0  ;;  %v3145_v34 = vmax.f32 %v2322_v19, 0.0 }
 0x10e   : > { %v791_v51 = vmul.f32 0.7, %v3093_v46  ;;  %v792_v52 = vmul.f32 0.7, %v3095_v47 }
 0x10f   : > { %vm630_vm8 = vcmp.ge.f32.partialorder %v626_v53, 1.0  ;;  %vm631_vm9 = vcmp.ge.f32.partialorder %v627_v54, 1.0  ;;  %v484_v55 = vmin.f32 %v3145_v34, 255.0 }
 0x110   : > { %v1912_v62 = vsel %vm630_vm8, 1.0, %v2596_v6  ;;  %v3112_v63 = vsel %vm631_vm9, 1.0, %v2596_v6 }
 0x111   : > { %v2325_v2 = vcvt.f32.s32 %v1912_v62  ;;  %v597_v3 = vpop.f32.mrf.mxu2  ;;  %v610_v5 = vpop.f32.mrf.mxu3  ;;  %v2333_v12 = vcvt.f32.s32 %v3112_v63  ;;  %v642_v20 = vsub.f32 1.0, %v1912_v62  ;;  %v2323_v21 = vand.u32 2147483647, %v1912_v62 }
 0x112   : > { %v573_v15 = vpop.f32.mrf.mxu0  ;;  %v586_v7 = vpop.f32.mrf.mxu1  ;;  %v2328_v25 = vand.u32 2147483648, %v1912_v62  ;;  %v620_v26 = vadd.f32 %v616_v4, %v597_v3  ;;  %v3135_v27 = vadd.f32 %v617_v17, %v610_v5  ;;  %v643_v18 = vsub.f32 1.0, %v3112_v63 }
 0x113   : > { %v2326_v13 = vcvt.s32.f32 %v2325_v2  ;;  %v2334_v22 = vcvt.s32.f32 %v2333_v12  ;;  %v2336_v31 = vand.u32 2147483648, %v3112_v63  ;;  %v646_v35 = vmul.f32 %v642_v20, %v626_v53 }
 0x114   : > { %v628_v32 = vadd.f32 %v624_v10, %v620_v26  ;;  %v629_v23 = vadd.f32 %v625_v16, %v3135_v27  ;;  %v2331_v36 = vand.u32 2147483647, %v3112_v63  ;;  %vm3148_vm12 = vcmp.lt.f32.partialorder %v2323_v21, 8388608.0 }
 0x115   : > { %v2327_v24 = vand.u32 2147483647, %v2326_v13  ;;  %v2335_v30 = vand.u32 2147483647, %v2334_v22  ;;  %v647_v43 = vmul.f32 %v643_v18, %v627_v54  ;;  %v483_v53 = vmin.f32 %v3143_v33, 255.0 }
 0x116   : > { %vm632_vm13 = vcmp.ge.f32.partialorder %v628_v32, 1.0  ;;  %vm633_vm14 = vcmp.ge.f32.partialorder %v629_v23, 1.0  ;;  %vm2332_vm15 = vcmp.lt.f32.partialorder %v2331_v36, 8388608.0  ;;  %v799_v59 = vmul.f32 0.75, %v646_v35 }
 0x117   : > { %v2329_v14 = vor.u32 %v2328_v25, %v2327_v24  ;;  %v2337_v38 = vor.u32 %v2336_v31, %v2335_v30  ;;  %v1914_v44 = vsel %vm632_vm13, 1.0, %v2596_v6  ;;  %v3157_v50 = vsel %vm633_vm14, 1.0, %v2596_v6 }
 0x118   : > { %v2341_v49 = vcvt.f32.s32 %v1914_v44  ;;  %v644_v56 = vsub.f32 1.0, %v1914_v44  ;;  %v2339_v60 = vand.u32 2147483647, %v1914_v44  ;;  %v645_v61 = vsub.f32 1.0, %v3157_v50 }
 0x119   : > { %v599_v39 = vpop.f32.mrf.mxu2  ;;  %v612_v40 = vpop.f32.mrf.mxu3  ;;  %v2330_v42 = vsel %vm3148_vm12, %v2329_v14, %v1912_v62  ;;  %v2338_v54 = vsel %vm2332_vm15, %v2337_v38, %v3112_v63  ;;  %v2349_v62 = vcvt.f32.s32 %v3157_v50  ;;  %v800_v1 = vmul.f32 0.75, %v647_v43 }
 0x11a   : > { %v748_v45 = vpop.f32.mrf.mxu0  ;;  %v761_v48 = vpop.f32.mrf.mxu1  ;;  %v654_v57 = vmax.f32 %v2330_v42, 0.0  ;;  %v2342_v58 = vcvt.s32.f32 %v2341_v49  ;;  %v2344_v2 = vand.u32 2147483648, %v1914_v44  ;;  %v793_v3 = vmul.f32 0.7, %v620_v26 }
 0x11b   : > { %v795_v47 = vadd.f32 %v791_v51, %v748_v45  ;;  %v3166_v4 = vmax.f32 %v2338_v54, 0.0  ;;  %v648_v5 = vmul.f32 %v644_v56, %v628_v32  ;;  %v2350_v8 = vcvt.s32.f32 %v2349_v62 }
 0x11c   : > { %v2343_v46 = vand.u32 2147483647, %v2342_v58  ;;  %v796_v10 = vadd.f32 %v792_v52, %v761_v48  ;;  %v658_v11 = vmin.f32 %v654_v57, 255.0  ;;  %v2347_v63 = vand.u32 2147483647, %v3157_v50 }
 0x11d   : > { %v803_v15 = vadd.f32 %v799_v59, %v795_v47  ;;  %vm3169_vm0 = vcmp.lt.f32.partialorder %v2339_v60, 8388608.0  ;;  %v649_v13 = vmul.f32 %v645_v61, %v629_v23  ;;  %v2351_v24 = vand.u32 2147483647, %v2350_v8 }
 0x11e   : > { %v2345_v12 = vor.u32 %v2344_v2, %v2343_v46  ;;  %v804_v17 = vadd.f32 %v800_v1, %v796_v10  ;;  %v794_v25 = vmul.f32 0.7, %v3135_v27  ;;  %v659_v26 = vmin.f32 %v3166_v4, 255.0 }
 0x11f   : > { %vm807_vm1 = vcmp.ge.f32.partialorder %v803_v15, 1.0  ;;  %v801_v30 = vmul.f32 0.75, %v648_v5  ;;  %v3182_v14 = vadd.f32 %v658_v11, %v481_v28  ;;  %vm3184_vm3 = vcmp.lt.f32.partialorder %v2347_v63, 8388608.0 }
 0x120   : > { %v2346_v22 = vsel %vm3169_vm0, %v2345_v12, %v1914_v44  ;;  %v1962_v18 = vsel %vm807_vm1, 1.0, %v2596_v6  ;;  %vm808_vm2 = vcmp.ge.f32.partialorder %v804_v17, 1.0  ;;  %v2352_v32 = vand.u32 2147483648, %v3157_v50 }
 0x121   : > { %v774_v7 = vpop.f32.mrf.mxu2  ;;  %v787_v9 = vpop.f32.mrf.mxu3  ;;  %v2357_v23 = vcvt.f32.s32 %v1962_v18  ;;  %v656_v35 = vmax.f32 %v2346_v22, 0.0  ;;  %v1963_v27 = vsel %vm808_vm2, 1.0, %v2596_v6  ;;  %v802_v37 = vmul.f32 0.75, %v649_v13 }
 0x122   : > { %v3173_v19 = vadd.f32 %v793_v3, %v774_v7  ;;  %v750_v20 = vpop.f32.mrf.mxu0  ;;  %v763_v21 = vpop.f32.mrf.mxu1  ;;  %v2353_v38 = vor.u32 %v2352_v32, %v2351_v24  ;;  %v819_v39 = vsub.f32 1.0, %v1962_v18  ;;  %v2355_v40 = vand.u32 2147483647, %v1962_v18 }
 0x123   : > { %v2358_v42 = vcvt.s32.f32 %v2357_v23  ;;  %v2360_v0 = vand.u32 2147483648, %v1962_v18  ;;  %v2365_v28 = vcvt.f32.s32 %v1963_v27  ;;  %v3191_v43 = vadd.f32 %v794_v25, %v787_v9 }
 0x124   : > { %v805_v36 = vadd.f32 %v801_v30, %v3173_v19  ;;  %v968_v44 = vmul.f32 0.7, %v795_v47  ;;  %v820_v48 = vsub.f32 1.0, %v1963_v27  ;;  %v2363_v49 = vand.u32 2147483647, %v1963_v27 }
 0x125   : > { %v2359_v45 = vand.u32 2147483647, %v2358_v42  ;;  %v660_v56 = vmin.f32 %v656_v35, 255.0  ;;  %v2366_v57 = vcvt.s32.f32 %v2365_v28  ;;  %v969_v60 = vmul.f32 0.7, %v796_v10 }
 0x126   : > { %vm809_vm4 = vcmp.ge.f32.partialorder %v805_v36, 1.0  ;;  %v2354_v61 = vsel %vm3184_vm3, %v2353_v38, %v3157_v50  ;;  %v823_v62 = vmul.f32 %v819_v39, %v803_v15  ;;  %vm3199_vm5 = vcmp.lt.f32.partialorder %v2355_v40, 8388608.0 }
 0x127   : > { %v3194_v54 = vsel %vm809_vm4, 1.0, %v2596_v6  ;;  %v2361_v46 = vor.u32 %v2360_v0, %v2359_v45  ;;  %v2367_v2 = vand.u32 2147483647, %v2366_v57  ;;  %v2368_v47 = vand.u32 2147483648, %v1963_v27 }
 0x128   : > { %v2373_v3 = vcvt.f32.s32 %v3194_v54  ;;  %v806_v4 = vadd.f32 %v802_v37, %v3191_v43  ;;  %v824_v8 = vmul.f32 %v820_v48, %v804_v17  ;;  %vm2364_vm6 = vcmp.lt.f32.partialorder %v2363_v49, 8388608.0 }
 0x129   : > { %v776_v51 = vpop.f32.mrf.mxu2  ;;  %v789_v52 = vpop.f32.mrf.mxu3  ;;  %v2362_v5 = vsel %vm3199_vm5, %v2361_v46, %v1962_v18  ;;  %v821_v10 = vsub.f32 1.0, %v3194_v54  ;;  %v2369_v50 = vor.u32 %v2368_v47, %v2367_v2  ;;  %v2371_v63 = vand.u32 2147483647, %v3194_v54 }
 0x12a   : > { %v925_v58 = vpop.f32.mrf.mxu0  ;;  %v938_v59 = vpop.f32.mrf.mxu1  ;;  %v2374_v11 = vcvt.s32.f32 %v2373_v3  ;;  %vm810_vm7 = vcmp.ge.f32.partialorder %v806_v4, 1.0  ;;  %v2376_v15 = vand.u32 2147483648, %v3194_v54  ;;  %v831_v16 = vmax.f32 %v2362_v5, 0.0 }
 0x12b   : > { %v3208_v12 = vadd.f32 %v968_v44, %v925_v58  ;;  %v3213_v7 = vsel %vm810_vm7, 1.0, %v2596_v6  ;;  %v3215_v9 = vadd.f32 %v969_v60, %v938_v59  ;;  %v2370_v13 = vsel %vm2364_vm6, %v2369_v50, %v1963_v27 }
 0x12c   : > { %v2375_v17 = vand.u32 2147483647, %v2374_v11  ;;  %v976_v20 = vmul.f32 0.75, %v823_v62  ;;  %v663_v21 = vadd.f32 %v659_v26, %v482_v41  ;;  %v832_v22 = vmax.f32 %v2370_v13, 0.0 }
 0x12d   : > { %v2381_v24 = vcvt.f32.s32 %v3213_v7  ;;  %v977_v25 = vmul.f32 0.75, %v824_v8  ;;  %v3222_v31 = vadd.f32 %v660_v56, %v483_v53  ;;  %v3224_v32 = vmax.f32 %v2354_v61, 0.0 }
 0x12e   : > { %v2377_v23 = vor.u32 %v2376_v15, %v2375_v17  ;;  %v980_v35 = vadd.f32 %v976_v20, %v3208_v12  ;;  %v825_v38 = vmul.f32 %v821_v10, %v805_v36  ;;  %vm3227_vm8 = vcmp.lt.f32.partialorder %v2371_v63, 8388608.0 }
 0x12f   : > { %v2382_v41 = vcvt.s32.f32 %v2381_v24  ;;  %v3232_v26 = vadd.f32 %v977_v25, %v3215_v9  ;;  %v835_v39 = vmin.f32 %v831_v16, 255.0  ;;  %v822_v33 = vsub.f32 1.0, %v3213_v7 }
 0x130   : > { %v2379_v53 = vand.u32 2147483647, %v3213_v7  ;;  %vm984_vm9 = vcmp.ge.f32.partialorder %v980_v35, 1.0  ;;  %v836_v40 = vmin.f32 %v832_v22, 255.0  ;;  %v970_v36 = vmul.f32 0.7, %v3173_v19 }
 0x131   : > { %v951_v18 = vpop.f32.mrf.mxu2  ;;  %v964_v30 = vpop.f32.mrf.mxu3  ;;  %v2383_v42 = vand.u32 2147483647, %v2382_v41  ;;  %v2012_v0 = vsel %vm984_vm9, 1.0, %v2596_v6  ;;  %v661_v28 = vmin.f32 %v3224_v32, 255.0  ;;  %v2378_v44 = vsel %vm3227_vm8, %v2377_v23, %v3194_v54 }
 0x132   : > { %v927_v27 = vpop.f32.mrf.mxu0  ;;  %v940_v37 = vpop.f32.mrf.mxu1  ;;  %v2384_v45 = vand.u32 2147483648, %v3213_v7  ;;  %v2389_v48 = vcvt.f32.s32 %v2012_v0  ;;  %v996_v49 = vsub.f32 1.0, %v2012_v0  ;;  %v2387_v51 = vand.u32 2147483647, %v2012_v0 }
 0x133   : > { %vm985_vm10 = vcmp.ge.f32.partialorder %v3232_v26, 1.0  ;;  %v3244_v52 = vadd.f32 %v970_v36, %v951_v18  ;;  %v839_v56 = vadd.f32 %v835_v39, %v3182_v14  ;;  %v3248_v59 = vadd.f32 %v836_v40, %v663_v21 }
 0x134   : > { %v2385_v57 = vor.u32 %v2384_v45, %v2383_v42  ;;  %v2390_v58 = vcvt.s32.f32 %v2389_v48  ;;  %v2013_v19 = vsel %vm985_vm10, 1.0, %v2596_v6  ;;  %v826_v60 = vmul.f32 %v822_v33, %v806_v4 }
 0x135   : > { %vm3250_vm11 = vcmp.lt.f32.partialorder %v2379_v53, 8388608.0  ;;  %v978_v61 = vmul.f32 0.75, %v825_v38  ;;  %v3254_v46 = vmax.f32 %v2378_v44, 0.0  ;;  %v2392_v47 = vand.u32 2147483648, %v2012_v0 }
 0x136   : > { %v2391_v2 = vand.u32 2147483647, %v2390_v58  ;;  %v2397_v3 = vcvt.f32.s32 %v2013_v19  ;;  %v1000_v8 = vmul.f32 %v996_v49, %v980_v35  ;;  %vm2388_vm12 = vcmp.lt.f32.partialorder %v2387_v51, 8388608.0 }
 0x137   : > { %v982_v10 = vadd.f32 %v978_v61, %v3244_v52  ;;  %v971_v4 = vmul.f32 0.7, %v3191_v43  ;;  %v2386_v50 = vsel %vm3250_vm11, %v2385_v57, %v3213_v7  ;;  %v2395_v63 = vand.u32 2147483647, %v2013_v19 }
 0x138   : > { %v2393_v11 = vor.u32 %v2392_v47, %v2391_v2  ;;  %v2398_v15 = vcvt.s32.f32 %v2397_v3  ;;  %v2400_v16 = vand.u32 2147483648, %v2013_v19  ;;  %v979_v17 = vmul.f32 0.75, %v826_v60 }
 0x139   : > { %v953_v62 = vpop.f32.mrf.mxu2  ;;  %v966_v1 = vpop.f32.mrf.mxu3  ;;  %vm986_vm13 = vcmp.ge.f32.partialorder %v982_v10, 1.0  ;;  %v3261_v13 = vadd.f32 %v971_v4, %v964_v30  ;;  %v1149_v24 = vmul.f32 0.7, %v3208_v12  ;;  %v997_v43 = vsub.f32 1.0, %v2013_v19 }
 0x13a   : > { %v1106_v14 = vpop.f32.mrf.mxu0  ;;  %v1119_v5 = vpop.f32.mrf.mxu1  ;;  %v2394_v20 = vsel %vm2388_vm12, %v2393_v11, %v2012_v0  ;;  %v2399_v21 = vand.u32 2147483647, %v2398_v15  ;;  %v2014_v22 = vsel %vm986_vm13, 1.0, %v2596_v6  ;;  %v1157_v23 = vmul.f32 0.75, %v1000_v8 }
 0x13b   : > { %v1008_v25 = vmax.f32 %v2394_v20, 0.0  ;;  %v2405_v18 = vcvt.f32.s32 %v2014_v22  ;;  %v998_v7 = vsub.f32 1.0, %v2014_v22  ;;  %v983_v27 = vadd.f32 %v979_v17, %v3261_v13 }
 0x13c   : > { %v2401_v35 = vor.u32 %v2400_v16, %v2399_v21  ;;  %v3266_v37 = vadd.f32 %v1149_v24, %v1106_v14  ;;  %v3268_v38 = vmax.f32 %v2386_v50, 0.0  ;;  %vm2396_vm14 = vcmp.lt.f32.partialorder %v2395_v63, 8388608.0 }
 0x13d   : > { %v1012_v30 = vmin.f32 %v1008_v25, 255.0  ;;  %v2406_v29 = vcvt.s32.f32 %v2405_v18  ;;  %v2403_v12 = vand.u32 2147483647, %v2014_v22  ;;  %vm987_vm15 = vcmp.ge.f32.partialorder %v983_v27, 1.0 }
 0x13e   : > { %v2402_v33 = vsel %vm2396_vm14, %v2401_v35, %v2013_v19  ;;  %v3271_v53 = vadd.f32 %v1157_v23, %v3266_v37  ;;  %v2408_v44 = vand.u32 2147483648, %v2014_v22  ;;  %v2015_v45 = vsel %vm987_vm15, 1.0, %v2596_v6 }
 0x13f   : > { %v1009_v0 = vmax.f32 %v2402_v33, 0.0  ;;  %v2407_v36 = vand.u32 2147483647, %v2406_v29  ;;  %v1001_v48 = vmul.f32 %v997_v43, %v3232_v26  ;;  %v1002_v49 = vmul.f32 %v998_v7, %v982_v10 }
 0x140   : > { %v2413_v51 = vcvt.f32.s32 %v2015_v45  ;;  %v1150_v57 = vmul.f32 0.7, %v3215_v9  ;;  %v1016_v58 = vadd.f32 %v1012_v30, %v839_v56  ;;  %vm1165_vm0 = vcmp.ge.f32.partialorder %v3271_v53, 1.0 }
 0x141   : > { %v1132_v41 = vpop.f32.mrf.mxu2  ;;  %v1145_v39 = vpop.f32.mrf.mxu3  ;;  %v1013_v19 = vmin.f32 %v1009_v0, 255.0  ;;  %v2409_v60 = vor.u32 %v2408_v44, %v2407_v36  ;;  %vm2404_vm1 = vcmp.lt.f32.partialorder %v2403_v12, 8388608.0  ;;  %v999_v54 = vsub.f32 1.0, %v2015_v45 }
 0x142   : > { %v1108_v40 = vpop.f32.mrf.mxu0  ;;  %v1121_v42 = vpop.f32.mrf.mxu1  ;;  %v2414_v61 = vcvt.s32.f32 %v2413_v51  ;;  %v3280_v62 = vsel %vm1165_vm0, 1.0, %v2596_v6  ;;  %v2411_v2 = vand.u32 2147483647, %v2015_v45  ;;  %v3283_v47 = vadd.f32 %v1150_v57, %v1119_v5 }
 0x143   : > { %v1017_v1 = vadd.f32 %v1013_v19, %v3248_v59  ;;  %v2410_v26 = vsel %vm2404_vm1, %v2409_v60, %v2014_v22  ;;  %v2416_v3 = vand.u32 2147483648, %v2015_v45  ;;  %v2421_v14 = vcvt.f32.s32 %v3280_v62 }
 0x144   : > { %v1010_v9 = vmax.f32 %v2410_v26, 0.0  ;;  %v2415_v56 = vand.u32 2147483647, %v2414_v61  ;;  %v665_v8 = vadd.f32 %v661_v28, %v484_v55  ;;  %v837_v10 = vmin.f32 %v3254_v46, 255.0 }
 0x145   : > { %v1020_v4 = vpack.c.bf16 %v1017_v1, %v1016_v58  ;;  %v1158_v50 = vmul.f32 0.75, %v1001_v48  ;;  %v838_v63 = vmin.f32 %v3268_v38, 255.0  ;;  %v1003_v5 = vmul.f32 %v999_v54, %v983_v27 }
 0x146   : > { %v2417_v15 = vor.u32 %v2416_v3, %v2415_v56  ;;  %v1151_v16 = vmul.f32 0.7, %v3244_v52  ;;  %v1014_v34 = vmin.f32 %v1010_v9, 255.0  ;;  %vm2412_vm2 = vcmp.lt.f32.partialorder %v2411_v2, 8388608.0 }
 0x147   : > { %1022 = vst [vmem:[%s3293_s3] sm:$0xff] %v1020_v4  ;;  %v2422_v55 = vcvt.s32.f32 %v2421_v14  ;;  %v1162_v32 = vadd.f32 %v1158_v50, %v3283_v47  ;;  %v1159_v21 = vmul.f32 0.75, %v1002_v49  ;;  %v1152_v22 = vmul.f32 0.7, %v3261_v13 }
 0x148   : > { %v2418_v28 = vsel %vm2412_vm2, %v2417_v15, %v2015_v45  ;;  %v1155_v46 = vadd.f32 %v1151_v16, %v1132_v41  ;;  %v841_v24 = vadd.f32 %v837_v10, %v3222_v31  ;;  %v1177_v52 = vsub.f32 1.0, %v3280_v62 }
 0x149   : > { %v1134_v11 = vpop.f32.mrf.mxu2  ;;  %v1147_v59 = vpop.f32.mrf.mxu3  ;;  %v1011_v25 = vmax.f32 %v2418_v28, 0.0  ;;  %vm1166_vm3 = vcmp.ge.f32.partialorder %v1162_v32, 1.0  ;;  %v3303_v23 = vadd.f32 %v1152_v22, %v1145_v39  ;;  %v842_v35 = vadd.f32 %v838_v63, %v665_v8 }
 0x14a   : > { %v1283_v17 = vpop.f32.mrf.mxu0  ;;  %v1296_v20 = vpop.f32.mrf.mxu1  ;;  %v3301_v43 = vsel %vm1166_vm3, 1.0, %v2596_v6  ;;  %v1163_v18 = vadd.f32 %v1159_v21, %v1155_v46  ;;  %v1018_v7 = vadd.f32 %v1014_v34, %v841_v24  ;;  %v2423_v38 = vand.u32 2147483647, %v2422_v55 }
 0x14b   : > { %v1015_v27 = vmin.f32 %v1011_v25, 255.0  ;;  %v1160_v30 = vmul.f32 0.75, %v1003_v5  ;;  %v1181_v31 = vmul.f32 %v1177_v52, %v3271_v53  ;;  %v2429_v13 = vcvt.f32.s32 %v3301_v43 }
 0x14c   : > { %vm1167_vm4 = vcmp.ge.f32.partialorder %v1163_v18, 1.0  ;;  %v1326_v41 = vmul.f32 0.7, %v3266_v37  ;;  %v2424_v39 = vand.u32 2147483648, %v3280_v62  ;;  %v1178_v40 = vsub.f32 1.0, %v3301_v43 }
 0x14d   : > { %v1019_v29 = vadd.f32 %v1015_v27, %v842_v35  ;;  %v1164_v42 = vadd.f32 %v1160_v30, %v3303_v23  ;;  %v2419_v45 = vand.u32 2147483647, %v3280_v62  ;;  %v3315_v53 = vsel %vm1167_vm4, 1.0, %v2596_v6 }
 0x14e   : > { %v3317_v48 = vadd.f32 %v1326_v41, %v1283_v17  ;;  %v2425_v37 = vor.u32 %v2424_v39, %v2423_v38  ;;  %v2430_v49 = vcvt.s32.f32 %v2429_v13  ;;  %v1334_v51 = vmul.f32 0.75, %v1181_v31 }
 0x14f   : > { %v1021_v44 = vpack.c.bf16 %v1019_v29, %v1018_v7  ;;  %v1182_v57 = vmul.f32 %v1178_v40, %v1162_v32  ;;  %v1179_v58 = vsub.f32 1.0, %v3315_v53  ;;  %v2437_v19 = vcvt.f32.s32 %v3315_v53 }
 0x150   : > { %vm1168_vm5 = vcmp.ge.f32.partialorder %v1164_v42, 1.0  ;;  %vm3322_vm6 = vcmp.lt.f32.partialorder %v2419_v45, 8388608.0  ;;  %v1338_v54 = vadd.f32 %v1334_v51, %v3317_v48  ;;  %v1327_v61 = vmul.f32 0.7, %v3283_v47 }
 0x151   : > { %v1309_v33 = vpop.f32.mrf.mxu2  ;;  %v3308_v12 = vpop.f32.mrf.mxu3  ;;  %1023 = vst [vmem:[%s3293_s3 + $0x8] sm:$0xff] %v1021_v44  ;;  %v2426_v1 = vsel %vm3322_vm6, %v2425_v37, %v3280_v62  ;;  %v2431_v26 = vand.u32 2147483647, %v2430_v49  ;;  %v3332_v2 = vsel %vm1168_vm5, 1.0, %v2596_v6  ;;  %v1183_v14 = vmul.f32 %v1179_v58, %v1163_v18 }
 0x152   : > { %v1285_v0 = vpop.f32.mrf.mxu0  ;;  %v1298_v36 = vpop.f32.mrf.mxu1  ;;  %vm1342_vm7 = vcmp.ge.f32.partialorder %v1338_v54, 1.0  ;;  %v3334_v9 = vadd.f32 %v1327_v61, %v1296_v20  ;;  %v2438_v8 = vcvt.s32.f32 %v2437_v19  ;;  %v1335_v4 = vmul.f32 0.75, %v1182_v57 }
 0x153   : > { %v2112_v10 = vsel %vm1342_vm7, 1.0, %v2596_v6  ;;  %v2432_v11 = vand.u32 2147483648, %v3301_v43  ;;  %v2427_v59 = vand.u32 2147483647, %v3301_v43  ;;  %v1180_v63 = vsub.f32 1.0, %v3332_v2 }
 0x154   : > { %v2453_v62 = vcvt.f32.s32 %v2112_v10  ;;  %v1339_v5 = vadd.f32 %v1335_v4, %v3334_v9  ;;  %v1328_v15 = vmul.f32 0.7, %v1155_v46  ;;  %v3343_v16 = vmax.f32 %v2426_v1, 0.0 }
 0x155   : > { %v2433_v17 = vor.u32 %v2432_v11, %v2431_v26  ;;  %v2445_v20 = vcvt.f32.s32 %v3332_v2  ;;  %v2439_v55 = vand.u32 2147483647, %v2438_v8  ;;  %v1336_v28 = vmul.f32 0.75, %v1183_v14 }
 0x156   : > { %v2454_v34 = vcvt.s32.f32 %v2453_v62  ;;  %vm1343_vm8 = vcmp.ge.f32.partialorder %v1339_v5, 1.0  ;;  %v3346_v32 = vadd.f32 %v1328_v15, %v1309_v33  ;;  %v1354_v21 = vsub.f32 1.0, %v2112_v10 }
 0x157   : > { %v2456_v24 = vand.u32 2147483648, %v2112_v10  ;;  %v3349_v25 = vsel %vm1343_vm8, 1.0, %v2596_v6  ;;  %v1184_v52 = vmul.f32 %v1180_v63, %v1164_v42  ;;  %v2451_v18 = vand.u32 2147483647, %v2112_v10 }
 0x158   : > { %v2455_v22 = vand.u32 2147483647, %v2454_v34  ;;  %v2461_v46 = vcvt.f32.s32 %v3349_v25  ;;  %v1329_v35 = vmul.f32 0.7, %v3303_v23  ;;  %v2440_v7 = vand.u32 2147483648, %v3315_v53 }
 0x159   : > { %v1311_v56 = vpop.f32.mrf.mxu2  ;;  %v1324_v3 = vpop.f32.mrf.mxu3  ;;  %v2446_v27 = vcvt.s32.f32 %v2445_v20  ;;  %v1340_v30 = vadd.f32 %v1336_v28, %v3346_v32  ;;  %vm3357_vm9 = vcmp.lt.f32.partialorder %v2427_v59, 8388608.0  ;;  %v2435_v41 = vand.u32 2147483647, %v3315_v53 }
 0x15a   : > { %v1460_v50 = vpop.f32.mrf.mxu0  ;;  %v3337_v47 = vpop.f32.mrf.mxu1  ;;  %v2457_v38 = vor.u32 %v2456_v24, %v2455_v22  ;;  %v2462_v33 = vcvt.s32.f32 %v2461_v46  ;;  %v3363_v39 = vadd.f32 %v1329_v35, %v3308_v12  ;;  %v2434_v42 = vsel %vm3357_vm9, %v2433_v17, %v3301_v43 }
 0x15b   : > { %v2441_v0 = vor.u32 %v2440_v7, %v2439_v55  ;;  %v1358_v36 = vmul.f32 %v1354_v21, %v1338_v54  ;;  %vm1344_vm10 = vcmp.ge.f32.partialorder %v1340_v30, 1.0  ;;  %vm3368_vm11 = vcmp.lt.f32.partialorder %v2451_v18, 8388608.0 }
 0x15c   : > { %v3373_v45 = vsel %vm1344_vm10, 1.0, %v2596_v6  ;;  %v1337_v37 = vmul.f32 0.75, %v1184_v52  ;;  %v1503_v12 = vmul.f32 0.7, %v3317_v48  ;;  %v2443_v49 = vand.u32 2147483647, %v3332_v2 }
 0x15d   : > { %v2447_v51 = vand.u32 2147483647, %v2446_v27  ;;  %v2458_v57 = vsel %vm3368_vm11, %v2457_v38, %v2112_v10  ;;  %v1355_v43 = vsub.f32 1.0, %v3349_v25  ;;  %vm3380_vm12 = vcmp.lt.f32.partialorder %v2435_v41, 8388608.0 }
 0x15e   : > { %v2463_v19 = vand.u32 2147483647, %v2462_v33  ;;  %v3385_v60 = vadd.f32 %v1337_v37, %v3363_v39  ;;  %v3387_v54 = vadd.f32 %v1503_v12, %v1460_v50  ;;  %v3389_v61 = vmax.f32 %v2434_v42, 0.0 }
 0x15f   : > { %v2442_v48 = vsel %vm3380_vm12, %v2441_v0, %v3315_v53  ;;  %v2448_v1 = vand.u32 2147483648, %v3332_v2  ;;  %v1356_v26 = vsub.f32 1.0, %v3373_v45  ;;  %v1366_v56 = vmax.f32 %v2458_v57, 0.0 }
 0x160   : > { %v2459_v3 = vand.u32 2147483647, %v3349_v25  ;;  %v2464_v14 = vand.u32 2147483648, %v3349_v25  ;;  %v1511_v8 = vmul.f32 0.75, %v1358_v36  ;;  %v1193_v10 = vmin.f32 %v3343_v16, 255.0 }
 0x161   : > { %v1486_v29 = vpop.f32.mrf.mxu2  ;;  %v3355_v31 = vpop.f32.mrf.mxu3  ;;  %vm3399_vm13 = vcmp.lt.f32.partialorder %v2443_v49, 8388608.0  ;;  %v3403_v50 = vor.u32 %v2448_v1, %v2447_v51  ;;  %v1359_v11 = vmul.f32 %v1355_v43, %v1339_v5  ;;  %vm1345_vm14 = vcmp.ge.f32.partialorder %v3385_v60, 1.0 }
 0x162   : > { %v1462_v23 = vpop.f32.mrf.mxu0  ;;  %v1475_v40 = vpop.f32.mrf.mxu1  ;;  %v2465_v59 = vor.u32 %v2464_v14, %v2463_v19  ;;  %v1515_v63 = vadd.f32 %v1511_v8, %v3387_v54  ;;  %v1504_v15 = vmul.f32 0.7, %v3334_v9  ;;  %v1194_v16 = vmin.f32 %v3389_v61, 255.0 }
 0x163   : > { %v3413_v34 = vmax.f32 %v2442_v48, 0.0  ;;  %v1360_v55 = vmul.f32 %v1356_v26, %v1340_v30  ;;  %v2469_v5 = vcvt.f32.s32 %v3373_v45  ;;  %v1370_v28 = vmin.f32 %v1366_v56, 255.0 }
 0x164   : > { %vm3416_vm15 = vcmp.lt.f32.partialorder %v2459_v3, 8388608.0  ;;  %vm1519_vm0 = vcmp.ge.f32.partialorder %v1515_v63, 1.0  ;;  %v3421_v22 = vadd.f32 %v1504_v15, %v3337_v47  ;;  %v3424_v9 = vsel %vm1345_vm14, 1.0, %v2596_v6 }
 0x165   : > { %v3427_v24 = vsel %vm1519_vm0, 1.0, %v2596_v6  ;;  %v1512_v52 = vmul.f32 0.75, %v1359_v11  ;;  %v1505_v18 = vmul.f32 0.7, %v3346_v32  ;;  %v2450_v46 = vsel %vm3399_vm13, %v3403_v50, %v3332_v2 }
 0x166   : > { %v2466_v35 = vsel %vm3416_vm15, %v2465_v59, %v3349_v25  ;;  %v2467_v47 = vand.u32 2147483647, %v3373_v45  ;;  %v2485_v7 = vcvt.f32.s32 %v3427_v24  ;;  %v2470_v27 = vcvt.s32.f32 %v2469_v5 }
 0x167   : > { %v1516_v38 = vadd.f32 %v1512_v52, %v3421_v22  ;;  %v1509_v30 = vadd.f32 %v1505_v18, %v1486_v29  ;;  %v1513_v13 = vmul.f32 0.75, %v1360_v55  ;;  %v3440_v41 = vadd.f32 %v1370_v28, %v1193_v10 }
 0x168   : > { %v2472_v32 = vand.u32 2147483648, %v3373_v45  ;;  %v1357_v33 = vsub.f32 1.0, %v3424_v9  ;;  %v2486_v23 = vcvt.s32.f32 %v2485_v7  ;;  %v3444_v40 = vmax.f32 %v2466_v35, 0.0 }
 0x169   : > { %v1488_v53 = vpop.f32.mrf.mxu2  ;;  %v1501_v62 = vpop.f32.mrf.mxu3  ;;  %v2477_v25 = vcvt.f32.s32 %v3424_v9  ;;  %vm1520_vm1 = vcmp.ge.f32.partialorder %v1516_v38, 1.0  ;;  %v1517_v42 = vadd.f32 %v1513_v13, %v1509_v30  ;;  %v1531_v44 = vsub.f32 1.0, %v3427_v24 }
 0x16a   : > { %v3408_v17 = vpop.f32.mrf.mxu0  ;;  %v3410_v20 = vpop.f32.mrf.mxu1  ;;  %v2487_v29 = vand.u32 2147483647, %v2486_v23  ;;  %v2488_v37 = vand.u32 2147483648, %v3427_v24  ;;  %v3452_v12 = vsel %vm1520_vm1, 1.0, %v2596_v6  ;;  %v2471_v57 = vand.u32 2147483647, %v2470_v27 }
 0x16b   : > { %v2475_v43 = vand.u32 2147483647, %v3424_v9  ;;  %v2483_v58 = vand.u32 2147483647, %v3427_v24  ;;  %v2493_v19 = vcvt.f32.s32 %v3452_v12  ;;  %vm3457_vm2 = vcmp.lt.f32.partialorder %v2467_v47, 8388608.0 }
 0x16c   : > { %v1361_v1 = vmul.f32 %v1357_v33, %v3385_v60  ;;  %v2489_v26 = vor.u32 %v2488_v37, %v2487_v29  ;;  %vm1521_vm3 = vcmp.ge.f32.partialorder %v1517_v42, 1.0  ;;  %v1506_v56 = vmul.f32 0.7, %v3363_v39 }
 0x16d   : > { %v2478_v3 = vcvt.s32.f32 %v2477_v25  ;;  %v1532_v14 = vsub.f32 1.0, %v3452_v12  ;;  %v2494_v8 = vcvt.s32.f32 %v2493_v19  ;;  %v3465_v10 = vsel %vm1521_vm3, 1.0, %v2596_v6 }
 0x16e   : > { %v1371_v11 = vmin.f32 %v3444_v40, 255.0  ;;  %v2480_v53 = vand.u32 2147483648, %v3424_v9  ;;  %v1535_v62 = vmul.f32 %v1531_v44, %v1515_v63  ;;  %v3470_v59 = vadd.f32 %v1506_v56, %v3355_v31 }
 0x16f   : > { %v2473_v60 = vor.u32 %v2472_v32, %v2471_v57  ;;  %vm3472_vm4 = vcmp.lt.f32.partialorder %v2483_v58, 8388608.0  ;;  %v2495_v39 = vand.u32 2147483647, %v2494_v8  ;;  %v1533_v55 = vsub.f32 1.0, %v3465_v10 }
 0x170   : > { %v2490_v5 = vsel %vm3472_vm4, %v2489_v26, %v3427_v24  ;;  %v2501_v28 = vcvt.f32.s32 %v3465_v10  ;;  %v1514_v21 = vmul.f32 0.75, %v1361_v1  ;;  %v1680_v63 = vmul.f32 0.7, %v3387_v54 }
 0x171   : > { %v1663_v0 = vpop.f32.mrf.mxu2  ;;  %v3447_v36 = vpop.f32.mrf.mxu3  ;;  %v2479_v52 = vand.u32 2147483647, %v2478_v3  ;;  %v1536_v31 = vmul.f32 %v1532_v14, %v1516_v38  ;;  %v2491_v18 = vand.u32 2147483647, %v3452_v12  ;;  %v2496_v35 = vand.u32 2147483648, %v3452_v12 }
 0x172   : > { %v1639_v49 = vpop.f32.mrf.mxu0  ;;  %v1652_v51 = vpop.f32.mrf.mxu1  ;;  %vm3484_vm5 = vcmp.lt.f32.partialorder %v2475_v43, 8388608.0  ;;  %v1518_v13 = vadd.f32 %v1514_v21, %v3470_v59  ;;  %v1684_v24 = vadd.f32 %v1680_v63, %v3408_v17  ;;  %v1688_v32 = vmul.f32 0.75, %v1535_v62 }
 0x173   : > { %v1681_v33 = vmul.f32 0.7, %v3421_v22  ;;  %v1543_v54 = vmax.f32 %v2490_v5, 0.0  ;;  %v2497_v23 = vor.u32 %v2496_v35, %v2495_v39  ;;  %v1537_v38 = vmul.f32 %v1533_v55, %v1517_v42 }
 0x174   : > { %v1682_v40 = vmul.f32 0.7, %v1509_v30  ;;  %v2502_v25 = vcvt.s32.f32 %v2501_v28  ;;  %vm1522_vm6 = vcmp.ge.f32.partialorder %v1518_v13, 1.0  ;;  %v1692_v44 = vadd.f32 %v1688_v32, %v1684_v24 }
 0x175   : > { %v1685_v29 = vadd.f32 %v1681_v33, %v3410_v20  ;;  %v2474_v37 = vsel %vm3457_vm2, %v2473_v60, %v3373_v45  ;;  %v3496_v49 = vsel %vm1522_vm6, 1.0, %v2596_v6  ;;  %v1689_v17 = vmul.f32 0.75, %v1536_v31 }
 0x176   : > { %v1686_v51 = vadd.f32 %v1682_v40, %v1663_v0  ;;  %v3498_v57 = vor.u32 %v2480_v53, %v2479_v52  ;;  %vm3500_vm7 = vcmp.lt.f32.partialorder %v2491_v18, 8388608.0  ;;  %v2499_v30 = vand.u32 2147483647, %v3465_v10 }
 0x177   : > { %v2509_v42 = vcvt.f32.s32 %v3496_v49  ;;  %v2498_v20 = vsel %vm3500_vm7, %v2497_v23, %v3452_v12  ;;  %vm1696_vm8 = vcmp.ge.f32.partialorder %v1692_v44, 1.0  ;;  %v1693_v45 = vadd.f32 %v1689_v17, %v1685_v29 }
 0x178   : > { %v1690_v43 = vmul.f32 0.75, %v1537_v38  ;;  %v3511_v0 = vadd.f32 %v1371_v11, %v1194_v16  ;;  %v1547_v58 = vmin.f32 %v1543_v54, 255.0  ;;  %v2503_v19 = vand.u32 2147483647, %v2502_v25 }
 0x179   : > { %v1665_v47 = vpop.f32.mrf.mxu2  ;;  %v1678_v7 = vpop.f32.mrf.mxu3  ;;  %v1534_v48 = vsub.f32 1.0, %v3496_v49  ;;  %v2510_v1 = vcvt.s32.f32 %v2509_v42  ;;  %v2212_v26 = vsel %vm1696_vm8, 1.0, %v2596_v6  ;;  %vm1697_vm9 = vcmp.ge.f32.partialorder %v1693_v45, 1.0 }
 0x17a   : > { %v1694_v56 = vadd.f32 %v1690_v43, %v1686_v51  ;;  %v3515_v3 = vmax.f32 %v2474_v37, 0.0  ;;  %v1544_v14 = vmax.f32 %v2498_v20, 0.0  ;;  %v2504_v12 = vand.u32 2147483648, %v3465_v10 }
 0x17b   : > { %v2517_v8 = vcvt.f32.s32 %v2212_v26  ;;  %v2482_v61 = vsel %vm3484_vm5, %v3498_v57, %v3424_v9  ;;  %vm3522_vm10 = vcmp.lt.f32.partialorder %v2499_v30, 8388608.0  ;;  %v2213_v11 = vsel %vm1697_vm9, 1.0, %v2596_v6 }
 0x17c   : > { %vm1698_vm11 = vcmp.ge.f32.partialorder %v1694_v56, 1.0  ;;  %v2505_v53 = vor.u32 %v2504_v12, %v2503_v19  ;;  %v1538_v62 = vmul.f32 %v1534_v48, %v1518_v13  ;;  %v1551_v60 = vadd.f32 %v1547_v58, %v3440_v41 }
 0x17d   : > { %v2518_v15 = vcvt.s32.f32 %v2517_v8  ;;  %v2511_v39 = vand.u32 2147483647, %v2510_v1  ;;  %v2515_v55 = vand.u32 2147483647, %v2212_v26  ;;  %v2525_v5 = vcvt.f32.s32 %v2213_v11 }
 0x17e   : > { %v2214_v28 = vsel %vm1698_vm11, 1.0, %v2596_v6  ;;  %v1548_v21 = vmin.f32 %v1544_v14, 255.0  ;;  %v2520_v9 = vand.u32 2147483648, %v2212_v26  ;;  %v1683_v52 = vmul.f32 0.7, %v3470_v59 }
 0x17f   : > { %v2519_v63 = vand.u32 2147483647, %v2518_v15  ;;  %v2507_v31 = vand.u32 2147483647, %v3496_v49  ;;  %v2512_v18 = vand.u32 2147483648, %v3496_v49  ;;  %v2526_v35 = vcvt.s32.f32 %v2525_v5 }
 0x180   : > { %v2533_v47 = vcvt.f32.s32 %v2214_v28  ;;  %v2523_v27 = vand.u32 2147483647, %v2213_v11  ;;  %v1687_v41 = vadd.f32 %v1683_v52, %v3447_v36  ;;  %v1691_v13 = vmul.f32 0.75, %v1538_v62 }
 0x181   : > { %v2521_v7 = vor.u32 %v2520_v9, %v2519_v63  ;;  %vm2516_vm12 = vcmp.lt.f32.partialorder %v2515_v55, 8388608.0  ;;  %v2527_v24 = vand.u32 2147483647, %v2526_v35  ;;  %v2528_v32 = vand.u32 2147483648, %v2213_v11  ;;  %v1751_v63 = vld [vmem:[%s3293_s3] sm:$0xff] (%p2642_p5)  ;;  %v1753_v9 = vld [vmem:[%s3293_s3 + $0x8] sm:$0xff] (%p2642_p5) }
 0x182   : > { %v2534_v33 = vcvt.s32.f32 %v2533_v47  ;;  %v2513_v54 = vor.u32 %v2512_v18, %v2511_v39  ;;  %v2531_v38 = vand.u32 2147483647, %v2214_v28  ;;  %v1695_v40 = vadd.f32 %v1691_v13, %v1687_v41  ;;  %1752 = vst [vmem:[%s1738_s7] sm:$0xff] (%p2642_p5), %v1751_v63 }
 0x183   : > { %v2522_v23 = vsel %vm2516_vm12, %v2521_v7, %v2212_v26  ;;  %v2529_v25 = vor.u32 %v2528_v32, %v2527_v24  ;;  %v2536_v29 = vand.u32 2147483648, %v2214_v28  ;;  %v2506_v37 = vsel %vm3522_vm10, %v2505_v53, %v3465_v10  ;;  %1754 = vst [vmem:[%s1738_s7 + $0x8] sm:$0xff] (%p2642_p5), %v1753_v9 }
 0x184   : > { %v1712_v59 = vmax.f32 %v2522_v23, 0.0  ;;  %v2535_v44 = vand.u32 2147483647, %v2534_v33  ;;  %vm3536_vm14 = vcmp.lt.f32.partialorder %v2507_v31, 8388608.0  ;;  %vm2524_vm15 = vcmp.lt.f32.partialorder %v2523_v27, 8388608.0 }
 0x185   : > { %vm1699_vm0 = vcmp.ge.f32.partialorder %v1695_v40, 1.0  ;;  %v2530_v51 = vsel %vm2524_vm15, %v2529_v25, %v2213_v11  ;;  %v2514_v30 = vsel %vm3536_vm14, %v2513_v54, %v3496_v49  ;;  %vm2532_vm1 = vcmp.lt.f32.partialorder %v2531_v38, 8388608.0 }
 0x186   : > { %v1716_v36 = vmin.f32 %v1712_v59, 255.0  ;;  %v2537_v57 = vor.u32 %v2536_v29, %v2535_v44  ;;  %v2215_v22 = vsel %vm1699_vm0, 1.0, %v2596_v6  ;;  %v1713_v42 = vmax.f32 %v2530_v51, 0.0 }
 0x187   : > { %v2541_v20 = vcvt.f32.s32 %v2215_v22  ;;  %v1192_v10 = vmax.f32 %v2450_v46, 0.0  ;;  %v1369_v45 = vmax.f32 %v2482_v61, 0.0  ;;  %v1545_v43 = vmax.f32 %v2506_v37, 0.0 }
 0x188   : > { %v2538_v58 = vsel %vm2532_vm1, %v2537_v57, %v2214_v28  ;;  %v1720_v19 = vadd.f32 %v1716_v36, %v1551_v60  ;;  %v1552_v48 = vadd.f32 %v1548_v21, %v3511_v0  ;;  %v1717_v6 = vmin.f32 %v1713_v42, 255.0 }
 0x189   : > { %v2542_v1 = vcvt.s32.f32 %v2541_v20  ;;  %v1372_v26 = vmin.f32 %v3515_v3, 255.0  ;;  %v1546_v49 = vmax.f32 %v2514_v30, 0.0  ;;  %v1714_v56 = vmax.f32 %v2538_v58, 0.0 }
 0x18a   : > { %v2539_v14 = vand.u32 2147483647, %v2215_v22  ;;  %v1721_v12 = vadd.f32 %v1717_v6, %v1552_v48  ;;  %v2544_v8 = vand.u32 2147483648, %v2215_v22  ;;  %v1195_v2 = vmin.f32 %v3413_v34, 255.0 }
 0x18b   : > { %v2543_v4 = vand.u32 2147483647, %v2542_v1  ;;  %v1373_v50 = vmin.f32 %v1369_v45, 255.0  ;;  %v1549_v46 = vmin.f32 %v1545_v43, 255.0  ;;  %v1196_v61 = vmin.f32 %v1192_v10, 255.0 }
 0x18c   : > { %v1724_v16 = vpack.c.bf16 %v1721_v12, %v1720_v19  ;;  %v1376_v0 = vadd.f32 %v1372_v26, %v1195_v2  ;;  %v1550_v53 = vmin.f32 %v1546_v49, 255.0  ;;  %v1718_v62 = vmin.f32 %v1714_v56, 255.0 }
 0x18d   : > { %v2545_v11 = vor.u32 %v2544_v8, %v2543_v4  ;;  %vm2540_vm13 = vcmp.lt.f32.partialorder %v2539_v14, 8388608.0  ;;  %v1377_v60 = vadd.f32 %v1373_v50, %v1196_v61 }
 0x18e   : > { %2216 = vst [vmem:[%s3293_s3 + $0x10] sm:$0xff] %v1724_v16  ;;  %v1553_v15 = vadd.f32 %v1549_v46, %v1376_v0 }
 0x18f   : > { %v2546_v3 = vsel %vm2540_vm13, %v2545_v11, %v2215_v22  ;;  %v1554_v5 = vadd.f32 %v1550_v53, %v1377_v60 }
 0x190   : > { %v1715_v39 = vmax.f32 %v2546_v3, 0.0  ;;  %v1722_v55 = vadd.f32 %v1718_v62, %v1553_v15 }
 0x192   : > { %v1719_v28 = vmin.f32 %v1715_v39, 255.0 }
 0x194   : > { %v1723_v21 = vadd.f32 %v1719_v28, %v1554_v5  ;;  %1735 = sbr.rel (!%p2642_p5) target bundleno = 417 (0x1a1), region = 55 }
 0x195   : > { %v1755_v52 = vld [vmem:[%s3293_s3 + $0x10] sm:$0xff] (%p2642_p5) }
 0x196   : > { %v1725_v34 = vpack.c.bf16 %v1723_v21, %v1722_v55  ;;  %1756 = vst [vmem:[%s1738_s7 + $0x40] sm:$0xff] (%p2642_p5), %v1755_v52 }
 0x198   : > { %2217 = vst [vmem:[%s3293_s3 + $0x18] sm:$0xff] %v1725_v34 }
 0x19f   : > { %v1757_v31 = vld [vmem:[%s3293_s3 + $0x18] sm:$0xff] }
 0x1a0   : > { %1758 = vst [vmem:[%s1738_s7 + $0x48] sm:$0xff] %v1757_v31 }
 0x1a1 PF: > { %p9_p10 = scmp.ge.s32.totalorder %s2629_s13, 6   ;;  %s3623_s9 = smov %s2590_s10 }
 0x1a2   : > { %s3624_s10 = smov %s2640_s16  ;;  %s3625_s11 = smov %s2629_s13 }
 0x1a3   :  { %11 = sbr.rel (!%p9_p10) target bundleno = 2 (0x2), region = 117 }

// kernel: hnn_forward.11
= control target key start
LH: loop header
LB: loop body
LE: loop exit
PB: predicated region body
PF: predicated region fallthrough
CT: control target
= control target key end

     0   :  { %vm254_vm0 = vcmask 130048   ;;  %s875_s1 = inlined_call_operand.vmem [shape: bf16[144,512], index: 1, kind: input, shape index: {}]   ;;  %s876_s0 = inlined_call_operand.vmem [shape: bf16[16,144], index: 0, kind: input, shape index: {}]   ;;  %s877_s2 = inlined_call_operand.vmem [shape: f32[16,1], index: 2, kind: input, shape index: {}]   ;;  %s878_s3 = inlined_call_operand.vmem [shape: f32[16,512], index: 3, kind: output, shape index: {}]  }
   0x1   :  { %v512_v0 = vld [vmem:[%s875_s1 + $0xe0] sm:$0xf]  ;;  %v578_v1 = vld [vmem:[%s875_s1 + $0xec] sm:$0xf0]  ;;  %v576_v5 = vld [vmem:[%s875_s1 + $0xe4] sm:$0xf] }
   0x2   :  { %v528_v2 = vld [vmem:[%s875_s1 + $0x100] sm:$0xf]  ;;  %v513_v3 = vor.u32 %v578_v1, %v512_v0  ;;  %v582_v4 = vld [vmem:[%s875_s1 + $0x10c] sm:$0xf0]  ;;  %v514_v6 = vld [vmem:[%s875_s1 + $0xf0] sm:$0xf0] }
   0x3   :  { %v529_v7 = vor.u32 %v582_v4, %v528_v2  ;;  %v517_v8 = vor.u32 %v576_v5, %v514_v6  ;;  %v520_v9 = vld [vmem:[%s875_s1 + $0xe8] sm:$0xf]  ;;  %v579_v10 = vld [vmem:[%s875_s1 + $0xf4] sm:$0xf0]  ;;  %v496_v11 = vld [vmem:[%s875_s1 + $0xc0] sm:$0xf] }
   0x4   :  { %258 = vmatpush.bf16.msra.mxu0 %v513_v3  ;;  %v521_v12 = vor.u32 %v579_v10, %v520_v9  ;;  %v574_v13 = vld [vmem:[%s875_s1 + $0xcc] sm:$0xf0]  ;;  %v572_v14 = vld [vmem:[%s875_s1 + $0xc4] sm:$0xf]  ;;  %v498_v15 = vld [vmem:[%s875_s1 + $0xd0] sm:$0xf0] }
   0x5   :  { %279 = vmatpush.bf16.msra.mxu1 %v529_v7  ;;  %286 = vmatpush.bf16.msra.mxu2 %v517_v8  ;;  %v497_v16 = vor.u32 %v574_v13, %v496_v11  ;;  %v501_v17 = vor.u32 %v572_v14, %v498_v15  ;;  %v504_v18 = vld [vmem:[%s875_s1 + $0xc8] sm:$0xf]  ;;  %v575_v19 = vld [vmem:[%s875_s1 + $0xd4] sm:$0xf0]  ;;  %v577_v23 = vld [vmem:[%s875_s1 + $0xec] sm:$0xf] }
   0x6   :  { %v536_v20 = vld [vmem:[%s875_s1 + $0x108] sm:$0xf]  ;;  %v505_v21 = vor.u32 %v575_v19, %v504_v18  ;;  %v583_v22 = vld [vmem:[%s875_s1 + $0x114] sm:$0xf0]  ;;  %v522_v24 = vld [vmem:[%s875_s1 + $0xf8] sm:$0xf0] }
   0x7   :  { %v537_v25 = vor.u32 %v583_v22, %v536_v20  ;;  %v525_v26 = vor.u32 %v577_v23, %v522_v24  ;;  %v480_v27 = vld [vmem:[%s875_s1 + $0xa0] sm:$0xf]  ;;  %v570_v28 = vld [vmem:[%s875_s1 + $0xac] sm:$0xf0]  ;;  %v568_v29 = vld [vmem:[%s875_s1 + $0xa4] sm:$0xf] }
   0x8   :  { %259 = vmatpush.bf16.msra.mxu0 %v497_v16  ;;  %v481_v30 = vor.u32 %v570_v28, %v480_v27  ;;  %v482_v31 = vld [vmem:[%s875_s1 + $0xb0] sm:$0xf0]  ;;  %v488_v32 = vld [vmem:[%s875_s1 + $0xa8] sm:$0xf]  ;;  %v571_v33 = vld [vmem:[%s875_s1 + $0xb4] sm:$0xf0] }
   0x9   :  { %314 = vmatpush.bf16.msrb.mxu1 %v521_v12  ;;  %287 = vmatpush.bf16.msra.mxu2 %v501_v17  ;;  %v485_v34 = vor.u32 %v568_v29, %v482_v31  ;;  %v573_v35 = vld [vmem:[%s875_s1 + $0xcc] sm:$0xf]  ;;  %v506_v36 = vld [vmem:[%s875_s1 + $0xd8] sm:$0xf0]  ;;  %v464_v37 = vld [vmem:[%s875_s1 + $0x80] sm:$0xf]  ;;  %v489_v38 = vor.u32 %v571_v33, %v488_v32 }
   0xa   :  { %335 = vmatpush.bf16.msra.mxu3 %v537_v25  ;;  %v509_v39 = vor.u32 %v573_v35, %v506_v36  ;;  %v566_v40 = vld [vmem:[%s875_s1 + $0x8c] sm:$0xf0]  ;;  %v564_v41 = vld [vmem:[%s875_s1 + $0x84] sm:$0xf]  ;;  %v466_v42 = vld [vmem:[%s875_s1 + $0x90] sm:$0xf0] }
   0xb   :  { %v472_v43 = vld [vmem:[%s875_s1 + $0x88] sm:$0xf]  ;;  %v567_v44 = vld [vmem:[%s875_s1 + $0x94] sm:$0xf0]  ;;  %v569_v45 = vld [vmem:[%s875_s1 + $0xac] sm:$0xf]  ;;  %v465_v46 = vor.u32 %v566_v40, %v464_v37  ;;  %v469_v49 = vor.u32 %v564_v41, %v466_v42 }
   0xc   :  { %260 = vmatpush.bf16.msra.mxu0 %v481_v30  ;;  %v490_v47 = vld [vmem:[%s875_s1 + $0xb8] sm:$0xf0]  ;;  %v448_v48 = vld [vmem:[%s875_s1 + $0x60] sm:$0xf]  ;;  %v562_v50 = vld [vmem:[%s875_s1 + $0x6c] sm:$0xf0]  ;;  %v473_v53 = vor.u32 %v567_v44, %v472_v43 }
   0xd   :  { %315 = vmatpush.bf16.msrb.mxu1 %v505_v21  ;;  %288 = vmatpush.bf16.msra.mxu2 %v485_v34  ;;  %v546_v51 = vld [vmem:[%s876_s0 + $0x4] sm:$0xf]  ;;  %v394_v52 = vld [vmem:[%s876_s0 + $0x8] sm:$0xf0]  ;;  %v493_v54 = vor.u32 %v569_v45, %v490_v47  ;;  %v450_v57 = vld [vmem:[%s875_s1 + $0x70] sm:$0xf0]  ;;  %v449_v62 = vor.u32 %v562_v50, %v448_v48 }
   0xe   :  { %342 = vmatpush.bf16.msrb.mxu3 %v525_v26  ;;  %v721_v55 = vor.u32 %v546_v51, %v394_v52  ;;  %v560_v56 = vld [vmem:[%s875_s1 + $0x64] sm:$0xf]  ;;  %v456_v58 = vld [vmem:[%s875_s1 + $0x68] sm:$0xf]  ;;  %v563_v59 = vld [vmem:[%s875_s1 + $0x74] sm:$0xf0] }
   0xf   :  { %v565_v60 = vld [vmem:[%s875_s1 + $0x8c] sm:$0xf]  ;;  %v474_v61 = vld [vmem:[%s875_s1 + $0x98] sm:$0xf0]  ;;  %v453_v63 = vor.u32 %v560_v56, %v450_v57  ;;  %v432_v0 = vld [vmem:[%s875_s1 + $0x40] sm:$0xf]  ;;  %v457_v2 = vor.u32 %v563_v59, %v456_v58 }
  0x10   :  { %261 = vmatpush.bf16.msra.mxu0 %v465_v46  ;;  %542 = vmatmul.msk.bf16.vlgmr.msra.gmra.mxu1 %vm254_vm0, %v721_v55  ;;  %v558_v1 = vld [vmem:[%s875_s1 + $0x4c] sm:$0xf0]  ;;  %v477_v3 = vor.u32 %v565_v60, %v474_v61  ;;  %v556_v4 = vld [vmem:[%s875_s1 + $0x44] sm:$0xf]  ;;  %v434_v5 = vld [vmem:[%s875_s1 + $0x50] sm:$0xf0] }
  0x11   :  { %316 = vmatpush.bf16.msrb.mxu1 %v489_v38  ;;  %289 = vmatpush.bf16.msra.mxu2 %v469_v49  ;;  %v440_v6 = vld [vmem:[%s875_s1 + $0x48] sm:$0xf]  ;;  %v559_v7 = vld [vmem:[%s875_s1 + $0x54] sm:$0xf0]  ;;  %v561_v8 = vld [vmem:[%s875_s1 + $0x6c] sm:$0xf]  ;;  %v433_v10 = vor.u32 %v558_v1, %v432_v0  ;;  %v437_v11 = vor.u32 %v556_v4, %v434_v5 }
  0x12   :  { %343 = vmatpush.bf16.msrb.mxu3 %v509_v39  ;;  %v458_v9 = vld [vmem:[%s875_s1 + $0x78] sm:$0xf0]  ;;  %v416_v12 = vld [vmem:[%s875_s1 + $0x20] sm:$0xf]  ;;  %v554_v13 = vld [vmem:[%s875_s1 + $0x2c] sm:$0xf0]  ;;  %v441_v14 = vor.u32 %v559_v7, %v440_v6 }
  0x13   :  { %544 = vmatmul.msk.bf16.vlgmr.msra.gmra.mxu3 %vm254_vm0, %v721_v55  ;;  %v461_v15 = vor.u32 %v561_v8, %v458_v9  ;;  %v552_v16 = vld [vmem:[%s875_s1 + $0x24] sm:$0xf]  ;;  %v418_v17 = vld [vmem:[%s875_s1 + $0x30] sm:$0xf0]  ;;  %v424_v18 = vld [vmem:[%s875_s1 + $0x28] sm:$0xf]  ;;  %v417_v22 = vor.u32 %v554_v13, %v416_v12 }
  0x14   :  { %262 = vmatpush.bf16.msra.mxu0 %v449_v62  ;;  %v555_v19 = vld [vmem:[%s875_s1 + $0x34] sm:$0xf0]  ;;  %v557_v20 = vld [vmem:[%s875_s1 + $0x4c] sm:$0xf]  ;;  %v442_v21 = vld [vmem:[%s875_s1 + $0x58] sm:$0xf0]  ;;  %v421_v26 = vor.u32 %v552_v16, %v418_v17 }
  0x15   :  { %317 = vmatpush.bf16.msrb.mxu1 %v473_v53  ;;  %290 = vmatpush.bf16.msra.mxu2 %v453_v63  ;;  %v400_v23 = vld [vmem:[%s875_s1] sm:$0xf]  ;;  %v550_v24 = vld [vmem:[%s875_s1 + $0xc] sm:$0xf0]  ;;  %v548_v25 = vld [vmem:[%s875_s1 + $0x4] sm:$0xf]  ;;  %v425_v30 = vor.u32 %v555_v19, %v424_v18  ;;  %v445_v31 = vor.u32 %v557_v20, %v442_v21 }
  0x16   :  { %344 = vmatpush.bf16.msrb.mxu3 %v493_v54  ;;  %v402_v27 = vld [vmem:[%s875_s1 + $0x10] sm:$0xf0]  ;;  %v408_v28 = vld [vmem:[%s875_s1 + $0x8] sm:$0xf]  ;;  %v551_v29 = vld [vmem:[%s875_s1 + $0x14] sm:$0xf0]  ;;  %v401_v39 = vor.u32 %v550_v24, %v400_v23 }
  0x17   :  { %v581_v32 = vld [vmem:[%s875_s1 + $0x10c] sm:$0xf]  ;;  %v538_v33 = vld [vmem:[%s875_s1 + $0x118] sm:$0xf0]  ;;  %v53_v34 = vld [vmem:[%s877_s2] sm:$0xff]  ;;  %v586_v38 = vmov 0   ;;  %v405_v43 = vor.u32 %v548_v25, %v402_v27  ;;  %v409_v45 = vor.u32 %v551_v29, %v408_v28 }
  0x18   :  { %263 = vmatpush.bf16.msra.mxu0 %v433_v10  ;;  %v553_v35 = vld [vmem:[%s875_s1 + $0x2c] sm:$0xf]  ;;  %v426_v36 = vld [vmem:[%s875_s1 + $0x38] sm:$0xf0]  ;;  %v392_v37 = vld [vmem:[%s876_s0] sm:$0xf]  ;;  %585 = vset.pattern.permute.xlu0 %v586_v38  ;;  %v541_v44 = vor.u32 %v581_v32, %v538_v33 }
  0x19   :  { %318 = vmatpush.bf16.msrb.mxu1 %v457_v2  ;;  %291 = vmatpush.bf16.msra.mxu2 %v437_v11  ;;  %v547_v40 = vld [vmem:[%s876_s0 + $0x4] sm:$0xf0]  ;;  %v580_v41 = vld [vmem:[%s875_s1 + $0x104] sm:$0xf]  ;;  %v530_v42 = vld [vmem:[%s875_s1 + $0x110] sm:$0xf0]  ;;  %v429_v46 = vor.u32 %v553_v35, %v426_v36 }
  0x1a   :  { %345 = vmatpush.bf16.msrb.mxu3 %v477_v3  ;;  %57 = vperm.xlu0 %585, %v53_v34   ;;  %v393_v47 = vor.u32 %v547_v40, %v392_v37  ;;  %v533_v48 = vor.u32 %v580_v41, %v530_v42  ;;  %v549_v49 = vld [vmem:[%s875_s1 + $0xc] sm:$0xf]  ;;  %v410_v50 = vld [vmem:[%s875_s1 + $0x18] sm:$0xf0] }
  0x1b   :  { %v54_v51 = vld [vmem:[%s877_s2 + $0x8] sm:$0xff]  ;;  %v413_v52 = vor.u32 %v549_v49, %v410_v50 }
  0x1c   :  { %264 = vmatpush.bf16.msra.mxu0 %v417_v22 }
  0x1d   :  { %319 = vmatpush.bf16.msrb.mxu1 %v441_v14  ;;  %292 = vmatpush.bf16.msra.mxu2 %v421_v26 }
  0x1e   :  { %346 = vmatpush.bf16.msrb.mxu3 %v461_v15 }
  0x20   :  { %265 = vmatpush.bf16.msra.mxu0 %v401_v39 }
  0x21   :  { %320 = vmatpush.bf16.msrb.mxu1 %v425_v30  ;;  %293 = vmatpush.bf16.msra.mxu2 %v405_v43 }
  0x22   :  { %347 = vmatpush.bf16.msrb.mxu3 %v445_v31  ;;  %62 = vperm.xlu0 %585, %v54_v51  }
  0x23   :  { %266 = vmatmul.bf16.vlgmr.msra.gmra.mxu0 %v393_v47 }
  0x24   :  { %363 = vmatpush.bf16.msrb.mxu0 %v541_v44  ;;  %294 = vmatmul.bf16.vlgmr.msra.gmra.mxu2 %v393_v47 }
  0x25   :  { %321 = vmatpush.bf16.msrb.mxu1 %v409_v45  ;;  %307 = vmatpush.bf16.msrb.mxu2 %v533_v48 }
  0x26   :  { %348 = vmatpush.bf16.msrb.mxu3 %v429_v46 }
  0x28   :  { %322 = vmatmul.bf16.vlgmr.msrb.gmra.mxu1 %v393_v47 }
  0x2a   :  { %349 = vmatpush.bf16.msrb.mxu3 %v413_v52 }
  0x2d   :  { %350 = vmatmul.bf16.vlgmr.msrb.gmra.mxu3 %v393_v47 }
  0x33   :  { %545 = vmatmul.msk.bf16.vlgmr.msrb.gmra.mxu0 %vm254_vm0, %v721_v55 }
  0x34   :  { %543 = vmatmul.msk.bf16.vlgmr.msrb.gmra.mxu2 %vm254_vm0, %v721_v55 }
  0x8c   :  { %v58_v57 = vpop.permute.xlu0 %57 }
  0x8d   :  { %v281_v53 = vpop.f32.mrf.mxu1 }
  0x94   :  { %v63_v2 = vpop.permute.xlu0 %62 }
  0x95   :  { %v283_v54 = vpop.f32.mrf.mxu1 }
  0x96   :  { %v337_v56 = vpop.f32.mrf.mxu3 }
  0x9e   :  { %v339_v61 = vpop.f32.mrf.mxu3 }
  0xa0   :  { %v267_v58 = vpop.f32.mrf.mxu0 }
  0xa1   :  { %v268_v59 = vadd.f32 %v267_v58, %v58_v57 }
  0xa3   :  { %v282_v62 = vadd.f32 %v281_v53, %v268_v59 }
  0xa5   :  { %v323_v60 = vpop.f32.mrf.mxu1  ;;  %v370_v0 = vmax.f32 %v282_v62, 0.0 }
  0xa6   :  { %v324_v63 = vadd.f32 %v323_v60, %v58_v57 }
  0xa7   :  { %378 = vst [vmem:[%s878_s3] sm:$0xff] %v370_v0  ;;  %v295_v4 = vpop.f32.mrf.mxu2 }
  0xa8   :  { %v338_v1 = vadd.f32 %v337_v56, %v324_v63  ;;  %v269_v55 = vpop.f32.mrf.mxu0  ;;  %v296_v19 = vadd.f32 %v295_v4, %v58_v57 }
  0xa9   :  { %v270_v5 = vadd.f32 %v269_v55, %v63_v2 }
  0xaa   :  { %v372_v3 = vmax.f32 %v338_v1, 0.0 }
  0xab   :  { %v284_v7 = vadd.f32 %v283_v54, %v270_v5 }
  0xac   :  { %380 = vst [vmem:[%s878_s3 + $0x10] sm:$0xff] %v372_v3 }
  0xad   :  { %v325_v6 = vpop.f32.mrf.mxu1  ;;  %v374_v10 = vmax.f32 %v284_v7, 0.0 }
  0xae   :  { %v326_v8 = vadd.f32 %v325_v6, %v63_v2 }
  0xaf   :  { %382 = vst [vmem:[%s878_s3 + $0x20] sm:$0xff] %v374_v10  ;;  %v297_v14 = vpop.f32.mrf.mxu2 }
  0xb0   :  { %v351_v9 = vpop.f32.mrf.mxu3  ;;  %v340_v11 = vadd.f32 %v339_v61, %v326_v8  ;;  %v365_v15 = vpop.f32.mrf.mxu0  ;;  %v298_v27 = vadd.f32 %v297_v14, %v63_v2 }
  0xb1   :  { %v352_v12 = vadd.f32 %v351_v9, %v58_v57 }
  0xb2   :  { %v376_v13 = vmax.f32 %v340_v11, 0.0 }
  0xb3   :  { %v366_v16 = vadd.f32 %v365_v15, %v352_v12 }
  0xb4   :  { %384 = vst [vmem:[%s878_s3 + $0x30] sm:$0xff] %v376_v13 }
  0xb5   :  { %v373_v17 = vmax.f32 %v366_v16, 0.0 }
  0xb7   :  { %381 = vst [vmem:[%s878_s3 + $0x18] sm:$0xff] %v373_v17  ;;  %v309_v21 = vpop.f32.mrf.mxu2 }
  0xb8   :  { %v353_v18 = vpop.f32.mrf.mxu3  ;;  %v310_v22 = vadd.f32 %v309_v21, %v296_v19  ;;  %v367_v23 = vpop.f32.mrf.mxu0 }
  0xb9   :  { %v354_v20 = vadd.f32 %v353_v18, %v63_v2 }
  0xba   :  { %v371_v25 = vmax.f32 %v310_v22, 0.0 }
  0xbb   :  { %v368_v24 = vadd.f32 %v367_v23, %v354_v20 }
  0xbc   :  { %379 = vst [vmem:[%s878_s3 + $0x8] sm:$0xff] %v371_v25 }
  0xbd   :  { %v377_v26 = vmax.f32 %v368_v24, 0.0 }
  0xbf   :  { %385 = vst [vmem:[%s878_s3 + $0x38] sm:$0xff] %v377_v26  ;;  %v311_v28 = vpop.f32.mrf.mxu2 }
  0xc0   :  { %v312_v29 = vadd.f32 %v311_v28, %v298_v27 }
  0xc2   :  { %v375_v30 = vmax.f32 %v312_v29, 0.0 }
  0xc4   :  { %383 = vst [vmem:[%s878_s3 + $0x28] sm:$0xff] %v375_v30 }

// kernel: hnn_forward.12
= control target key start
LH: loop header
LB: loop body
LE: loop exit
PB: predicated region body
PF: predicated region fallthrough
CT: control target
= control target key end

     0   :  { %v268_v6 = vmov 0   ;;  %vm133_vm0 = vcmask 130048   ;;  %s366_s1 = inlined_call_operand.vmem [shape: bf16[144,128], index: 1, kind: input, shape index: {}]   ;;  %s367_s0 = inlined_call_operand.vmem [shape: bf16[32,144], index: 0, kind: input, shape index: {}]   ;;  %s368_s2 = inlined_call_operand.vmem [shape: f32[32,1], index: 2, kind: input, shape index: {}]   ;;  %s369_s3 = inlined_call_operand.vmem [shape: f32[32,128], index: 3, kind: output, shape index: {}]  }
   0x1   :  { %v255_v0 = vld [vmem:[%s366_s1 + $0x38] sm:$0xff]  ;;  %v256_v1 = vld [vmem:[%s366_s1 + $0x40] sm:$0xff]  ;;  %v254_v3 = vld [vmem:[%s366_s1 + $0x30] sm:$0xff]  ;;  %267 = vset.pattern.permute.xlu1 %v268_v6  ;;  %266 = vset.pattern.permute.xlu0 %v268_v6 }
   0x2   :  { %v244_v2 = vld [vmem:[%s367_s0 + $0x4] sm:$0xf]  ;;  %140 = vmatpush.bf16.msra.mxu0 %v255_v0  ;;  %257 = vmatpush.bf16.msra.mxu2 %v255_v0  ;;  %v194_v4 = vld [vmem:[%s367_s0 + $0x8] sm:$0xf0]  ;;  %v39_v7 = vld [vmem:[%s368_s2 + $0x10] sm:$0xff] }
   0x3   :  { %166 = vmatpush.bf16.msra.mxu1 %v256_v1  ;;  %v197_v5 = vor.u32 %v244_v2, %v194_v4  ;;  %v253_v8 = vld [vmem:[%s366_s1 + $0x28] sm:$0xff]  ;;  %v37_v9 = vld [vmem:[%s368_s2] sm:$0xff]  ;;  %53 = vperm.xlu1 %267, %v39_v7   ;;  %v40_v11 = vld [vmem:[%s368_s2 + $0x18] sm:$0xff] }
   0x4   :  { %43 = vperm.xlu0 %266, %v37_v9   ;;  %v252_v10 = vld [vmem:[%s366_s1 + $0x20] sm:$0xff]  ;;  %v38_v12 = vld [vmem:[%s368_s2 + $0x8] sm:$0xff]  ;;  %v251_v13 = vld [vmem:[%s366_s1 + $0x18] sm:$0xff] }
   0x5   :  { %v246_v14 = vld [vmem:[%s367_s0 + $0x14] sm:$0xf]  ;;  %v202_v15 = vld [vmem:[%s367_s0 + $0x18] sm:$0xf0]  ;;  %v249_v18 = vld [vmem:[%s366_s1 + $0x8] sm:$0xff] }
   0x6   :  { %141 = vmatpush.bf16.msra.mxu0 %v254_v3  ;;  %258 = vmatpush.bf16.msra.mxu2 %v254_v3  ;;  %v250_v16 = vld [vmem:[%s366_s1 + $0x10] sm:$0xff]  ;;  %v205_v17 = vor.u32 %v246_v14, %v202_v15  ;;  %v248_v19 = vld [vmem:[%s366_s1] sm:$0xff]  ;;  %v245_v21 = vld [vmem:[%s367_s0 + $0x4] sm:$0xf0] }
   0x7   :  { %242 = vmatmul.msk.bf16.vlgmr.msra.gmra.mxu1 %vm133_vm0, %v197_v5  ;;  %v192_v20 = vld [vmem:[%s367_s0] sm:$0xf]  ;;  %v200_v22 = vld [vmem:[%s367_s0 + $0x10] sm:$0xf]  ;;  %v247_v23 = vld [vmem:[%s367_s0 + $0x14] sm:$0xf0] }
   0x8   :  { %v193_v24 = vor.u32 %v245_v21, %v192_v20  ;;  %v201_v25 = vor.u32 %v247_v23, %v200_v22 }
   0xa   :  { %142 = vmatpush.bf16.msra.mxu0 %v253_v8  ;;  %259 = vmatpush.bf16.msra.mxu2 %v253_v8 }
   0xb   :  { %58 = vperm.xlu1 %267, %v40_v11  }
   0xc   :  { %48 = vperm.xlu0 %266, %v38_v12  }
   0xe   :  { %143 = vmatpush.bf16.msra.mxu0 %v252_v10  ;;  %260 = vmatpush.bf16.msra.mxu2 %v252_v10 }
  0x12   :  { %144 = vmatpush.bf16.msra.mxu0 %v251_v13  ;;  %261 = vmatpush.bf16.msra.mxu2 %v251_v13 }
  0x16   :  { %145 = vmatpush.bf16.msra.mxu0 %v250_v16  ;;  %262 = vmatpush.bf16.msra.mxu2 %v250_v16 }
  0x17   :  { %243 = vmatmul.msk.bf16.gmra.mxu1 %vm133_vm0, %v205_v17 }
  0x1a   :  { %146 = vmatpush.bf16.msra.mxu0 %v249_v18  ;;  %263 = vmatpush.bf16.msra.mxu2 %v249_v18 }
  0x1e   :  { %147 = vmatpush.bf16.msra.mxu0 %v248_v19  ;;  %264 = vmatpush.bf16.msra.mxu2 %v248_v19 }
  0x21   :  { %148 = vmatmul.bf16.vlgmr.msra.gmra.mxu0 %v193_v24  ;;  %153 = vmatmul.bf16.vlgmr.msra.gmra.mxu2 %v201_v25 }
  0x75   :  { %v54_v32 = vpop.permute.xlu1 %53 }
  0x76   :  { %v44_v28 = vpop.permute.xlu0 %43 }
  0x7d   :  { %v59_v44 = vpop.permute.xlu1 %58 }
  0x7e   :  { %v49_v37 = vpop.permute.xlu0 %48 }
  0x84   :  { %v168_v26 = vpop.f32.mrf.mxu1 }
  0x8c   :  { %v170_v27 = vpop.f32.mrf.mxu1 }
  0x94   :  { %v173_v34 = vpop.f32.mrf.mxu1 }
  0x9c   :  { %v175_v47 = vpop.f32.mrf.mxu1 }
  0x9e   :  { %v149_v29 = vpop.f32.mrf.mxu0 }
  0x9f   :  { %v150_v30 = vadd.f32 %v149_v29, %v44_v28 }
  0xa1   :  { %v169_v31 = vadd.f32 %v168_v26, %v150_v30 }
  0xa3   :  { %v178_v33 = vmax.f32 %v169_v31, 0.0 }
  0xa4   :  { %v154_v35 = vpop.f32.mrf.mxu2 }
  0xa5   :  { %182 = vst [vmem:[%s369_s3] sm:$0xff] %v178_v33  ;;  %v155_v36 = vadd.f32 %v154_v35, %v54_v32 }
  0xa6   :  { %v151_v38 = vpop.f32.mrf.mxu0 }
  0xa7   :  { %v174_v39 = vadd.f32 %v173_v34, %v155_v36  ;;  %v152_v40 = vadd.f32 %v151_v38, %v49_v37 }
  0xa9   :  { %v180_v41 = vmax.f32 %v174_v39, 0.0  ;;  %v171_v42 = vadd.f32 %v170_v27, %v152_v40 }
  0xab   :  { %184 = vst [vmem:[%s369_s3 + $0x10] sm:$0xff] %v180_v41  ;;  %v179_v43 = vmax.f32 %v171_v42, 0.0 }
  0xac   :  { %v156_v45 = vpop.f32.mrf.mxu2 }
  0xad   :  { %183 = vst [vmem:[%s369_s3 + $0x8] sm:$0xff] %v179_v43  ;;  %v157_v46 = vadd.f32 %v156_v45, %v59_v44 }
  0xaf   :  { %v176_v48 = vadd.f32 %v175_v47, %v157_v46 }
  0xb1   :  { %v181_v49 = vmax.f32 %v176_v48, 0.0 }
  0xb3   :  { %185 = vst [vmem:[%s369_s3 + $0x18] sm:$0xff] %v181_v49 }

// kernel: hnn_forward.13
= control target key start
LH: loop header
LB: loop body
LE: loop exit
PB: predicated region body
PF: predicated region fallthrough
CT: control target
= control target key end

     0   :  { %vm283_vm0 = vcmask 261120   ;;  %v577_v15 = vmov 0   ;;  %s804_s1 = inlined_call_operand.vmem [shape: bf16[288,32], index: 1, kind: input, shape index: {}]   ;;  %s805_s0 = inlined_call_operand.vmem [shape: bf16[64,288], index: 0, kind: input, shape index: {}]   ;;  %s806_s2 = inlined_call_operand.vmem [shape: f32[64,1], index: 2, kind: input, shape index: {}]   ;;  %s807_s3 = inlined_call_operand.vmem [shape: f32[64,32], index: 3, kind: output, shape index: {}]  }
   0x1   :  { %v546_v0 = vld [vmem:[%s804_s1 + $0x38] sm:$0xff]  ;;  %v556_v2 = vld [vmem:[%s804_s1 + $0x88] sm:$0xff]  ;;  %v545_v3 = vld [vmem:[%s804_s1 + $0x30] sm:$0xff]  ;;  %575 = vset.pattern.permute.xlu1 %v577_v15  ;;  %574 = vset.pattern.permute.xlu0 %v577_v15 }
   0x2   :  { %v604_v1 = vld [vmem:[%s804_s1 + $0x78] sm:$0xff]  ;;  %296 = vmatpush.bf16.msra.mxu0 %v546_v0  ;;  %557 = vmatpush.bf16.msra.mxu3 %v546_v0  ;;  %v616_v4 = vld [vmem:[%s804_s1 + $0x70] sm:$0xff]  ;;  %v555_v5 = vld [vmem:[%s804_s1 + $0x80] sm:$0xff] }
   0x3   :  { %565 = vmatpush.bf16.msra.mxu1 %v604_v1  ;;  %360 = vmatpush.bf16.msra.mxu2 %v556_v2  ;;  %v413_v6 = vld [vmem:[%s805_s0 + $0x8] sm:$0xf]  ;;  %v529_v7 = vld [vmem:[%s805_s0 + $0x10] sm:$0xf0]  ;;  %v543_v11 = vld [vmem:[%s804_s1 + $0x20] sm:$0xff] }
   0x4   :  { %v544_v8 = vld [vmem:[%s804_s1 + $0x28] sm:$0xff]  ;;  %v414_v10 = vor.u32 %v529_v7, %v413_v6  ;;  %v644_v12 = vld [vmem:[%s804_s1 + $0x60] sm:$0xff]  ;;  %v542_v13 = vld [vmem:[%s804_s1 + $0x18] sm:$0xff]  ;;  %576 = vset.pattern.permute.xlu2 %v577_v15 }
   0x5   :  { %v634_v9 = vld [vmem:[%s804_s1 + $0x68] sm:$0xff]  ;;  %v653_v14 = vld [vmem:[%s804_s1 + $0x58] sm:$0xff]  ;;  %v541_v16 = vld [vmem:[%s804_s1 + $0x10] sm:$0xff] }
   0x6   :  { %297 = vmatpush.bf16.msra.mxu0 %v545_v3  ;;  %558 = vmatpush.bf16.msra.mxu3 %v545_v3  ;;  %v69_v17 = vld [vmem:[%s806_s2 + $0x10] sm:$0xff]  ;;  %v425_v19 = vld [vmem:[%s805_s0 + $0x20] sm:$0xf]  ;;  %v532_v20 = vld [vmem:[%s805_s0 + $0x28] sm:$0xf0] }
   0x7   :  { %566 = vmatpush.bf16.msra.mxu1 %v616_v4  ;;  %361 = vmatpush.bf16.msra.mxu2 %v555_v5  ;;  %v549_v18 = vld [vmem:[%s804_s1 + $0x50] sm:$0xff]  ;;  %v540_v21 = vld [vmem:[%s804_s1 + $0x8] sm:$0xff]  ;;  %v426_v23 = vor.u32 %v532_v20, %v425_v19  ;;  %v67_v24 = vld [vmem:[%s806_s2] sm:$0xff] }
   0x8   :  { %87 = vperm.xlu1 %575, %v69_v17   ;;  %v548_v22 = vld [vmem:[%s804_s1 + $0x48] sm:$0xff]  ;;  %77 = vperm.xlu0 %574, %v67_v24   ;;  %v539_v25 = vld [vmem:[%s804_s1] sm:$0xff]  ;;  %v417_v26 = vld [vmem:[%s805_s0 + $0x18] sm:$0xf] }
   0x9   :  { %v70_v27 = vld [vmem:[%s806_s2 + $0x18] sm:$0xff]  ;;  %v531_v28 = vld [vmem:[%s805_s0 + $0x20] sm:$0xf0]  ;;  %v405_v29 = vld [vmem:[%s805_s0] sm:$0xf] }
   0xa   :  { %298 = vmatpush.bf16.msra.mxu0 %v544_v8  ;;  %559 = vmatpush.bf16.msra.mxu3 %v544_v8  ;;  %v528_v30 = vld [vmem:[%s805_s0 + $0x8] sm:$0xf0]  ;;  %v547_v31 = vld [vmem:[%s804_s1 + $0x40] sm:$0xff]  ;;  %v530_v32 = vld [vmem:[%s805_s0 + $0x1c] sm:$0xf]  ;;  %v418_v34 = vor.u32 %v531_v28, %v417_v26 }
   0xb   :  { %567 = vmatpush.bf16.msra.mxu1 %v634_v9  ;;  %523 = vmatmul.msk.bf16.vlgmr.msra.gmra.mxu2 %vm283_vm0, %v414_v10  ;;  %v419_v33 = vld [vmem:[%s805_s0 + $0x24] sm:$0xf0]  ;;  %v406_v35 = vor.u32 %v528_v30, %v405_v29  ;;  %v74_v38 = vld [vmem:[%s806_s2 + $0x38] sm:$0xff]  ;;  %v71_v39 = vld [vmem:[%s806_s2 + $0x20] sm:$0xff] }
   0xc   :  { %v422_v36 = vor.u32 %v530_v32, %v419_v33  ;;  %v68_v37 = vld [vmem:[%s806_s2 + $0x8] sm:$0xff]  ;;  %v437_v40 = vld [vmem:[%s805_s0 + $0x38] sm:$0xf]  ;;  %v535_v41 = vld [vmem:[%s805_s0 + $0x40] sm:$0xf0]  ;;  %97 = vperm.xlu2 %576, %v71_v39  }
   0xd   :  { %v438_v42 = vor.u32 %v535_v41, %v437_v40  ;;  %v73_v43 = vld [vmem:[%s806_s2 + $0x30] sm:$0xff]  ;;  %v72_v44 = vld [vmem:[%s806_s2 + $0x28] sm:$0xff]  ;;  %v534_v46 = vld [vmem:[%s805_s0 + $0x38] sm:$0xf0] }
   0xe   :  { %299 = vmatpush.bf16.msra.mxu0 %v543_v11  ;;  %560 = vmatpush.bf16.msra.mxu3 %v543_v11  ;;  %v429_v45 = vld [vmem:[%s805_s0 + $0x30] sm:$0xf]  ;;  %v533_v47 = vld [vmem:[%s805_s0 + $0x34] sm:$0xf]  ;;  %v431_v48 = vld [vmem:[%s805_s0 + $0x3c] sm:$0xf0] }
   0xf   :  { %568 = vmatpush.bf16.msra.mxu1 %v644_v12  ;;  %v430_v49 = vor.u32 %v534_v46, %v429_v45  ;;  %v434_v50 = vor.u32 %v533_v47, %v431_v48  ;;  %v449_v51 = vld [vmem:[%s805_s0 + $0x50] sm:$0xf]  ;;  %v538_v52 = vld [vmem:[%s805_s0 + $0x58] sm:$0xf0]  ;;  %v527_v54 = vld [vmem:[%s805_s0 + $0x4] sm:$0xf] }
  0x10   :  { %92 = vperm.xlu1 %575, %v70_v27   ;;  %82 = vperm.xlu0 %574, %v68_v37   ;;  %v450_v53 = vor.u32 %v538_v52, %v449_v51  ;;  %v407_v55 = vld [vmem:[%s805_s0 + $0xc] sm:$0xf0]  ;;  %v441_v57 = vld [vmem:[%s805_s0 + $0x48] sm:$0xf]  ;;  %v537_v58 = vld [vmem:[%s805_s0 + $0x50] sm:$0xf0] }
  0x11   :  { %v410_v56 = vor.u32 %v527_v54, %v407_v55  ;;  %v536_v59 = vld [vmem:[%s805_s0 + $0x4c] sm:$0xf]  ;;  %v443_v60 = vld [vmem:[%s805_s0 + $0x54] sm:$0xf0]  ;;  %v442_v61 = vor.u32 %v537_v58, %v441_v57 }
  0x12   :  { %300 = vmatpush.bf16.msra.mxu0 %v542_v13  ;;  %561 = vmatpush.bf16.msra.mxu3 %v542_v13  ;;  %v446_v62 = vor.u32 %v536_v59, %v443_v60 }
  0x13   :  { %569 = vmatpush.bf16.msra.mxu1 %v653_v14 }
  0x14   :  { %102 = vperm.xlu2 %576, %v72_v44  }
  0x16   :  { %301 = vmatpush.bf16.msra.mxu0 %v541_v16  ;;  %562 = vmatpush.bf16.msra.mxu3 %v541_v16 }
  0x17   :  { %570 = vmatpush.bf16.msra.mxu1 %v549_v18 }
  0x18   :  { %112 = vperm.xlu1 %575, %v74_v38   ;;  %107 = vperm.xlu0 %574, %v73_v43  }
  0x1a   :  { %302 = vmatpush.bf16.msra.mxu0 %v540_v21  ;;  %563 = vmatpush.bf16.msra.mxu3 %v540_v21 }
  0x1b   :  { %571 = vmatpush.bf16.msra.mxu1 %v548_v22  ;;  %524 = vmatmul.msk.bf16.gmra.mxu2 %vm283_vm0, %v426_v23 }
  0x1e   :  { %303 = vmatpush.bf16.msra.mxu0 %v539_v25  ;;  %564 = vmatpush.bf16.msra.mxu3 %v539_v25 }
  0x1f   :  { %572 = vmatpush.bf16.msra.mxu1 %v547_v31 }
  0x21   :  { %309 = vmatmul.bf16.vlgmr.msra.gmra.mxu3 %v418_v34  ;;  %304 = vmatmul.bf16.vlgmr.msra.gmra.mxu0 %v406_v35 }
  0x22   :  { %325 = vmatpush.bf16.msrb.mxu0 %v604_v1  ;;  %338 = vmatmul.bf16.vlgmr.msra.gmra.mxu1 %v422_v36 }
  0x26   :  { %326 = vmatpush.bf16.msrb.mxu0 %v616_v4 }
  0x2a   :  { %327 = vmatpush.bf16.msrb.mxu0 %v634_v9 }
  0x2b   :  { %525 = vmatmul.msk.bf16.gmra.mxu2 %vm283_vm0, %v438_v42 }
  0x2e   :  { %328 = vmatpush.bf16.msrb.mxu0 %v644_v12 }
  0x31   :  { %314 = vmatmul.bf16.gmra.mxu3 %v430_v49 }
  0x32   :  { %329 = vmatpush.bf16.msrb.mxu0 %v653_v14  ;;  %343 = vmatmul.bf16.gmra.mxu1 %v434_v50 }
  0x36   :  { %330 = vmatpush.bf16.msrb.mxu0 %v549_v18 }
  0x3a   :  { %331 = vmatpush.bf16.msrb.mxu0 %v548_v22 }
  0x3b   :  { %526 = vmatmul.msk.bf16.gmra.mxu2 %vm283_vm0, %v450_v53 }
  0x3e   :  { %332 = vmatpush.bf16.msrb.mxu0 %v547_v31 }
  0x41   :  { %333 = vmatmul.bf16.vlgmr.msrb.gmra.mxu0 %v410_v56  ;;  %319 = vmatmul.bf16.gmra.mxu3 %v442_v61 }
  0x42   :  { %348 = vmatmul.bf16.gmra.mxu1 %v446_v62 }
  0x66   :  { %v98_v18 = vpop.permute.xlu2 %97 }
  0x6e   :  { %v103_v30 = vpop.permute.xlu2 %102 }
  0x7a   :  { %v88_v3 = vpop.permute.xlu1 %87  ;;  %v78_v15 = vpop.permute.xlu0 %77 }
  0x82   :  { %v93_v11 = vpop.permute.xlu1 %92  ;;  %v83_v26 = vpop.permute.xlu0 %82 }
  0x8a   :  { %v108_v42 = vpop.permute.xlu0 %107  ;;  %v113_v55 = vpop.permute.xlu1 %112 }
  0x8e   :  { %v363_v63 = vpop.f32.mrf.mxu2 }
  0x96   :  { %v365_v0 = vpop.f32.mrf.mxu2 }
  0x9e   :  { %v368_v1 = vpop.f32.mrf.mxu2  ;;  %v305_v8 = vpop.f32.mrf.mxu0 }
  0x9f   :  { %v339_v2 = vpop.f32.mrf.mxu1  ;;  %v306_v28 = vadd.f32 %v305_v8, %v78_v15 }
  0xa4   :  { %v310_v4 = vpop.f32.mrf.mxu3 }
  0xa5   :  { %v311_v5 = vadd.f32 %v310_v4, %v88_v3 }
  0xa6   :  { %v370_v9 = vpop.f32.mrf.mxu2  ;;  %v307_v20 = vpop.f32.mrf.mxu0 }
  0xa7   :  { %v340_v6 = vadd.f32 %v339_v2, %v311_v5  ;;  %v341_v7 = vpop.f32.mrf.mxu1  ;;  %v308_v41 = vadd.f32 %v307_v20, %v83_v26 }
  0xa9   :  { %v369_v10 = vadd.f32 %v368_v1, %v340_v6 }
  0xab   :  { %v385_v12 = vmax.f32 %v369_v10, 0.0 }
  0xac   :  { %v312_v13 = vpop.f32.mrf.mxu3 }
  0xad   :  { %393 = vst.msk [vmem:[%s807_s3 + $0x10] sm:$0xff] %vm283_vm0, %v385_v12  ;;  %v313_v14 = vadd.f32 %v312_v13, %v93_v11 }
  0xae   :  { %v373_v21 = vpop.f32.mrf.mxu2 }
  0xaf   :  { %v342_v16 = vadd.f32 %v341_v7, %v313_v14  ;;  %v344_v17 = vpop.f32.mrf.mxu1 }
  0xb1   :  { %v371_v19 = vadd.f32 %v370_v9, %v342_v16 }
  0xb3   :  { %v386_v22 = vmax.f32 %v371_v19, 0.0 }
  0xb4   :  { %v315_v23 = vpop.f32.mrf.mxu3 }
  0xb5   :  { %394 = vst.msk [vmem:[%s807_s3 + $0x18] sm:$0xff] %vm283_vm0, %v386_v22  ;;  %v316_v24 = vadd.f32 %v315_v23, %v98_v18 }
  0xb6   :  { %v375_v33 = vpop.f32.mrf.mxu2 }
  0xb7   :  { %v345_v25 = vadd.f32 %v344_v17, %v316_v24  ;;  %v346_v29 = vpop.f32.mrf.mxu1 }
  0xb9   :  { %v374_v27 = vadd.f32 %v373_v21, %v345_v25 }
  0xbb   :  { %v387_v31 = vmax.f32 %v374_v27, 0.0 }
  0xbc   :  { %v317_v35 = vpop.f32.mrf.mxu3 }
  0xbd   :  { %395 = vst.msk [vmem:[%s807_s3 + $0x20] sm:$0xff] %vm283_vm0, %v387_v31  ;;  %v318_v36 = vadd.f32 %v317_v35, %v103_v30 }
  0xbe   :  { %v334_v32 = vpop.f32.mrf.mxu0  ;;  %v378_v49 = vpop.f32.mrf.mxu2 }
  0xbf   :  { %v335_v34 = vadd.f32 %v334_v32, %v306_v28  ;;  %v347_v38 = vadd.f32 %v346_v29, %v318_v36  ;;  %v349_v45 = vpop.f32.mrf.mxu1 }
  0xc1   :  { %v364_v37 = vadd.f32 %v363_v63, %v335_v34  ;;  %v376_v40 = vadd.f32 %v375_v33, %v347_v38 }
  0xc3   :  { %v383_v39 = vmax.f32 %v364_v37, 0.0  ;;  %v388_v43 = vmax.f32 %v376_v40, 0.0 }
  0xc4   :  { %v320_v47 = vpop.f32.mrf.mxu3 }
  0xc5   :  { %391 = vst.msk [vmem:[%s807_s3] sm:$0xff] %vm283_vm0, %v383_v39  ;;  %v321_v48 = vadd.f32 %v320_v47, %v108_v42 }
  0xc6   :  { %v336_v44 = vpop.f32.mrf.mxu0  ;;  %396 = vst.msk [vmem:[%s807_s3 + $0x28] sm:$0xff] %vm283_vm0, %v388_v43  ;;  %v380_v60 = vpop.f32.mrf.mxu2 }
  0xc7   :  { %v337_v46 = vadd.f32 %v336_v44, %v308_v41  ;;  %v350_v51 = vadd.f32 %v349_v45, %v321_v48  ;;  %v351_v58 = vpop.f32.mrf.mxu1 }
  0xc9   :  { %v366_v50 = vadd.f32 %v365_v0, %v337_v46  ;;  %v379_v53 = vadd.f32 %v378_v49, %v350_v51 }
  0xcb   :  { %v384_v52 = vmax.f32 %v366_v50, 0.0  ;;  %v389_v54 = vmax.f32 %v379_v53, 0.0 }
  0xcc   :  { %v322_v56 = vpop.f32.mrf.mxu3 }
  0xcd   :  { %392 = vst.msk [vmem:[%s807_s3 + $0x8] sm:$0xff] %vm283_vm0, %v384_v52  ;;  %v323_v57 = vadd.f32 %v322_v56, %v113_v55 }
  0xce   :  { %397 = vst.msk [vmem:[%s807_s3 + $0x30] sm:$0xff] %vm283_vm0, %v389_v54 }
  0xcf   :  { %v352_v59 = vadd.f32 %v351_v58, %v323_v57 }
  0xd1   :  { %v381_v61 = vadd.f32 %v380_v60, %v352_v59 }
  0xd3   :  { %v390_v62 = vmax.f32 %v381_v61, 0.0 }
  0xd5   :  { %398 = vst.msk [vmem:[%s807_s3 + $0x38] sm:$0xff] %vm283_vm0, %v390_v62 }

// kernel: hnn_forward.14
= control target key start
LH: loop header
LB: loop body
LE: loop exit
PB: predicated region body
PF: predicated region fallthrough
CT: control target
= control target key end

     0   :  { %v1370_v1 = vmov 0   ;;  %vm647_vm0 = vcmask 523264   ;;  %vm933_vm1 = vcmask 64512   ;;  %s1895_s1 = inlined_call_operand.vmem [shape: bf16[576,8], index: 1, kind: input, shape index: {}]   ;;  %s1896_s2 = inlined_call_operand.vmem [shape: f32[128,1], index: 2, kind: input, shape index: {}]   ;;  %s1897_s0 = inlined_call_operand.vmem [shape: bf16[128,576], index: 0, kind: input, shape index: {}]   ;;  %s1898_s3 = inlined_call_operand.vmem [shape: f32[128,8], index: 3, kind: output, shape index: {}]  }
   0x1   :  { %v1313_v0 = vld [vmem:[%s1895_s1 + $0x38] sm:$0xff]  ;;  %1367 = vset.pattern.permute.xlu0 %v1370_v1  ;;  %1368 = vset.pattern.permute.xlu1 %v1370_v1  ;;  %v135_v2 = vld [vmem:[%s1896_s2] sm:$0xff]  ;;  %v1312_v3 = vld [vmem:[%s1895_s1 + $0x30] sm:$0xff] }
   0x2   :  { %1369 = vset.pattern.permute.xlu2 %v1370_v1  ;;  %1342 = vmatpush.bf16.msra.mxu1 %v1313_v0  ;;  %v137_v4 = vld [vmem:[%s1896_s2 + $0x10] sm:$0xff]  ;;  %v1311_v5 = vld [vmem:[%s1895_s1 + $0x28] sm:$0xff]  ;;  %v138_v7 = vld [vmem:[%s1896_s2 + $0x18] sm:$0xff] }
   0x3   :  { %1343 = vmatpush.bf16.msra.mxu2 %v1313_v0  ;;  %1344 = vmatpush.bf16.msra.mxu3 %v1313_v0  ;;  %v136_v6 = vld [vmem:[%s1896_s2 + $0x8] sm:$0xff]  ;;  %v1310_v8 = vld [vmem:[%s1895_s1 + $0x20] sm:$0xff]  ;;  %v1309_v9 = vld [vmem:[%s1895_s1 + $0x18] sm:$0xff] }
   0x4   :  { %672 = vmatpush.bf16.msra.mxu0 %v1313_v0  ;;  %153 = vperm.xlu0 %1367, %v135_v2   ;;  %v141_v10 = vld [vmem:[%s1896_s2 + $0x30] sm:$0xff]  ;;  %v142_v11 = vld [vmem:[%s1896_s2 + $0x38] sm:$0xff]  ;;  %v1307_v13 = vld [vmem:[%s1895_s1 + $0x8] sm:$0xff] }
   0x5   :  { %163 = vperm.xlu1 %1368, %v137_v4   ;;  %v1308_v12 = vld [vmem:[%s1895_s1 + $0x10] sm:$0xff]  ;;  %v1306_v14 = vld [vmem:[%s1895_s1] sm:$0xff]  ;;  %v144_v18 = vld [vmem:[%s1896_s2 + $0x48] sm:$0xff] }
   0x6   :  { %1345 = vmatpush.bf16.msra.mxu1 %v1312_v3  ;;  %v996_v15 = vld [vmem:[%s1897_s0 + $0x50] sm:$0xf]  ;;  %v139_v16 = vld [vmem:[%s1896_s2 + $0x20] sm:$0xff]  ;;  %v1288_v21 = vld [vmem:[%s1897_s0 + $0xb0] sm:$0xf0] }
   0x7   :  { %1346 = vmatpush.bf16.msra.mxu2 %v1312_v3  ;;  %1347 = vmatpush.bf16.msra.mxu3 %v1312_v3  ;;  %v1278_v17 = vld [vmem:[%s1897_s0 + $0x60] sm:$0xf0]  ;;  %v145_v19 = vld [vmem:[%s1896_s2 + $0x50] sm:$0xff]  ;;  %v1036_v20 = vld [vmem:[%s1897_s0 + $0xa0] sm:$0xf] }
   0x8   :  { %673 = vmatpush.bf16.msra.mxu0 %v1312_v3  ;;  %173 = vperm.xlu2 %1369, %v139_v16   ;;  %v1076_v22 = vld [vmem:[%s1897_s0 + $0xf0] sm:$0xf]  ;;  %v1298_v23 = vld [vmem:[%s1897_s0 + $0x100] sm:$0xf0]  ;;  %v956_v24 = vld [vmem:[%s1897_s0] sm:$0xf]  ;;  %v997_v28 = vor.u32 %v1278_v17, %v996_v15  ;;  %v1037_v29 = vor.u32 %v1288_v21, %v1036_v20 }
   0x9   :  { %v1268_v25 = vld [vmem:[%s1897_s0 + $0x10] sm:$0xf0]  ;;  %v1329_v26 = vld [vmem:[%s1895_s1 + $0xb8] sm:$0xff]  ;;  %v1077_v30 = vor.u32 %v1298_v23, %v1076_v22  ;;  %v147_v36 = vld [vmem:[%s1896_s2 + $0x60] sm:$0xff] }
   0xa   :  { %1348 = vmatpush.bf16.msra.mxu1 %v1311_v5  ;;  %v1321_v27 = vld [vmem:[%s1895_s1 + $0x78] sm:$0xff]  ;;  %v957_v31 = vor.u32 %v1268_v25, %v956_v24  ;;  %v1328_v34 = vld [vmem:[%s1895_s1 + $0xb0] sm:$0xff]  ;;  %v148_v37 = vld [vmem:[%s1896_s2 + $0x68] sm:$0xff] }
   0xb   :  { %1349 = vmatpush.bf16.msra.mxu2 %v1311_v5  ;;  %1350 = vmatpush.bf16.msra.mxu3 %v1311_v5  ;;  %v1337_v32 = vld [vmem:[%s1895_s1 + $0xf8] sm:$0xff]  ;;  %v1320_v35 = vld [vmem:[%s1895_s1 + $0x70] sm:$0xff]  ;;  %v140_v40 = vld [vmem:[%s1896_s2 + $0x28] sm:$0xff] }
   0xc   :  { %674 = vmatpush.bf16.msra.mxu0 %v1311_v5  ;;  %158 = vperm.xlu0 %1367, %v136_v6   ;;  %v1341_v33 = vld [vmem:[%s1895_s1 + $0x118] sm:$0xff]  ;;  %v1336_v38 = vld [vmem:[%s1895_s1 + $0xf0] sm:$0xff]  ;;  %v1327_v41 = vld [vmem:[%s1895_s1 + $0xa8] sm:$0xff] }
   0xd   :  { %168 = vperm.xlu1 %1368, %v138_v7   ;;  %v1340_v39 = vld [vmem:[%s1895_s1 + $0x110] sm:$0xff]  ;;  %v1319_v42 = vld [vmem:[%s1895_s1 + $0x68] sm:$0xff]  ;;  %v1326_v44 = vld [vmem:[%s1895_s1 + $0xa0] sm:$0xff] }
   0xe   :  { %1351 = vmatpush.bf16.msra.mxu1 %v1310_v8  ;;  %v1335_v43 = vld [vmem:[%s1895_s1 + $0xe8] sm:$0xff]  ;;  %v1318_v46 = vld [vmem:[%s1895_s1 + $0x60] sm:$0xff]  ;;  %v1016_v47 = vld [vmem:[%s1897_s0 + $0x78] sm:$0xf] }
   0xf   :  { %1352 = vmatpush.bf16.msra.mxu2 %v1310_v8  ;;  %1353 = vmatpush.bf16.msra.mxu3 %v1310_v8  ;;  %v1339_v45 = vld [vmem:[%s1895_s1 + $0x108] sm:$0xff]  ;;  %v1334_v49 = vld [vmem:[%s1895_s1 + $0xe0] sm:$0xff]  ;;  %v1293_v51 = vld [vmem:[%s1897_s0 + $0xd8] sm:$0xf0] }
  0x10   :  { %675 = vmatpush.bf16.msra.mxu0 %v1310_v8  ;;  %178 = vperm.xlu2 %1369, %v140_v40   ;;  %v1283_v48 = vld [vmem:[%s1897_s0 + $0x88] sm:$0xf0]  ;;  %v1056_v50 = vld [vmem:[%s1897_s0 + $0xc8] sm:$0xf]  ;;  %v1096_v52 = vld [vmem:[%s1897_s0 + $0x118] sm:$0xf] }
  0x11   :  { %v1303_v53 = vld [vmem:[%s1897_s0 + $0x128] sm:$0xf0]  ;;  %v976_v54 = vld [vmem:[%s1897_s0 + $0x28] sm:$0xf]  ;;  %v150_v55 = vld [vmem:[%s1896_s2 + $0x78] sm:$0xff]  ;;  %v1017_v61 = vor.u32 %v1283_v48, %v1016_v47  ;;  %v1057_v62 = vor.u32 %v1293_v51, %v1056_v50 }
  0x12   :  { %1354 = vmatpush.bf16.msra.mxu1 %v1309_v9  ;;  %v1273_v56 = vld [vmem:[%s1897_s0 + $0x38] sm:$0xf0]  ;;  %v1338_v57 = vld [vmem:[%s1895_s1 + $0x100] sm:$0xff]  ;;  %v1097_v63 = vor.u32 %v1303_v53, %v1096_v52  ;;  %v1324_v2 = vld [vmem:[%s1895_s1 + $0x90] sm:$0xff] }
  0x13   :  { %1355 = vmatpush.bf16.msra.mxu2 %v1309_v9  ;;  %1356 = vmatpush.bf16.msra.mxu3 %v1309_v9  ;;  %v143_v58 = vld [vmem:[%s1896_s2 + $0x40] sm:$0xff]  ;;  %v1325_v59 = vld [vmem:[%s1895_s1 + $0x98] sm:$0xff]  ;;  %v977_v0 = vor.u32 %v1273_v56, %v976_v54  ;;  %v1316_v3 = vld [vmem:[%s1895_s1 + $0x50] sm:$0xff] }
  0x14   :  { %676 = vmatpush.bf16.msra.mxu0 %v1309_v9  ;;  %183 = vperm.xlu0 %1367, %v141_v10   ;;  %v1317_v60 = vld [vmem:[%s1895_s1 + $0x58] sm:$0xff]  ;;  %v1332_v4 = vld [vmem:[%s1895_s1 + $0xd0] sm:$0xff]  ;;  %v1323_v6 = vld [vmem:[%s1895_s1 + $0x88] sm:$0xff] }
  0x15   :  { %188 = vperm.xlu1 %1368, %v142_v11   ;;  %v1333_v1 = vld [vmem:[%s1895_s1 + $0xd8] sm:$0xff]  ;;  %v1315_v7 = vld [vmem:[%s1895_s1 + $0x48] sm:$0xff]  ;;  %v1322_v9 = vld [vmem:[%s1895_s1 + $0x80] sm:$0xff] }
  0x16   :  { %1357 = vmatpush.bf16.msra.mxu1 %v1308_v12  ;;  %v146_v5 = vld [vmem:[%s1896_s2 + $0x58] sm:$0xff]  ;;  %v1331_v8 = vld [vmem:[%s1895_s1 + $0xc8] sm:$0xff]  ;;  %v1314_v10 = vld [vmem:[%s1895_s1 + $0x40] sm:$0xff] }
  0x17   :  { %1358 = vmatpush.bf16.msra.mxu2 %v1308_v12  ;;  %1359 = vmatpush.bf16.msra.mxu3 %v1308_v12  ;;  %v1330_v11 = vld [vmem:[%s1895_s1 + $0xc0] sm:$0xff]  ;;  %v1269_v15 = vld [vmem:[%s1897_s0 + $0x18] sm:$0xf0]  ;;  %v1267_v16 = vld [vmem:[%s1897_s0 + $0xc] sm:$0xf] }
  0x18   :  { %677 = vmatpush.bf16.msra.mxu0 %v1308_v12  ;;  %193 = vperm.xlu2 %1369, %v143_v58   ;;  %v1266_v12 = vld [vmem:[%s1897_s0 + $0x4] sm:$0xf]  ;;  %v966_v17 = vld [vmem:[%s1897_s0 + $0x1c] sm:$0xf0]  ;;  %v149_v20 = vld [vmem:[%s1896_s2 + $0x70] sm:$0xff] }
  0x19   :  { %v969_v23 = vor.u32 %v1267_v16, %v966_v17  ;;  %v1271_v25 = vld [vmem:[%s1897_s0 + $0x2c] sm:$0xf]  ;;  %v1018_v50 = vld [vmem:[%s1897_s0 + $0x8c] sm:$0xf0]  ;;  %v1024_v51 = vld [vmem:[%s1897_s0 + $0x80] sm:$0xf] }
  0x1a   :  { %1360 = vmatpush.bf16.msra.mxu1 %v1307_v13  ;;  %v1279_v40 = vld [vmem:[%s1897_s0 + $0x68] sm:$0xf0]  ;;  %v1284_v52 = vld [vmem:[%s1897_s0 + $0x90] sm:$0xf0]  ;;  %v1282_v53 = vld [vmem:[%s1897_s0 + $0x84] sm:$0xf] }
  0x1b   :  { %1361 = vmatpush.bf16.msra.mxu2 %v1307_v13  ;;  %1362 = vmatpush.bf16.msra.mxu3 %v1307_v13  ;;  %v1026_v54 = vld [vmem:[%s1897_s0 + $0x94] sm:$0xf0]  ;;  %v1285_v56 = vld [vmem:[%s1897_s0 + $0x98] sm:$0xf0]  ;;  %v1025_v58 = vor.u32 %v1284_v52, %v1024_v51  ;;  %v1295_v16 = vld [vmem:[%s1897_s0 + $0xe8] sm:$0xf0] }
  0x1c   :  { %678 = vmatpush.bf16.msra.mxu0 %v1307_v13  ;;  %198 = vperm.xlu0 %1367, %v144_v18   ;;  %v958_v13 = vld [vmem:[%s1897_s0 + $0x14] sm:$0xf0]  ;;  %v972_v18 = vld [vmem:[%s1897_s0 + $0x10] sm:$0xf] }
  0x1d   :  { %203 = vperm.xlu1 %1368, %v145_v19   ;;  %v1270_v19 = vld [vmem:[%s1897_s0 + $0x20] sm:$0xf0]  ;;  %v961_v21 = vor.u32 %v1266_v12, %v958_v13  ;;  %v1292_v13 = vld [vmem:[%s1897_s0 + $0xd4] sm:$0xf] }
  0x1e   :  { %1363 = vmatpush.bf16.msra.mxu1 %v1306_v14  ;;  %v973_v24 = vor.u32 %v1270_v19, %v972_v18  ;;  %v1294_v12 = vld [vmem:[%s1897_s0 + $0xe0] sm:$0xf0] }
  0x1f   :  { %1364 = vmatpush.bf16.msra.mxu2 %v1306_v14  ;;  %1365 = vmatpush.bf16.msra.mxu3 %v1306_v14 }
  0x20   :  { %679 = vmatpush.bf16.msra.mxu0 %v1306_v14  ;;  %208 = vperm.xlu2 %1369, %v146_v5   ;;  %v964_v14 = vld [vmem:[%s1897_s0 + $0x8] sm:$0xf] }
  0x21   :  { %690 = vmatmul.bf16.vlgmr.msra.gmra.mxu1 %v997_v28  ;;  %v965_v22 = vor.u32 %v1269_v15, %v964_v14  ;;  %v1274_v28 = vld [vmem:[%s1897_s0 + $0x40] sm:$0xf0]  ;;  %v1066_v14 = vld [vmem:[%s1897_s0 + $0xe4] sm:$0xf0]  ;;  %v1072_v15 = vld [vmem:[%s1897_s0 + $0xd8] sm:$0xf] }
  0x22   :  { %721 = vmatpush.bf16.msrb.mxu1 %v1321_v27  ;;  %700 = vmatmul.bf16.vlgmr.msra.gmra.mxu2 %v1037_v29  ;;  %v984_v27 = vld [vmem:[%s1897_s0 + $0x30] sm:$0xf]  ;;  %v1272_v29 = vld [vmem:[%s1897_s0 + $0x34] sm:$0xf]  ;;  %v1069_v19 = vor.u32 %v1292_v13, %v1066_v14 }
  0x23   :  { %770 = vmatpush.bf16.msrb.mxu2 %v1329_v26  ;;  %710 = vmatmul.bf16.vlgmr.msra.gmra.mxu3 %v1077_v30  ;;  %v978_v26 = vld [vmem:[%s1897_s0 + $0x3c] sm:$0xf0]  ;;  %v986_v30 = vld [vmem:[%s1897_s0 + $0x44] sm:$0xf0] }
  0x24   :  { %680 = vmatmul.bf16.vlgmr.msra.gmra.mxu0 %v957_v31  ;;  %819 = vmatpush.bf16.msrb.mxu3 %v1337_v32  ;;  %v992_v31 = vld [vmem:[%s1897_s0 + $0x38] sm:$0xf]  ;;  %v1275_v32 = vld [vmem:[%s1897_s0 + $0x48] sm:$0xf0] }
  0x25   :  { %872 = vmatpush.bf16.msrb.mxu0 %v1341_v33  ;;  %213 = vperm.xlu0 %1367, %v147_v36   ;;  %v981_v33 = vor.u32 %v1271_v25, %v978_v26  ;;  %v993_v36 = vor.u32 %v1275_v32, %v992_v31  ;;  %v1297_v25 = vld [vmem:[%s1897_s0 + $0xfc] sm:$0xf]  ;;  %v1086_v26 = vld [vmem:[%s1897_s0 + $0x10c] sm:$0xf0] }
  0x26   :  { %722 = vmatpush.bf16.msrb.mxu1 %v1320_v35  ;;  %218 = vperm.xlu1 %1368, %v148_v37   ;;  %v989_v35 = vor.u32 %v1272_v29, %v986_v30  ;;  %v1276_v37 = vld [vmem:[%s1897_s0 + $0x54] sm:$0xf]  ;;  %v1089_v32 = vor.u32 %v1297_v25, %v1086_v26 }
  0x27   :  { %771 = vmatpush.bf16.msrb.mxu2 %v1328_v34  ;;  %v985_v34 = vor.u32 %v1274_v28, %v984_v27  ;;  %v1092_v27 = vld [vmem:[%s1897_s0 + $0x100] sm:$0xf]  ;;  %v1300_v28 = vld [vmem:[%s1897_s0 + $0x110] sm:$0xf0] }
  0x28   :  { %820 = vmatpush.bf16.msrb.mxu3 %v1336_v38  ;;  %223 = vperm.xlu2 %1369, %v149_v20   ;;  %v998_v38 = vld [vmem:[%s1897_s0 + $0x64] sm:$0xf0]  ;;  %v1073_v20 = vor.u32 %v1295_v16, %v1072_v15 }
  0x29   :  { %873 = vmatpush.bf16.msrb.mxu0 %v1340_v39  ;;  %v1004_v39 = vld [vmem:[%s1897_s0 + $0x58] sm:$0xf] }
  0x2a   :  { %723 = vmatpush.bf16.msrb.mxu1 %v1319_v42  ;;  %v1006_v42 = vld [vmem:[%s1897_s0 + $0x6c] sm:$0xf0] }
  0x2b   :  { %772 = vmatpush.bf16.msrb.mxu2 %v1327_v41  ;;  %v1277_v41 = vld [vmem:[%s1897_s0 + $0x5c] sm:$0xf] }
  0x2c   :  { %821 = vmatpush.bf16.msrb.mxu3 %v1335_v43  ;;  %v1012_v43 = vld [vmem:[%s1897_s0 + $0x60] sm:$0xf]  ;;  %v1009_v47 = vor.u32 %v1277_v41, %v1006_v42  ;;  %v1304_v42 = vld [vmem:[%s1897_s0 + $0x130] sm:$0xf0] }
  0x2d   :  { %874 = vmatpush.bf16.msrb.mxu0 %v1339_v45  ;;  %228 = vperm.xlu0 %1367, %v150_v55   ;;  %v1001_v45 = vor.u32 %v1276_v37, %v998_v38  ;;  %v1032_v55 = vld [vmem:[%s1897_s0 + $0x88] sm:$0xf]  ;;  %v1104_v41 = vld [vmem:[%s1897_s0 + $0x120] sm:$0xf] }
  0x2e   :  { %724 = vmatpush.bf16.msrb.mxu1 %v1318_v46  ;;  %v1005_v46 = vor.u32 %v1279_v40, %v1004_v39  ;;  %v1301_v39 = vld [vmem:[%s1897_s0 + $0x11c] sm:$0xf]  ;;  %v1098_v40 = vld [vmem:[%s1897_s0 + $0x12c] sm:$0xf0] }
  0x2f   :  { %773 = vmatpush.bf16.msrb.mxu2 %v1326_v44  ;;  %v1280_v44 = vld [vmem:[%s1897_s0 + $0x70] sm:$0xf0] }
  0x30   :  { %822 = vmatpush.bf16.msrb.mxu3 %v1334_v49  ;;  %v1013_v48 = vor.u32 %v1280_v44, %v1012_v43  ;;  %v1281_v49 = vld [vmem:[%s1897_s0 + $0x7c] sm:$0xf]  ;;  %v1302_v43 = vld [vmem:[%s1897_s0 + $0x124] sm:$0xf]  ;;  %v1106_v44 = vld [vmem:[%s1897_s0 + $0x134] sm:$0xf0] }
  0x31   :  { %875 = vmatpush.bf16.msrb.mxu0 %v1338_v57  ;;  %695 = vmatmul.bf16.gmra.mxu1 %v1017_v61  ;;  %v1021_v57 = vor.u32 %v1281_v49, %v1018_v50  ;;  %v1286_v61 = vld [vmem:[%s1897_s0 + $0xa4] sm:$0xf]  ;;  %v1101_v49 = vor.u32 %v1301_v39, %v1098_v40  ;;  %v1105_v50 = vor.u32 %v1304_v42, %v1104_v41 }
  0x32   :  { %725 = vmatpush.bf16.msrb.mxu1 %v1317_v60  ;;  %705 = vmatmul.bf16.gmra.mxu2 %v1057_v62  ;;  %v1033_v60 = vor.u32 %v1285_v56, %v1032_v55  ;;  %v1038_v62 = vld [vmem:[%s1897_s0 + $0xb4] sm:$0xf0]  ;;  %v1109_v52 = vor.u32 %v1302_v43, %v1106_v44 }
  0x33   :  { %774 = vmatpush.bf16.msrb.mxu2 %v1325_v59  ;;  %715 = vmatmul.bf16.gmra.mxu3 %v1097_v63  ;;  %v1029_v59 = vor.u32 %v1282_v53, %v1026_v54  ;;  %v1044_v63 = vld [vmem:[%s1897_s0 + $0xa8] sm:$0xf]  ;;  %v1041_v5 = vor.u32 %v1286_v61, %v1038_v62 }
  0x34   :  { %685 = vmatmul.bf16.gmra.mxu0 %v977_v0  ;;  %823 = vmatpush.bf16.msrb.mxu3 %v1333_v1  ;;  %v1289_v0 = vld [vmem:[%s1897_s0 + $0xb8] sm:$0xf0]  ;;  %v1287_v1 = vld [vmem:[%s1897_s0 + $0xac] sm:$0xf] }
  0x36   :  { %726 = vmatpush.bf16.msrb.mxu1 %v1316_v3  ;;  %v1052_v3 = vld [vmem:[%s1897_s0 + $0xb0] sm:$0xf] }
  0x37   :  { %775 = vmatpush.bf16.msrb.mxu2 %v1324_v2  ;;  %v1046_v2 = vld [vmem:[%s1897_s0 + $0xbc] sm:$0xf0] }
  0x38   :  { %824 = vmatpush.bf16.msrb.mxu3 %v1332_v4  ;;  %v1290_v4 = vld [vmem:[%s1897_s0 + $0xc0] sm:$0xf0] }
  0x3a   :  { %727 = vmatpush.bf16.msrb.mxu1 %v1315_v7  ;;  %v1049_v7 = vor.u32 %v1287_v1, %v1046_v2 }
  0x3b   :  { %776 = vmatpush.bf16.msrb.mxu2 %v1323_v6  ;;  %v1045_v6 = vor.u32 %v1289_v0, %v1044_v63 }
  0x3c   :  { %825 = vmatpush.bf16.msrb.mxu3 %v1331_v8  ;;  %v1053_v8 = vor.u32 %v1290_v4, %v1052_v3 }
  0x3e   :  { %728 = vmatpush.bf16.msrb.mxu1 %v1314_v10  ;;  %v1058_v10 = vld [vmem:[%s1897_s0 + $0xdc] sm:$0xf0] }
  0x3f   :  { %777 = vmatpush.bf16.msrb.mxu2 %v1322_v9  ;;  %v1291_v9 = vld [vmem:[%s1897_s0 + $0xcc] sm:$0xf] }
  0x40   :  { %826 = vmatpush.bf16.msrb.mxu3 %v1330_v11  ;;  %v1064_v11 = vld [vmem:[%s1897_s0 + $0xd0] sm:$0xf]  ;;  %v1061_v17 = vor.u32 %v1291_v9, %v1058_v10 }
  0x41   :  { %729 = vmatmul.bf16.vlgmr.msrb.gmra.mxu1 %v961_v21  ;;  %v1065_v18 = vor.u32 %v1294_v12, %v1064_v11  ;;  %v1296_v21 = vld [vmem:[%s1897_s0 + $0xf4] sm:$0xf] }
  0x42   :  { %778 = vmatmul.bf16.vlgmr.msrb.gmra.mxu2 %v965_v22  ;;  %v1078_v22 = vld [vmem:[%s1897_s0 + $0x104] sm:$0xf0] }
  0x43   :  { %827 = vmatmul.bf16.vlgmr.msrb.gmra.mxu3 %v969_v23  ;;  %v1084_v23 = vld [vmem:[%s1897_s0 + $0xf8] sm:$0xf]  ;;  %v1081_v29 = vor.u32 %v1296_v21, %v1078_v22 }
  0x44   :  { %1258 = vmatmul.msk.bf16.vlgmr.msrb.gmra.mxu0 %vm647_vm0, %v973_v24  ;;  %v1299_v24 = vld [vmem:[%s1897_s0 + $0x108] sm:$0xf0] }
  0x45   :  { %v1085_v30 = vor.u32 %v1299_v24, %v1084_v23 }
  0x51   :  { %734 = vmatmul.bf16.gmra.mxu1 %v981_v33  ;;  %v1093_v33 = vor.u32 %v1300_v28, %v1092_v27 }
  0x52   :  { %783 = vmatmul.bf16.gmra.mxu2 %v985_v34 }
  0x53   :  { %832 = vmatmul.bf16.gmra.mxu3 %v989_v35 }
  0x54   :  { %1259 = vmatmul.msk.bf16.gmra.mxu0 %vm647_vm0, %v993_v36 }
  0x61   :  { %739 = vmatmul.bf16.gmra.mxu1 %v1001_v45  ;;  %v1112_v45 = vld [vmem:[%s1897_s0 + $0x128] sm:$0xf] }
  0x62   :  { %788 = vmatmul.bf16.gmra.mxu2 %v1005_v46  ;;  %v1305_v46 = vld [vmem:[%s1897_s0 + $0x138] sm:$0xf0]  ;;  %v174_v42 = vpop.permute.xlu2 %173 }
  0x63   :  { %837 = vmatmul.bf16.gmra.mxu3 %v1009_v47  ;;  %v1113_v53 = vor.u32 %v1305_v46, %v1112_v45 }
  0x64   :  { %1260 = vmatmul.msk.bf16.gmra.mxu0 %vm647_vm0, %v1013_v48 }
  0x71   :  { %744 = vmatmul.bf16.gmra.mxu1 %v1021_v57 }
  0x72   :  { %793 = vmatmul.bf16.gmra.mxu2 %v1025_v58 }
  0x73   :  { %842 = vmatmul.bf16.gmra.mxu3 %v1029_v59 }
  0x74   :  { %1261 = vmatmul.msk.bf16.gmra.mxu0 %vm647_vm0, %v1033_v60 }
  0x76   :  { %v154_v61 = vpop.permute.xlu0 %153 }
  0x77   :  { %v164_v16 = vpop.permute.xlu1 %163 }
  0x81   :  { %749 = vmatmul.bf16.gmra.mxu1 %v1041_v5 }
  0x82   :  { %798 = vmatmul.bf16.gmra.mxu2 %v1045_v6 }
  0x83   :  { %847 = vmatmul.bf16.gmra.mxu3 %v1049_v7 }
  0x84   :  { %1262 = vmatmul.msk.bf16.gmra.mxu0 %vm647_vm0, %v1053_v8  ;;  %v159_v8 = vpop.permute.xlu0 %158 }
  0x91   :  { %754 = vmatmul.bf16.gmra.mxu1 %v1061_v17 }
  0x92   :  { %803 = vmatmul.bf16.gmra.mxu2 %v1065_v18 }
  0x93   :  { %852 = vmatmul.bf16.gmra.mxu3 %v1069_v19 }
  0x94   :  { %1263 = vmatmul.msk.bf16.gmra.mxu0 %vm647_vm0, %v1073_v20 }
  0x9e   :  { %v1769_v31 = vpop.f32.mrf.mxu1 }
  0x9f   :  { %v692_v46 = vadd.f32 %v1769_v31, %v174_v42 }
  0xa1   :  { %v681_v34 = vpop.f32.mrf.mxu0  ;;  %759 = vmatmul.bf16.gmra.mxu1 %v1081_v29 }
  0xa2   :  { %808 = vmatmul.bf16.gmra.mxu2 %v1085_v30  ;;  %v682_v0 = vadd.f32 %v681_v34, %v154_v61  ;;  %v169_v30 = vpop.permute.xlu1 %168 }
  0xa3   :  { %857 = vmatmul.bf16.gmra.mxu3 %v1089_v32 }
  0xa4   :  { %1264 = vmatmul.msk.bf16.gmra.mxu0 %vm647_vm0, %v1093_v33 }
  0xa5   :  { %v1772_v35 = vpop.f32.mrf.mxu2 }
  0xa6   :  { %v1774_v36 = vpop.f32.mrf.mxu3  ;;  %v1776_v37 = vpop.f32.mrf.mxu1 }
  0xa9   :  { %v683_v38 = vpop.f32.mrf.mxu0 }
  0xaa   :  { %v684_v9 = vadd.f32 %v683_v38, %v159_v8 }
  0xad   :  { %v1802_v47 = vpop.f32.mrf.mxu2 }
  0xae   :  { %v1804_v48 = vpop.f32.mrf.mxu3  ;;  %v1806_v51 = vpop.f32.mrf.mxu1 }
  0xb1   :  { %v686_v54 = vpop.f32.mrf.mxu0  ;;  %764 = vmatmul.bf16.gmra.mxu1 %v1101_v49 }
  0xb2   :  { %813 = vmatmul.bf16.gmra.mxu2 %v1105_v50  ;;  %v687_v20 = vadd.f32 %v686_v54, %v164_v16 }
  0xb3   :  { %862 = vmatmul.bf16.gmra.mxu3 %v1109_v52 }
  0xb4   :  { %1265 = vmatmul.msk.bf16.gmra.mxu0 %vm647_vm0, %v1113_v53 }
  0xb5   :  { %v1809_v55 = vpop.f32.mrf.mxu2 }
  0xb6   :  { %v1811_v56 = vpop.f32.mrf.mxu3  ;;  %v1813_v57 = vpop.f32.mrf.mxu1 }
  0xb9   :  { %v688_v58 = vpop.f32.mrf.mxu0 }
  0xba   :  { %v689_v32 = vadd.f32 %v688_v58, %v169_v30 }
  0xbd   :  { %v1815_v59 = vpop.f32.mrf.mxu2 }
  0xbe   :  { %v1817_v60 = vpop.f32.mrf.mxu3  ;;  %v730_v62 = vpop.f32.mrf.mxu1 }
  0xbf   :  { %v731_v1 = vadd.f32 %v730_v62, %v682_v0  ;;  %v179_v0 = vpop.permute.xlu2 %178 }
  0xc1   :  { %v877_v63 = vpop.f32.mrf.mxu0 }
  0xc5   :  { %v779_v2 = vpop.f32.mrf.mxu2 }
  0xc6   :  { %v780_v3 = vadd.f32 %v779_v2, %v731_v1  ;;  %v828_v4 = vpop.f32.mrf.mxu3  ;;  %v732_v5 = vpop.f32.mrf.mxu1  ;;  %v694_v1 = vadd.f32 %v1776_v37, %v179_v0 }
  0xc7   :  { %v733_v12 = vadd.f32 %v732_v5, %v684_v9 }
  0xc8   :  { %v829_v6 = vadd.f32 %v828_v4, %v780_v3 }
  0xc9   :  { %v879_v7 = vpop.f32.mrf.mxu0 }
  0xca   :  { %v878_v10 = vadd.f32 %v877_v63, %v829_v6 }
  0xcc   :  { %v917_v11 = vmax.f32 %v878_v10, 0.0  ;;  %v184_v10 = vpop.permute.xlu0 %183 }
  0xcd   :  { %v781_v13 = vpop.f32.mrf.mxu2 }
  0xce   :  { %934 = vst.msk [vmem:[%s1898_s3] sm:$0xff] %vm933_vm1, %v917_v11  ;;  %v782_v14 = vadd.f32 %v781_v13, %v733_v12  ;;  %v830_v15 = vpop.f32.mrf.mxu3  ;;  %v735_v17 = vpop.f32.mrf.mxu1  ;;  %v697_v11 = vadd.f32 %v1806_v51, %v184_v10 }
  0xcf   :  { %v736_v23 = vadd.f32 %v735_v17, %v687_v20  ;;  %v189_v20 = vpop.permute.xlu1 %188 }
  0xd0   :  { %v831_v18 = vadd.f32 %v830_v15, %v782_v14 }
  0xd1   :  { %v882_v19 = vpop.f32.mrf.mxu0 }
  0xd2   :  { %v880_v21 = vadd.f32 %v879_v7, %v831_v18 }
  0xd4   :  { %v918_v22 = vmax.f32 %v880_v21, 0.0  ;;  %v699_v21 = vadd.f32 %v1813_v57, %v189_v20 }
  0xd5   :  { %v784_v24 = vpop.f32.mrf.mxu2 }
  0xd6   :  { %935 = vst.msk [vmem:[%s1898_s3 + $0x8] sm:$0xff] %vm933_vm1, %v918_v22  ;;  %v785_v25 = vadd.f32 %v784_v24, %v736_v23  ;;  %v833_v26 = vpop.f32.mrf.mxu3  ;;  %v737_v27 = vpop.f32.mrf.mxu1 }
  0xd7   :  { %v738_v38 = vadd.f32 %v737_v27, %v689_v32  ;;  %v194_v27 = vpop.permute.xlu2 %193 }
  0xd8   :  { %v834_v28 = vadd.f32 %v833_v26, %v785_v25  ;;  %v702_v32 = vadd.f32 %v1772_v35, %v194_v27 }
  0xd9   :  { %v884_v29 = vpop.f32.mrf.mxu0 }
  0xda   :  { %v883_v33 = vadd.f32 %v882_v19, %v834_v28 }
  0xdc   :  { %v919_v34 = vmax.f32 %v883_v33, 0.0 }
  0xdd   :  { %v786_v39 = vpop.f32.mrf.mxu2 }
  0xde   :  { %936 = vst.msk [vmem:[%s1898_s3 + $0x10] sm:$0xff] %vm933_vm1, %v919_v34  ;;  %v787_v40 = vadd.f32 %v786_v39, %v738_v38  ;;  %v835_v41 = vpop.f32.mrf.mxu3  ;;  %v740_v43 = vpop.f32.mrf.mxu1 }
  0xdf   :  { %v741_v52 = vadd.f32 %v740_v43, %v692_v46 }
  0xe0   :  { %v836_v44 = vadd.f32 %v835_v41, %v787_v40 }
  0xe1   :  { %v887_v45 = vpop.f32.mrf.mxu0 }
  0xe2   :  { %v885_v49 = vadd.f32 %v884_v29, %v836_v44  ;;  %v199_v44 = vpop.permute.xlu0 %198 }
  0xe4   :  { %v920_v50 = vmax.f32 %v885_v49, 0.0 }
  0xe5   :  { %v789_v53 = vpop.f32.mrf.mxu2 }
  0xe6   :  { %937 = vst.msk [vmem:[%s1898_s3 + $0x18] sm:$0xff] %vm933_vm1, %v920_v50  ;;  %v790_v54 = vadd.f32 %v789_v53, %v741_v52  ;;  %v838_v58 = vpop.f32.mrf.mxu3  ;;  %v742_v61 = vpop.f32.mrf.mxu1 }
  0xe7   :  { %v743_v31 = vadd.f32 %v742_v61, %v694_v1 }
  0xe8   :  { %v839_v62 = vadd.f32 %v838_v58, %v790_v54 }
  0xe9   :  { %v889_v63 = vpop.f32.mrf.mxu0 }
  0xea   :  { %v888_v2 = vadd.f32 %v887_v45, %v839_v62  ;;  %v704_v45 = vadd.f32 %v1802_v47, %v199_v44  ;;  %v204_v62 = vpop.permute.xlu1 %203 }
  0xec   :  { %v921_v3 = vmax.f32 %v888_v2, 0.0 }
  0xed   :  { %v791_v4 = vpop.f32.mrf.mxu2 }
  0xee   :  { %938 = vst.msk [vmem:[%s1898_s3 + $0x20] sm:$0xff] %vm933_vm1, %v921_v3  ;;  %v792_v5 = vadd.f32 %v791_v4, %v743_v31  ;;  %v840_v6 = vpop.f32.mrf.mxu3  ;;  %v745_v7 = vpop.f32.mrf.mxu1 }
  0xef   :  { %v746_v37 = vadd.f32 %v745_v7, %v697_v11 }
  0xf0   :  { %v841_v8 = vadd.f32 %v840_v6, %v792_v5  ;;  %v209_v6 = vpop.permute.xlu2 %208 }
  0xf1   :  { %v892_v9 = vpop.f32.mrf.mxu0 }
  0xf2   :  { %v890_v12 = vadd.f32 %v889_v63, %v841_v8  ;;  %v707_v63 = vadd.f32 %v1809_v55, %v204_v62  ;;  %v709_v8 = vadd.f32 %v1815_v59, %v209_v6 }
  0xf4   :  { %v922_v13 = vmax.f32 %v890_v12, 0.0 }
  0xf5   :  { %v794_v14 = vpop.f32.mrf.mxu2 }
  0xf6   :  { %939 = vst.msk [vmem:[%s1898_s3 + $0x28] sm:$0xff] %vm933_vm1, %v922_v13  ;;  %v795_v15 = vadd.f32 %v794_v14, %v746_v37  ;;  %v843_v16 = vpop.f32.mrf.mxu3  ;;  %v747_v17 = vpop.f32.mrf.mxu1 }
  0xf7   :  { %v748_v51 = vadd.f32 %v747_v17, %v699_v21  ;;  %v214_v37 = vpop.permute.xlu0 %213 }
  0xf8   :  { %v844_v18 = vadd.f32 %v843_v16, %v795_v15  ;;  %v712_v16 = vadd.f32 %v1774_v36, %v214_v37 }
  0xf9   :  { %v894_v19 = vpop.f32.mrf.mxu0 }
  0xfa   :  { %v893_v22 = vadd.f32 %v892_v9, %v844_v18 }
  0xfc   :  { %v923_v23 = vmax.f32 %v893_v22, 0.0 }
  0xfd   :  { %v796_v24 = vpop.f32.mrf.mxu2 }
  0xfe   :  { %940 = vst.msk [vmem:[%s1898_s3 + $0x30] sm:$0xff] %vm933_vm1, %v923_v23  ;;  %v797_v25 = vadd.f32 %v796_v24, %v748_v51  ;;  %v845_v26 = vpop.f32.mrf.mxu3  ;;  %v750_v28 = vpop.f32.mrf.mxu1 }
  0xff   :  { %v751_v57 = vadd.f32 %v750_v28, %v702_v32  ;;  %v219_v23 = vpop.permute.xlu1 %218  ;;  %v229_v44 = vpop.permute.xlu0 %228 }
 0x100   :  { %v846_v29 = vadd.f32 %v845_v26, %v797_v25  ;;  %v714_v25 = vadd.f32 %v1804_v48, %v219_v23 }
 0x101   :  { %v897_v30 = vpop.f32.mrf.mxu0 }
 0x102   :  { %v895_v33 = vadd.f32 %v894_v19, %v846_v29 }
 0x104   :  { %v924_v34 = vmax.f32 %v895_v33, 0.0  ;;  %v224_v33 = vpop.permute.xlu2 %223 }
 0x105   :  { %v799_v38 = vpop.f32.mrf.mxu2 }
 0x106   :  { %941 = vst.msk [vmem:[%s1898_s3 + $0x38] sm:$0xff] %vm933_vm1, %v924_v34  ;;  %v800_v39 = vadd.f32 %v799_v38, %v751_v57  ;;  %v848_v40 = vpop.f32.mrf.mxu3  ;;  %v752_v41 = vpop.f32.mrf.mxu1  ;;  %v717_v38 = vadd.f32 %v1811_v56, %v224_v33 }
 0x107   :  { %v753_v35 = vadd.f32 %v752_v41, %v704_v45 }
 0x108   :  { %v849_v42 = vadd.f32 %v848_v40, %v800_v39 }
 0x109   :  { %v899_v43 = vpop.f32.mrf.mxu0 }
 0x10a   :  { %v898_v46 = vadd.f32 %v897_v30, %v849_v42 }
 0x10c   :  { %v925_v49 = vmax.f32 %v898_v46, 0.0 }
 0x10d   :  { %v801_v50 = vpop.f32.mrf.mxu2 }
 0x10e   :  { %942 = vst.msk [vmem:[%s1898_s3 + $0x40] sm:$0xff] %vm933_vm1, %v925_v49  ;;  %v802_v52 = vadd.f32 %v801_v50, %v753_v35  ;;  %v850_v53 = vpop.f32.mrf.mxu3  ;;  %v755_v54 = vpop.f32.mrf.mxu1  ;;  %v719_v35 = vadd.f32 %v1817_v60, %v229_v44 }
 0x10f   :  { %v756_v47 = vadd.f32 %v755_v54, %v707_v63 }
 0x110   :  { %v851_v58 = vadd.f32 %v850_v53, %v802_v52 }
 0x111   :  { %v902_v61 = vpop.f32.mrf.mxu0 }
 0x112   :  { %v900_v0 = vadd.f32 %v899_v43, %v851_v58 }
 0x114   :  { %v926_v1 = vmax.f32 %v900_v0, 0.0 }
 0x115   :  { %v804_v2 = vpop.f32.mrf.mxu2 }
 0x116   :  { %943 = vst.msk [vmem:[%s1898_s3 + $0x48] sm:$0xff] %vm933_vm1, %v926_v1  ;;  %v805_v3 = vadd.f32 %v804_v2, %v756_v47  ;;  %v853_v31 = vpop.f32.mrf.mxu3  ;;  %v757_v4 = vpop.f32.mrf.mxu1 }
 0x117   :  { %v758_v55 = vadd.f32 %v757_v4, %v709_v8 }
 0x118   :  { %v854_v5 = vadd.f32 %v853_v31, %v805_v3 }
 0x119   :  { %v904_v7 = vpop.f32.mrf.mxu0 }
 0x11a   :  { %v903_v9 = vadd.f32 %v902_v61, %v854_v5 }
 0x11c   :  { %v927_v10 = vmax.f32 %v903_v9, 0.0 }
 0x11d   :  { %v806_v11 = vpop.f32.mrf.mxu2 }
 0x11e   :  { %944 = vst.msk [vmem:[%s1898_s3 + $0x50] sm:$0xff] %vm933_vm1, %v927_v10  ;;  %v807_v12 = vadd.f32 %v806_v11, %v758_v55  ;;  %v855_v13 = vpop.f32.mrf.mxu3  ;;  %v760_v14 = vpop.f32.mrf.mxu1 }
 0x11f   :  { %v761_v59 = vadd.f32 %v760_v14, %v712_v16 }
 0x120   :  { %v856_v15 = vadd.f32 %v855_v13, %v807_v12 }
 0x121   :  { %v907_v18 = vpop.f32.mrf.mxu0 }
 0x122   :  { %v905_v17 = vadd.f32 %v904_v7, %v856_v15 }
 0x124   :  { %v928_v19 = vmax.f32 %v905_v17, 0.0 }
 0x125   :  { %v809_v20 = vpop.f32.mrf.mxu2 }
 0x126   :  { %945 = vst.msk [vmem:[%s1898_s3 + $0x58] sm:$0xff] %vm933_vm1, %v928_v19  ;;  %v810_v21 = vadd.f32 %v809_v20, %v761_v59  ;;  %v858_v22 = vpop.f32.mrf.mxu3  ;;  %v762_v51 = vpop.f32.mrf.mxu1 }
 0x127   :  { %v763_v36 = vadd.f32 %v762_v51, %v714_v25 }
 0x128   :  { %v859_v24 = vadd.f32 %v858_v22, %v810_v21 }
 0x129   :  { %v909_v28 = vpop.f32.mrf.mxu0 }
 0x12a   :  { %v908_v26 = vadd.f32 %v907_v18, %v859_v24 }
 0x12c   :  { %v929_v27 = vmax.f32 %v908_v26, 0.0 }
 0x12d   :  { %v811_v29 = vpop.f32.mrf.mxu2 }
 0x12e   :  { %946 = vst.msk [vmem:[%s1898_s3 + $0x60] sm:$0xff] %vm933_vm1, %v929_v27  ;;  %v812_v30 = vadd.f32 %v811_v29, %v763_v36  ;;  %v860_v32 = vpop.f32.mrf.mxu3  ;;  %v765_v34 = vpop.f32.mrf.mxu1 }
 0x12f   :  { %v766_v48 = vadd.f32 %v765_v34, %v717_v38 }
 0x130   :  { %v861_v57 = vadd.f32 %v860_v32, %v812_v30 }
 0x131   :  { %v912_v45 = vpop.f32.mrf.mxu0 }
 0x132   :  { %v910_v39 = vadd.f32 %v909_v28, %v861_v57 }
 0x134   :  { %v930_v40 = vmax.f32 %v910_v39, 0.0 }
 0x135   :  { %v814_v41 = vpop.f32.mrf.mxu2 }
 0x136   :  { %947 = vst.msk [vmem:[%s1898_s3 + $0x68] sm:$0xff] %vm933_vm1, %v930_v40  ;;  %v815_v42 = vadd.f32 %v814_v41, %v766_v48  ;;  %v863_v43 = vpop.f32.mrf.mxu3  ;;  %v767_v49 = vpop.f32.mrf.mxu1 }
 0x137   :  { %v768_v56 = vadd.f32 %v767_v49, %v719_v35 }
 0x138   :  { %v864_v46 = vadd.f32 %v863_v43, %v815_v42 }
 0x139   :  { %v914_v62 = vpop.f32.mrf.mxu0 }
 0x13a   :  { %v913_v50 = vadd.f32 %v912_v45, %v864_v46 }
 0x13c   :  { %v931_v52 = vmax.f32 %v913_v50, 0.0 }
 0x13d   :  { %v816_v53 = vpop.f32.mrf.mxu2 }
 0x13e   :  { %948 = vst.msk [vmem:[%s1898_s3 + $0x70] sm:$0xff] %vm933_vm1, %v931_v52  ;;  %v817_v54 = vadd.f32 %v816_v53, %v768_v56  ;;  %v865_v58 = vpop.f32.mrf.mxu3 }
 0x140   :  { %v866_v61 = vadd.f32 %v865_v58, %v817_v54 }
 0x142   :  { %v915_v63 = vadd.f32 %v914_v62, %v866_v61 }
 0x144   :  { %v932_v0 = vmax.f32 %v915_v63, 0.0 }
 0x146   :  { %949 = vst.msk [vmem:[%s1898_s3 + $0x78] sm:$0xff] %vm933_vm1, %v932_v0 }

// kernel: hnn_forward.16
= control target key start
LH: loop header
LB: loop body
LE: loop exit
PB: predicated region body
PF: predicated region fallthrough
CT: control target
= control target key end

     0   :  { %vm1092_vm0 = vcmask 1043456   ;;  %vm1089_vm1 = vcmask 64512   ;;  %s2411_s1 = inlined_call_operand.vmem [shape: bf16[2056,128], index: 1, kind: input, shape index: {}]   ;;  %s2412_s0 = inlined_call_operand.vmem [shape: bf16[2,2056], index: 0, kind: input, shape index: {}]   ;;  %s2413_s2 = inlined_call_operand.vmem [shape: f32[1,128], index: 2, kind: input, shape index: {}]   ;;  %s2414_s3 = inlined_call_operand.vmem [shape: f32[2,128], index: 3, kind: output, shape index: {}]  }
   0x1   :  { %v1843_v0 = vld [vmem:[%s2411_s1 + $0x38] sm:$0xff]  ;;  %v1842_v4 = vld [vmem:[%s2411_s1 + $0x30] sm:$0xff]  ;;  %v1841_v8 = vld [vmem:[%s2411_s1 + $0x28] sm:$0xff] }
   0x2   :  { %v1859_v1 = vld [vmem:[%s2411_s1 + $0xb8] sm:$0xff]  ;;  %1096 = vmatpush.bf16.msra.mxu0 %v1843_v0  ;;  %v1858_v5 = vld [vmem:[%s2411_s1 + $0xb0] sm:$0xff]  ;;  %v1857_v9 = vld [vmem:[%s2411_s1 + $0xa8] sm:$0xff] }
   0x3   :  { %v1851_v2 = vld [vmem:[%s2411_s1 + $0x78] sm:$0xff]  ;;  %1122 = vmatpush.bf16.msra.mxu2 %v1859_v1  ;;  %v1850_v6 = vld [vmem:[%s2411_s1 + $0x70] sm:$0xff]  ;;  %v1849_v10 = vld [vmem:[%s2411_s1 + $0x68] sm:$0xff] }
   0x4   :  { %v1867_v3 = vld [vmem:[%s2411_s1 + $0xf8] sm:$0xff]  ;;  %1109 = vmatpush.bf16.msra.mxu1 %v1851_v2  ;;  %v1866_v7 = vld [vmem:[%s2411_s1 + $0xf0] sm:$0xff]  ;;  %v1865_v11 = vld [vmem:[%s2411_s1 + $0xe8] sm:$0xff] }
   0x5   :  { %1135 = vmatpush.bf16.msra.mxu3 %v1867_v3  ;;  %v1840_v12 = vld [vmem:[%s2411_s1 + $0x20] sm:$0xff]  ;;  %v1839_v16 = vld [vmem:[%s2411_s1 + $0x18] sm:$0xff]  ;;  %v1838_v21 = vld [vmem:[%s2411_s1 + $0x10] sm:$0xff] }
   0x6   :  { %1097 = vmatpush.bf16.msra.mxu0 %v1842_v4  ;;  %v1856_v13 = vld [vmem:[%s2411_s1 + $0xa0] sm:$0xff]  ;;  %v1855_v17 = vld [vmem:[%s2411_s1 + $0x98] sm:$0xff]  ;;  %v1854_v22 = vld [vmem:[%s2411_s1 + $0x90] sm:$0xff] }
   0x7   :  { %1123 = vmatpush.bf16.msra.mxu2 %v1858_v5  ;;  %v1848_v14 = vld [vmem:[%s2411_s1 + $0x60] sm:$0xff]  ;;  %v1847_v18 = vld [vmem:[%s2411_s1 + $0x58] sm:$0xff]  ;;  %v1846_v23 = vld [vmem:[%s2411_s1 + $0x50] sm:$0xff] }
   0x8   :  { %1110 = vmatpush.bf16.msra.mxu1 %v1850_v6  ;;  %v1864_v15 = vld [vmem:[%s2411_s1 + $0xe0] sm:$0xff]  ;;  %v1863_v19 = vld [vmem:[%s2411_s1 + $0xd8] sm:$0xff]  ;;  %v1862_v24 = vld [vmem:[%s2411_s1 + $0xd0] sm:$0xff] }
   0x9   :  { %1136 = vmatpush.bf16.msra.mxu3 %v1866_v7  ;;  %v15_v20 = vld [vmem:[%s2412_s0] sm:$0xff]  ;;  %v1837_v25 = vld [vmem:[%s2411_s1 + $0x8] sm:$0xff]  ;;  %v1875_v31 = vld [vmem:[%s2411_s1 + $0x138] sm:$0xff] }
   0xa   :  { %1098 = vmatpush.bf16.msra.mxu0 %v1841_v8  ;;  %280 = vst [vmem:[#allocation1] ss:$9 sm:$0xff] %v15_v20  ;;  %v1853_v26 = vld [vmem:[%s2411_s1 + $0x88] sm:$0xff]  ;;  %v1836_v29 = vld [vmem:[%s2411_s1] sm:$0xff]  ;;  %v1891_v32 = vld [vmem:[%s2411_s1 + $0x1b8] sm:$0xff] }
   0xb   :  { %1124 = vmatpush.bf16.msra.mxu2 %v1857_v9  ;;  %v1845_v27 = vld [vmem:[%s2411_s1 + $0x48] sm:$0xff]  ;;  %v1852_v30 = vld [vmem:[%s2411_s1 + $0x80] sm:$0xff]  ;;  %v1883_v35 = vld [vmem:[%s2411_s1 + $0x178] sm:$0xff] }
   0xc   :  { %1111 = vmatpush.bf16.msra.mxu1 %v1849_v10  ;;  %v1861_v28 = vld [vmem:[%s2411_s1 + $0xc8] sm:$0xff]  ;;  %v1844_v33 = vld [vmem:[%s2411_s1 + $0x40] sm:$0xff]  ;;  %v1899_v36 = vld [vmem:[%s2411_s1 + $0x1f8] sm:$0xff] }
   0xd   :  { %1137 = vmatpush.bf16.msra.mxu3 %v1865_v11  ;;  %v1860_v34 = vld [vmem:[%s2411_s1 + $0xc0] sm:$0xff]  ;;  %v1874_v37 = vld [vmem:[%s2411_s1 + $0x130] sm:$0xff]  ;;  %v16_v45 = vld [vmem:[%s2412_s0 + $0x8] sm:$0xff] }
   0xe   :  { %1099 = vmatpush.bf16.msra.mxu0 %v1840_v12  ;;  %v1890_v38 = vld [vmem:[%s2411_s1 + $0x1b0] sm:$0xff]  ;;  %v1873_v46 = vld [vmem:[%s2411_s1 + $0x128] sm:$0xff]  ;;  %v1872_v54 = vld [vmem:[%s2411_s1 + $0x120] sm:$0xff] }
   0xf   :  { %1125 = vmatpush.bf16.msra.mxu2 %v1856_v13  ;;  %v1882_v41 = vld [vmem:[%s2411_s1 + $0x170] sm:$0xff]  ;;  %v1889_v47 = vld [vmem:[%s2411_s1 + $0x1a8] sm:$0xff]  ;;  %v1888_v55 = vld [vmem:[%s2411_s1 + $0x1a0] sm:$0xff] }
  0x10   :  { %1112 = vmatpush.bf16.msra.mxu1 %v1848_v14  ;;  %v1898_v42 = vld [vmem:[%s2411_s1 + $0x1f0] sm:$0xff]  ;;  %v1881_v52 = vld [vmem:[%s2411_s1 + $0x168] sm:$0xff]  ;;  %v1880_v56 = vld [vmem:[%s2411_s1 + $0x160] sm:$0xff] }
  0x11   :  { %1138 = vmatpush.bf16.msra.mxu3 %v1864_v15  ;;  %v283_v39 = vld [vmem:[#allocation1 + $0x12] sm:$0xff]  ;;  %v281_v40 = vld [vmem:[#allocation1] sm:$0xff]  ;;  %v282_v44 = vld [vmem:[#allocation1 + $0x9] sm:$0xff] }
  0x12   :  { %1100 = vmatpush.bf16.msra.mxu0 %v1839_v16  ;;  %v284_v43 = vld [vmem:[#allocation1 + $0x1b] sm:$0xff]  ;;  %v2119_v49 = vld [vmem:[#allocation1 + $0x24] sm:$0xff]  ;;  %v2123_v51 = vld [vmem:[#allocation1 + $0x2d] sm:$0xff] }
  0x13   :  { %1126 = vmatpush.bf16.msra.mxu2 %v1855_v17  ;;  %v2117_v48 = vld [vmem:[#allocation1 + $0x36] sm:$0xff]  ;;  %v2121_v50 = vld [vmem:[#allocation1 + $0x3f] sm:$0xff]  ;;  %v1897_v53 = vld [vmem:[%s2411_s1 + $0x1e8] sm:$0xff] }
  0x14   :  { %1113 = vmatpush.bf16.msra.mxu1 %v1847_v18  ;;  %290 = vst [vmem:[#allocation1] ss:$9 sm:$0xff] %v16_v45  ;;  %v1896_v57 = vld [vmem:[%s2411_s1 + $0x1e0] sm:$0xff]  ;;  %v1871_v58 = vld [vmem:[%s2411_s1 + $0x118] sm:$0xff]  ;;  %v1870_v62 = vld [vmem:[%s2411_s1 + $0x110] sm:$0xff] }
  0x15   :  { %1139 = vmatpush.bf16.msra.mxu3 %v1863_v19  ;;  %v1887_v59 = vld [vmem:[%s2411_s1 + $0x198] sm:$0xff]  ;;  %v1886_v63 = vld [vmem:[%s2411_s1 + $0x190] sm:$0xff]  ;;  %v1869_v2 = vld [vmem:[%s2411_s1 + $0x108] sm:$0xff] }
  0x16   :  { %1101 = vmatpush.bf16.msra.mxu0 %v1838_v21  ;;  %v1879_v60 = vld [vmem:[%s2411_s1 + $0x158] sm:$0xff]  ;;  %v1878_v0 = vld [vmem:[%s2411_s1 + $0x150] sm:$0xff]  ;;  %v1885_v3 = vld [vmem:[%s2411_s1 + $0x188] sm:$0xff] }
  0x17   :  { %1127 = vmatpush.bf16.msra.mxu2 %v1854_v22  ;;  %v1895_v61 = vld [vmem:[%s2411_s1 + $0x1d8] sm:$0xff]  ;;  %v1894_v1 = vld [vmem:[%s2411_s1 + $0x1d0] sm:$0xff]  ;;  %v1877_v4 = vld [vmem:[%s2411_s1 + $0x148] sm:$0xff] }
  0x18   :  { %1114 = vmatpush.bf16.msra.mxu1 %v1846_v23  ;;  %v1893_v5 = vld [vmem:[%s2411_s1 + $0x1c8] sm:$0xff]  ;;  %v1868_v6 = vld [vmem:[%s2411_s1 + $0x100] sm:$0xff]  ;;  %v1907_v8 = vld [vmem:[%s2411_s1 + $0x238] sm:$0xff] }
  0x19   :  { %1140 = vmatpush.bf16.msra.mxu3 %v1862_v24  ;;  %v1884_v7 = vld [vmem:[%s2411_s1 + $0x180] sm:$0xff]  ;;  %v1923_v9 = vld [vmem:[%s2411_s1 + $0x2b8] sm:$0xff]  ;;  %v1906_v14 = vld [vmem:[%s2411_s1 + $0x230] sm:$0xff] }
  0x1a   :  { %1102 = vmatpush.bf16.msra.mxu0 %v1837_v25  ;;  %v1876_v10 = vld [vmem:[%s2411_s1 + $0x140] sm:$0xff]  ;;  %v1915_v12 = vld [vmem:[%s2411_s1 + $0x278] sm:$0xff]  ;;  %v1922_v15 = vld [vmem:[%s2411_s1 + $0x2b0] sm:$0xff] }
  0x1b   :  { %1128 = vmatpush.bf16.msra.mxu2 %v1853_v26  ;;  %v1892_v11 = vld [vmem:[%s2411_s1 + $0x1c0] sm:$0xff]  ;;  %v1931_v13 = vld [vmem:[%s2411_s1 + $0x2f8] sm:$0xff]  ;;  %v1914_v16 = vld [vmem:[%s2411_s1 + $0x270] sm:$0xff] }
  0x1c   :  { %1115 = vmatpush.bf16.msra.mxu1 %v1845_v27  ;;  %v1930_v17 = vld [vmem:[%s2411_s1 + $0x2f0] sm:$0xff]  ;;  %v1905_v18 = vld [vmem:[%s2411_s1 + $0x228] sm:$0xff]  ;;  %v1904_v22 = vld [vmem:[%s2411_s1 + $0x220] sm:$0xff] }
  0x1d   :  { %1141 = vmatpush.bf16.msra.mxu3 %v1861_v28  ;;  %v1921_v19 = vld [vmem:[%s2411_s1 + $0x2a8] sm:$0xff]  ;;  %v1920_v23 = vld [vmem:[%s2411_s1 + $0x2a0] sm:$0xff]  ;;  %v1903_v26 = vld [vmem:[%s2411_s1 + $0x218] sm:$0xff] }
  0x1e   :  { %1103 = vmatpush.bf16.msra.mxu0 %v1836_v29  ;;  %v1913_v20 = vld [vmem:[%s2411_s1 + $0x268] sm:$0xff]  ;;  %v1912_v24 = vld [vmem:[%s2411_s1 + $0x260] sm:$0xff]  ;;  %v1919_v27 = vld [vmem:[%s2411_s1 + $0x298] sm:$0xff] }
  0x1f   :  { %1129 = vmatpush.bf16.msra.mxu2 %v1852_v30  ;;  %v1929_v21 = vld [vmem:[%s2411_s1 + $0x2e8] sm:$0xff]  ;;  %v1928_v25 = vld [vmem:[%s2411_s1 + $0x2e0] sm:$0xff]  ;;  %v1911_v28 = vld [vmem:[%s2411_s1 + $0x258] sm:$0xff] }
  0x20   :  { %1116 = vmatpush.bf16.msra.mxu1 %v1844_v33  ;;  %v1927_v29 = vld [vmem:[%s2411_s1 + $0x2d8] sm:$0xff]  ;;  %v1902_v30 = vld [vmem:[%s2411_s1 + $0x210] sm:$0xff]  ;;  %v291_v45 = vld [vmem:[#allocation1] sm:$0xff] }
  0x21   :  { %1142 = vmatpush.bf16.msra.mxu3 %v1860_v34  ;;  %1104 = vmatmul.bf16.vlgmr.msra.gmra.mxu0 %v281_v40  ;;  %v1926_v33 = vld [vmem:[%s2411_s1 + $0x2d0] sm:$0xff]  ;;  %v1901_v34 = vld [vmem:[%s2411_s1 + $0x208] sm:$0xff]  ;;  %v1939_v40 = vld [vmem:[%s2411_s1 + $0x338] sm:$0xff] }
  0x22   :  { %1148 = vmatpush.bf16.msrb.mxu0 %v1875_v31  ;;  %1130 = vmatmul.bf16.vlgmr.msra.gmra.mxu2 %v283_v39  ;;  %v1918_v31 = vld [vmem:[%s2411_s1 + $0x290] sm:$0xff]  ;;  %v1916_v39 = vld [vmem:[%s2411_s1 + $0x280] sm:$0xff] }
  0x23   :  { %1174 = vmatpush.bf16.msrb.mxu2 %v1891_v32  ;;  %1117 = vmatmul.bf16.vlgmr.msra.gmra.mxu1 %v282_v44  ;;  %v1910_v32 = vld [vmem:[%s2411_s1 + $0x250] sm:$0xff]  ;;  %v1924_v44 = vld [vmem:[%s2411_s1 + $0x2c0] sm:$0xff] }
  0x24   :  { %1161 = vmatpush.bf16.msrb.mxu1 %v1883_v35  ;;  %1143 = vmatmul.bf16.vlgmr.msra.gmra.mxu3 %v284_v43  ;;  %v1917_v35 = vld [vmem:[%s2411_s1 + $0x288] sm:$0xff]  ;;  %v1908_v43 = vld [vmem:[%s2411_s1 + $0x240] sm:$0xff] }
  0x25   :  { %1187 = vmatpush.bf16.msrb.mxu3 %v1899_v36  ;;  %v1909_v36 = vld [vmem:[%s2411_s1 + $0x248] sm:$0xff] }
  0x26   :  { %1149 = vmatpush.bf16.msrb.mxu0 %v1874_v37  ;;  %v1925_v37 = vld [vmem:[%s2411_s1 + $0x2c8] sm:$0xff] }
  0x27   :  { %1175 = vmatpush.bf16.msrb.mxu2 %v1890_v38  ;;  %v1900_v38 = vld [vmem:[%s2411_s1 + $0x200] sm:$0xff] }
  0x28   :  { %1162 = vmatpush.bf16.msrb.mxu1 %v1882_v41  ;;  %v1955_v41 = vld [vmem:[%s2411_s1 + $0x3b8] sm:$0xff] }
  0x29   :  { %1188 = vmatpush.bf16.msrb.mxu3 %v1898_v42  ;;  %v17_v42 = vld [vmem:[%s2412_s0 + $0x10] sm:$0x1] }
  0x2a   :  { %1150 = vmatpush.bf16.msrb.mxu0 %v1873_v46  ;;  %v293_v46 = vld [vmem:[#allocation1 + $0x12] sm:$0xff] }
  0x2b   :  { %1176 = vmatpush.bf16.msrb.mxu2 %v1889_v47  ;;  %v1947_v47 = vld [vmem:[%s2411_s1 + $0x378] sm:$0xff] }
  0x2c   :  { %1163 = vmatpush.bf16.msrb.mxu1 %v1881_v52  ;;  %v1954_v52 = vld [vmem:[%s2411_s1 + $0x3b0] sm:$0xff] }
  0x2d   :  { %1189 = vmatpush.bf16.msrb.mxu3 %v1897_v53  ;;  %v2312_v53 = vld [vmem:[#allocation1 + $0x24] sm:$0xff] }
  0x2e   :  { %1151 = vmatpush.bf16.msrb.mxu0 %v1872_v54  ;;  %v2314_v54 = vld [vmem:[#allocation1 + $0x36] sm:$0xff] }
  0x2f   :  { %1177 = vmatpush.bf16.msrb.mxu2 %v1888_v55  ;;  %v2316_v55 = vld [vmem:[#allocation1 + $0x2d] sm:$0xff] }
  0x30   :  { %1164 = vmatpush.bf16.msrb.mxu1 %v1880_v56  ;;  %v2318_v56 = vld [vmem:[#allocation1 + $0x3f] sm:$0xff] }
  0x31   :  { %1190 = vmatpush.bf16.msrb.mxu3 %v1896_v57  ;;  %v1946_v57 = vld [vmem:[%s2411_s1 + $0x370] sm:$0xff] }
  0x32   :  { %1152 = vmatpush.bf16.msrb.mxu0 %v1871_v58  ;;  %v1962_v58 = vld [vmem:[%s2411_s1 + $0x3f0] sm:$0xff] }
  0x33   :  { %1178 = vmatpush.bf16.msrb.mxu2 %v1887_v59  ;;  %v1937_v59 = vld [vmem:[%s2411_s1 + $0x328] sm:$0xff] }
  0x34   :  { %1165 = vmatpush.bf16.msrb.mxu1 %v1879_v60  ;;  %v1953_v60 = vld [vmem:[%s2411_s1 + $0x3a8] sm:$0xff] }
  0x35   :  { %1191 = vmatpush.bf16.msrb.mxu3 %v1895_v61  ;;  %v1945_v61 = vld [vmem:[%s2411_s1 + $0x368] sm:$0xff] }
  0x36   :  { %1153 = vmatpush.bf16.msrb.mxu0 %v1870_v62  ;;  %v1961_v62 = vld [vmem:[%s2411_s1 + $0x3e8] sm:$0xff] }
  0x37   :  { %1179 = vmatpush.bf16.msrb.mxu2 %v1886_v63  ;;  %v1936_v63 = vld [vmem:[%s2411_s1 + $0x320] sm:$0xff] }
  0x38   :  { %1166 = vmatpush.bf16.msrb.mxu1 %v1878_v0  ;;  %v1952_v0 = vld [vmem:[%s2411_s1 + $0x3a0] sm:$0xff] }
  0x39   :  { %1192 = vmatpush.bf16.msrb.mxu3 %v1894_v1  ;;  %v1944_v1 = vld [vmem:[%s2411_s1 + $0x360] sm:$0xff] }
  0x3a   :  { %1154 = vmatpush.bf16.msrb.mxu0 %v1869_v2  ;;  %v1960_v2 = vld [vmem:[%s2411_s1 + $0x3e0] sm:$0xff] }
  0x3b   :  { %1180 = vmatpush.bf16.msrb.mxu2 %v1885_v3  ;;  %v1935_v3 = vld [vmem:[%s2411_s1 + $0x318] sm:$0xff] }
  0x3c   :  { %1167 = vmatpush.bf16.msrb.mxu1 %v1877_v4  ;;  %v1951_v4 = vld [vmem:[%s2411_s1 + $0x398] sm:$0xff] }
  0x3d   :  { %1193 = vmatpush.bf16.msrb.mxu3 %v1893_v5  ;;  %v1943_v5 = vld [vmem:[%s2411_s1 + $0x358] sm:$0xff] }
  0x3e   :  { %1155 = vmatpush.bf16.msrb.mxu0 %v1868_v6  ;;  %v1959_v6 = vld [vmem:[%s2411_s1 + $0x3d8] sm:$0xff] }
  0x3f   :  { %1181 = vmatpush.bf16.msrb.mxu2 %v1884_v7  ;;  %v274_v7 = vld [vmem:[%s2411_s1 + $0x400] sm:$0xf] }
  0x40   :  { %1168 = vmatpush.bf16.msrb.mxu1 %v1876_v10  ;;  %v1942_v10 = vld [vmem:[%s2411_s1 + $0x350] sm:$0xff] }
  0x41   :  { %1194 = vmatpush.bf16.msrb.mxu3 %v1892_v11  ;;  %1156 = vmatmul.bf16.vlgmr.msrb.gmra.mxu0 %v2119_v49  ;;  %v292_v49 = vld [vmem:[#allocation1 + $0x9] sm:$0xff] }
  0x42   :  { %1200 = vmatpush.bf16.msra.mxu0 %v1907_v8  ;;  %1182 = vmatmul.bf16.vlgmr.msrb.gmra.mxu2 %v2117_v48  ;;  %v1963_v48 = vld [vmem:[%s2411_s1 + $0x3f8] sm:$0xff]  ;;  %v1934_v8 = vld [vmem:[%s2411_s1 + $0x310] sm:$0xff] }
  0x43   :  { %1226 = vmatpush.bf16.msra.mxu2 %v1923_v9  ;;  %1169 = vmatmul.bf16.vlgmr.msrb.gmra.mxu1 %v2123_v51  ;;  %v294_v51 = vld [vmem:[#allocation1 + $0x1b] sm:$0xff]  ;;  %v1950_v9 = vld [vmem:[%s2411_s1 + $0x390] sm:$0xff] }
  0x44   :  { %1213 = vmatpush.bf16.msra.mxu1 %v1915_v12  ;;  %1195 = vmatmul.bf16.vlgmr.msrb.gmra.mxu3 %v2121_v50  ;;  %v1938_v50 = vld [vmem:[%s2411_s1 + $0x330] sm:$0xff]  ;;  %300 = vst [vmem:[#allocation1] ss:$9 sm:$0xff] %v17_v42  ;;  %v831_v12 = vunpack.c.l.b16 %v274_v7 }
  0x45   :  { %1239 = vmatpush.bf16.msra.mxu3 %v1931_v13  ;;  %v1958_v11 = vld [vmem:[%s2411_s1 + $0x3d0] sm:$0xff]  ;;  %v1933_v13 = vld [vmem:[%s2411_s1 + $0x308] sm:$0xff] }
  0x46   :  { %1201 = vmatpush.bf16.msra.mxu0 %v1906_v14  ;;  %v1949_v14 = vld [vmem:[%s2411_s1 + $0x388] sm:$0xff] }
  0x47   :  { %1227 = vmatpush.bf16.msra.mxu2 %v1922_v15  ;;  %v1941_v15 = vld [vmem:[%s2411_s1 + $0x348] sm:$0xff] }
  0x48   :  { %1214 = vmatpush.bf16.msra.mxu1 %v1914_v16  ;;  %v1957_v16 = vld [vmem:[%s2411_s1 + $0x3c8] sm:$0xff] }
  0x49   :  { %1240 = vmatpush.bf16.msra.mxu3 %v1930_v17  ;;  %v960_v17 = vpack.c.b16 %v831_v12, %v831_v12 }
  0x4a   :  { %1202 = vmatpush.bf16.msra.mxu0 %v1905_v18  ;;  %v1932_v18 = vld [vmem:[%s2411_s1 + $0x300] sm:$0xff] }
  0x4b   :  { %1228 = vmatpush.bf16.msra.mxu2 %v1921_v19  ;;  %v1948_v19 = vld [vmem:[%s2411_s1 + $0x380] sm:$0xff] }
  0x4c   :  { %1215 = vmatpush.bf16.msra.mxu1 %v1913_v20  ;;  %v1940_v20 = vld [vmem:[%s2411_s1 + $0x340] sm:$0xff] }
  0x4d   :  { %1241 = vmatpush.bf16.msra.mxu3 %v1929_v21  ;;  %v1956_v21 = vld [vmem:[%s2411_s1 + $0x3c0] sm:$0xff] }
  0x4e   :  { %1203 = vmatpush.bf16.msra.mxu0 %v1904_v22  ;;  %v1094_v22 = vsel %vm1092_vm0, %v960_v17, 0 }
  0x4f   :  { %1229 = vmatpush.bf16.msra.mxu2 %v1920_v23  ;;  %v301_v23 = vld [vmem:[#allocation1] sm:$0xff] }
  0x50   :  { %1216 = vmatpush.bf16.msra.mxu1 %v1912_v24  ;;  %v1964_v24 = vld [vmem:[%s2413_s2] ss:$0 sm:$0xff] }
  0x51   :  { %1242 = vmatpush.bf16.msra.mxu3 %v1928_v25 }
  0x52   :  { %1204 = vmatpush.bf16.msra.mxu0 %v1903_v26 }
  0x53   :  { %1230 = vmatpush.bf16.msra.mxu2 %v1919_v27 }
  0x54   :  { %1217 = vmatpush.bf16.msra.mxu1 %v1911_v28 }
  0x55   :  { %1243 = vmatpush.bf16.msra.mxu3 %v1927_v29 }
  0x56   :  { %1205 = vmatpush.bf16.msra.mxu0 %v1902_v30 }
  0x57   :  { %1231 = vmatpush.bf16.msra.mxu2 %v1918_v31 }
  0x58   :  { %1218 = vmatpush.bf16.msra.mxu1 %v1910_v32 }
  0x59   :  { %1244 = vmatpush.bf16.msra.mxu3 %v1926_v33 }
  0x5a   :  { %1206 = vmatpush.bf16.msra.mxu0 %v1901_v34 }
  0x5b   :  { %1232 = vmatpush.bf16.msra.mxu2 %v1917_v35 }
  0x5c   :  { %1219 = vmatpush.bf16.msra.mxu1 %v1909_v36 }
  0x5d   :  { %1245 = vmatpush.bf16.msra.mxu3 %v1925_v37 }
  0x5e   :  { %1207 = vmatpush.bf16.msra.mxu0 %v1900_v38 }
  0x5f   :  { %1233 = vmatpush.bf16.msra.mxu2 %v1916_v39 }
  0x60   :  { %1220 = vmatpush.bf16.msra.mxu1 %v1908_v43 }
  0x61   :  { %1246 = vmatpush.bf16.msra.mxu3 %v1924_v44  ;;  %1208 = vmatmul.bf16.vlgmr.msra.gmra.mxu0 %v291_v45 }
  0x62   :  { %1252 = vmatpush.bf16.msrb.mxu0 %v1939_v40  ;;  %1234 = vmatmul.bf16.vlgmr.msra.gmra.mxu2 %v293_v46 }
  0x63   :  { %1278 = vmatpush.bf16.msrb.mxu2 %v1955_v41  ;;  %1221 = vmatmul.bf16.vlgmr.msra.gmra.mxu1 %v292_v49 }
  0x64   :  { %1265 = vmatpush.bf16.msrb.mxu1 %v1947_v47  ;;  %1247 = vmatmul.bf16.vlgmr.msra.gmra.mxu3 %v294_v51 }
  0x65   :  { %1291 = vmatpush.bf16.msrb.mxu3 %v1963_v48 }
  0x66   :  { %1253 = vmatpush.bf16.msrb.mxu0 %v1938_v50 }
  0x67   :  { %1279 = vmatpush.bf16.msrb.mxu2 %v1954_v52 }
  0x68   :  { %1266 = vmatpush.bf16.msrb.mxu1 %v1946_v57 }
  0x69   :  { %1292 = vmatpush.bf16.msrb.mxu3 %v1962_v58 }
  0x6a   :  { %1254 = vmatpush.bf16.msrb.mxu0 %v1937_v59 }
  0x6b   :  { %1280 = vmatpush.bf16.msrb.mxu2 %v1953_v60 }
  0x6c   :  { %1267 = vmatpush.bf16.msrb.mxu1 %v1945_v61 }
  0x6d   :  { %1293 = vmatpush.bf16.msrb.mxu3 %v1961_v62 }
  0x6e   :  { %1255 = vmatpush.bf16.msrb.mxu0 %v1936_v63 }
  0x6f   :  { %1281 = vmatpush.bf16.msrb.mxu2 %v1952_v0 }
  0x70   :  { %1268 = vmatpush.bf16.msrb.mxu1 %v1944_v1 }
  0x71   :  { %1294 = vmatpush.bf16.msrb.mxu3 %v1960_v2 }
  0x72   :  { %1256 = vmatpush.bf16.msrb.mxu0 %v1935_v3 }
  0x73   :  { %1282 = vmatpush.bf16.msrb.mxu2 %v1951_v4 }
  0x74   :  { %1269 = vmatpush.bf16.msrb.mxu1 %v1943_v5 }
  0x75   :  { %1295 = vmatpush.bf16.msrb.mxu3 %v1959_v6 }
  0x76   :  { %1257 = vmatpush.bf16.msrb.mxu0 %v1934_v8 }
  0x77   :  { %1283 = vmatpush.bf16.msrb.mxu2 %v1950_v9 }
  0x78   :  { %1270 = vmatpush.bf16.msrb.mxu1 %v1942_v10 }
  0x79   :  { %1296 = vmatpush.bf16.msrb.mxu3 %v1958_v11 }
  0x7a   :  { %1258 = vmatpush.bf16.msrb.mxu0 %v1933_v13 }
  0x7b   :  { %1284 = vmatpush.bf16.msrb.mxu2 %v1949_v14 }
  0x7c   :  { %1271 = vmatpush.bf16.msrb.mxu1 %v1941_v15 }
  0x7d   :  { %1297 = vmatpush.bf16.msrb.mxu3 %v1957_v16 }
  0x7e   :  { %1259 = vmatpush.bf16.msrb.mxu0 %v1932_v18 }
  0x7f   :  { %1285 = vmatpush.bf16.msrb.mxu2 %v1948_v19 }
  0x80   :  { %1272 = vmatpush.bf16.msrb.mxu1 %v1940_v20 }
  0x81   :  { %1298 = vmatpush.bf16.msrb.mxu3 %v1956_v21  ;;  %1260 = vmatmul.bf16.vlgmr.msrb.gmra.mxu0 %v2312_v53 }
  0x82   :  { %1311 = vmatpush.bf16.msra.mxu0 %v1094_v22  ;;  %1286 = vmatmul.bf16.vlgmr.msrb.gmra.mxu2 %v2314_v54 }
  0x83   :  { %1273 = vmatmul.bf16.vlgmr.msrb.gmra.mxu1 %v2316_v55 }
  0x84   :  { %1299 = vmatmul.bf16.vlgmr.msrb.gmra.mxu3 %v2318_v56 }
  0x91   :  { %1835 = vmatmul.msk.bf16.vlgmr.msra.gmra.mxu0 %vm1089_vm1, %v301_v23 }
  0x9e   :  { %v1105_v25 = vpop.f32.mrf.mxu0 }
  0x9f   :  { %v1106_v26 = vadd.f32 %v1964_v24, %v1105_v25 }
  0xa0   :  { %v1118_v27 = vpop.f32.mrf.mxu1 }
  0xa1   :  { %v1119_v28 = vadd.f32 %v1118_v27, %v1106_v26 }
  0xa5   :  { %v1131_v29 = vpop.f32.mrf.mxu2 }
  0xa6   :  { %v1132_v30 = vadd.f32 %v1131_v29, %v1119_v28  ;;  %v1107_v32 = vpop.f32.mrf.mxu0 }
  0xa7   :  { %v1144_v31 = vpop.f32.mrf.mxu3 }
  0xa8   :  { %v1145_v33 = vadd.f32 %v1144_v31, %v1132_v30  ;;  %v1120_v34 = vpop.f32.mrf.mxu1 }
  0xad   :  { %v1133_v35 = vpop.f32.mrf.mxu2 }
  0xaf   :  { %v1146_v36 = vpop.f32.mrf.mxu3 }
  0xbe   :  { %v1157_v37 = vpop.f32.mrf.mxu0 }
  0xbf   :  { %v1158_v50 = vadd.f32 %v1157_v37, %v1145_v33 }
  0xc0   :  { %v1170_v38 = vpop.f32.mrf.mxu1 }
  0xc1   :  { %v1171_v52 = vadd.f32 %v1170_v38, %v1158_v50 }
  0xc5   :  { %v1183_v39 = vpop.f32.mrf.mxu2 }
  0xc6   :  { %v1159_v41 = vpop.f32.mrf.mxu0  ;;  %v1184_v55 = vadd.f32 %v1183_v39, %v1171_v52 }
  0xc7   :  { %v1196_v40 = vpop.f32.mrf.mxu3 }
  0xc8   :  { %v1172_v42 = vpop.f32.mrf.mxu1  ;;  %v1197_v56 = vadd.f32 %v1196_v40, %v1184_v55 }
  0xcd   :  { %v1185_v43 = vpop.f32.mrf.mxu2 }
  0xcf   :  { %v1198_v44 = vpop.f32.mrf.mxu3 }
  0xde   :  { %v1209_v45 = vpop.f32.mrf.mxu0 }
  0xdf   :  { %v1210_v57 = vadd.f32 %v1209_v45, %v1197_v56 }
  0xe0   :  { %v1222_v46 = vpop.f32.mrf.mxu1 }
  0xe1   :  { %v1223_v58 = vadd.f32 %v1222_v46, %v1210_v57 }
  0xe5   :  { %v1235_v47 = vpop.f32.mrf.mxu2 }
  0xe6   :  { %v1211_v49 = vpop.f32.mrf.mxu0  ;;  %v1236_v59 = vadd.f32 %v1235_v47, %v1223_v58 }
  0xe7   :  { %v1248_v48 = vpop.f32.mrf.mxu3 }
  0xe8   :  { %v1224_v51 = vpop.f32.mrf.mxu1  ;;  %v1249_v62 = vadd.f32 %v1248_v48, %v1236_v59 }
  0xed   :  { %v1237_v53 = vpop.f32.mrf.mxu2 }
  0xef   :  { %v1250_v54 = vpop.f32.mrf.mxu3 }
  0xfe   :  { %v1261_v60 = vpop.f32.mrf.mxu0 }
  0xff   :  { %v1262_v63 = vadd.f32 %v1261_v60, %v1249_v62 }
 0x100   :  { %v1274_v61 = vpop.f32.mrf.mxu1 }
 0x101   :  { %v1275_v3 = vadd.f32 %v1274_v61, %v1262_v63 }
 0x105   :  { %v1287_v0 = vpop.f32.mrf.mxu2 }
 0x106   :  { %v1263_v1 = vpop.f32.mrf.mxu0  ;;  %v1288_v5 = vadd.f32 %v1287_v0, %v1275_v3 }
 0x107   :  { %v1300_v2 = vpop.f32.mrf.mxu3 }
 0x108   :  { %v1276_v4 = vpop.f32.mrf.mxu1  ;;  %v1301_v7 = vadd.f32 %v1300_v2, %v1288_v5 }
 0x10d   :  { %v1289_v6 = vpop.f32.mrf.mxu2 }
 0x10e   :  { %v1313_v9 = vpop.f32.mrf.mxu0 }
 0x10f   :  { %v1302_v8 = vpop.f32.mrf.mxu3  ;;  %v1314_v10 = vadd.f32 %v1313_v9, %v1301_v7 }
 0x111   :  { %v1317_v11 = vmax.f32 %v1314_v10, 0.0 }
 0x113   :  { %1318 = vst [vmem:[%s2414_s3] sm:$0x3] %v1317_v11 }
 0x116   :  { %v1315_v12 = vpop.f32.mrf.mxu0 }

// kernel: hnn_forward.17
= control target key start
LH: loop header
LB: loop body
LE: loop exit
PB: predicated region body
PF: predicated region fallthrough
CT: control target
= control target key end

     0   :  { %s237_s0 = inlined_call_operand.vmem [shape: bf16[2,128], index: 0, kind: input, shape index: {}]   ;;  %s238_s1 = inlined_call_operand.vmem [shape: bf16[128,11], index: 1, kind: input, shape index: {}]   ;;  %s239_s2 = inlined_call_operand.vmem [shape: f32[1,11], index: 2, kind: input, shape index: {}]   ;;  %s240_s3 = inlined_call_operand.hbm [shape: f32[2,11], index: 3, kind: output, shape index: {}]  }
   0x1   :  { %v154_v0 = vld [vmem:[%s238_s1 + $0x38] sm:$0xff]  ;;  %v153_v1 = vld [vmem:[%s238_s1 + $0x30] sm:$0xff] }
   0x2   :  { %84 = vmatpush.bf16.msra.mxu0 %v154_v0 }
   0x3   :  { %8 = vsyncpa [#allocation3], 0  ;;  %v152_v2 = vld [vmem:[%s238_s1 + $0x28] sm:$0xff]  ;;  %v151_v3 = vld [vmem:[%s238_s1 + $0x20] sm:$0xff]  ;;  %s183_s5 = smov [#allocation2]   ;;  %s106_s9 = sshll.u32 %s240_s3, 4  ;;  %s107_s9 = int_to_ptr.hbm [resolvable:$true] %s106_s9 }
   0x4   :  { %v150_v4 = vld [vmem:[%s238_s1 + $0x18] sm:$0xff]  ;;  %v149_v5 = vld [vmem:[%s238_s1 + $0x10] sm:$0xff]  ;;  %v148_v6 = vld [vmem:[%s238_s1 + $0x8] sm:$0xff]  ;;  %s104_s6 = sshll.u32 %s183_s5, 4  ;;  %vm97_vm0 = vcmask 82944   ;;  %s105_s6 = int_to_ptr.vmem [resolvable:$true] %s104_s6 }
   0x5   :  { %v147_v7 = vld [vmem:[%s238_s1] sm:$0xff] }
   0x6   :  { %85 = vmatpush.bf16.msra.mxu0 %v153_v1  ;;  %v15_v8 = vld [vmem:[%s237_s0] sm:$0x1] }
   0x7   :  { %v156_v9 = vld [vmem:[%s239_s2] ss:$0 sm:$0xff] }
   0xa   :  { %86 = vmatpush.bf16.msra.mxu0 %v152_v2 }
   0xe   :  { %87 = vmatpush.bf16.msra.mxu0 %v151_v3 }
  0x12   :  { %88 = vmatpush.bf16.msra.mxu0 %v150_v4 }
  0x16   :  { %89 = vmatpush.bf16.msra.mxu0 %v149_v5 }
  0x1a   :  { %90 = vmatpush.bf16.msra.mxu0 %v148_v6 }
  0x1e   :  { %91 = vmatpush.bf16.msra.mxu0 %v147_v7 }
  0x21   :  { %92 = vmatmul.bf16.vlgmr.msra.gmra.mxu0 %v15_v8 }
  0x9e   :  { %v93_v10 = vpop.f32.mrf.mxu0 }
  0x9f   :  { %v94_v11 = vadd.f32 %v156_v9, %v93_v10 }
  0xa1   :  { %98 = vst.msk [vmem:[#allocation2] sm:$0x3] %vm97_vm0, %v94_v11 }
  0xa2   :  { %109 = dma.vmem_to_hbm [thread:$0]  %s105_s6, 32, %s107_s9, [#allocation3]  }
  0xa6   :  { %v95_v12 = vpop.f32.mrf.mxu0 }
  0xa7   :  { %181 = dma.done.wait [#allocation3], 32  }
  0xa8   :  { %182 = vsyncadd [#allocation3], 4294967264 }
  0xa9   :  { %114 = vsyncpa [#allocation3], 1 }

// kernel: hnn_forward.15
= control target key start
LH: loop header
LB: loop body
LE: loop exit
PB: predicated region body
PF: predicated region fallthrough
CT: control target
= control target key end

     0   :  { %vm4322_vm0 = vcmask 1041408   ;;  %vm4324_vm1 = vcmask 1045508   ;;  %vm4326_vm2 = vcmask 1043456   ;;  %vm4345_vm3 = vcmask 58368   ;;  %s10614_s1 = inlined_call_operand.vmem [shape: bf16[512,2056], index: 1, kind: input, shape index: {}]   ;;  %s10615_s0 = inlined_call_operand.vmem [shape: bf16[2,512], index: 0, kind: input, shape index: {}]   ;;  %s10616_s2 = inlined_call_operand.vmem [shape: f32[1,2056], index: 2, kind: input, shape index: {}]   ;;  %s10617_s3 = inlined_call_operand.vmem [shape: f32[2,2056], index: 3, kind: output, shape index: {}]  }
   0x1   :  { %v4829_v0 = vld [vmem:[%s10614_s1 + $0x3b8] sm:$0xf]  ;;  %v6654_v1 = vld [vmem:[%s10614_s1 + $0x3f8] sm:$0xf0]  ;;  %v4761_v11 = vld [vmem:[%s10614_s1 + $0x330] sm:$0xf] }
   0x2   :  { %v5373_v2 = vld [vmem:[%s10614_s1 + $0x7f8] sm:$0xf]  ;;  %v4830_v3 = vor.u32 %v6654_v1, %v4829_v0  ;;  %v6790_v4 = vld [vmem:[%s10614_s1 + $0x838] sm:$0xf0]  ;;  %v6637_v13 = vld [vmem:[%s10614_s1 + $0x370] sm:$0xf0] }
   0x3   :  { %v5917_v5 = vld [vmem:[%s10614_s1 + $0xc38] sm:$0xf]  ;;  %v6926_v6 = vld [vmem:[%s10614_s1 + $0xc78] sm:$0xf0]  ;;  %v5374_v7 = vor.u32 %v6790_v4, %v5373_v2  ;;  %v5305_v14 = vld [vmem:[%s10614_s1 + $0x770] sm:$0xf]  ;;  %v4762_v16 = vor.u32 %v6637_v13, %v4761_v11 }
   0x4   :  { %v5918_v8 = vor.u32 %v6926_v6, %v5917_v5  ;;  %v6461_v9 = vld [vmem:[%s10614_s1 + $0x1078] sm:$0xf]  ;;  %v7062_v10 = vld [vmem:[%s10614_s1 + $0x10b8] sm:$0xf0]  ;;  %3393 = vmatpush.bf16.msra.mxu0 %v4830_v3  ;;  %v6773_v15 = vld [vmem:[%s10614_s1 + $0x7b0] sm:$0xf0] }
   0x5   :  { %v6462_v12 = vor.u32 %v7062_v10, %v6461_v9  ;;  %3406 = vmatpush.bf16.msra.mxu1 %v5374_v7  ;;  %v5306_v17 = vor.u32 %v6773_v15, %v5305_v14  ;;  %v5849_v18 = vld [vmem:[%s10614_s1 + $0xbb0] sm:$0xf]  ;;  %v6909_v19 = vld [vmem:[%s10614_s1 + $0xbf0] sm:$0xf0]  ;;  %v4693_v23 = vld [vmem:[%s10614_s1 + $0x2a8] sm:$0xf] }
   0x6   :  { %3419 = vmatpush.bf16.msra.mxu2 %v5918_v8  ;;  %v6393_v20 = vld [vmem:[%s10614_s1 + $0xff0] sm:$0xf]  ;;  %v5850_v21 = vor.u32 %v6909_v19, %v5849_v18  ;;  %v7045_v22 = vld [vmem:[%s10614_s1 + $0x1030] sm:$0xf0]  ;;  %v6620_v24 = vld [vmem:[%s10614_s1 + $0x2e8] sm:$0xf0] }
   0x7   :  { %3432 = vmatpush.bf16.msra.mxu3 %v6462_v12  ;;  %v6394_v25 = vor.u32 %v7045_v22, %v6393_v20  ;;  %v5237_v26 = vld [vmem:[%s10614_s1 + $0x6e8] sm:$0xf]  ;;  %v6756_v27 = vld [vmem:[%s10614_s1 + $0x728] sm:$0xf0]  ;;  %v4694_v29 = vor.u32 %v6620_v24, %v4693_v23  ;;  %v4625_v35 = vld [vmem:[%s10614_s1 + $0x220] sm:$0xf] }
   0x8   :  { %v5781_v28 = vld [vmem:[%s10614_s1 + $0xb28] sm:$0xf]  ;;  %3394 = vmatpush.bf16.msra.mxu0 %v4762_v16  ;;  %v6892_v30 = vld [vmem:[%s10614_s1 + $0xb68] sm:$0xf0]  ;;  %v5238_v33 = vor.u32 %v6756_v27, %v5237_v26  ;;  %v6603_v36 = vld [vmem:[%s10614_s1 + $0x260] sm:$0xf0] }
   0x9   :  { %v6325_v31 = vld [vmem:[%s10614_s1 + $0xf68] sm:$0xf]  ;;  %v7028_v32 = vld [vmem:[%s10614_s1 + $0xfa8] sm:$0xf0]  ;;  %3407 = vmatpush.bf16.msra.mxu1 %v5306_v17  ;;  %v5782_v34 = vor.u32 %v6892_v30, %v5781_v28  ;;  %v5169_v37 = vld [vmem:[%s10614_s1 + $0x660] sm:$0xf]  ;;  %v4626_v44 = vor.u32 %v6603_v36, %v4625_v35 }
   0xa   :  { %3420 = vmatpush.bf16.msra.mxu2 %v5850_v21  ;;  %v6326_v38 = vor.u32 %v7028_v32, %v6325_v31  ;;  %v6739_v39 = vld [vmem:[%s10614_s1 + $0x6a0] sm:$0xf0]  ;;  %v5713_v40 = vld [vmem:[%s10614_s1 + $0xaa0] sm:$0xf]  ;;  %v4557_v47 = vld [vmem:[%s10614_s1 + $0x198] sm:$0xf] }
   0xb   :  { %3433 = vmatpush.bf16.msra.mxu3 %v6394_v25  ;;  %v6875_v41 = vld [vmem:[%s10614_s1 + $0xae0] sm:$0xf0]  ;;  %v6257_v42 = vld [vmem:[%s10614_s1 + $0xee0] sm:$0xf]  ;;  %v5170_v45 = vor.u32 %v6739_v39, %v5169_v37  ;;  %v6586_v48 = vld [vmem:[%s10614_s1 + $0x1d8] sm:$0xf0] }
   0xc   :  { %v7011_v43 = vld [vmem:[%s10614_s1 + $0xf20] sm:$0xf0]  ;;  %3395 = vmatpush.bf16.msra.mxu0 %v4694_v29  ;;  %v5714_v46 = vor.u32 %v6875_v41, %v5713_v40  ;;  %v5101_v49 = vld [vmem:[%s10614_s1 + $0x5d8] sm:$0xf]  ;;  %v6722_v51 = vld [vmem:[%s10614_s1 + $0x618] sm:$0xf0]  ;;  %v4558_v56 = vor.u32 %v6586_v48, %v4557_v47 }
   0xd   :  { %3408 = vmatpush.bf16.msra.mxu1 %v5238_v33  ;;  %v6258_v50 = vor.u32 %v7011_v43, %v6257_v42  ;;  %v5645_v52 = vld [vmem:[%s10614_s1 + $0xa18] sm:$0xf]  ;;  %v6858_v53 = vld [vmem:[%s10614_s1 + $0xa58] sm:$0xf0]  ;;  %v5102_v57 = vor.u32 %v6722_v51, %v5101_v49  ;;  %v4489_v59 = vld [vmem:[%s10614_s1 + $0x110] sm:$0xf] }
   0xe   :  { %3421 = vmatpush.bf16.msra.mxu2 %v5782_v34  ;;  %v6189_v54 = vld [vmem:[%s10614_s1 + $0xe58] sm:$0xf]  ;;  %v6994_v55 = vld [vmem:[%s10614_s1 + $0xe98] sm:$0xf0]  ;;  %v5646_v58 = vor.u32 %v6858_v53, %v5645_v52  ;;  %v6569_v60 = vld [vmem:[%s10614_s1 + $0x150] sm:$0xf0] }
   0xf   :  { %3434 = vmatpush.bf16.msra.mxu3 %v6326_v38  ;;  %v5033_v61 = vld [vmem:[%s10614_s1 + $0x550] sm:$0xf]  ;;  %v6190_v62 = vor.u32 %v6994_v55, %v6189_v54  ;;  %v6705_v63 = vld [vmem:[%s10614_s1 + $0x590] sm:$0xf0]  ;;  %v4490_v4 = vor.u32 %v6569_v60, %v4489_v59  ;;  %v4421_v7 = vld [vmem:[%s10614_s1 + $0x88] sm:$0xf] }
  0x10   :  { %3396 = vmatpush.bf16.msra.mxu0 %v4626_v44  ;;  %v5577_v0 = vld [vmem:[%s10614_s1 + $0x990] sm:$0xf]  ;;  %v6841_v1 = vld [vmem:[%s10614_s1 + $0x9d0] sm:$0xf0]  ;;  %v5034_v5 = vor.u32 %v6705_v63, %v5033_v61  ;;  %v6552_v8 = vld [vmem:[%s10614_s1 + $0xc8] sm:$0xf0] }
  0x11   :  { %3409 = vmatpush.bf16.msra.mxu1 %v5170_v45  ;;  %v6121_v2 = vld [vmem:[%s10614_s1 + $0xdd0] sm:$0xf]  ;;  %v6977_v3 = vld [vmem:[%s10614_s1 + $0xe10] sm:$0xf0]  ;;  %v5578_v6 = vor.u32 %v6841_v1, %v5577_v0  ;;  %v4965_v9 = vld [vmem:[%s10614_s1 + $0x4c8] sm:$0xf]  ;;  %v4422_v16 = vor.u32 %v6552_v8, %v4421_v7 }
  0x12   :  { %3422 = vmatpush.bf16.msra.mxu2 %v5714_v46  ;;  %v6122_v10 = vor.u32 %v6977_v3, %v6121_v2  ;;  %v6688_v11 = vld [vmem:[%s10614_s1 + $0x508] sm:$0xf0]  ;;  %v5509_v12 = vld [vmem:[%s10614_s1 + $0x908] sm:$0xf]  ;;  %v4353_v17 = vld [vmem:[%s10614_s1] sm:$0xf] }
  0x13   :  { %3435 = vmatpush.bf16.msra.mxu3 %v6258_v50  ;;  %v6824_v13 = vld [vmem:[%s10614_s1 + $0x948] sm:$0xf0]  ;;  %v6053_v14 = vld [vmem:[%s10614_s1 + $0xd48] sm:$0xf]  ;;  %v6535_v18 = vld [vmem:[%s10614_s1 + $0x40] sm:$0xf0]  ;;  %v4966_v19 = vor.u32 %v6688_v11, %v4965_v9 }
  0x14   :  { %3397 = vmatpush.bf16.msra.mxu0 %v4558_v56  ;;  %v6960_v15 = vld [vmem:[%s10614_s1 + $0xd88] sm:$0xf0]  ;;  %v5510_v20 = vor.u32 %v6824_v13, %v5509_v12  ;;  %v4897_v21 = vld [vmem:[%s10614_s1 + $0x440] sm:$0xf]  ;;  %v6671_v22 = vld [vmem:[%s10614_s1 + $0x480] sm:$0xf0]  ;;  %v4354_v31 = vor.u32 %v6535_v18, %v4353_v17 }
  0x15   :  { %3410 = vmatpush.bf16.msra.mxu1 %v5102_v57  ;;  %v5441_v23 = vld [vmem:[%s10614_s1 + $0x880] sm:$0xf]  ;;  %v6054_v24 = vor.u32 %v6960_v15, %v6053_v14  ;;  %v6807_v25 = vld [vmem:[%s10614_s1 + $0x8c0] sm:$0xf0]  ;;  %v6646_v28 = vld [vmem:[%s10614_s1 + $0x3bc] sm:$0xf]  ;;  %v4898_v35 = vor.u32 %v6671_v22, %v4897_v21 }
  0x16   :  { %3423 = vmatpush.bf16.msra.mxu2 %v5646_v58  ;;  %v5985_v26 = vld [vmem:[%s10614_s1 + $0xcc0] sm:$0xf]  ;;  %v6943_v27 = vld [vmem:[%s10614_s1 + $0xd00] sm:$0xf0]  ;;  %v6782_v30 = vld [vmem:[%s10614_s1 + $0x7fc] sm:$0xf]  ;;  %v5442_v36 = vor.u32 %v6807_v25, %v5441_v23 }
  0x17   :  { %3436 = vmatpush.bf16.msra.mxu3 %v6190_v62  ;;  %v4831_v29 = vld [vmem:[%s10614_s1 + $0x3fc] sm:$0xf0]  ;;  %v6918_v33 = vld [vmem:[%s10614_s1 + $0xc3c] sm:$0xf]  ;;  %v5986_v39 = vor.u32 %v6943_v27, %v5985_v26  ;;  %v6629_v43 = vld [vmem:[%s10614_s1 + $0x334] sm:$0xf] }
  0x18   :  { %3398 = vmatpush.bf16.msra.mxu0 %v4490_v4  ;;  %v5375_v32 = vld [vmem:[%s10614_s1 + $0x83c] sm:$0xf0]  ;;  %v7054_v37 = vld [vmem:[%s10614_s1 + $0x107c] sm:$0xf]  ;;  %v4834_v40 = vor.u32 %v6646_v28, %v4831_v29  ;;  %v4763_v44 = vld [vmem:[%s10614_s1 + $0x374] sm:$0xf0] }
  0x19   :  { %3411 = vmatpush.bf16.msra.mxu1 %v5034_v5  ;;  %v5919_v34 = vld [vmem:[%s10614_s1 + $0xc7c] sm:$0xf0]  ;;  %v5378_v41 = vor.u32 %v6782_v30, %v5375_v32  ;;  %v6765_v45 = vld [vmem:[%s10614_s1 + $0x774] sm:$0xf]  ;;  %v5307_v47 = vld [vmem:[%s10614_s1 + $0x7b4] sm:$0xf0]  ;;  %v4766_v53 = vor.u32 %v6629_v43, %v4763_v44 }
  0x1a   :  { %3424 = vmatpush.bf16.msra.mxu2 %v5578_v6  ;;  %v6463_v38 = vld [vmem:[%s10614_s1 + $0x10bc] sm:$0xf0]  ;;  %v5922_v42 = vor.u32 %v6918_v33, %v5919_v34  ;;  %v6901_v48 = vld [vmem:[%s10614_s1 + $0xbb4] sm:$0xf]  ;;  %v5851_v49 = vld [vmem:[%s10614_s1 + $0xbf4] sm:$0xf0]  ;;  %v5310_v54 = vor.u32 %v6765_v45, %v5307_v47 }
  0x1b   :  { %3437 = vmatpush.bf16.msra.mxu3 %v6122_v10  ;;  %v6466_v46 = vor.u32 %v7054_v37, %v6463_v38  ;;  %v7037_v50 = vld [vmem:[%s10614_s1 + $0xff4] sm:$0xf]  ;;  %v6395_v51 = vld [vmem:[%s10614_s1 + $0x1034] sm:$0xf0]  ;;  %v14_v52 = vld [vmem:[%s10615_s0] sm:$0xf]  ;;  %v5854_v55 = vor.u32 %v6901_v48, %v5851_v49 }
  0x1c   :  { %3399 = vmatpush.bf16.msra.mxu0 %v4422_v16  ;;  %632 = vst [vmem:[#allocation1] ss:$9 sm:$0xff] %v14_v52  ;;  %v6612_v56 = vld [vmem:[%s10614_s1 + $0x2ac] sm:$0xf]  ;;  %v4695_v57 = vld [vmem:[%s10614_s1 + $0x2ec] sm:$0xf0]  ;;  %v6398_v59 = vor.u32 %v7037_v50, %v6395_v51 }
  0x1d   :  { %3412 = vmatpush.bf16.msra.mxu1 %v4966_v19  ;;  %v6748_v58 = vld [vmem:[%s10614_s1 + $0x6ec] sm:$0xf]  ;;  %v5239_v60 = vld [vmem:[%s10614_s1 + $0x72c] sm:$0xf0]  ;;  %v4698_v1 = vor.u32 %v6612_v56, %v4695_v57  ;;  %v6595_v2 = vld [vmem:[%s10614_s1 + $0x224] sm:$0xf] }
  0x1e   :  { %3425 = vmatpush.bf16.msra.mxu2 %v5510_v20  ;;  %v6884_v61 = vld [vmem:[%s10614_s1 + $0xb2c] sm:$0xf]  ;;  %v5783_v62 = vld [vmem:[%s10614_s1 + $0xb6c] sm:$0xf0]  ;;  %v5242_v3 = vor.u32 %v6748_v58, %v5239_v60  ;;  %v4627_v5 = vld [vmem:[%s10614_s1 + $0x264] sm:$0xf0] }
  0x1f   :  { %3438 = vmatpush.bf16.msra.mxu3 %v6054_v24  ;;  %v7020_v63 = vld [vmem:[%s10614_s1 + $0xf6c] sm:$0xf]  ;;  %v6327_v0 = vld [vmem:[%s10614_s1 + $0xfac] sm:$0xf0]  ;;  %v5786_v4 = vor.u32 %v6884_v61, %v5783_v62  ;;  %v6731_v6 = vld [vmem:[%s10614_s1 + $0x664] sm:$0xf]  ;;  %v4630_v15 = vor.u32 %v6595_v2, %v4627_v5 }
  0x20   :  { %3400 = vmatpush.bf16.msra.mxu0 %v4354_v31  ;;  %v5171_v7 = vld [vmem:[%s10614_s1 + $0x6a4] sm:$0xf0]  ;;  %v6330_v8 = vor.u32 %v7020_v63, %v6327_v0  ;;  %v6867_v9 = vld [vmem:[%s10614_s1 + $0xaa4] sm:$0xf]  ;;  %v6578_v20 = vld [vmem:[%s10614_s1 + $0x19c] sm:$0xf] }
  0x21   :  { %3413 = vmatpush.bf16.msra.mxu1 %v4898_v35  ;;  %v5715_v10 = vld [vmem:[%s10614_s1 + $0xae4] sm:$0xf0]  ;;  %v7003_v11 = vld [vmem:[%s10614_s1 + $0xee4] sm:$0xf]  ;;  %v5174_v18 = vor.u32 %v6731_v6, %v5171_v7  ;;  %v4559_v21 = vld [vmem:[%s10614_s1 + $0x1dc] sm:$0xf0] }
  0x22   :  { %3426 = vmatpush.bf16.msra.mxu2 %v5442_v36  ;;  %v6259_v12 = vld [vmem:[%s10614_s1 + $0xf24] sm:$0xf0]  ;;  %v5718_v19 = vor.u32 %v6867_v9, %v5715_v10  ;;  %v6714_v22 = vld [vmem:[%s10614_s1 + $0x5dc] sm:$0xf]  ;;  %v5103_v24 = vld [vmem:[%s10614_s1 + $0x61c] sm:$0xf0]  ;;  %v4562_v29 = vor.u32 %v6578_v20, %v4559_v21 }
  0x23   :  { %3439 = vmatpush.bf16.msra.mxu3 %v5986_v39  ;;  %v7401_v13 = vld [vmem:[#allocation1 + $0x12] sm:$0xff]  ;;  %v7403_v14 = vld [vmem:[#allocation1] sm:$0xff]  ;;  %v7408_v17 = vld [vmem:[#allocation1 + $0x9] sm:$0xff]  ;;  %v6262_v23 = vor.u32 %v7003_v11, %v6259_v12  ;;  %v5106_v30 = vor.u32 %v6714_v22, %v5103_v24 }
  0x24   :  { %3445 = vmatpush.bf16.msrb.mxu0 %v4834_v40  ;;  %v7406_v16 = vld [vmem:[#allocation1 + $0x1b] sm:$0xff]  ;;  %3414 = vmatmul.bf16.vlgmr.msra.gmra.mxu1 %v7408_v17  ;;  %v6561_v32 = vld [vmem:[%s10614_s1 + $0x114] sm:$0xf]  ;;  %v6544_v44 = vld [vmem:[%s10614_s1 + $0x8c] sm:$0xf] }
  0x25   :  { %3458 = vmatpush.bf16.msrb.mxu1 %v5378_v41  ;;  %3427 = vmatmul.bf16.vlgmr.msra.gmra.mxu2 %v7401_v13  ;;  %v6850_v25 = vld [vmem:[%s10614_s1 + $0xa1c] sm:$0xf]  ;;  %v5647_v26 = vld [vmem:[%s10614_s1 + $0xa5c] sm:$0xf0]  ;;  %v4491_v33 = vld [vmem:[%s10614_s1 + $0x154] sm:$0xf0] }
  0x26   :  { %3471 = vmatpush.bf16.msrb.mxu2 %v5922_v42  ;;  %3401 = vmatmul.bf16.vlgmr.msra.gmra.mxu0 %v7403_v14  ;;  %v6986_v27 = vld [vmem:[%s10614_s1 + $0xe5c] sm:$0xf]  ;;  %v6191_v28 = vld [vmem:[%s10614_s1 + $0xe9c] sm:$0xf0]  ;;  %v5650_v31 = vor.u32 %v6850_v25, %v5647_v26  ;;  %v6697_v34 = vld [vmem:[%s10614_s1 + $0x554] sm:$0xf]  ;;  %v4494_v41 = vor.u32 %v6561_v32, %v4491_v33 }
  0x27   :  { %3484 = vmatpush.bf16.msrb.mxu3 %v6466_v46  ;;  %v6194_v35 = vor.u32 %v6986_v27, %v6191_v28  ;;  %v5035_v36 = vld [vmem:[%s10614_s1 + $0x594] sm:$0xf0]  ;;  %v6833_v37 = vld [vmem:[%s10614_s1 + $0x994] sm:$0xf]  ;;  %v4423_v45 = vld [vmem:[%s10614_s1 + $0xcc] sm:$0xf0] }
  0x28   :  { %3446 = vmatpush.bf16.msrb.mxu0 %v4766_v53  ;;  %3440 = vmatmul.bf16.vlgmr.msra.gmra.mxu3 %v7406_v16  ;;  %v5579_v38 = vld [vmem:[%s10614_s1 + $0x9d4] sm:$0xf0]  ;;  %v6969_v39 = vld [vmem:[%s10614_s1 + $0xdd4] sm:$0xf]  ;;  %v5038_v42 = vor.u32 %v6697_v34, %v5035_v36  ;;  %v6680_v46 = vld [vmem:[%s10614_s1 + $0x4cc] sm:$0xf]  ;;  %v4426_v53 = vor.u32 %v6544_v44, %v4423_v45 }
  0x29   :  { %3459 = vmatpush.bf16.msrb.mxu1 %v5310_v54  ;;  %v6123_v40 = vld [vmem:[%s10614_s1 + $0xe14] sm:$0xf0]  ;;  %v5582_v43 = vor.u32 %v6833_v37, %v5579_v38  ;;  %v4967_v48 = vld [vmem:[%s10614_s1 + $0x50c] sm:$0xf0]  ;;  %v6816_v49 = vld [vmem:[%s10614_s1 + $0x90c] sm:$0xf] }
  0x2a   :  { %3472 = vmatpush.bf16.msrb.mxu2 %v5854_v55  ;;  %v6126_v47 = vor.u32 %v6969_v39, %v6123_v40  ;;  %v5511_v50 = vld [vmem:[%s10614_s1 + $0x94c] sm:$0xf0]  ;;  %v6952_v51 = vld [vmem:[%s10614_s1 + $0xd4c] sm:$0xf]  ;;  %v6527_v54 = vld [vmem:[%s10614_s1 + $0x4] sm:$0xf]  ;;  %v4970_v56 = vor.u32 %v6680_v46, %v4967_v48 }
  0x2b   :  { %3485 = vmatpush.bf16.msrb.mxu3 %v6398_v59  ;;  %v6055_v52 = vld [vmem:[%s10614_s1 + $0xd8c] sm:$0xf0]  ;;  %v4355_v55 = vld [vmem:[%s10614_s1 + $0x44] sm:$0xf0]  ;;  %v5514_v57 = vor.u32 %v6816_v49, %v5511_v50  ;;  %v6663_v58 = vld [vmem:[%s10614_s1 + $0x444] sm:$0xf] }
  0x2c   :  { %3447 = vmatpush.bf16.msrb.mxu0 %v4698_v1  ;;  %v4899_v59 = vld [vmem:[%s10614_s1 + $0x484] sm:$0xf0]  ;;  %v6799_v60 = vld [vmem:[%s10614_s1 + $0x884] sm:$0xf]  ;;  %v6058_v61 = vor.u32 %v6952_v51, %v6055_v52  ;;  %v4837_v1 = vld [vmem:[%s10614_s1 + $0x3c0] sm:$0xf] }
  0x2d   :  { %3460 = vmatpush.bf16.msrb.mxu1 %v5242_v3  ;;  %v5443_v62 = vld [vmem:[%s10614_s1 + $0x8c4] sm:$0xf0]  ;;  %v6935_v63 = vld [vmem:[%s10614_s1 + $0xcc4] sm:$0xf]  ;;  %v5381_v3 = vld [vmem:[%s10614_s1 + $0x800] sm:$0xf] }
  0x2e   :  { %3473 = vmatpush.bf16.msrb.mxu2 %v5786_v4  ;;  %v5987_v0 = vld [vmem:[%s10614_s1 + $0xd04] sm:$0xf0]  ;;  %v6655_v2 = vld [vmem:[%s10614_s1 + $0x400] sm:$0xf0]  ;;  %v4358_v4 = vor.u32 %v6527_v54, %v4355_v55  ;;  %v5925_v6 = vld [vmem:[%s10614_s1 + $0xc40] sm:$0xf]  ;;  %v5446_v9 = vor.u32 %v6799_v60, %v5443_v62 }
  0x2f   :  { %3486 = vmatpush.bf16.msrb.mxu3 %v6330_v8  ;;  %v6791_v5 = vld [vmem:[%s10614_s1 + $0x840] sm:$0xf0]  ;;  %v4902_v8 = vor.u32 %v6663_v58, %v4899_v59  ;;  %v6469_v10 = vld [vmem:[%s10614_s1 + $0x1080] sm:$0xf]  ;;  %v5990_v12 = vor.u32 %v6935_v63, %v5987_v0  ;;  %v4769_v20 = vld [vmem:[%s10614_s1 + $0x338] sm:$0xf] }
  0x30   :  { %3448 = vmatpush.bf16.msrb.mxu0 %v4630_v15  ;;  %v6927_v7 = vld [vmem:[%s10614_s1 + $0xc80] sm:$0xf0]  ;;  %v4838_v15 = vor.u32 %v6655_v2, %v4837_v1  ;;  %v6638_v21 = vld [vmem:[%s10614_s1 + $0x378] sm:$0xf0]  ;;  %v5313_v22 = vld [vmem:[%s10614_s1 + $0x778] sm:$0xf] }
  0x31   :  { %3461 = vmatpush.bf16.msrb.mxu1 %v5174_v18  ;;  %v7063_v11 = vld [vmem:[%s10614_s1 + $0x10c0] sm:$0xf0]  ;;  %v5382_v18 = vor.u32 %v6791_v5, %v5381_v3  ;;  %v6774_v24 = vld [vmem:[%s10614_s1 + $0x7b8] sm:$0xf0]  ;;  %v5857_v25 = vld [vmem:[%s10614_s1 + $0xbb8] sm:$0xf] }
  0x32   :  { %3474 = vmatpush.bf16.msrb.mxu2 %v5718_v19  ;;  %v5926_v19 = vor.u32 %v6927_v7, %v5925_v6  ;;  %v6910_v26 = vld [vmem:[%s10614_s1 + $0xbf8] sm:$0xf0]  ;;  %v6401_v27 = vld [vmem:[%s10614_s1 + $0xff8] sm:$0xf]  ;;  %v4701_v32 = vld [vmem:[%s10614_s1 + $0x2b0] sm:$0xf] }
  0x33   :  { %3487 = vmatpush.bf16.msrb.mxu3 %v6262_v23  ;;  %v6470_v23 = vor.u32 %v7063_v11, %v6469_v10  ;;  %v7046_v28 = vld [vmem:[%s10614_s1 + $0x1038] sm:$0xf0]  ;;  %v6621_v33 = vld [vmem:[%s10614_s1 + $0x2f0] sm:$0xf0]  ;;  %v5245_v34 = vld [vmem:[%s10614_s1 + $0x6f0] sm:$0xf] }
  0x34   :  { %3449 = vmatpush.bf16.msrb.mxu0 %v4562_v29  ;;  %v4770_v29 = vor.u32 %v6638_v21, %v4769_v20  ;;  %v6757_v36 = vld [vmem:[%s10614_s1 + $0x730] sm:$0xf0]  ;;  %v5789_v37 = vld [vmem:[%s10614_s1 + $0xb30] sm:$0xf]  ;;  %v4633_v44 = vld [vmem:[%s10614_s1 + $0x228] sm:$0xf] }
  0x35   :  { %3462 = vmatpush.bf16.msrb.mxu1 %v5106_v30  ;;  %v5314_v30 = vor.u32 %v6774_v24, %v5313_v22  ;;  %v6893_v38 = vld [vmem:[%s10614_s1 + $0xb70] sm:$0xf0]  ;;  %v6333_v39 = vld [vmem:[%s10614_s1 + $0xf70] sm:$0xf]  ;;  %v6604_v45 = vld [vmem:[%s10614_s1 + $0x268] sm:$0xf0] }
  0x36   :  { %3475 = vmatpush.bf16.msrb.mxu2 %v5650_v31  ;;  %v5858_v31 = vor.u32 %v6910_v26, %v5857_v25  ;;  %v7029_v40 = vld [vmem:[%s10614_s1 + $0xfb0] sm:$0xf0]  ;;  %v5177_v46 = vld [vmem:[%s10614_s1 + $0x668] sm:$0xf]  ;;  %v6740_v48 = vld [vmem:[%s10614_s1 + $0x6a8] sm:$0xf0] }
  0x37   :  { %3488 = vmatpush.bf16.msrb.mxu3 %v6194_v35  ;;  %v6402_v35 = vor.u32 %v7046_v28, %v6401_v27  ;;  %v5721_v49 = vld [vmem:[%s10614_s1 + $0xaa8] sm:$0xf]  ;;  %v6876_v50 = vld [vmem:[%s10614_s1 + $0xae8] sm:$0xf0]  ;;  %v5178_v54 = vor.u32 %v6740_v48, %v5177_v46  ;;  %v5109_v58 = vld [vmem:[%s10614_s1 + $0x5e0] sm:$0xf] }
  0x38   :  { %3450 = vmatpush.bf16.msrb.mxu0 %v4494_v41  ;;  %v4702_v41 = vor.u32 %v6621_v33, %v4701_v32  ;;  %v6265_v51 = vld [vmem:[%s10614_s1 + $0xee8] sm:$0xf]  ;;  %v7012_v52 = vld [vmem:[%s10614_s1 + $0xf28] sm:$0xf0]  ;;  %v5722_v55 = vor.u32 %v6876_v50, %v5721_v49  ;;  %v6723_v60 = vld [vmem:[%s10614_s1 + $0x620] sm:$0xf0] }
  0x39   :  { %3463 = vmatpush.bf16.msrb.mxu1 %v5038_v42  ;;  %v5246_v42 = vor.u32 %v6757_v36, %v5245_v34  ;;  %v6266_v59 = vor.u32 %v7012_v52, %v6265_v51  ;;  %v6859_v62 = vld [vmem:[%s10614_s1 + $0xa60] sm:$0xf0]  ;;  %v6197_v63 = vld [vmem:[%s10614_s1 + $0xe60] sm:$0xf]  ;;  %v5110_v2 = vor.u32 %v6723_v60, %v5109_v58  ;;  %v6570_v5 = vld [vmem:[%s10614_s1 + $0x158] sm:$0xf0] }
  0x3a   :  { %3476 = vmatpush.bf16.msrb.mxu2 %v5582_v43  ;;  %v5790_v43 = vor.u32 %v6893_v38, %v5789_v37  ;;  %v6995_v0 = vld [vmem:[%s10614_s1 + $0xea0] sm:$0xf0]  ;;  %v5041_v6 = vld [vmem:[%s10614_s1 + $0x558] sm:$0xf]  ;;  %v6842_v10 = vld [vmem:[%s10614_s1 + $0x9d8] sm:$0xf0] }
  0x3b   :  { %3489 = vmatpush.bf16.msrb.mxu3 %v6126_v47  ;;  %v6334_v47 = vor.u32 %v7029_v40, %v6333_v39  ;;  %v6198_v7 = vor.u32 %v6995_v0, %v6197_v63  ;;  %v6129_v11 = vld [vmem:[%s10614_s1 + $0xdd8] sm:$0xf]  ;;  %v4429_v20 = vld [vmem:[%s10614_s1 + $0x90] sm:$0xf]  ;;  %v6553_v21 = vld [vmem:[%s10614_s1 + $0xd0] sm:$0xf0] }
  0x3c   :  { %3451 = vmatpush.bf16.msrb.mxu0 %v4426_v53  ;;  %v4634_v53 = vor.u32 %v6604_v45, %v4633_v44  ;;  %v4973_v22 = vld [vmem:[%s10614_s1 + $0x4d0] sm:$0xf]  ;;  %v6689_v24 = vld [vmem:[%s10614_s1 + $0x510] sm:$0xf0]  ;;  %v4905_v34 = vld [vmem:[%s10614_s1 + $0x448] sm:$0xf] }
  0x3d   :  { %3464 = vmatpush.bf16.msrb.mxu1 %v4970_v56  ;;  %v4565_v56 = vld [vmem:[%s10614_s1 + $0x1a0] sm:$0xf]  ;;  %v5517_v25 = vld [vmem:[%s10614_s1 + $0x910] sm:$0xf]  ;;  %v6825_v26 = vld [vmem:[%s10614_s1 + $0x950] sm:$0xf0]  ;;  %v4974_v32 = vor.u32 %v6689_v24, %v4973_v22 }
  0x3e   :  { %3477 = vmatpush.bf16.msrb.mxu2 %v5514_v57  ;;  %v6587_v57 = vld [vmem:[%s10614_s1 + $0x1e0] sm:$0xf0]  ;;  %v6061_v27 = vld [vmem:[%s10614_s1 + $0xd50] sm:$0xf]  ;;  %v6961_v28 = vld [vmem:[%s10614_s1 + $0xd90] sm:$0xf0]  ;;  %v5518_v33 = vor.u32 %v6825_v26, %v5517_v25 }
  0x3f   :  { %3490 = vmatpush.bf16.msrb.mxu3 %v6058_v61  ;;  %v5653_v61 = vld [vmem:[%s10614_s1 + $0xa20] sm:$0xf]  ;;  %v4566_v1 = vor.u32 %v6587_v57, %v4565_v56  ;;  %v5449_v36 = vld [vmem:[%s10614_s1 + $0x888] sm:$0xf]  ;;  %v6062_v37 = vor.u32 %v6961_v28, %v6061_v27  ;;  %v6808_v38 = vld [vmem:[%s10614_s1 + $0x8c8] sm:$0xf0] }
  0x40   :  { %3452 = vmatpush.bf16.msrb.mxu0 %v4358_v4  ;;  %v5654_v3 = vor.u32 %v6859_v62, %v5653_v61  ;;  %v4497_v4 = vld [vmem:[%s10614_s1 + $0x118] sm:$0xf]  ;;  %v5993_v39 = vld [vmem:[%s10614_s1 + $0xcc8] sm:$0xf]  ;;  %v6944_v40 = vld [vmem:[%s10614_s1 + $0xd08] sm:$0xf0]  ;;  %v5450_v49 = vor.u32 %v6808_v38, %v5449_v36 }
  0x41   :  { %3465 = vmatpush.bf16.msrb.mxu1 %v4902_v8  ;;  %v6706_v8 = vld [vmem:[%s10614_s1 + $0x598] sm:$0xf0]  ;;  %v5383_v45 = vld [vmem:[%s10614_s1 + $0x844] sm:$0xf0]  ;;  %v6919_v46 = vld [vmem:[%s10614_s1 + $0xc44] sm:$0xf]  ;;  %v5994_v52 = vor.u32 %v6944_v40, %v5993_v39 }
  0x42   :  { %3478 = vmatpush.bf16.msrb.mxu2 %v5446_v9  ;;  %v5585_v9 = vld [vmem:[%s10614_s1 + $0x998] sm:$0xf]  ;;  %v7055_v50 = vld [vmem:[%s10614_s1 + $0x1084] sm:$0xf]  ;;  %v6471_v51 = vld [vmem:[%s10614_s1 + $0x10c4] sm:$0xf0] }
  0x43   :  { %3491 = vmatpush.bf16.msrb.mxu3 %v5990_v12  ;;  %3453 = vmatmul.bf16.vlgmr.msrb.gmra.mxu0 %v7403_v14  ;;  %v6978_v12 = vld [vmem:[%s10614_s1 + $0xe18] sm:$0xf0]  ;;  %v4771_v57 = vld [vmem:[%s10614_s1 + $0x37c] sm:$0xf0]  ;;  %v6732_v22 = vld [vmem:[%s10614_s1 + $0x66c] sm:$0xf] }
  0x44   :  { %3497 = vmatpush.bf16.msra.mxu0 %v4838_v15  ;;  %3466 = vmatmul.bf16.vlgmr.msrb.gmra.mxu1 %v7408_v17  ;;  %v4498_v15 = vor.u32 %v6570_v5, %v4497_v4  ;;  %v6630_v56 = vld [vmem:[%s10614_s1 + $0x33c] sm:$0xf]  ;;  %v5315_v60 = vld [vmem:[%s10614_s1 + $0x7bc] sm:$0xf0]  ;;  %v6613_v4 = vld [vmem:[%s10614_s1 + $0x2b4] sm:$0xf] }
  0x45   :  { %3510 = vmatpush.bf16.msra.mxu1 %v5382_v18  ;;  %3479 = vmatmul.bf16.vlgmr.msrb.gmra.mxu2 %v7401_v13  ;;  %v5042_v18 = vor.u32 %v6706_v8, %v5041_v6  ;;  %v6766_v58 = vld [vmem:[%s10614_s1 + $0x77c] sm:$0xf]  ;;  %v5859_v62 = vld [vmem:[%s10614_s1 + $0xbfc] sm:$0xf0]  ;;  %v4703_v5 = vld [vmem:[%s10614_s1 + $0x2f4] sm:$0xf0] }
  0x46   :  { %3523 = vmatpush.bf16.msra.mxu2 %v5926_v19  ;;  %3492 = vmatmul.bf16.vlgmr.msrb.gmra.mxu3 %v7406_v16  ;;  %v5586_v19 = vor.u32 %v6842_v10, %v5585_v9  ;;  %v6902_v61 = vld [vmem:[%s10614_s1 + $0xbbc] sm:$0xf]  ;;  %v6403_v0 = vld [vmem:[%s10614_s1 + $0x103c] sm:$0xf0]  ;;  %v6749_v6 = vld [vmem:[%s10614_s1 + $0x6f4] sm:$0xf] }
  0x47   :  { %3536 = vmatpush.bf16.msra.mxu3 %v6470_v23  ;;  %v6130_v23 = vor.u32 %v6978_v12, %v6129_v11  ;;  %v7038_v63 = vld [vmem:[%s10614_s1 + $0xffc] sm:$0xf]  ;;  %v5247_v8 = vld [vmem:[%s10614_s1 + $0x734] sm:$0xf0]  ;;  %v6885_v9 = vld [vmem:[%s10614_s1 + $0xb34] sm:$0xf] }
  0x48   :  { %3498 = vmatpush.bf16.msra.mxu0 %v4770_v29  ;;  %v4430_v29 = vor.u32 %v6553_v21, %v4429_v20  ;;  %v5791_v10 = vld [vmem:[%s10614_s1 + $0xb74] sm:$0xf0]  ;;  %v7021_v11 = vld [vmem:[%s10614_s1 + $0xf74] sm:$0xf]  ;;  %v6596_v20 = vld [vmem:[%s10614_s1 + $0x22c] sm:$0xf] }
  0x49   :  { %3511 = vmatpush.bf16.msra.mxu1 %v5314_v30  ;;  %v4361_v30 = vld [vmem:[%s10614_s1 + $0x8] sm:$0xf]  ;;  %v6335_v12 = vld [vmem:[%s10614_s1 + $0xfb4] sm:$0xf0]  ;;  %v4635_v21 = vld [vmem:[%s10614_s1 + $0x26c] sm:$0xf0] }
  0x4a   :  { %3524 = vmatpush.bf16.msra.mxu2 %v5858_v31  ;;  %v6536_v31 = vld [vmem:[%s10614_s1 + $0x48] sm:$0xf0]  ;;  %v5179_v24 = vld [vmem:[%s10614_s1 + $0x6ac] sm:$0xf0]  ;;  %v5111_v36 = vld [vmem:[%s10614_s1 + $0x624] sm:$0xf0] }
  0x4b   :  { %3537 = vmatpush.bf16.msra.mxu3 %v6402_v35  ;;  %v6672_v35 = vld [vmem:[%s10614_s1 + $0x488] sm:$0xf0]  ;;  %v4362_v44 = vor.u32 %v6536_v31, %v4361_v30  ;;  %v5723_v26 = vld [vmem:[%s10614_s1 + $0xaec] sm:$0xf0]  ;;  %v5182_v30 = vor.u32 %v6732_v22, %v5179_v24  ;;  %v5655_v38 = vld [vmem:[%s10614_s1 + $0xa64] sm:$0xf0] }
  0x4c   :  { %3499 = vmatpush.bf16.msra.mxu0 %v4702_v41  ;;  %v6647_v41 = vld [vmem:[%s10614_s1 + $0x3c4] sm:$0xf]  ;;  %v4906_v48 = vor.u32 %v6672_v35, %v4905_v34  ;;  %v6868_v25 = vld [vmem:[%s10614_s1 + $0xaac] sm:$0xf]  ;;  %v6267_v28 = vld [vmem:[%s10614_s1 + $0xf2c] sm:$0xf0] }
  0x4d   :  { %3512 = vmatpush.bf16.msra.mxu1 %v5246_v42  ;;  %v4839_v42 = vld [vmem:[%s10614_s1 + $0x404] sm:$0xf0]  ;;  %v7004_v27 = vld [vmem:[%s10614_s1 + $0xeec] sm:$0xf]  ;;  %v5726_v31 = vor.u32 %v6868_v25, %v5723_v26  ;;  %v6715_v34 = vld [vmem:[%s10614_s1 + $0x5e4] sm:$0xf] }
  0x4e   :  { %3525 = vmatpush.bf16.msra.mxu2 %v5790_v43  ;;  %v6783_v43 = vld [vmem:[%s10614_s1 + $0x804] sm:$0xf]  ;;  %v6270_v35 = vor.u32 %v7004_v27, %v6267_v28  ;;  %v6199_v40 = vld [vmem:[%s10614_s1 + $0xea4] sm:$0xf0]  ;;  %v7064_v27 = vld [vmem:[%s10614_s1 + $0x10c8] sm:$0xf0] }
  0x4f   :  { %3538 = vmatpush.bf16.msra.mxu3 %v6334_v47  ;;  %v5927_v47 = vld [vmem:[%s10614_s1 + $0xc84] sm:$0xf0]  ;;  %v6987_v39 = vld [vmem:[%s10614_s1 + $0xe64] sm:$0xf] }
  0x50   :  { %3500 = vmatpush.bf16.msra.mxu0 %v4634_v53  ;;  %v4842_v53 = vor.u32 %v6647_v41, %v4839_v42  ;;  %v5114_v42 = vor.u32 %v6715_v34, %v5111_v36  ;;  %v5933_v22 = vld [vmem:[%s10614_s1 + $0xc48] sm:$0xf]  ;;  %v5321_v34 = vld [vmem:[%s10614_s1 + $0x780] sm:$0xf]  ;;  %v6775_v36 = vld [vmem:[%s10614_s1 + $0x7c0] sm:$0xf0] }
  0x51   :  { %3513 = vmatpush.bf16.msra.mxu1 %v5178_v54  ;;  %v5386_v54 = vor.u32 %v6783_v43, %v5383_v45  ;;  %v4499_v45 = vld [vmem:[%s10614_s1 + $0x15c] sm:$0xf0]  ;;  %v6477_v26 = vld [vmem:[%s10614_s1 + $0x1088] sm:$0xf] }
  0x52   :  { %3526 = vmatpush.bf16.msra.mxu2 %v5722_v55  ;;  %v5930_v55 = vor.u32 %v6919_v46, %v5927_v47  ;;  %v6698_v46 = vld [vmem:[%s10614_s1 + $0x55c] sm:$0xf]  ;;  %v6202_v47 = vor.u32 %v6987_v39, %v6199_v40  ;;  %v6409_v39 = vld [vmem:[%s10614_s1 + $0x1000] sm:$0xf]  ;;  %v7047_v40 = vld [vmem:[%s10614_s1 + $0x1040] sm:$0xf0] }
  0x53   :  { %3539 = vmatpush.bf16.msra.mxu3 %v6266_v59  ;;  %v6474_v59 = vor.u32 %v7055_v50, %v6471_v51  ;;  %v5587_v50 = vld [vmem:[%s10614_s1 + $0x9dc] sm:$0xf0]  ;;  %v6970_v51 = vld [vmem:[%s10614_s1 + $0xddc] sm:$0xf] }
  0x54   :  { %3501 = vmatpush.bf16.msra.mxu0 %v4566_v1  ;;  %v4774_v1 = vor.u32 %v6630_v56, %v4771_v57  ;;  %v6545_v56 = vld [vmem:[%s10614_s1 + $0x94] sm:$0xf]  ;;  %v4431_v57 = vld [vmem:[%s10614_s1 + $0xd4] sm:$0xf0] }
  0x55   :  { %3514 = vmatpush.bf16.msra.mxu1 %v5110_v2  ;;  %v5318_v2 = vor.u32 %v6766_v58, %v5315_v60  ;;  %v6681_v58 = vld [vmem:[%s10614_s1 + $0x4d4] sm:$0xf]  ;;  %v4975_v60 = vld [vmem:[%s10614_s1 + $0x514] sm:$0xf0] }
  0x56   :  { %3527 = vmatpush.bf16.msra.mxu2 %v5654_v3  ;;  %v5862_v3 = vor.u32 %v6902_v61, %v5859_v62  ;;  %v6817_v61 = vld [vmem:[%s10614_s1 + $0x914] sm:$0xf]  ;;  %v5519_v62 = vld [vmem:[%s10614_s1 + $0x954] sm:$0xf0] }
  0x57   :  { %3540 = vmatpush.bf16.msra.mxu3 %v6198_v7  ;;  %v6406_v7 = vor.u32 %v7038_v63, %v6403_v0  ;;  %v6953_v63 = vld [vmem:[%s10614_s1 + $0xd54] sm:$0xf]  ;;  %v6063_v0 = vld [vmem:[%s10614_s1 + $0xd94] sm:$0xf0] }
  0x58   :  { %3502 = vmatpush.bf16.msra.mxu0 %v4498_v15  ;;  %v4706_v15 = vor.u32 %v6613_v4, %v4703_v5  ;;  %v4978_v4 = vor.u32 %v6681_v58, %v4975_v60  ;;  %v5522_v5 = vor.u32 %v6817_v61, %v5519_v62  ;;  %v6877_v58 = vld [vmem:[%s10614_s1 + $0xaf0] sm:$0xf0] }
  0x59   :  { %3515 = vmatpush.bf16.msra.mxu1 %v5042_v18  ;;  %v5250_v18 = vor.u32 %v6749_v6, %v5247_v8  ;;  %v6664_v6 = vld [vmem:[%s10614_s1 + $0x44c] sm:$0xf]  ;;  %v7013_v60 = vld [vmem:[%s10614_s1 + $0xf30] sm:$0xf0] }
  0x5a   :  { %3528 = vmatpush.bf16.msra.mxu2 %v5586_v19  ;;  %v5794_v19 = vor.u32 %v6885_v9, %v5791_v10  ;;  %v6800_v8 = vld [vmem:[%s10614_s1 + $0x88c] sm:$0xf]  ;;  %v6066_v9 = vor.u32 %v6953_v63, %v6063_v0  ;;  %v5451_v10 = vld [vmem:[%s10614_s1 + $0x8cc] sm:$0xf0]  ;;  %v4573_v0 = vld [vmem:[%s10614_s1 + $0x1a8] sm:$0xf] }
  0x5b   :  { %3541 = vmatpush.bf16.msra.mxu3 %v6130_v23  ;;  %v6338_v23 = vor.u32 %v7021_v11, %v6335_v12  ;;  %v6936_v11 = vld [vmem:[%s10614_s1 + $0xccc] sm:$0xf]  ;;  %v5995_v12 = vld [vmem:[%s10614_s1 + $0xd0c] sm:$0xf0]  ;;  %v5454_v25 = vor.u32 %v6800_v8, %v5451_v10 }
  0x5c   :  { %3503 = vmatpush.bf16.msra.mxu0 %v4430_v29  ;;  %v4638_v29 = vor.u32 %v6596_v20, %v4635_v21  ;;  %v6792_v21 = vld [vmem:[%s10614_s1 + $0x848] sm:$0xf0]  ;;  %v5998_v28 = vor.u32 %v6936_v11, %v5995_v12  ;;  %v4505_v12 = vld [vmem:[%s10614_s1 + $0x120] sm:$0xf] }
  0x5d   :  { %3516 = vmatpush.bf16.msra.mxu1 %v4974_v32  ;;  %v6579_v32 = vld [vmem:[%s10614_s1 + $0x1a4] sm:$0xf]  ;;  %v6996_v8 = vld [vmem:[%s10614_s1 + $0xea8] sm:$0xf0] }
  0x5e   :  { %3529 = vmatpush.bf16.msra.mxu2 %v5518_v33  ;;  %v4567_v33 = vld [vmem:[%s10614_s1 + $0x1e4] sm:$0xf0] }
  0x5f   :  { %3542 = vmatpush.bf16.msra.mxu3 %v6062_v37  ;;  %v6851_v37 = vld [vmem:[%s10614_s1 + $0xa24] sm:$0xf]  ;;  %v4570_v41 = vor.u32 %v6579_v32, %v4567_v33  ;;  %v4777_v32 = vld [vmem:[%s10614_s1 + $0x340] sm:$0xf] }
  0x60   :  { %3504 = vmatpush.bf16.msra.mxu0 %v4362_v44  ;;  %v5658_v43 = vor.u32 %v6851_v37, %v5655_v38  ;;  %v6562_v44 = vld [vmem:[%s10614_s1 + $0x11c] sm:$0xf]  ;;  %v6639_v33 = vld [vmem:[%s10614_s1 + $0x380] sm:$0xf0]  ;;  %v5865_v37 = vld [vmem:[%s10614_s1 + $0xbc0] sm:$0xf] }
  0x61   :  { %3517 = vmatpush.bf16.msra.mxu1 %v4906_v48  ;;  %v5043_v48 = vld [vmem:[%s10614_s1 + $0x59c] sm:$0xf0]  ;;  %v6911_v38 = vld [vmem:[%s10614_s1 + $0xc00] sm:$0xf0] }
  0x62   :  { %3530 = vmatpush.bf16.msra.mxu2 %v5450_v49  ;;  %v6834_v49 = vld [vmem:[%s10614_s1 + $0x99c] sm:$0xf] }
  0x63   :  { %3543 = vmatpush.bf16.msra.mxu3 %v5994_v52  ;;  %3505 = vmatmul.bf16.vlgmr.msra.gmra.mxu0 %v7403_v14  ;;  %v6131_v52 = vld [vmem:[%s10614_s1 + $0xe1c] sm:$0xf0] }
  0x64   :  { %3549 = vmatpush.bf16.msrb.mxu0 %v4842_v53  ;;  %3518 = vmatmul.bf16.vlgmr.msra.gmra.mxu1 %v7408_v17  ;;  %v4502_v53 = vor.u32 %v6562_v44, %v4499_v45  ;;  %v4709_v44 = vld [vmem:[%s10614_s1 + $0x2b8] sm:$0xf]  ;;  %v6622_v45 = vld [vmem:[%s10614_s1 + $0x2f8] sm:$0xf0] }
  0x65   :  { %3562 = vmatpush.bf16.msrb.mxu1 %v5386_v54  ;;  %3531 = vmatmul.bf16.vlgmr.msra.gmra.mxu2 %v7401_v13  ;;  %v5046_v54 = vor.u32 %v6698_v46, %v5043_v48  ;;  %v5253_v46 = vld [vmem:[%s10614_s1 + $0x6f8] sm:$0xf]  ;;  %v6758_v48 = vld [vmem:[%s10614_s1 + $0x738] sm:$0xf0] }
  0x66   :  { %3575 = vmatpush.bf16.msrb.mxu2 %v5930_v55  ;;  %3544 = vmatmul.bf16.vlgmr.msra.gmra.mxu3 %v7406_v16  ;;  %v5590_v55 = vor.u32 %v6834_v49, %v5587_v50  ;;  %v5797_v49 = vld [vmem:[%s10614_s1 + $0xb38] sm:$0xf]  ;;  %v6894_v50 = vld [vmem:[%s10614_s1 + $0xb78] sm:$0xf0] }
  0x67   :  { %3588 = vmatpush.bf16.msrb.mxu3 %v6474_v59  ;;  %v6134_v59 = vor.u32 %v6970_v51, %v6131_v52  ;;  %v7030_v51 = vld [vmem:[%s10614_s1 + $0xfb8] sm:$0xf0]  ;;  %v4710_v52 = vor.u32 %v6622_v45, %v4709_v44  ;;  %v5457_v44 = vld [vmem:[%s10614_s1 + $0x890] sm:$0xf] }
  0x68   :  { %3550 = vmatpush.bf16.msrb.mxu0 %v4774_v1  ;;  %v4434_v1 = vor.u32 %v6545_v56, %v4431_v57  ;;  %v5729_v57 = vld [vmem:[%s10614_s1 + $0xab0] sm:$0xf] }
  0x69   :  { %3563 = vmatpush.bf16.msrb.mxu1 %v5318_v2  ;;  %v6528_v2 = vld [vmem:[%s10614_s1 + $0xc] sm:$0xf]  ;;  %v5730_v63 = vor.u32 %v6877_v58, %v5729_v57 }
  0x6a   :  { %3576 = vmatpush.bf16.msrb.mxu2 %v5862_v3  ;;  %v4363_v3 = vld [vmem:[%s10614_s1 + $0x4c] sm:$0xf0] }
  0x6b   :  { %3589 = vmatpush.bf16.msrb.mxu3 %v6406_v7  ;;  %v4907_v7 = vld [vmem:[%s10614_s1 + $0x48c] sm:$0xf0]  ;;  %v4366_v20 = vor.u32 %v6528_v2, %v4363_v3  ;;  %v5117_v2 = vld [vmem:[%s10614_s1 + $0x5e8] sm:$0xf] }
  0x6c   :  { %3551 = vmatpush.bf16.msrb.mxu0 %v4706_v15  ;;  %v4845_v15 = vld [vmem:[%s10614_s1 + $0x3c8] sm:$0xf]  ;;  %v4910_v24 = vor.u32 %v6664_v6, %v4907_v7  ;;  %v6860_v6 = vld [vmem:[%s10614_s1 + $0xa68] sm:$0xf0] }
  0x6d   :  { %3564 = vmatpush.bf16.msrb.mxu1 %v5250_v18  ;;  %v6656_v18 = vld [vmem:[%s10614_s1 + $0x408] sm:$0xf0]  ;;  %v6205_v7 = vld [vmem:[%s10614_s1 + $0xe68] sm:$0xf] }
  0x6e   :  { %3577 = vmatpush.bf16.msrb.mxu2 %v5794_v19  ;;  %v5389_v19 = vld [vmem:[%s10614_s1 + $0x808] sm:$0xf] }
  0x6f   :  { %3590 = vmatpush.bf16.msrb.mxu3 %v6338_v23  ;;  %v6928_v23 = vld [vmem:[%s10614_s1 + $0xc88] sm:$0xf0] }
  0x70   :  { %3552 = vmatpush.bf16.msrb.mxu0 %v4638_v29  ;;  %v4846_v29 = vor.u32 %v6656_v18, %v4845_v15  ;;  %v6571_v15 = vld [vmem:[%s10614_s1 + $0x160] sm:$0xf0]  ;;  %v5049_v18 = vld [vmem:[%s10614_s1 + $0x560] sm:$0xf] }
  0x71   :  { %3565 = vmatpush.bf16.msrb.mxu1 %v5182_v30  ;;  %v5390_v30 = vor.u32 %v6792_v21, %v5389_v19  ;;  %v6206_v19 = vor.u32 %v6996_v8, %v6205_v7  ;;  %v5593_v21 = vld [vmem:[%s10614_s1 + $0x9a0] sm:$0xf]  ;;  %v6614_v8 = vld [vmem:[%s10614_s1 + $0x2bc] sm:$0xf] }
  0x72   :  { %3578 = vmatpush.bf16.msrb.mxu2 %v5726_v31  ;;  %v5934_v31 = vor.u32 %v6928_v23, %v5933_v22  ;;  %v6843_v22 = vld [vmem:[%s10614_s1 + $0x9e0] sm:$0xf0]  ;;  %v6137_v23 = vld [vmem:[%s10614_s1 + $0xde0] sm:$0xf] }
  0x73   :  { %3591 = vmatpush.bf16.msrb.mxu3 %v6270_v35  ;;  %v6478_v35 = vor.u32 %v7064_v27, %v6477_v26  ;;  %v5594_v27 = vor.u32 %v6843_v22, %v5593_v21  ;;  %v6343_v21 = vld [vmem:[%s10614_s1 + $0xfbc] sm:$0xf0] }
  0x74   :  { %3553 = vmatpush.bf16.msrb.mxu0 %v4570_v41  ;;  %v4778_v41 = vor.u32 %v6639_v33, %v4777_v32  ;;  %v6690_v32 = vld [vmem:[%s10614_s1 + $0x518] sm:$0xf0]  ;;  %v5525_v33 = vld [vmem:[%s10614_s1 + $0x918] sm:$0xf]  ;;  %v8172_v22 = vld [vmem:[#allocation1] sm:$0xff] }
  0x75   :  { %3566 = vmatpush.bf16.msrb.mxu1 %v5114_v42  ;;  %v5322_v42 = vor.u32 %v6775_v36, %v5321_v34  ;;  %v6826_v34 = vld [vmem:[%s10614_s1 + $0x958] sm:$0xf0] }
  0x76   :  { %3579 = vmatpush.bf16.msrb.mxu2 %v5658_v43  ;;  %v5866_v43 = vor.u32 %v6911_v38, %v5865_v37  ;;  %v6962_v36 = vld [vmem:[%s10614_s1 + $0xd98] sm:$0xf0]  ;;  %v4369_v38 = vld [vmem:[%s10614_s1 + $0x10] sm:$0xf] }
  0x77   :  { %3592 = vmatpush.bf16.msrb.mxu3 %v6202_v47  ;;  %v6410_v47 = vor.u32 %v7047_v40, %v6409_v39  ;;  %v6537_v39 = vld [vmem:[%s10614_s1 + $0x50] sm:$0xf0] }
  0x78   :  { %3554 = vmatpush.bf16.msrb.mxu0 %v4502_v53  ;;  %v5254_v53 = vor.u32 %v6758_v48, %v5253_v46  ;;  %v6809_v46 = vld [vmem:[%s10614_s1 + $0x8d0] sm:$0xf0] }
  0x79   :  { %3567 = vmatpush.bf16.msrb.mxu1 %v5046_v54  ;;  %v5798_v54 = vor.u32 %v6894_v50, %v5797_v49  ;;  %v6945_v48 = vld [vmem:[%s10614_s1 + $0xd10] sm:$0xf0]  ;;  %v6648_v49 = vld [vmem:[%s10614_s1 + $0x3cc] sm:$0xf]  ;;  %v4847_v50 = vld [vmem:[%s10614_s1 + $0x40c] sm:$0xf0] }
  0x7a   :  { %3580 = vmatpush.bf16.msrb.mxu2 %v5590_v55  ;;  %v5185_v55 = vld [vmem:[%s10614_s1 + $0x670] sm:$0xf]  ;;  %v4850_v57 = vor.u32 %v6648_v49, %v4847_v50 }
  0x7b   :  { %3593 = vmatpush.bf16.msrb.mxu3 %v6134_v59  ;;  %v6273_v59 = vld [vmem:[%s10614_s1 + $0xef0] sm:$0xf] }
  0x7c   :  { %3555 = vmatpush.bf16.msrb.mxu0 %v4434_v1  ;;  %v6588_v1 = vld [vmem:[%s10614_s1 + $0x1e8] sm:$0xf0]  ;;  %v6274_v3 = vor.u32 %v7013_v60, %v6273_v59  ;;  %v6631_v60 = vld [vmem:[%s10614_s1 + $0x344] sm:$0xf]  ;;  %v6207_v49 = vld [vmem:[%s10614_s1 + $0xeac] sm:$0xf0] }
  0x7d   :  { %3568 = vmatpush.bf16.msrb.mxu1 %v4978_v4  ;;  %v6724_v4 = vld [vmem:[%s10614_s1 + $0x628] sm:$0xf0] }
  0x7e   :  { %3581 = vmatpush.bf16.msrb.mxu2 %v5522_v5  ;;  %v5661_v5 = vld [vmem:[%s10614_s1 + $0xa28] sm:$0xf]  ;;  %v5118_v10 = vor.u32 %v6724_v4, %v5117_v2 }
  0x7f   :  { %3594 = vmatpush.bf16.msrb.mxu3 %v6066_v9  ;;  %v4574_v9 = vor.u32 %v6588_v1, %v4573_v0  ;;  %v5662_v11 = vor.u32 %v6860_v6, %v5661_v5  ;;  %v5323_v0 = vld [vmem:[%s10614_s1 + $0x7c4] sm:$0xf0]  ;;  %v6903_v1 = vld [vmem:[%s10614_s1 + $0xbc4] sm:$0xf] }
  0x80   :  { %3556 = vmatpush.bf16.msrb.mxu0 %v4366_v20  ;;  %v6707_v20 = vld [vmem:[%s10614_s1 + $0x5a0] sm:$0xf0]  ;;  %v5867_v2 = vld [vmem:[%s10614_s1 + $0xc04] sm:$0xf0] }
  0x81   :  { %3569 = vmatpush.bf16.msrb.mxu1 %v4910_v24  ;;  %v6979_v24 = vld [vmem:[%s10614_s1 + $0xe20] sm:$0xf0]  ;;  %v5050_v26 = vor.u32 %v6707_v20, %v5049_v18  ;;  %v6411_v4 = vld [vmem:[%s10614_s1 + $0x1044] sm:$0xf0]  ;;  %v5870_v7 = vor.u32 %v6903_v1, %v5867_v2  ;;  %v5799_v18 = vld [vmem:[%s10614_s1 + $0xb7c] sm:$0xf0] }
  0x82   :  { %3582 = vmatpush.bf16.msrb.mxu2 %v5454_v25  ;;  %v4506_v25 = vor.u32 %v6571_v15, %v4505_v12  ;;  %v5255_v12 = vld [vmem:[%s10614_s1 + $0x73c] sm:$0xf0]  ;;  %v6886_v15 = vld [vmem:[%s10614_s1 + $0xb3c] sm:$0xf] }
  0x83   :  { %3595 = vmatpush.bf16.msrb.mxu3 %v5998_v28  ;;  %3557 = vmatmul.bf16.vlgmr.msrb.gmra.mxu0 %v7403_v14  ;;  %v4641_v14 = vld [vmem:[%s10614_s1 + $0x230] sm:$0xf]  ;;  %v4437_v28 = vld [vmem:[%s10614_s1 + $0x98] sm:$0xf]  ;;  %v7022_v20 = vld [vmem:[%s10614_s1 + $0xf7c] sm:$0xf] }
  0x84   :  { %3601 = vmatpush.bf16.msra.mxu0 %v4846_v29  ;;  %3570 = vmatmul.bf16.vlgmr.msrb.gmra.mxu1 %v7408_v17  ;;  %v6741_v17 = vld [vmem:[%s10614_s1 + $0x6b0] sm:$0xf0]  ;;  %v6554_v29 = vld [vmem:[%s10614_s1 + $0xd8] sm:$0xf0]  ;;  %v4439_v2 = vld [vmem:[%s10614_s1 + $0xdc] sm:$0xf0] }
  0x85   :  { %3614 = vmatpush.bf16.msra.mxu1 %v5390_v30  ;;  %3583 = vmatmul.bf16.vlgmr.msrb.gmra.mxu2 %v7401_v13  ;;  %v6341_v13 = vld [vmem:[%s10614_s1 + $0xf78] sm:$0xf]  ;;  %v5186_v62 = vor.u32 %v6741_v17, %v5185_v55  ;;  %v4438_v37 = vor.u32 %v6554_v29, %v4437_v28  ;;  %v7056_v55 = vld [vmem:[%s10614_s1 + $0x108c] sm:$0xf]  ;;  %v6597_v28 = vld [vmem:[%s10614_s1 + $0x234] sm:$0xf] }
  0x86   :  { %3627 = vmatpush.bf16.msra.mxu2 %v5934_v31  ;;  %3596 = vmatmul.bf16.vlgmr.msrb.gmra.mxu3 %v7406_v16  ;;  %v6605_v16 = vld [vmem:[%s10614_s1 + $0x270] sm:$0xf0]  ;;  %v6342_v56 = vor.u32 %v7030_v51, %v6341_v13  ;;  %v4981_v30 = vld [vmem:[%s10614_s1 + $0x4d8] sm:$0xf]  ;;  %v6138_v31 = vor.u32 %v6979_v24, %v6137_v23  ;;  %v6784_v13 = vld [vmem:[%s10614_s1 + $0x80c] sm:$0xf]  ;;  %v4370_v51 = vor.u32 %v6537_v39, %v4369_v38 }
  0x87   :  { %3640 = vmatpush.bf16.msra.mxu3 %v6478_v35  ;;  %v4642_v61 = vor.u32 %v6605_v16, %v4641_v14  ;;  %v6069_v35 = vld [vmem:[%s10614_s1 + $0xd58] sm:$0xf]  ;;  %v4982_v40 = vor.u32 %v6690_v32, %v4981_v30  ;;  %v5458_v16 = vor.u32 %v6809_v46, %v5457_v44  ;;  %v6733_v30 = vld [vmem:[%s10614_s1 + $0x674] sm:$0xf]  ;;  %v6580_v38 = vld [vmem:[%s10614_s1 + $0x1ac] sm:$0xf] }
  0x88   :  { %3602 = vmatpush.bf16.msra.mxu0 %v4778_v41  ;;  %v5526_v41 = vor.u32 %v6826_v34, %v5525_v33  ;;  %v6070_v45 = vor.u32 %v6962_v36, %v6069_v35  ;;  %v8175_v23 = vld [vmem:[#allocation1 + $0x1b] sm:$0xff]  ;;  %v6869_v33 = vld [vmem:[%s10614_s1 + $0xab4] sm:$0xf]  ;;  %v6852_v46 = vld [vmem:[%s10614_s1 + $0xa2c] sm:$0xf] }
  0x89   :  { %3615 = vmatpush.bf16.msra.mxu1 %v5322_v42  ;;  %v4913_v42 = vld [vmem:[%s10614_s1 + $0x450] sm:$0xf]  ;;  %v4643_v29 = vld [vmem:[%s10614_s1 + $0x274] sm:$0xf0]  ;;  %v7005_v35 = vld [vmem:[%s10614_s1 + $0xef4] sm:$0xf] }
  0x8a   :  { %3628 = vmatpush.bf16.msra.mxu2 %v5866_v43  ;;  %v6673_v43 = vld [vmem:[%s10614_s1 + $0x490] sm:$0xf0]  ;;  %v5187_v32 = vld [vmem:[%s10614_s1 + $0x6b4] sm:$0xf0]  ;;  %v6546_v1 = vld [vmem:[%s10614_s1 + $0x9c] sm:$0xf] }
  0x8b   :  { %3641 = vmatpush.bf16.msra.mxu3 %v6410_v47  ;;  %v6001_v47 = vld [vmem:[%s10614_s1 + $0xcd0] sm:$0xf]  ;;  %v4914_v14 = vor.u32 %v6673_v43, %v4913_v42  ;;  %v5731_v34 = vld [vmem:[%s10614_s1 + $0xaf4] sm:$0xf0]  ;;  %v5190_v39 = vor.u32 %v6733_v30, %v5187_v32  ;;  %v6716_v42 = vld [vmem:[%s10614_s1 + $0x5ec] sm:$0xf] }
  0x8c   :  { %3603 = vmatpush.bf16.msra.mxu0 %v4710_v52  ;;  %v5391_v52 = vld [vmem:[%s10614_s1 + $0x84c] sm:$0xf0]  ;;  %v6002_v17 = vor.u32 %v6945_v48, %v6001_v47  ;;  %v6275_v36 = vld [vmem:[%s10614_s1 + $0xf34] sm:$0xf0]  ;;  %v8217_v43 = vld [vmem:[%s10616_s2] sm:$0xff] }
  0x8d   :  { %3616 = vmatpush.bf16.msra.mxu1 %v5254_v53  ;;  %v6920_v53 = vld [vmem:[%s10614_s1 + $0xc4c] sm:$0xf]  ;;  %v5394_v58 = vor.u32 %v6784_v13, %v5391_v52  ;;  %v6278_v44 = vor.u32 %v7005_v35, %v6275_v36  ;;  %v5663_v47 = vld [vmem:[%s10614_s1 + $0xa6c] sm:$0xf0]  ;;  %v597_v13 = vperm.slane %v8217_v43, 0 }
  0x8e   :  { %3629 = vmatpush.bf16.msra.mxu2 %v5798_v54  ;;  %v5935_v54 = vld [vmem:[%s10614_s1 + $0xc8c] sm:$0xf0]  ;;  %v6988_v48 = vld [vmem:[%s10614_s1 + $0xe6c] sm:$0xf]  ;;  %v5666_v52 = vor.u32 %v6852_v46, %v5663_v47  ;;  %v5459_v30 = vld [vmem:[%s10614_s1 + $0x8d4] sm:$0xf0] }
  0x8f   :  { %3642 = vmatpush.bf16.msra.mxu3 %v6342_v56  ;;  %v6479_v56 = vld [vmem:[%s10614_s1 + $0x10cc] sm:$0xf0]  ;;  %v5938_v59 = vor.u32 %v6920_v53, %v5935_v54  ;;  %v6563_v53 = vld [vmem:[%s10614_s1 + $0x124] sm:$0xf]  ;;  %v4507_v54 = vld [vmem:[%s10614_s1 + $0x164] sm:$0xf0] }
  0x90   :  { %3604 = vmatpush.bf16.msra.mxu0 %v4642_v61  ;;  %v4779_v61 = vld [vmem:[%s10614_s1 + $0x384] sm:$0xf0]  ;;  %v6003_v32 = vld [vmem:[%s10614_s1 + $0xd14] sm:$0xf0]  ;;  %v6657_v35 = vld [vmem:[%s10614_s1 + $0x410] sm:$0xf0] }
  0x91   :  { %3617 = vmatpush.bf16.msra.mxu1 %v5186_v62  ;;  %v6767_v62 = vld [vmem:[%s10614_s1 + $0x784] sm:$0xf]  ;;  %v4782_v5 = vor.u32 %v6631_v60, %v4779_v61  ;;  %v4510_v60 = vor.u32 %v6563_v53, %v4507_v54  ;;  %v5397_v36 = vld [vmem:[%s10614_s1 + $0x810] sm:$0xf]  ;;  %v6640_v53 = vld [vmem:[%s10614_s1 + $0x388] sm:$0xf0] }
  0x92   :  { %3630 = vmatpush.bf16.msra.mxu2 %v5730_v63  ;;  %v6482_v63 = vor.u32 %v7056_v55, %v6479_v56  ;;  %v5326_v6 = vor.u32 %v6767_v62, %v5323_v0  ;;  %v5051_v55 = vld [vmem:[%s10614_s1 + $0x5a4] sm:$0xf0]  ;;  %v6835_v56 = vld [vmem:[%s10614_s1 + $0x9a4] sm:$0xf]  ;;  %v6485_v47 = vld [vmem:[%s10614_s1 + $0x1090] sm:$0xf] }
  0x93   :  { %3643 = vmatpush.bf16.msra.mxu3 %v6274_v3  ;;  %v7039_v3 = vld [vmem:[%s10614_s1 + $0x1004] sm:$0xf]  ;;  %v5329_v54 = vld [vmem:[%s10614_s1 + $0x788] sm:$0xf] }
  0x94   :  { %3605 = vmatpush.bf16.msra.mxu0 %v4574_v9  ;;  %v4711_v9 = vld [vmem:[%s10614_s1 + $0x2fc] sm:$0xf0] }
  0x95   :  { %3618 = vmatpush.bf16.msra.mxu1 %v5118_v10  ;;  %v6750_v10 = vld [vmem:[%s10614_s1 + $0x6fc] sm:$0xf]  ;;  %v4714_v24 = vor.u32 %v6614_v8, %v4711_v9 }
  0x96   :  { %3631 = vmatpush.bf16.msra.mxu2 %v5662_v11  ;;  %v6414_v11 = vor.u32 %v7039_v3, %v6411_v4  ;;  %v6682_v3 = vld [vmem:[%s10614_s1 + $0x4dc] sm:$0xf] }
  0x97   :  { %3644 = vmatpush.bf16.msra.mxu3 %v6206_v19  ;;  %v8163_v19 = vld [vmem:[#allocation1 + $0x12] sm:$0xff]  ;;  %v6954_v9 = vld [vmem:[%s10614_s1 + $0xd5c] sm:$0xf] }
  0x98   :  { %3606 = vmatpush.bf16.msra.mxu0 %v4506_v25  ;;  %v8178_v25 = vld [vmem:[#allocation1 + $0x9] sm:$0xff] }
  0x99   :  { %3619 = vmatpush.bf16.msra.mxu1 %v5050_v26  ;;  %v5258_v26 = vor.u32 %v6750_v10, %v5255_v12  ;;  %v6071_v10 = vld [vmem:[%s10614_s1 + $0xd9c] sm:$0xf0]  ;;  %v4442_v12 = vor.u32 %v6546_v1, %v4439_v2 }
  0x9a   :  { %3632 = vmatpush.bf16.msra.mxu2 %v5594_v27  ;;  %v5802_v27 = vor.u32 %v6886_v15, %v5799_v18  ;;  %v6529_v15 = vld [vmem:[%s10614_s1 + $0x14] sm:$0xf]  ;;  %v4371_v18 = vld [vmem:[%s10614_s1 + $0x54] sm:$0xf0]  ;;  %v5261_v1 = vld [vmem:[%s10614_s1 + $0x700] sm:$0xf] }
  0x9b   :  { %3645 = vmatpush.bf16.msra.mxu3 %v6138_v31  ;;  %v6346_v31 = vor.u32 %v7022_v20, %v6343_v21 }
  0x9c   :  { %3607 = vmatpush.bf16.msra.mxu0 %v4438_v37  ;;  %v4646_v37 = vor.u32 %v6597_v28, %v4643_v29  ;;  %v6801_v28 = vld [vmem:[%s10614_s1 + $0x894] sm:$0xf]  ;;  %v6074_v29 = vor.u32 %v6954_v9, %v6071_v10 }
  0x9d   :  { %3620 = vmatpush.bf16.msra.mxu1 %v4982_v40  ;;  %v5734_v40 = vor.u32 %v6869_v33, %v5731_v34  ;;  %v4853_v34 = vld [vmem:[%s10614_s1 + $0x3d0] sm:$0xf]  ;;  %v5462_v46 = vor.u32 %v6801_v28, %v5459_v30 }
  0x9e   :  { %3633 = vmatpush.bf16.msra.mxu2 %v5526_v41  ;;  %v4575_v41 = vld [vmem:[%s10614_s1 + $0x1ec] sm:$0xf0] }
  0x9f   :  { %3646 = vmatpush.bf16.msra.mxu3 %v6070_v45  ;;  %v5119_v45 = vld [vmem:[%s10614_s1 + $0x62c] sm:$0xf0]  ;;  %v4578_v50 = vor.u32 %v6580_v38, %v4575_v41 }
  0xa0   :  { %3608 = vmatpush.bf16.msra.mxu0 %v4370_v51  ;;  %v5122_v51 = vor.u32 %v6716_v42, %v5119_v45  ;;  %v5941_v41 = vld [vmem:[%s10614_s1 + $0xc50] sm:$0xf]  ;;  %v6929_v42 = vld [vmem:[%s10614_s1 + $0xc90] sm:$0xf0] }
  0xa1   :  { %3621 = vmatpush.bf16.msra.mxu1 %v4914_v14  ;;  %v6699_v14 = vld [vmem:[%s10614_s1 + $0x564] sm:$0xf]  ;;  %v3415_v62 = vpop.f32.mrf.mxu1 }
  0xa2   :  { %3634 = vmatpush.bf16.msra.mxu2 %v5458_v16  ;;  %v6210_v16 = vor.u32 %v6988_v48, %v6207_v49  ;;  %v7065_v48 = vld [vmem:[%s10614_s1 + $0x10d0] sm:$0xf0] }
  0xa3   :  { %3647 = vmatpush.bf16.msra.mxu3 %v6002_v17  ;;  %3609 = vmatmul.bf16.vlgmr.msra.gmra.mxu0 %v8172_v22  ;;  %v5595_v17 = vld [vmem:[%s10614_s1 + $0x9e4] sm:$0xf0] }
  0xa4   :  { %3653 = vmatpush.bf16.msrb.mxu0 %v4850_v57  ;;  %3622 = vmatmul.bf16.vlgmr.msra.gmra.mxu1 %v8178_v25  ;;  %v6971_v57 = vld [vmem:[%s10614_s1 + $0xde4] sm:$0xf]  ;;  %v5598_v0 = vor.u32 %v6835_v56, %v5595_v17  ;;  %v5873_v56 = vld [vmem:[%s10614_s1 + $0xbc8] sm:$0xf]  ;;  %v6912_v17 = vld [vmem:[%s10614_s1 + $0xc08] sm:$0xf0] }
  0xa5   :  { %3666 = vmatpush.bf16.msrb.mxu1 %v5394_v58  ;;  %3635 = vmatmul.bf16.vlgmr.msra.gmra.mxu2 %v8163_v19  ;;  %v6139_v58 = vld [vmem:[%s10614_s1 + $0xe24] sm:$0xf0] }
  0xa6   :  { %3679 = vmatpush.bf16.msrb.mxu2 %v5938_v59  ;;  %3648 = vmatmul.bf16.vlgmr.msra.gmra.mxu3 %v8175_v23  ;;  %v3402_v59 = vpop.f32.mrf.mxu0  ;;  %v6142_v4 = vor.u32 %v6971_v57, %v6139_v58  ;;  %v6417_v57 = vld [vmem:[%s10614_s1 + $0x1008] sm:$0xf]  ;;  %v7048_v58 = vld [vmem:[%s10614_s1 + $0x1048] sm:$0xf0] }
  0xa7   :  { %3692 = vmatpush.bf16.msrb.mxu3 %v6482_v63  ;;  %v3403_v61 = vadd.f32 %v3402_v59, %v597_v13  ;;  %v5054_v63 = vor.u32 %v6699_v14, %v5051_v55  ;;  %v6776_v55 = vld [vmem:[%s10614_s1 + $0x7c8] sm:$0xf0]  ;;  %v6418_v2 = vor.u32 %v7048_v58, %v6417_v57  ;;  %v4445_v58 = vld [vmem:[%s10614_s1 + $0xa0] sm:$0xf] }
  0xa8   :  { %3654 = vmatpush.bf16.msrb.mxu0 %v4782_v5  ;;  %v4983_v5 = vld [vmem:[%s10614_s1 + $0x51c] sm:$0xf0] }
  0xa9   :  { %3667 = vmatpush.bf16.msrb.mxu1 %v5326_v6  ;;  %v6818_v6 = vld [vmem:[%s10614_s1 + $0x91c] sm:$0xf]  ;;  %v3416_v8 = vadd.f32 %v3415_v62, %v3403_v61  ;;  %v4986_v21 = vor.u32 %v6682_v3, %v4983_v5  ;;  %v5330_v61 = vor.u32 %v6776_v55, %v5329_v54  ;;  %v5874_v62 = vor.u32 %v6912_v17, %v5873_v56  ;;  %v6759_v3 = vld [vmem:[%s10614_s1 + $0x740] sm:$0xf0]  ;;  %v6844_v54 = vld [vmem:[%s10614_s1 + $0x9e8] sm:$0xf0] }
  0xaa   :  { %3680 = vmatpush.bf16.msrb.mxu2 %v5870_v7  ;;  %v5527_v7 = vld [vmem:[%s10614_s1 + $0x95c] sm:$0xf0]  ;;  %v6895_v5 = vld [vmem:[%s10614_s1 + $0xb80] sm:$0xf0]  ;;  %v5262_v9 = vor.u32 %v6759_v3, %v5261_v1 }
  0xab   :  { %3693 = vmatpush.bf16.msrb.mxu3 %v6414_v11  ;;  %v3428_v11 = vpop.f32.mrf.mxu2  ;;  %v3441_v33 = vpop.f32.mrf.mxu3  ;;  %v6827_v1 = vld [vmem:[%s10614_s1 + $0x960] sm:$0xf0] }
  0xac   :  { %3655 = vmatpush.bf16.msrb.mxu0 %v4714_v24  ;;  %v3429_v20 = vadd.f32 %v3428_v11, %v3416_v8  ;;  %v5530_v24 = vor.u32 %v6818_v6, %v5527_v7  ;;  %v6349_v6 = vld [vmem:[%s10614_s1 + $0xf80] sm:$0xf]  ;;  %v7031_v7 = vld [vmem:[%s10614_s1 + $0xfc0] sm:$0xf0]  ;;  %v4649_v11 = vld [vmem:[%s10614_s1 + $0x238] sm:$0xf] }
  0xad   :  { %3668 = vmatpush.bf16.msrb.mxu1 %v5258_v26  ;;  %v6665_v26 = vld [vmem:[%s10614_s1 + $0x454] sm:$0xf]  ;;  %v6963_v3 = vld [vmem:[%s10614_s1 + $0xda0] sm:$0xf0] }
  0xae   :  { %3681 = vmatpush.bf16.msrb.mxu2 %v5802_v27  ;;  %v4915_v27 = vld [vmem:[%s10614_s1 + $0x494] sm:$0xf0]  ;;  %v3404_v38 = vpop.f32.mrf.mxu0 }
  0xaf   :  { %3694 = vmatpush.bf16.msrb.mxu3 %v6346_v31  ;;  %v6937_v31 = vld [vmem:[%s10614_s1 + $0xcd4] sm:$0xf]  ;;  %v4918_v45 = vor.u32 %v6665_v26, %v4915_v27  ;;  %v6281_v26 = vld [vmem:[%s10614_s1 + $0xef8] sm:$0xf]  ;;  %v7014_v27 = vld [vmem:[%s10614_s1 + $0xf38] sm:$0xf0] }
  0xb0   :  { %3656 = vmatpush.bf16.msrb.mxu0 %v4646_v37  ;;  %v8316_v37 = vadd.f32 %v3441_v33, %v3429_v20  ;;  %v6006_v49 = vor.u32 %v6937_v31, %v6003_v32  ;;  %v6742_v20 = vld [vmem:[%s10614_s1 + $0x6b8] sm:$0xf0]  ;;  %v4581_v33 = vld [vmem:[%s10614_s1 + $0x1b0] sm:$0xf]  ;;  %v6725_v38 = vld [vmem:[%s10614_s1 + $0x630] sm:$0xf0] }
  0xb1   :  { %3669 = vmatpush.bf16.msrb.mxu1 %v5190_v39  ;;  %v4374_v39 = vor.u32 %v6529_v15, %v4371_v18  ;;  %v5193_v15 = vld [vmem:[%s10614_s1 + $0x678] sm:$0xf]  ;;  %v6350_v18 = vor.u32 %v7031_v7, %v6349_v6  ;;  %v6538_v6 = vld [vmem:[%s10614_s1 + $0x58] sm:$0xf0] }
  0xb2   :  { %3682 = vmatpush.bf16.msrb.mxu2 %v5734_v40  ;;  %v6793_v40 = vld [vmem:[%s10614_s1 + $0x850] sm:$0xf0]  ;;  %v5194_v30 = vor.u32 %v6742_v20, %v5193_v15  ;;  %v6009_v20 = vld [vmem:[%s10614_s1 + $0xcd8] sm:$0xf] }
  0xb3   :  { %3695 = vmatpush.bf16.msrb.mxu3 %v6278_v44  ;;  %v3417_v44 = vpop.f32.mrf.mxu1  ;;  %v5398_v13 = vor.u32 %v6793_v40, %v5397_v36  ;;  %v3430_v14 = vpop.f32.mrf.mxu2  ;;  %v6282_v36 = vor.u32 %v7014_v27, %v6281_v26  ;;  %v6861_v40 = vld [vmem:[%s10614_s1 + $0xa70] sm:$0xf0]  ;;  %v4855_v27 = vld [vmem:[%s10614_s1 + $0x414] sm:$0xf0] }
  0xb4   :  { %3657 = vmatpush.bf16.msrb.mxu0 %v4578_v50  ;;  %v4854_v50 = vor.u32 %v6657_v35, %v4853_v34  ;;  %v6589_v34 = vld [vmem:[%s10614_s1 + $0x1f0] sm:$0xf0]  ;;  %v5125_v35 = vld [vmem:[%s10614_s1 + $0x5f0] sm:$0xf]  ;;  %v6145_v14 = vld [vmem:[%s10614_s1 + $0xde8] sm:$0xf] }
  0xb5   :  { %3670 = vmatpush.bf16.msrb.mxu1 %v5122_v51  ;;  %v5942_v51 = vor.u32 %v6929_v42, %v5941_v41  ;;  %v6213_v41 = vld [vmem:[%s10614_s1 + $0xe70] sm:$0xf]  ;;  %v6997_v42 = vld [vmem:[%s10614_s1 + $0xeb0] sm:$0xf0]  ;;  %v4582_v44 = vor.u32 %v6589_v34, %v4581_v33  ;;  %v5943_v34 = vld [vmem:[%s10614_s1 + $0xc94] sm:$0xf0] }
  0xb6   :  { %3683 = vmatpush.bf16.msrb.mxu2 %v5666_v52  ;;  %v4785_v52 = vld [vmem:[%s10614_s1 + $0x348] sm:$0xf]  ;;  %v6649_v26 = vld [vmem:[%s10614_s1 + $0x3d4] sm:$0xf] }
  0xb7   :  { %3696 = vmatpush.bf16.msrb.mxu3 %v6210_v16  ;;  %v6486_v16 = vor.u32 %v7065_v48, %v6485_v47  ;;  %v4786_v59 = vor.u32 %v6640_v53, %v4785_v52  ;;  %v4513_v48 = vld [vmem:[%s10614_s1 + $0x128] sm:$0xf]  ;;  %v6708_v52 = vld [vmem:[%s10614_s1 + $0x5a8] sm:$0xf0]  ;;  %v6921_v33 = vld [vmem:[%s10614_s1 + $0xc54] sm:$0xf] }
  0xb8   :  { %3658 = vmatpush.bf16.msrb.mxu0 %v4510_v60  ;;  %v3443_v60 = vpop.f32.mrf.mxu3  ;;  %v5601_v53 = vld [vmem:[%s10614_s1 + $0x9a8] sm:$0xf] }
  0xb9   :  { %3671 = vmatpush.bf16.msrb.mxu1 %v5054_v63  ;;  %v4717_v63 = vld [vmem:[%s10614_s1 + $0x2c0] sm:$0xf]  ;;  %v5602_v57 = vor.u32 %v6844_v54, %v5601_v53  ;;  %v7040_v53 = vld [vmem:[%s10614_s1 + $0x100c] sm:$0xf]  ;;  %v6419_v54 = vld [vmem:[%s10614_s1 + $0x104c] sm:$0xf0] }
  0xba   :  { %3684 = vmatpush.bf16.msrb.mxu2 %v5598_v0  ;;  %v6623_v0 = vld [vmem:[%s10614_s1 + $0x300] sm:$0xf0]  ;;  %v4989_v60 = vld [vmem:[%s10614_s1 + $0x4e0] sm:$0xf] }
  0xbb   :  { %3697 = vmatpush.bf16.msrb.mxu3 %v6142_v4  ;;  %v5805_v4 = vld [vmem:[%s10614_s1 + $0xb40] sm:$0xf]  ;;  %v4718_v8 = vor.u32 %v6623_v0, %v4717_v63  ;;  %v6691_v63 = vld [vmem:[%s10614_s1 + $0x520] sm:$0xf0] }
  0xbc   :  { %3659 = vmatpush.bf16.msrb.mxu0 %v4442_v12  ;;  %v5806_v10 = vor.u32 %v6895_v5, %v5805_v4  ;;  %v6606_v12 = vld [vmem:[%s10614_s1 + $0x278] sm:$0xf0]  ;;  %v5533_v0 = vld [vmem:[%s10614_s1 + $0x920] sm:$0xf]  ;;  %v4377_v5 = vld [vmem:[%s10614_s1 + $0x18] sm:$0xf]  ;;  %v4990_v7 = vor.u32 %v6691_v63, %v4989_v60 }
  0xbd   :  { %3672 = vmatpush.bf16.msrb.mxu1 %v4986_v21  ;;  %v5737_v21 = vld [vmem:[%s10614_s1 + $0xab8] sm:$0xf]  ;;  %v4650_v28 = vor.u32 %v6606_v12, %v4649_v11  ;;  %v6887_v60 = vld [vmem:[%s10614_s1 + $0xb44] sm:$0xf]  ;;  %v6351_v63 = vld [vmem:[%s10614_s1 + $0xfc4] sm:$0xf0] }
  0xbe   :  { %3685 = vmatpush.bf16.msrb.mxu2 %v5530_v24  ;;  %v6878_v24 = vld [vmem:[%s10614_s1 + $0xaf8] sm:$0xf0]  ;;  %v5465_v11 = vld [vmem:[%s10614_s1 + $0x898] sm:$0xf] }
  0xbf   :  { %3698 = vmatpush.bf16.msrb.mxu3 %v6074_v29  ;;  %v5738_v31 = vor.u32 %v6878_v24, %v5737_v21  ;;  %v6946_v21 = vld [vmem:[%s10614_s1 + $0xd18] sm:$0xf0] }
  0xc0   :  { %3660 = vmatpush.bf16.msrb.mxu0 %v4374_v39  ;;  %v8409_v29 = vpop.f32.mrf.mxu0  ;;  %v5669_v39 = vld [vmem:[%s10614_s1 + $0xa30] sm:$0xf] }
  0xc1   :  { %3673 = vmatpush.bf16.msrb.mxu1 %v4918_v45  ;;  %v8411_v32 = vpop.f32.mrf.mxu1  ;;  %v5126_v45 = vor.u32 %v6725_v38, %v5125_v35  ;;  %v7057_v38 = vld [vmem:[%s10614_s1 + $0x1094] sm:$0xf] }
  0xc2   :  { %3686 = vmatpush.bf16.msrb.mxu2 %v5462_v46  ;;  %v5670_v46 = vor.u32 %v6861_v40, %v5669_v39  ;;  %v6487_v39 = vld [vmem:[%s10614_s1 + $0x10d4] sm:$0xf0]  ;;  %v6010_v40 = vor.u32 %v6946_v21, %v6009_v20  ;;  %v6581_v21 = vld [vmem:[%s10614_s1 + $0x1b4] sm:$0xf] }
  0xc3   :  { %3699 = vmatpush.bf16.msrb.mxu3 %v6006_v49  ;;  %3661 = vmatmul.bf16.vlgmr.msrb.gmra.mxu0 %v8172_v22  ;;  %v6572_v49 = vld [vmem:[%s10614_s1 + $0x168] sm:$0xf0] }
  0xc4   :  { %3705 = vmatpush.bf16.msra.mxu0 %v4854_v50  ;;  %3674 = vmatmul.bf16.vlgmr.msrb.gmra.mxu1 %v8178_v25  ;;  %v5057_v50 = vld [vmem:[%s10614_s1 + $0x568] sm:$0xf]  ;;  %v4514_v55 = vor.u32 %v6572_v49, %v4513_v48  ;;  %v6768_v48 = vld [vmem:[%s10614_s1 + $0x78c] sm:$0xf]  ;;  %v6490_v49 = vor.u32 %v7057_v38, %v6487_v39 }
  0xc5   :  { %3718 = vmatpush.bf16.msra.mxu1 %v5398_v13  ;;  %3687 = vmatmul.bf16.vlgmr.msrb.gmra.mxu2 %v8163_v19  ;;  %v6214_v13 = vor.u32 %v6997_v42, %v6213_v41  ;;  %v5058_v17 = vor.u32 %v6708_v52, %v5057_v50  ;;  %v4858_v41 = vor.u32 %v6649_v26, %v4855_v27  ;;  %v5331_v50 = vld [vmem:[%s10614_s1 + $0x7cc] sm:$0xf0]  ;;  %v6717_v26 = vld [vmem:[%s10614_s1 + $0x5f4] sm:$0xf] }
  0xc6   :  { %3731 = vmatpush.bf16.msra.mxu2 %v5942_v51  ;;  %3700 = vmatmul.bf16.vlgmr.msrb.gmra.mxu3 %v8175_v23  ;;  %v5875_v52 = vld [vmem:[%s10614_s1 + $0xc0c] sm:$0xf0] }
  0xc7   :  { %3744 = vmatpush.bf16.msra.mxu3 %v6486_v16  ;;  %v6980_v16 = vld [vmem:[%s10614_s1 + $0xe28] sm:$0xf0] }
  0xc8   :  { %3706 = vmatpush.bf16.msra.mxu0 %v4786_v59  ;;  %v8437_v47 = vpop.f32.mrf.mxu2  ;;  %v3456_v56 = vpop.f32.mrf.mxu0  ;;  %v6555_v59 = vld [vmem:[%s10614_s1 + $0xe0] sm:$0xf0] }
  0xc9   :  { %3719 = vmatpush.bf16.msra.mxu1 %v5330_v61  ;;  %v8448_v51 = vpop.f32.mrf.mxu3  ;;  %v3469_v61 = vpop.f32.mrf.mxu1  ;;  %v4446_v4 = vor.u32 %v6555_v59, %v4445_v58  ;;  %v6615_v56 = vld [vmem:[%s10614_s1 + $0x2c4] sm:$0xf]  ;;  %v6422_v58 = vor.u32 %v7040_v53, %v6419_v54  ;;  %v5263_v59 = vld [vmem:[%s10614_s1 + $0x744] sm:$0xf0] }
  0xca   :  { %3732 = vmatpush.bf16.msra.mxu2 %v5874_v62  ;;  %v6146_v62 = vor.u32 %v6980_v16, %v6145_v14  ;;  %v5334_v16 = vor.u32 %v6768_v48, %v5331_v50  ;;  %v5807_v61 = vld [vmem:[%s10614_s1 + $0xb84] sm:$0xf0]  ;;  %v6836_v48 = vld [vmem:[%s10614_s1 + $0x9ac] sm:$0xf] }
  0xcb   :  { %3745 = vmatpush.bf16.msra.mxu3 %v6418_v2  ;;  %v6077_v2 = vld [vmem:[%s10614_s1 + $0xd60] sm:$0xf] }
  0xcc   :  { %3707 = vmatpush.bf16.msra.mxu0 %v4718_v8  ;;  %v5534_v8 = vor.u32 %v6827_v1, %v5533_v0  ;;  %v6078_v15 = vor.u32 %v6963_v3, %v6077_v2  ;;  %v5810_v2 = vor.u32 %v6887_v60, %v5807_v61  ;;  %v6598_v3 = vld [vmem:[%s10614_s1 + $0x23c] sm:$0xf]  ;;  %v6819_v60 = vld [vmem:[%s10614_s1 + $0x924] sm:$0xf]  ;;  %v5535_v61 = vld [vmem:[%s10614_s1 + $0x964] sm:$0xf0] }
  0xcd   :  { %3720 = vmatpush.bf16.msra.mxu1 %v5262_v9  ;;  %v4921_v9 = vld [vmem:[%s10614_s1 + $0x458] sm:$0xf] }
  0xce   :  { %3733 = vmatpush.bf16.msra.mxu2 %v5806_v10  ;;  %v6674_v10 = vld [vmem:[%s10614_s1 + $0x498] sm:$0xf0] }
  0xcf   :  { %3746 = vmatpush.bf16.msra.mxu3 %v6350_v18  ;;  %v6810_v18 = vld [vmem:[%s10614_s1 + $0x8d8] sm:$0xf0]  ;;  %v4922_v35 = vor.u32 %v6674_v10, %v4921_v9  ;;  %v5739_v9 = vld [vmem:[%s10614_s1 + $0xafc] sm:$0xf0] }
  0xd0   :  { %3708 = vmatpush.bf16.msra.mxu0 %v4650_v28  ;;  %v3482_v12 = vpop.f32.mrf.mxu2  ;;  %v6785_v28 = vld [vmem:[%s10614_s1 + $0x814] sm:$0xf]  ;;  %v7006_v10 = vld [vmem:[%s10614_s1 + $0xefc] sm:$0xf] }
  0xd1   :  { %3721 = vmatpush.bf16.msra.mxu1 %v5194_v30  ;;  %v3495_v24 = vpop.f32.mrf.mxu3  ;;  %v4378_v30 = vor.u32 %v6538_v6, %v4377_v5  ;;  %v6734_v5 = vld [vmem:[%s10614_s1 + $0x67c] sm:$0xf] }
  0xd2   :  { %3734 = vmatpush.bf16.msra.mxu2 %v5738_v31  ;;  %v5399_v31 = vld [vmem:[%s10614_s1 + $0x854] sm:$0xf0] }
  0xd3   :  { %3747 = vmatpush.bf16.msra.mxu3 %v6282_v36  ;;  %v5466_v36 = vor.u32 %v6810_v18, %v5465_v11  ;;  %v5402_v42 = vor.u32 %v6785_v28, %v5399_v31  ;;  %v6283_v11 = vld [vmem:[%s10614_s1 + $0xf3c] sm:$0xf0]  ;;  %v4583_v24 = vld [vmem:[%s10614_s1 + $0x1f4] sm:$0xf0]  ;;  %v6853_v31 = vld [vmem:[%s10614_s1 + $0xa34] sm:$0xf] }
  0xd4   :  { %3709 = vmatpush.bf16.msra.mxu0 %v4582_v44  ;;  %v5946_v44 = vor.u32 %v6921_v33, %v5943_v34  ;;  %v6286_v28 = vor.u32 %v7006_v10, %v6283_v11  ;;  %v5671_v33 = vld [vmem:[%s10614_s1 + $0xa74] sm:$0xf0]  ;;  %v6989_v34 = vld [vmem:[%s10614_s1 + $0xe74] sm:$0xf]  ;;  %v5467_v11 = vld [vmem:[%s10614_s1 + $0x8dc] sm:$0xf0] }
  0xd5   :  { %3722 = vmatpush.bf16.msra.mxu1 %v5126_v45  ;;  %v6632_v45 = vld [vmem:[%s10614_s1 + $0x34c] sm:$0xf]  ;;  %v5674_v39 = vor.u32 %v6853_v31, %v5671_v33  ;;  %v5949_v31 = vld [vmem:[%s10614_s1 + $0xc58] sm:$0xf]  ;;  %v6930_v33 = vld [vmem:[%s10614_s1 + $0xc98] sm:$0xf0] }
  0xd6   :  { %3735 = vmatpush.bf16.msra.mxu2 %v5670_v46  ;;  %v4787_v46 = vld [vmem:[%s10614_s1 + $0x38c] sm:$0xf0] }
  0xd7   :  { %3748 = vmatpush.bf16.msra.mxu3 %v6214_v13  ;;  %v6904_v13 = vld [vmem:[%s10614_s1 + $0xbcc] sm:$0xf]  ;;  %v4790_v14 = vor.u32 %v6632_v45, %v4787_v46  ;;  %v5059_v46 = vld [vmem:[%s10614_s1 + $0x5ac] sm:$0xf0] }
  0xd8   :  { %3710 = vmatpush.bf16.msra.mxu0 %v4514_v55  ;;  %v5878_v55 = vor.u32 %v6904_v13, %v5875_v52  ;;  %v6972_v13 = vld [vmem:[%s10614_s1 + $0xdec] sm:$0xf]  ;;  %v6147_v52 = vld [vmem:[%s10614_s1 + $0xe2c] sm:$0xf0] }
  0xd9   :  { %3723 = vmatpush.bf16.msra.mxu1 %v5058_v17  ;;  %v4719_v17 = vld [vmem:[%s10614_s1 + $0x304] sm:$0xf0] }
  0xda   :  { %3736 = vmatpush.bf16.msra.mxu2 %v5602_v57  ;;  %v6751_v57 = vld [vmem:[%s10614_s1 + $0x704] sm:$0xf]  ;;  %v4722_v0 = vor.u32 %v6615_v56, %v4719_v17  ;;  %v4447_v56 = vld [vmem:[%s10614_s1 + $0xe4] sm:$0xf0] }
  0xdb   :  { %3749 = vmatpush.bf16.msra.mxu3 %v6146_v62  ;;  %v7023_v62 = vld [vmem:[%s10614_s1 + $0xf84] sm:$0xf]  ;;  %v5266_v1 = vor.u32 %v6751_v57, %v5263_v59  ;;  %v4991_v59 = vld [vmem:[%s10614_s1 + $0x524] sm:$0xf0] }
  0xdc   :  { %3711 = vmatpush.bf16.msra.mxu0 %v4446_v4  ;;  %v4651_v4 = vld [vmem:[%s10614_s1 + $0x27c] sm:$0xf0]  ;;  %v6354_v6 = vor.u32 %v7023_v62, %v6351_v63  ;;  %v6683_v17 = vld [vmem:[%s10614_s1 + $0x4e4] sm:$0xf]  ;;  %v6079_v63 = vld [vmem:[%s10614_s1 + $0xda4] sm:$0xf0] }
  0xdd   :  { %3724 = vmatpush.bf16.msra.mxu1 %v4990_v7  ;;  %v5195_v7 = vld [vmem:[%s10614_s1 + $0x6bc] sm:$0xf0]  ;;  %v4654_v12 = vor.u32 %v6598_v3, %v4651_v4  ;;  %v6955_v62 = vld [vmem:[%s10614_s1 + $0xd64] sm:$0xf]  ;;  %v4994_v4 = vor.u32 %v6683_v17, %v4991_v59  ;;  %v6624_v59 = vld [vmem:[%s10614_s1 + $0x308] sm:$0xf0] }
  0xde   :  { %3737 = vmatpush.bf16.msra.mxu2 %v5534_v8  ;;  %v6870_v8 = vld [vmem:[%s10614_s1 + $0xabc] sm:$0xf]  ;;  %v5198_v18 = vor.u32 %v6734_v5, %v5195_v7  ;;  %v4379_v3 = vld [vmem:[%s10614_s1 + $0x5c] sm:$0xf0]  ;;  %v5538_v5 = vor.u32 %v6819_v60, %v5535_v61  ;;  %v6082_v10 = vor.u32 %v6955_v62, %v6079_v63  ;;  %v5269_v60 = vld [vmem:[%s10614_s1 + $0x708] sm:$0xf] }
  0xdf   :  { %3750 = vmatpush.bf16.msra.mxu3 %v6078_v15  ;;  %v5742_v20 = vor.u32 %v6870_v8, %v5739_v9  ;;  %v4923_v7 = vld [vmem:[%s10614_s1 + $0x49c] sm:$0xf0]  ;;  %v6802_v8 = vld [vmem:[%s10614_s1 + $0x89c] sm:$0xf]  ;;  %v6760_v61 = vld [vmem:[%s10614_s1 + $0x748] sm:$0xf0] }
  0xe0   :  { %3712 = vmatpush.bf16.msra.mxu0 %v4378_v30  ;;  %v8613_v15 = vpop.f32.mrf.mxu0  ;;  %v5127_v30 = vld [vmem:[%s10614_s1 + $0x634] sm:$0xf0]  ;;  %v5813_v62 = vld [vmem:[%s10614_s1 + $0xb48] sm:$0xf]  ;;  %v6896_v63 = vld [vmem:[%s10614_s1 + $0xb88] sm:$0xf0] }
  0xe1   :  { %3725 = vmatpush.bf16.msra.mxu1 %v4922_v35  ;;  %v8624_v27 = vpop.f32.mrf.mxu1  ;;  %v6215_v35 = vld [vmem:[%s10614_s1 + $0xeb4] sm:$0xf0]  ;;  %v5130_v38 = vor.u32 %v6717_v26, %v5127_v30  ;;  %v6794_v30 = vld [vmem:[%s10614_s1 + $0x858] sm:$0xf0] }
  0xe2   :  { %3738 = vmatpush.bf16.msra.mxu2 %v5466_v36  ;;  %v4586_v36 = vor.u32 %v6581_v21, %v4583_v24  ;;  %v6218_v45 = vor.u32 %v6989_v34, %v6215_v35  ;;  %v4861_v21 = vld [vmem:[%s10614_s1 + $0x3d8] sm:$0xf]  ;;  %v6658_v24 = vld [vmem:[%s10614_s1 + $0x418] sm:$0xf0]  ;;  %v599_v34 = vperm.slane %v8217_v43, 2 }
  0xe3   :  { %3751 = vmatpush.bf16.msra.mxu3 %v6010_v40  ;;  %3713 = vmatmul.bf16.vlgmr.msra.gmra.mxu0 %v8172_v22  ;;  %v6564_v40 = vld [vmem:[%s10614_s1 + $0x12c] sm:$0xf]  ;;  %v5405_v26 = vld [vmem:[%s10614_s1 + $0x818] sm:$0xf] }
  0xe4   :  { %3757 = vmatpush.bf16.msrb.mxu0 %v4858_v41  ;;  %3726 = vmatmul.bf16.vlgmr.msra.gmra.mxu1 %v8178_v25  ;;  %v4515_v41 = vld [vmem:[%s10614_s1 + $0x16c] sm:$0xf0] }
  0xe5   :  { %3770 = vmatpush.bf16.msrb.mxu1 %v5402_v42  ;;  %3739 = vmatmul.bf16.vlgmr.msra.gmra.mxu2 %v8163_v19  ;;  %v6700_v42 = vld [vmem:[%s10614_s1 + $0x56c] sm:$0xf]  ;;  %v4518_v53 = vor.u32 %v6564_v40, %v4515_v41 }
  0xe6   :  { %3783 = vmatpush.bf16.msrb.mxu2 %v5946_v44  ;;  %3752 = vmatmul.bf16.vlgmr.msra.gmra.mxu3 %v8175_v23 }
  0xe7   :  { %3796 = vmatpush.bf16.msrb.mxu3 %v6490_v49  ;;  %v5603_v49 = vld [vmem:[%s10614_s1 + $0x9ec] sm:$0xf0] }
  0xe8   :  { %3758 = vmatpush.bf16.msrb.mxu0 %v4790_v14  ;;  %v8650_v44 = vpop.f32.mrf.mxu2  ;;  %v3508_v54 = vpop.f32.mrf.mxu0  ;;  %v5062_v14 = vor.u32 %v6700_v42, %v5059_v46  ;;  %v4862_v42 = vor.u32 %v6658_v24, %v4861_v21  ;;  %v5950_v46 = vor.u32 %v6930_v33, %v5949_v31  ;;  %v6726_v31 = vld [vmem:[%s10614_s1 + $0x638] sm:$0xf0]  ;;  %v5677_v33 = vld [vmem:[%s10614_s1 + $0xa38] sm:$0xf] }
  0xe9   :  { %3771 = vmatpush.bf16.msrb.mxu1 %v5334_v16  ;;  %v8661_v50 = vpop.f32.mrf.mxu3  ;;  %v5606_v16 = vor.u32 %v6836_v48, %v5603_v49  ;;  %v3521_v57 = vpop.f32.mrf.mxu1  ;;  %v4793_v48 = vld [vmem:[%s10614_s1 + $0x350] sm:$0xf]  ;;  %v6641_v49 = vld [vmem:[%s10614_s1 + $0x390] sm:$0xf0] }
  0xea   :  { %3784 = vmatpush.bf16.msrb.mxu2 %v5878_v55  ;;  %v6547_v55 = vld [vmem:[%s10614_s1 + $0xa4] sm:$0xf]  ;;  %v6913_v54 = vld [vmem:[%s10614_s1 + $0xc10] sm:$0xf0]  ;;  %v4794_v17 = vor.u32 %v6641_v49, %v4793_v48  ;;  %v5065_v49 = vld [vmem:[%s10614_s1 + $0x570] sm:$0xf] }
  0xeb   :  { %3797 = vmatpush.bf16.msrb.mxu3 %v6422_v58  ;;  %v6150_v58 = vor.u32 %v6972_v13, %v6147_v52  ;;  %v5337_v13 = vld [vmem:[%s10614_s1 + $0x790] sm:$0xf]  ;;  %v6573_v48 = vld [vmem:[%s10614_s1 + $0x170] sm:$0xf0] }
  0xec   :  { %3759 = vmatpush.bf16.msrb.mxu0 %v4722_v0  ;;  %v598_v0 = vperm.slane %v8217_v43, 1 }
  0xed   :  { %3772 = vmatpush.bf16.msrb.mxu1 %v5266_v1  ;;  %v4450_v1 = vor.u32 %v6547_v55, %v4447_v56  ;;  %v7049_v55 = vld [vmem:[%s10614_s1 + $0x1050] sm:$0xf0] }
  0xee   :  { %3785 = vmatpush.bf16.msrb.mxu2 %v5810_v2  ;;  %v6530_v2 = vld [vmem:[%s10614_s1 + $0x1c] sm:$0xf]  ;;  %v3455_v40 = vadd.f32 %v8409_v29, %v598_v0  ;;  %v6777_v29 = vld [vmem:[%s10614_s1 + $0x7d0] sm:$0xf0] }
  0xef   :  { %3798 = vmatpush.bf16.msrb.mxu3 %v6354_v6  ;;  %v6666_v6 = vld [vmem:[%s10614_s1 + $0x45c] sm:$0xf]  ;;  %v5338_v57 = vor.u32 %v6777_v29, %v5337_v13 }
  0xf0   :  { %3760 = vmatpush.bf16.msrb.mxu0 %v4654_v12  ;;  %v3534_v9 = vpop.f32.mrf.mxu2  ;;  %v6938_v12 = vld [vmem:[%s10614_s1 + $0xcdc] sm:$0xf]  ;;  %v4926_v35 = vor.u32 %v6666_v6, %v4923_v7  ;;  %v3468_v56 = vadd.f32 %v8411_v32, %v3455_v40  ;;  %v6743_v6 = vld [vmem:[%s10614_s1 + $0x6c0] sm:$0xf0]  ;;  %v5745_v7 = vld [vmem:[%s10614_s1 + $0xac0] sm:$0xf] }
  0xf1   :  { %3773 = vmatpush.bf16.msrb.mxu1 %v5198_v18  ;;  %v6011_v18 = vld [vmem:[%s10614_s1 + $0xd1c] sm:$0xf0] }
  0xf2   :  { %3786 = vmatpush.bf16.msrb.mxu2 %v5742_v20  ;;  %v3547_v20 = vpop.f32.mrf.mxu3  ;;  %v6014_v41 = vor.u32 %v6938_v12, %v6011_v18 }
  0xf3   :  { %3799 = vmatpush.bf16.msrb.mxu3 %v6286_v28  ;;  %v4382_v28 = vor.u32 %v6530_v2, %v4379_v3  ;;  %v3481_v2 = vadd.f32 %v8437_v47, %v3468_v56  ;;  %v5201_v47 = vld [vmem:[%s10614_s1 + $0x680] sm:$0xf]  ;;  %v6981_v56 = vld [vmem:[%s10614_s1 + $0xe30] sm:$0xf0] }
  0xf4   :  { %3761 = vmatpush.bf16.msrb.mxu0 %v4586_v36  ;;  %v5470_v36 = vor.u32 %v6802_v8, %v5467_v11  ;;  %v6879_v8 = vld [vmem:[%s10614_s1 + $0xb00] sm:$0xf0]  ;;  %v5202_v20 = vor.u32 %v6743_v6, %v5201_v47 }
  0xf5   :  { %3774 = vmatpush.bf16.msrb.mxu1 %v5130_v38  ;;  %v6493_v38 = vld [vmem:[%s10614_s1 + $0x1098] sm:$0xf]  ;;  %v3494_v11 = vadd.f32 %v8448_v51, %v3481_v2  ;;  %v5746_v21 = vor.u32 %v6879_v8, %v5745_v7  ;;  %v5541_v2 = vld [vmem:[%s10614_s1 + $0x928] sm:$0xf]  ;;  %v4929_v8 = vld [vmem:[%s10614_s1 + $0x460] sm:$0xf] }
  0xf6   :  { %3787 = vmatpush.bf16.msrb.mxu2 %v5674_v39  ;;  %v7066_v39 = vld [vmem:[%s10614_s1 + $0x10d8] sm:$0xf0]  ;;  %v5133_v51 = vld [vmem:[%s10614_s1 + $0x5f8] sm:$0xf] }
  0xf7   :  { %3800 = vmatpush.bf16.msrb.mxu3 %v6218_v45  ;;  %v5406_v45 = vor.u32 %v6794_v30, %v5405_v26  ;;  %v6494_v52 = vor.u32 %v7066_v39, %v6493_v38  ;;  %v6221_v38 = vld [vmem:[%s10614_s1 + $0xe78] sm:$0xf]  ;;  %v6998_v39 = vld [vmem:[%s10614_s1 + $0xeb8] sm:$0xf0]  ;;  %v4278_v40 = vmax.f32 %v3494_v11, 0.0 }
  0xf8   :  { %3762 = vmatpush.bf16.msrb.mxu0 %v4518_v53  ;;  %v5881_v53 = vld [vmem:[%s10614_s1 + $0xbd0] sm:$0xf]  ;;  %v6222_v13 = vor.u32 %v6998_v39, %v6221_v38  ;;  %v7058_v39 = vld [vmem:[%s10614_s1 + $0x109c] sm:$0xf] }
  0xf9   :  { %3775 = vmatpush.bf16.msrb.mxu1 %v5062_v14  ;;  %v3507_v14 = vadd.f32 %v8613_v15, %v599_v34  ;;  %v4725_v15 = vld [vmem:[%s10614_s1 + $0x2c8] sm:$0xf]  ;;  %v6862_v34 = vld [vmem:[%s10614_s1 + $0xa78] sm:$0xf0] }
  0xfa   :  { %3788 = vmatpush.bf16.msrb.mxu2 %v5606_v16  ;;  %v6425_v16 = vld [vmem:[%s10614_s1 + $0x1010] sm:$0xf]  ;;  %v4726_v3 = vor.u32 %v6624_v59, %v4725_v15  ;;  %v4453_v15 = vld [vmem:[%s10614_s1 + $0xa8] sm:$0xf] }
  0xfb   :  { %3801 = vmatpush.bf16.msrb.mxu3 %v6150_v58  ;;  %v5882_v58 = vor.u32 %v6913_v54, %v5881_v53  ;;  %v6426_v32 = vor.u32 %v7049_v55, %v6425_v16  ;;  %v3520_v0 = vadd.f32 %v8624_v27, %v3507_v14  ;;  %v5814_v27 = vor.u32 %v6896_v63, %v5813_v62  ;;  %v6709_v53 = vld [vmem:[%s10614_s1 + $0x5b0] sm:$0xf0]  ;;  %v5609_v54 = vld [vmem:[%s10614_s1 + $0x9b0] sm:$0xf]  ;;  %v6692_v62 = vld [vmem:[%s10614_s1 + $0x528] sm:$0xf0] }
  0xfc   :  { %3763 = vmatpush.bf16.msrb.mxu0 %v4450_v1  ;;  %v7032_v1 = vld [vmem:[%s10614_s1 + $0xfc8] sm:$0xf0]  ;;  %v6845_v14 = vld [vmem:[%s10614_s1 + $0x9f0] sm:$0xf0]  ;;  %v6153_v55 = vld [vmem:[%s10614_s1 + $0xdf0] sm:$0xf] }
  0xfd   :  { %3776 = vmatpush.bf16.msrb.mxu1 %v4994_v4  ;;  %v6607_v4 = vld [vmem:[%s10614_s1 + $0x280] sm:$0xf0]  ;;  %v3533_v9 = vadd.f32 %v8650_v44, %v3520_v0  ;;  %v4589_v44 = vld [vmem:[%s10614_s1 + $0x1b8] sm:$0xf]  ;;  %v4310_v0 = vrot.slane %v4278_v40, 6 }
  0xfe   :  { %3789 = vmatpush.bf16.msrb.mxu2 %v5538_v5  ;;  %v600_v5 = vperm.slane %v8217_v43, 3  ;;  %v6289_v43 = vld [vmem:[%s10614_s1 + $0xf00] sm:$0xf] }
  0xff   :  { %3802 = vmatpush.bf16.msrb.mxu3 %v6082_v10  ;;  %v7015_v10 = vld [vmem:[%s10614_s1 + $0xf40] sm:$0xf0]  ;;  %v6495_v40 = vld [vmem:[%s10614_s1 + $0x10dc] sm:$0xf0] }
 0x100   :  { %3764 = vmatpush.bf16.msrb.mxu0 %v4382_v28  ;;  %v3558_v18 = vpop.f32.mrf.mxu0  ;;  %v6590_v28 = vld [vmem:[%s10614_s1 + $0x1f8] sm:$0xf0]  ;;  %v6290_v30 = vor.u32 %v7015_v10, %v6289_v43  ;;  %v5473_v43 = vld [vmem:[%s10614_s1 + $0x8a0] sm:$0xf] }
 0x101   :  { %3777 = vmatpush.bf16.msrb.mxu1 %v4926_v35  ;;  %v3559_v24 = vadd.f32 %v3558_v18, %v600_v5  ;;  %v3571_v26 = vpop.f32.mrf.mxu1  ;;  %v3546_v35 = vadd.f32 %v8661_v50, %v3533_v9  ;;  %v4521_v50 = vld [vmem:[%s10614_s1 + $0x130] sm:$0xf]  ;;  %v4385_v5 = vld [vmem:[%s10614_s1 + $0x20] sm:$0xf]  ;;  %v6675_v9 = vld [vmem:[%s10614_s1 + $0x4a0] sm:$0xf0] }
 0x102   :  { %3790 = vmatpush.bf16.msrb.mxu2 %v5470_v36 }
 0x103   :  { %3803 = vmatpush.bf16.msrb.mxu3 %v6014_v41  ;;  %3765 = vmatmul.bf16.vlgmr.msrb.gmra.mxu0 %v8172_v22  ;;  %v4657_v22 = vld [vmem:[%s10614_s1 + $0x240] sm:$0xf]  ;;  %v3572_v36 = vadd.f32 %v3571_v26, %v3559_v24  ;;  %v4590_v41 = vor.u32 %v6590_v28, %v4589_v44  ;;  %v4279_v16 = vmax.f32 %v3546_v35, 0.0  ;;  %v6947_v24 = vld [vmem:[%s10614_s1 + $0xd20] sm:$0xf0] }
 0x104   :  { %3809 = vmatpush.bf16.msra.mxu0 %v4862_v42  ;;  %3778 = vmatmul.bf16.vlgmr.msrb.gmra.mxu1 %v8178_v25  ;;  %v4658_v12 = vor.u32 %v6607_v4, %v4657_v22  ;;  %v5134_v42 = vor.u32 %v6726_v31, %v5133_v51  ;;  %v6650_v28 = vld [vmem:[%s10614_s1 + $0x3dc] sm:$0xf]  ;;  %v4863_v51 = vld [vmem:[%s10614_s1 + $0x41c] sm:$0xf0] }
 0x105   :  { %3822 = vmatpush.bf16.msra.mxu1 %v5406_v45  ;;  %3791 = vmatmul.bf16.vlgmr.msrb.gmra.mxu2 %v8163_v19  ;;  %v6357_v19 = vld [vmem:[%s10614_s1 + $0xf88] sm:$0xf]  ;;  %v5678_v45 = vor.u32 %v6862_v34, %v5677_v33  ;;  %v4311_v22 = vrot.slane %v4279_v16, 4  ;;  %v5407_v33 = vld [vmem:[%s10614_s1 + $0x85c] sm:$0xf0] }
 0x106   :  { %3835 = vmatpush.bf16.msra.mxu2 %v5950_v46  ;;  %3804 = vmatmul.bf16.vlgmr.msrb.gmra.mxu3 %v8175_v23  ;;  %v5270_v23 = vor.u32 %v6760_v61, %v5269_v60  ;;  %v6358_v25 = vor.u32 %v7032_v1, %v6357_v19  ;;  %v5066_v60 = vor.u32 %v6709_v53, %v5065_v49  ;;  %v6556_v61 = vld [vmem:[%s10614_s1 + $0xe8] sm:$0xf0]  ;;  %v6922_v34 = vld [vmem:[%s10614_s1 + $0xc5c] sm:$0xf]  ;;  %v5951_v35 = vld [vmem:[%s10614_s1 + $0xc9c] sm:$0xf0] }
 0x107   :  { %3848 = vmatpush.bf16.msra.mxu3 %v6494_v52  ;;  %v6154_v1 = vor.u32 %v6981_v56, %v6153_v55  ;;  %v4454_v47 = vor.u32 %v6556_v61, %v4453_v15  ;;  %v6769_v49 = vld [vmem:[%s10614_s1 + $0x794] sm:$0xf]  ;;  %v5883_v53 = vld [vmem:[%s10614_s1 + $0xc14] sm:$0xf0] }
 0x108   :  { %3810 = vmatpush.bf16.msra.mxu0 %v4794_v17  ;;  %v3584_v46 = vpop.f32.mrf.mxu2  ;;  %v4277_v17 = vmax.f32 %v8316_v37, 0.0  ;;  %v3560_v59 = vpop.f32.mrf.mxu0  ;;  %v4997_v37 = vld [vmem:[%s10614_s1 + $0x4e8] sm:$0xf]  ;;  %v8997_v61 = vld [vmem:[#allocation1 + $0x12] sm:$0xff] }
 0x109   :  { %3823 = vmatpush.bf16.msra.mxu1 %v5338_v57  ;;  %v3585_v52 = vadd.f32 %v3584_v46, %v3572_v36  ;;  %v3597_v29 = vpop.f32.mrf.mxu3  ;;  %v3573_v63 = vpop.f32.mrf.mxu1  ;;  %v4998_v6 = vor.u32 %v6692_v62, %v4997_v37  ;;  %v4930_v36 = vor.u32 %v6675_v9, %v4929_v8  ;;  %v5954_v46 = vor.u32 %v6922_v34, %v5951_v35  ;;  %v5271_v59 = vld [vmem:[%s10614_s1 + $0x74c] sm:$0xf0]  ;;  %v7024_v37 = vld [vmem:[%s10614_s1 + $0xf8c] sm:$0xf]  ;;  %v7007_v8 = vld [vmem:[%s10614_s1 + $0xf04] sm:$0xf] }
 0x10a   :  { %3836 = vmatpush.bf16.msra.mxu2 %v5882_v58  ;;  %v4522_v58 = vor.u32 %v6573_v48, %v4521_v50  ;;  %v4323_v11 = vsel %vm4322_vm0, %v4277_v17, %v4310_v0  ;;  %v6633_v50 = vld [vmem:[%s10614_s1 + $0x354] sm:$0xf]  ;;  %v4795_v48 = vld [vmem:[%s10614_s1 + $0x394] sm:$0xf0]  ;;  %v6616_v17 = vld [vmem:[%s10614_s1 + $0x2cc] sm:$0xf] }
 0x10b   :  { %3849 = vmatpush.bf16.msra.mxu3 %v6426_v32  ;;  %v3598_v57 = vadd.f32 %v3597_v29, %v3585_v52  ;;  %v5610_v32 = vor.u32 %v6845_v14, %v5609_v54  ;;  %v5339_v52 = vld [vmem:[%s10614_s1 + $0x7d4] sm:$0xf0]  ;;  %v6905_v29 = vld [vmem:[%s10614_s1 + $0xbd4] sm:$0xf]  ;;  %v4798_v16 = vor.u32 %v6633_v50, %v4795_v48  ;;  %v6359_v62 = vld [vmem:[%s10614_s1 + $0xfcc] sm:$0xf0] }
 0x10c   :  { %3811 = vmatpush.bf16.msra.mxu0 %v4726_v3  ;;  %v6828_v3 = vld [vmem:[%s10614_s1 + $0x968] sm:$0xf0]  ;;  %v7041_v54 = vld [vmem:[%s10614_s1 + $0x1014] sm:$0xf]  ;;  %v6427_v14 = vld [vmem:[%s10614_s1 + $0x1054] sm:$0xf0]  ;;  %v5342_v55 = vor.u32 %v6769_v49, %v5339_v52  ;;  %v5886_v56 = vor.u32 %v6905_v29, %v5883_v53 }
 0x10d   :  { %3824 = vmatpush.bf16.msra.mxu1 %v5270_v23  ;;  %v4280_v19 = vmax.f32 %v3598_v57, 0.0  ;;  %v6085_v23 = vld [vmem:[%s10614_s1 + $0xd68] sm:$0xf]  ;;  %v5542_v7 = vor.u32 %v6828_v3, %v5541_v2  ;;  %v4727_v57 = vld [vmem:[%s10614_s1 + $0x30c] sm:$0xf0]  ;;  %v6430_v15 = vor.u32 %v7041_v54, %v6427_v14  ;;  %v9006_v63 = vld [vmem:[#allocation1] sm:$0xff] }
 0x10e   :  { %3837 = vmatpush.bf16.msra.mxu2 %v5814_v27  ;;  %v6964_v27 = vld [vmem:[%s10614_s1 + $0xda8] sm:$0xf0]  ;;  %v9009_v0 = vld [vmem:[#allocation1 + $0x1b] sm:$0xff]  ;;  %v6291_v9 = vld [vmem:[%s10614_s1 + $0xf44] sm:$0xf0] }
 0x10f   :  { %3850 = vmatpush.bf16.msra.mxu3 %v6358_v25  ;;  %v4312_v4 = vrot.slane %v4280_v19, 2  ;;  %v6539_v25 = vld [vmem:[%s10614_s1 + $0x60] sm:$0xf0]  ;;  %v6086_v18 = vor.u32 %v6964_v27, %v6085_v23  ;;  %v4730_v19 = vor.u32 %v6616_v17, %v4727_v57  ;;  %v9015_v2 = vld [vmem:[#allocation1 + $0x9] sm:$0xff]  ;;  %v6837_v50 = vld [vmem:[%s10614_s1 + $0x9b4] sm:$0xf] }
 0x110   :  { %3812 = vmatpush.bf16.msra.mxu0 %v4658_v12  ;;  %v3586_v10 = vpop.f32.mrf.mxu2  ;;  %v4386_v31 = vor.u32 %v6539_v25, %v4385_v5  ;;  %v4659_v23 = vld [vmem:[%s10614_s1 + $0x284] sm:$0xf0]  ;;  %v6735_v27 = vld [vmem:[%s10614_s1 + $0x684] sm:$0xf]  ;;  %v6362_v5 = vor.u32 %v7024_v37, %v6359_v62  ;;  %v5611_v48 = vld [vmem:[%s10614_s1 + $0x9f4] sm:$0xf0] }
 0x111   :  { %3825 = vmatpush.bf16.msra.mxu1 %v5202_v20  ;;  %v4325_v12 = vsel %vm4324_vm1, %v4311_v22, %v4312_v4  ;;  %v6811_v20 = vld [vmem:[%s10614_s1 + $0x8e0] sm:$0xf0]  ;;  %v3599_v26 = vpop.f32.mrf.mxu3  ;;  %v5203_v25 = vld [vmem:[%s10614_s1 + $0x6c4] sm:$0xf0]  ;;  %v6973_v52 = vld [vmem:[%s10614_s1 + $0xdf4] sm:$0xf] }
 0x112   :  { %3838 = vmatpush.bf16.msra.mxu2 %v5746_v21  ;;  %v6017_v21 = vld [vmem:[%s10614_s1 + $0xce0] sm:$0xf]  ;;  %v4327_v44 = vsel %vm4326_vm2, %v4323_v11, %v4325_v12  ;;  %v5474_v38 = vor.u32 %v6811_v20, %v5473_v43  ;;  %v5206_v11 = vor.u32 %v6735_v27, %v5203_v25  ;;  %v6155_v29 = vld [vmem:[%s10614_s1 + $0xe34] sm:$0xf0]  ;;  %v4455_v17 = vld [vmem:[%s10614_s1 + $0xec] sm:$0xf0] }
 0x113   :  { %3851 = vmatpush.bf16.msra.mxu3 %v6290_v30  ;;  %v6786_v30 = vld [vmem:[%s10614_s1 + $0x81c] sm:$0xf]  ;;  %4341 = vst [vmem:[%s10617_s3] sm:$0xff] %v4327_v44  ;;  %v9027_v4 = vld [vmem:[%s10616_s2] sm:$0xff]  ;;  %v6294_v44 = vor.u32 %v7007_v8, %v6291_v9  ;;  %v6684_v57 = vld [vmem:[%s10614_s1 + $0x4ec] sm:$0xf] }
 0x114   :  { %3813 = vmatpush.bf16.msra.mxu0 %v4590_v41  ;;  %v6018_v41 = vor.u32 %v6947_v24, %v6017_v21  ;;  %v4591_v20 = vld [vmem:[%s10614_s1 + $0x1fc] sm:$0xf0]  ;;  %v6718_v21 = vld [vmem:[%s10614_s1 + $0x5fc] sm:$0xf]  ;;  %v6956_v37 = vld [vmem:[%s10614_s1 + $0xd6c] sm:$0xf] }
 0x115   :  { %3826 = vmatpush.bf16.msra.mxu1 %v5134_v42  ;;  %v4866_v42 = vor.u32 %v6650_v28, %v4863_v51  ;;  %v5135_v28 = vld [vmem:[%s10614_s1 + $0x63c] sm:$0xf0]  ;;  %v6854_v51 = vld [vmem:[%s10614_s1 + $0xa3c] sm:$0xf]  ;;  %v6087_v62 = vld [vmem:[%s10614_s1 + $0xdac] sm:$0xf0] }
 0x116   :  { %3839 = vmatpush.bf16.msra.mxu2 %v5678_v45  ;;  %v5410_v45 = vor.u32 %v6786_v30, %v5407_v33  ;;  %v5679_v30 = vld [vmem:[%s10614_s1 + $0xa7c] sm:$0xf0]  ;;  %v6667_v27 = vld [vmem:[%s10614_s1 + $0x464] sm:$0xf]  ;;  %v6019_v9 = vld [vmem:[%s10614_s1 + $0xd24] sm:$0xf0] }
 0x117   :  { %3852 = vmatpush.bf16.msra.mxu3 %v6222_v13  ;;  %v6498_v13 = vor.u32 %v7058_v39, %v6495_v40  ;;  %v6223_v33 = vld [vmem:[%s10614_s1 + $0xebc] sm:$0xf0]  ;;  %v6565_v39 = vld [vmem:[%s10614_s1 + $0x134] sm:$0xf]  ;;  %v4523_v40 = vld [vmem:[%s10614_s1 + $0x174] sm:$0xf0] }
 0x118   :  { %3814 = vmatpush.bf16.msra.mxu0 %v4522_v58  ;;  %v6752_v58 = vld [vmem:[%s10614_s1 + $0x70c] sm:$0xf]  ;;  %v4526_v53 = vor.u32 %v6565_v39, %v4523_v40  ;;  %v6939_v8 = vld [vmem:[%s10614_s1 + $0xce4] sm:$0xf]  ;;  %v6778_v40 = vld [vmem:[%s10614_s1 + $0x7d8] sm:$0xf0] }
 0x119   :  { %3827 = vmatpush.bf16.msra.mxu1 %v5066_v60  ;;  %v6888_v60 = vld [vmem:[%s10614_s1 + $0xb4c] sm:$0xf]  ;;  %v5274_v3 = vor.u32 %v6752_v58, %v5271_v59  ;;  %v4999_v59 = vld [vmem:[%s10614_s1 + $0x52c] sm:$0xf0] }
 0x11a   :  { %3840 = vmatpush.bf16.msra.mxu2 %v5610_v32  ;;  %v5815_v32 = vld [vmem:[%s10614_s1 + $0xb8c] sm:$0xf0] }
 0x11b   :  { %3853 = vmatpush.bf16.msra.mxu3 %v6154_v1  ;;  %v6599_v1 = vld [vmem:[%s10614_s1 + $0x244] sm:$0xf]  ;;  %v5818_v22 = vor.u32 %v6888_v60, %v5815_v32  ;;  %v6820_v60 = vld [vmem:[%s10614_s1 + $0x92c] sm:$0xf]  ;;  %v5543_v32 = vld [vmem:[%s10614_s1 + $0x96c] sm:$0xf0] }
 0x11c   :  { %3815 = vmatpush.bf16.msra.mxu0 %v4454_v47  ;;  %v601_v47 = vperm.slane %v9027_v4, 4  ;;  %v4662_v43 = vor.u32 %v6599_v1, %v4659_v23  ;;  %v6531_v1 = vld [vmem:[%s10614_s1 + $0x24] sm:$0xf]  ;;  %v5546_v23 = vor.u32 %v6820_v60, %v5543_v32  ;;  %v6608_v60 = vld [vmem:[%s10614_s1 + $0x288] sm:$0xf0] }
 0x11d   :  { %3828 = vmatpush.bf16.msra.mxu1 %v4998_v6  ;;  %v6871_v6 = vld [vmem:[%s10614_s1 + $0xac4] sm:$0xf]  ;;  %v5209_v32 = vld [vmem:[%s10614_s1 + $0x688] sm:$0xf] }
 0x11e   :  { %3841 = vmatpush.bf16.msra.mxu2 %v5542_v7  ;;  %v5747_v7 = vld [vmem:[%s10614_s1 + $0xb04] sm:$0xf0] }
 0x11f   :  { %3854 = vmatpush.bf16.msra.mxu3 %v6086_v18  ;;  %v5750_v12 = vor.u32 %v6871_v6, %v5747_v7  ;;  %v6582_v18 = vld [vmem:[%s10614_s1 + $0x1bc] sm:$0xf]  ;;  %v6090_v6 = vor.u32 %v6956_v37, %v6087_v62  ;;  %v5475_v7 = vld [vmem:[%s10614_s1 + $0x8e4] sm:$0xf0]  ;;  %v6744_v62 = vld [vmem:[%s10614_s1 + $0x6c8] sm:$0xf0] }
 0x120   :  { %3816 = vmatpush.bf16.msra.mxu0 %v4386_v31  ;;  %v3610_v10 = vpop.f32.mrf.mxu0  ;;  %v6990_v31 = vld [vmem:[%s10614_s1 + $0xe7c] sm:$0xf]  ;;  %v4594_v35 = vor.u32 %v6582_v18, %v4591_v20  ;;  %v6795_v20 = vld [vmem:[%s10614_s1 + $0x860] sm:$0xf0] }
 0x121   :  { %3829 = vmatpush.bf16.msra.mxu1 %v4930_v36  ;;  %v3611_v24 = vadd.f32 %v3610_v10, %v601_v47  ;;  %v3623_v26 = vpop.f32.mrf.mxu1  ;;  %v5138_v36 = vor.u32 %v6718_v21, %v5135_v28  ;;  %v4931_v47 = vld [vmem:[%s10614_s1 + $0x4a4] sm:$0xf0]  ;;  %v4869_v10 = vld [vmem:[%s10614_s1 + $0x3e0] sm:$0xf] }
 0x122   :  { %3842 = vmatpush.bf16.msra.mxu2 %v5474_v38  ;;  %v5682_v38 = vor.u32 %v6854_v51, %v5679_v30  ;;  %v5957_v21 = vld [vmem:[%s10614_s1 + $0xc60] sm:$0xf]  ;;  %v7067_v51 = vld [vmem:[%s10614_s1 + $0x10e0] sm:$0xf0]  ;;  %v6022_v30 = vor.u32 %v6939_v8, %v6019_v9 }
 0x123   :  { %3855 = vmatpush.bf16.msra.mxu3 %v6018_v41  ;;  %3817 = vmatmul.bf16.vlgmr.msra.gmra.mxu0 %v9006_v63  ;;  %v3624_v34 = vadd.f32 %v3623_v26, %v3611_v24  ;;  %v6701_v41 = vld [vmem:[%s10614_s1 + $0x574] sm:$0xf]  ;;  %v6931_v24 = vld [vmem:[%s10614_s1 + $0xca0] sm:$0xf0]  ;;  %v4934_v26 = vor.u32 %v6667_v27, %v4931_v47  ;;  %v6501_v28 = vld [vmem:[%s10614_s1 + $0x10a0] sm:$0xf]  ;;  %v5210_v47 = vor.u32 %v6744_v62, %v5209_v32 }
 0x124   :  { %3861 = vmatpush.bf16.msrb.mxu0 %v4866_v42  ;;  %3830 = vmatmul.bf16.vlgmr.msra.gmra.mxu1 %v9015_v2  ;;  %v6502_v39 = vor.u32 %v7067_v51, %v6501_v28  ;;  %v5141_v8 = vld [vmem:[%s10614_s1 + $0x600] sm:$0xf]  ;;  %v6574_v28 = vld [vmem:[%s10614_s1 + $0x178] sm:$0xf0]  ;;  %v5073_v51 = vld [vmem:[%s10614_s1 + $0x578] sm:$0xf] }
 0x125   :  { %3874 = vmatpush.bf16.msrb.mxu1 %v5410_v45  ;;  %3843 = vmatmul.bf16.vlgmr.msra.gmra.mxu2 %v8997_v61  ;;  %v6226_v45 = vor.u32 %v6990_v31, %v6223_v33  ;;  %v6025_v62 = vld [vmem:[%s10614_s1 + $0xce8] sm:$0xf] }
 0x126   :  { %3887 = vmatpush.bf16.msrb.mxu2 %v5954_v46  ;;  %3856 = vmatmul.bf16.vlgmr.msra.gmra.mxu3 %v9009_v0  ;;  %v5067_v46 = vld [vmem:[%s10614_s1 + $0x5b4] sm:$0xf0] }
 0x127   :  { %3900 = vmatpush.bf16.msrb.mxu3 %v6498_v13 }
 0x128   :  { %3862 = vmatpush.bf16.msrb.mxu0 %v4798_v16  ;;  %v3636_v42 = vpop.f32.mrf.mxu2  ;;  %v3612_v14 = vpop.f32.mrf.mxu0  ;;  %v5070_v16 = vor.u32 %v6701_v41, %v5067_v46  ;;  %v5889_v41 = vld [vmem:[%s10614_s1 + $0xbd8] sm:$0xf]  ;;  %v7050_v46 = vld [vmem:[%s10614_s1 + $0x1058] sm:$0xf0] }
 0x129   :  { %3875 = vmatpush.bf16.msrb.mxu1 %v5342_v55  ;;  %v3637_v49 = vadd.f32 %v3636_v42, %v3624_v34  ;;  %v3649_v13 = vpop.f32.mrf.mxu3  ;;  %v5614_v55 = vor.u32 %v6837_v50, %v5611_v48  ;;  %v3625_v58 = vpop.f32.mrf.mxu1  ;;  %v5958_v34 = vor.u32 %v6931_v24, %v5957_v21  ;;  %v6914_v42 = vld [vmem:[%s10614_s1 + $0xc18] sm:$0xf0]  ;;  %v6761_v14 = vld [vmem:[%s10614_s1 + $0x750] sm:$0xf0] }
 0x12a   :  { %3888 = vmatpush.bf16.msrb.mxu2 %v5886_v56  ;;  %v6548_v56 = vld [vmem:[%s10614_s1 + $0xac] sm:$0xf] }
 0x12b   :  { %3901 = vmatpush.bf16.msrb.mxu3 %v6430_v15  ;;  %v9093_v54 = vadd.f32 %v3649_v13, %v3637_v49  ;;  %v6158_v15 = vor.u32 %v6973_v52, %v6155_v29  ;;  %v5890_v49 = vor.u32 %v6914_v42, %v5889_v41  ;;  %v4733_v13 = vld [vmem:[%s10614_s1 + $0x2d0] sm:$0xf]  ;;  %v6625_v52 = vld [vmem:[%s10614_s1 + $0x310] sm:$0xf0] }
 0x12c   :  { %3863 = vmatpush.bf16.msrb.mxu0 %v4730_v19  ;;  %v4458_v19 = vor.u32 %v6548_v56, %v4455_v17  ;;  %v5277_v29 = vld [vmem:[%s10614_s1 + $0x710] sm:$0xf]  ;;  %v7033_v17 = vld [vmem:[%s10614_s1 + $0xfd0] sm:$0xf0] }
 0x12d   :  { %3876 = vmatpush.bf16.msrb.mxu1 %v5274_v3  ;;  %v4387_v3 = vld [vmem:[%s10614_s1 + $0x64] sm:$0xf0]  ;;  %v6365_v56 = vld [vmem:[%s10614_s1 + $0xf90] sm:$0xf]  ;;  %v5278_v58 = vor.u32 %v6761_v14, %v5277_v29  ;;  %v6829_v29 = vld [vmem:[%s10614_s1 + $0x970] sm:$0xf0] }
 0x12e   :  { %3889 = vmatpush.bf16.msrb.mxu2 %v5818_v22  ;;  %v5002_v22 = vor.u32 %v6684_v57, %v4999_v59  ;;  %v4390_v18 = vor.u32 %v6531_v1, %v4387_v3  ;;  %v4734_v57 = vor.u32 %v6625_v52, %v4733_v13  ;;  %v4665_v59 = vld [vmem:[%s10614_s1 + $0x248] sm:$0xf]  ;;  %v6366_v37 = vor.u32 %v7033_v17, %v6365_v56  ;;  %v6880_v1 = vld [vmem:[%s10614_s1 + $0xb08] sm:$0xf0]  ;;  %v6693_v13 = vld [vmem:[%s10614_s1 + $0x530] sm:$0xf0] }
 0x12f   :  { %3902 = vmatpush.bf16.msrb.mxu3 %v6362_v5  ;;  %v6803_v5 = vld [vmem:[%s10614_s1 + $0x8a4] sm:$0xf]  ;;  %v6297_v3 = vld [vmem:[%s10614_s1 + $0xf08] sm:$0xf]  ;;  %v5549_v52 = vld [vmem:[%s10614_s1 + $0x930] sm:$0xf] }
 0x130   :  { %3864 = vmatpush.bf16.msrb.mxu0 %v4662_v43  ;;  %v3638_v25 = vpop.f32.mrf.mxu2  ;;  %v6965_v14 = vld [vmem:[%s10614_s1 + $0xdb0] sm:$0xf0]  ;;  %v6540_v56 = vld [vmem:[%s10614_s1 + $0x68] sm:$0xf0] }
 0x131   :  { %3877 = vmatpush.bf16.msrb.mxu1 %v5206_v11  ;;  %v3651_v43 = vpop.f32.mrf.mxu3  ;;  %v6659_v11 = vld [vmem:[%s10614_s1 + $0x420] sm:$0xf0] }
 0x132   :  { %3890 = vmatpush.bf16.msrb.mxu2 %v5750_v12  ;;  %v5413_v12 = vld [vmem:[%s10614_s1 + $0x820] sm:$0xf]  ;;  %v4870_v31 = vor.u32 %v6659_v11, %v4869_v10  ;;  %v6727_v43 = vld [vmem:[%s10614_s1 + $0x640] sm:$0xf0] }
 0x133   :  { %3903 = vmatpush.bf16.msrb.mxu3 %v6294_v44  ;;  %v5478_v44 = vor.u32 %v6803_v5, %v5475_v7  ;;  %v5414_v33 = vor.u32 %v6795_v20, %v5413_v12  ;;  %v6591_v7 = vld [vmem:[%s10614_s1 + $0x200] sm:$0xf0]  ;;  %v5685_v10 = vld [vmem:[%s10614_s1 + $0xa40] sm:$0xf]  ;;  %v5142_v21 = vor.u32 %v6727_v43, %v5141_v8 }
 0x134   :  { %3865 = vmatpush.bf16.msrb.mxu0 %v4594_v35  ;;  %v4801_v35 = vld [vmem:[%s10614_s1 + $0x358] sm:$0xf]  ;;  %v6863_v11 = vld [vmem:[%s10614_s1 + $0xa80] sm:$0xf0]  ;;  %v6229_v12 = vld [vmem:[%s10614_s1 + $0xe80] sm:$0xf] }
 0x135   :  { %3878 = vmatpush.bf16.msrb.mxu1 %v5138_v36  ;;  %v6642_v36 = vld [vmem:[%s10614_s1 + $0x398] sm:$0xf0]  ;;  %v5686_v24 = vor.u32 %v6863_v11, %v5685_v10  ;;  %v7059_v43 = vld [vmem:[%s10614_s1 + $0x10a4] sm:$0xf]  ;;  %v6503_v10 = vld [vmem:[%s10614_s1 + $0x10e4] sm:$0xf0] }
 0x136   :  { %3891 = vmatpush.bf16.msrb.mxu2 %v5682_v38  ;;  %v5345_v38 = vld [vmem:[%s10614_s1 + $0x798] sm:$0xf]  ;;  %v4802_v50 = vor.u32 %v6642_v36, %v4801_v35  ;;  %v6846_v35 = vld [vmem:[%s10614_s1 + $0x9f8] sm:$0xf0] }
 0x137   :  { %3904 = vmatpush.bf16.msrb.mxu3 %v6226_v45  ;;  %v6433_v45 = vld [vmem:[%s10614_s1 + $0x1018] sm:$0xf]  ;;  %v5346_v48 = vor.u32 %v6778_v40, %v5345_v38  ;;  %v6982_v38 = vld [vmem:[%s10614_s1 + $0xe38] sm:$0xf0] }
 0x138   :  { %3866 = vmatpush.bf16.msrb.mxu0 %v4526_v53  ;;  %v6434_v53 = vor.u32 %v7050_v46, %v6433_v45  ;;  %v6161_v36 = vld [vmem:[%s10614_s1 + $0xdf8] sm:$0xf]  ;;  %v4461_v45 = vld [vmem:[%s10614_s1 + $0xb0] sm:$0xf]  ;;  %v6557_v46 = vld [vmem:[%s10614_s1 + $0xf0] sm:$0xf0] }
 0x139   :  { %3879 = vmatpush.bf16.msrb.mxu1 %v5070_v16  ;;  %v5821_v16 = vld [vmem:[%s10614_s1 + $0xb50] sm:$0xf] }
 0x13a   :  { %3892 = vmatpush.bf16.msrb.mxu2 %v5614_v55  ;;  %v6897_v55 = vld [vmem:[%s10614_s1 + $0xb90] sm:$0xf0] }
 0x13b   :  { %3905 = vmatpush.bf16.msrb.mxu3 %v6158_v15  ;;  %v5822_v15 = vor.u32 %v6897_v55, %v5821_v16  ;;  %v4462_v16 = vor.u32 %v6557_v46, %v4461_v45  ;;  %v4393_v55 = vld [vmem:[%s10614_s1 + $0x28] sm:$0xf]  ;;  %v5279_v46 = vld [vmem:[%s10614_s1 + $0x754] sm:$0xf0] }
 0x13c   :  { %3867 = vmatpush.bf16.msrb.mxu0 %v4458_v19  ;;  %v5753_v19 = vld [vmem:[%s10614_s1 + $0xac8] sm:$0xf] }
 0x13d   :  { %3880 = vmatpush.bf16.msrb.mxu1 %v5002_v22  ;;  %v7016_v22 = vld [vmem:[%s10614_s1 + $0xf48] sm:$0xf0]  ;;  %v5754_v5 = vor.u32 %v6880_v1, %v5753_v19 }
 0x13e   :  { %3893 = vmatpush.bf16.msrb.mxu2 %v5546_v23  ;;  %v4666_v23 = vor.u32 %v6608_v60, %v4665_v59  ;;  %v6298_v9 = vor.u32 %v7016_v22, %v6297_v3  ;;  %v5481_v59 = vld [vmem:[%s10614_s1 + $0x8a8] sm:$0xf]  ;;  %v6948_v19 = vld [vmem:[%s10614_s1 + $0xd28] sm:$0xf0]  ;;  %v6651_v3 = vld [vmem:[%s10614_s1 + $0x3e4] sm:$0xf] }
 0x13f   :  { %3906 = vmatpush.bf16.msrb.mxu3 %v6090_v6  ;;  %v4597_v6 = vld [vmem:[%s10614_s1 + $0x1c0] sm:$0xf]  ;;  %v4871_v22 = vld [vmem:[%s10614_s1 + $0x424] sm:$0xf0]  ;;  %v6026_v11 = vor.u32 %v6948_v19, %v6025_v62  ;;  %v6583_v19 = vld [vmem:[%s10614_s1 + $0x1c4] sm:$0xf] }
 0x140   :  { %3868 = vmatpush.bf16.msrb.mxu0 %v4390_v18  ;;  %v9243_v27 = vpop.f32.mrf.mxu0  ;;  %v6999_v18 = vld [vmem:[%s10614_s1 + $0xec0] sm:$0xf0]  ;;  %v4598_v20 = vor.u32 %v6591_v7, %v4597_v6  ;;  %v5959_v7 = vld [vmem:[%s10614_s1 + $0xca4] sm:$0xf0] }
 0x141   :  { %3881 = vmatpush.bf16.msrb.mxu1 %v4934_v26  ;;  %v9245_v25 = vpop.f32.mrf.mxu1  ;;  %v6923_v6 = vld [vmem:[%s10614_s1 + $0xc64] sm:$0xf] }
 0x142   :  { %3894 = vmatpush.bf16.msrb.mxu2 %v5478_v44  ;;  %v4529_v44 = vld [vmem:[%s10614_s1 + $0x138] sm:$0xf] }
 0x143   :  { %3907 = vmatpush.bf16.msrb.mxu3 %v6022_v30  ;;  %3869 = vmatmul.bf16.vlgmr.msrb.gmra.mxu0 %v9006_v63  ;;  %v6230_v30 = vor.u32 %v6999_v18, %v6229_v12  ;;  %v4874_v12 = vor.u32 %v6651_v3, %v4871_v22  ;;  %v6719_v3 = vld [vmem:[%s10614_s1 + $0x604] sm:$0xf] }
 0x144   :  { %3913 = vmatpush.bf16.msra.mxu0 %v4870_v31  ;;  %3882 = vmatmul.bf16.vlgmr.msrb.gmra.mxu1 %v9015_v2 }
 0x145   :  { %3926 = vmatpush.bf16.msra.mxu1 %v5414_v33  ;;  %3895 = vmatmul.bf16.vlgmr.msrb.gmra.mxu2 %v8997_v61  ;;  %v6710_v33 = vld [vmem:[%s10614_s1 + $0x5b8] sm:$0xf0] }
 0x146   :  { %3939 = vmatpush.bf16.msra.mxu2 %v5958_v34  ;;  %3908 = vmatmul.bf16.vlgmr.msrb.gmra.mxu3 %v9009_v0  ;;  %v5617_v34 = vld [vmem:[%s10614_s1 + $0x9b8] sm:$0xf]  ;;  %v5074_v41 = vor.u32 %v6710_v33, %v5073_v51  ;;  %v5347_v51 = vld [vmem:[%s10614_s1 + $0x7dc] sm:$0xf0] }
 0x147   :  { %3952 = vmatpush.bf16.msra.mxu3 %v6502_v39  ;;  %v4530_v39 = vor.u32 %v6574_v28, %v4529_v44  ;;  %v5618_v42 = vor.u32 %v6846_v35, %v5617_v34  ;;  %v6770_v44 = vld [vmem:[%s10614_s1 + $0x79c] sm:$0xf]  ;;  %v6506_v28 = vor.u32 %v7059_v43, %v6503_v10  ;;  %v5891_v33 = vld [vmem:[%s10614_s1 + $0xc1c] sm:$0xf0] }
 0x148   :  { %3914 = vmatpush.bf16.msra.mxu0 %v4802_v50  ;;  %v9271_v26 = vpop.f32.mrf.mxu2  ;;  %v3664_v40 = vpop.f32.mrf.mxu0  ;;  %v5005_v50 = vld [vmem:[%s10614_s1 + $0x4f0] sm:$0xf]  ;;  %v7042_v34 = vld [vmem:[%s10614_s1 + $0x101c] sm:$0xf]  ;;  %v6435_v35 = vld [vmem:[%s10614_s1 + $0x105c] sm:$0xf0] }
 0x149   :  { %3927 = vmatpush.bf16.msra.mxu1 %v5346_v48  ;;  %v9282_v31 = vpop.f32.mrf.mxu3  ;;  %v3677_v48 = vpop.f32.mrf.mxu1  ;;  %v5006_v17 = vor.u32 %v6693_v13, %v5005_v50  ;;  %v6617_v40 = vld [vmem:[%s10614_s1 + $0x2d4] sm:$0xf]  ;;  %v6438_v45 = vor.u32 %v7042_v34, %v6435_v35  ;;  %v6367_v13 = vld [vmem:[%s10614_s1 + $0xfd4] sm:$0xf0] }
 0x14a   :  { %3940 = vmatpush.bf16.msra.mxu2 %v5890_v49  ;;  %v6162_v49 = vor.u32 %v6982_v38, %v6161_v36  ;;  %v5350_v38 = vor.u32 %v6770_v44, %v5347_v51  ;;  %v6889_v50 = vld [vmem:[%s10614_s1 + $0xb54] sm:$0xf]  ;;  %v5823_v48 = vld [vmem:[%s10614_s1 + $0xb94] sm:$0xf0]  ;;  %v6838_v44 = vld [vmem:[%s10614_s1 + $0x9bc] sm:$0xf] }
 0x14b   :  { %3953 = vmatpush.bf16.msra.mxu3 %v6434_v53  ;;  %v6093_v53 = vld [vmem:[%s10614_s1 + $0xd70] sm:$0xf] }
 0x14c   :  { %3915 = vmatpush.bf16.msra.mxu0 %v4734_v57  ;;  %v5550_v57 = vor.u32 %v6829_v29, %v5549_v52  ;;  %v6094_v32 = vor.u32 %v6965_v14, %v6093_v53  ;;  %v5826_v53 = vor.u32 %v6889_v50, %v5823_v48  ;;  %v6600_v14 = vld [vmem:[%s10614_s1 + $0x24c] sm:$0xf]  ;;  %v6821_v50 = vld [vmem:[%s10614_s1 + $0x934] sm:$0xf]  ;;  %v5551_v48 = vld [vmem:[%s10614_s1 + $0x974] sm:$0xf0] }
 0x14d   :  { %3928 = vmatpush.bf16.msra.mxu1 %v5278_v58  ;;  %v4937_v58 = vld [vmem:[%s10614_s1 + $0x468] sm:$0xf] }
 0x14e   :  { %3941 = vmatpush.bf16.msra.mxu2 %v5822_v15  ;;  %v6676_v15 = vld [vmem:[%s10614_s1 + $0x4a8] sm:$0xf0] }
 0x14f   :  { %3954 = vmatpush.bf16.msra.mxu3 %v6366_v37  ;;  %v6812_v37 = vld [vmem:[%s10614_s1 + $0x8e8] sm:$0xf0]  ;;  %v4938_v8 = vor.u32 %v6676_v15, %v4937_v58  ;;  %v5755_v58 = vld [vmem:[%s10614_s1 + $0xb0c] sm:$0xf0] }
 0x150   :  { %3916 = vmatpush.bf16.msra.mxu0 %v4666_v23  ;;  %v3690_v60 = vpop.f32.mrf.mxu2  ;;  %v6787_v23 = vld [vmem:[%s10614_s1 + $0x824] sm:$0xf]  ;;  %v7008_v15 = vld [vmem:[%s10614_s1 + $0xf0c] sm:$0xf] }
 0x151   :  { %3929 = vmatpush.bf16.msra.mxu1 %v5210_v47  ;;  %v3703_v1 = vpop.f32.mrf.mxu3  ;;  %v4394_v47 = vor.u32 %v6540_v56, %v4393_v55  ;;  %v6736_v55 = vld [vmem:[%s10614_s1 + $0x68c] sm:$0xf] }
 0x152   :  { %3942 = vmatpush.bf16.msra.mxu2 %v5754_v5  ;;  %v5415_v5 = vld [vmem:[%s10614_s1 + $0x864] sm:$0xf0] }
 0x153   :  { %3955 = vmatpush.bf16.msra.mxu3 %v6298_v9  ;;  %v5482_v9 = vor.u32 %v6812_v37, %v5481_v59  ;;  %v5418_v18 = vor.u32 %v6787_v23, %v5415_v5  ;;  %v6299_v59 = vld [vmem:[%s10614_s1 + $0xf4c] sm:$0xf0]  ;;  %v4599_v1 = vld [vmem:[%s10614_s1 + $0x204] sm:$0xf0]  ;;  %v6855_v5 = vld [vmem:[%s10614_s1 + $0xa44] sm:$0xf] }
 0x154   :  { %3917 = vmatpush.bf16.msra.mxu0 %v4598_v20  ;;  %v5962_v20 = vor.u32 %v6923_v6, %v5959_v7  ;;  %v6302_v23 = vor.u32 %v7008_v15, %v6299_v59  ;;  %v5687_v6 = vld [vmem:[%s10614_s1 + $0xa84] sm:$0xf0]  ;;  %v6991_v7 = vld [vmem:[%s10614_s1 + $0xe84] sm:$0xf]  ;;  %v5483_v59 = vld [vmem:[%s10614_s1 + $0x8ec] sm:$0xf0] }
 0x155   :  { %3930 = vmatpush.bf16.msra.mxu1 %v5142_v21  ;;  %v6634_v21 = vld [vmem:[%s10614_s1 + $0x35c] sm:$0xf]  ;;  %v5690_v10 = vor.u32 %v6855_v5, %v5687_v6  ;;  %v5965_v5 = vld [vmem:[%s10614_s1 + $0xc68] sm:$0xf]  ;;  %v6932_v6 = vld [vmem:[%s10614_s1 + $0xca8] sm:$0xf0] }
 0x156   :  { %3943 = vmatpush.bf16.msra.mxu2 %v5686_v24  ;;  %v4803_v24 = vld [vmem:[%s10614_s1 + $0x39c] sm:$0xf0] }
 0x157   :  { %3956 = vmatpush.bf16.msra.mxu3 %v6230_v30  ;;  %v6906_v30 = vld [vmem:[%s10614_s1 + $0xbdc] sm:$0xf]  ;;  %v4806_v36 = vor.u32 %v6634_v21, %v4803_v24  ;;  %v5075_v24 = vld [vmem:[%s10614_s1 + $0x5bc] sm:$0xf0] }
 0x158   :  { %3918 = vmatpush.bf16.msra.mxu0 %v4530_v39  ;;  %v5894_v39 = vor.u32 %v6906_v30, %v5891_v33  ;;  %v6974_v30 = vld [vmem:[%s10614_s1 + $0xdfc] sm:$0xf]  ;;  %v6163_v33 = vld [vmem:[%s10614_s1 + $0xe3c] sm:$0xf0] }
 0x159   :  { %3931 = vmatpush.bf16.msra.mxu1 %v5074_v41  ;;  %v4735_v41 = vld [vmem:[%s10614_s1 + $0x314] sm:$0xf0] }
 0x15a   :  { %3944 = vmatpush.bf16.msra.mxu2 %v5618_v42  ;;  %v6753_v42 = vld [vmem:[%s10614_s1 + $0x714] sm:$0xf]  ;;  %v4738_v52 = vor.u32 %v6617_v40, %v4735_v41  ;;  %v4463_v40 = vld [vmem:[%s10614_s1 + $0xf4] sm:$0xf0] }
 0x15b   :  { %3957 = vmatpush.bf16.msra.mxu3 %v6162_v49  ;;  %v7025_v49 = vld [vmem:[%s10614_s1 + $0xf94] sm:$0xf]  ;;  %v5282_v29 = vor.u32 %v6753_v42, %v5279_v46  ;;  %v5007_v46 = vld [vmem:[%s10614_s1 + $0x534] sm:$0xf0] }
 0x15c   :  { %3919 = vmatpush.bf16.msra.mxu0 %v4462_v16  ;;  %v4667_v16 = vld [vmem:[%s10614_s1 + $0x28c] sm:$0xf0]  ;;  %v6370_v56 = vor.u32 %v7025_v49, %v6367_v13  ;;  %v6685_v41 = vld [vmem:[%s10614_s1 + $0x4f4] sm:$0xf]  ;;  %v6095_v13 = vld [vmem:[%s10614_s1 + $0xdb4] sm:$0xf0] }
 0x15d   :  { %3932 = vmatpush.bf16.msra.mxu1 %v5006_v17  ;;  %v5211_v17 = vld [vmem:[%s10614_s1 + $0x6cc] sm:$0xf0]  ;;  %v4670_v60 = vor.u32 %v6600_v14, %v4667_v16  ;;  %v6957_v49 = vld [vmem:[%s10614_s1 + $0xd74] sm:$0xf]  ;;  %v5010_v16 = vor.u32 %v6685_v41, %v5007_v46  ;;  %v4741_v46 = vld [vmem:[%s10614_s1 + $0x2d8] sm:$0xf] }
 0x15e   :  { %3945 = vmatpush.bf16.msra.mxu2 %v5550_v57  ;;  %v6872_v57 = vld [vmem:[%s10614_s1 + $0xacc] sm:$0xf]  ;;  %v5214_v37 = vor.u32 %v6736_v55, %v5211_v17  ;;  %v4395_v14 = vld [vmem:[%s10614_s1 + $0x6c] sm:$0xf0]  ;;  %v5554_v55 = vor.u32 %v6821_v50, %v5551_v48  ;;  %v6098_v15 = vor.u32 %v6957_v49, %v6095_v13  ;;  %v6626_v50 = vld [vmem:[%s10614_s1 + $0x318] sm:$0xf0] }
 0x15f   :  { %3958 = vmatpush.bf16.msra.mxu3 %v6094_v32  ;;  %v5758_v62 = vor.u32 %v6872_v57, %v5755_v58  ;;  %v4939_v17 = vld [vmem:[%s10614_s1 + $0x4ac] sm:$0xf0]  ;;  %v6804_v57 = vld [vmem:[%s10614_s1 + $0x8ac] sm:$0xf]  ;;  %v6762_v48 = vld [vmem:[%s10614_s1 + $0x758] sm:$0xf0] }
 0x160   :  { %3920 = vmatpush.bf16.msra.mxu0 %v4394_v47  ;;  %v9447_v32 = vpop.f32.mrf.mxu0  ;;  %v5143_v47 = vld [vmem:[%s10614_s1 + $0x644] sm:$0xf0]  ;;  %v5829_v49 = vld [vmem:[%s10614_s1 + $0xb58] sm:$0xf]  ;;  %v6898_v13 = vld [vmem:[%s10614_s1 + $0xb98] sm:$0xf0] }
 0x161   :  { %3933 = vmatpush.bf16.msra.mxu1 %v4938_v8  ;;  %v9458_v22 = vpop.f32.mrf.mxu1  ;;  %v6231_v8 = vld [vmem:[%s10614_s1 + $0xec4] sm:$0xf0]  ;;  %v5146_v43 = vor.u32 %v6719_v3, %v5143_v47  ;;  %v6796_v47 = vld [vmem:[%s10614_s1 + $0x868] sm:$0xf0] }
 0x162   :  { %3946 = vmatpush.bf16.msra.mxu2 %v5482_v9  ;;  %v4602_v9 = vor.u32 %v6583_v19, %v4599_v1  ;;  %v6234_v21 = vor.u32 %v6991_v7, %v6231_v8  ;;  %v4877_v19 = vld [vmem:[%s10614_s1 + $0x3e8] sm:$0xf]  ;;  %v6660_v1 = vld [vmem:[%s10614_s1 + $0x428] sm:$0xf0]  ;;  %v5486_v8 = vor.u32 %v6804_v57, %v5483_v59  ;;  %v6881_v57 = vld [vmem:[%s10614_s1 + $0xb10] sm:$0xf0] }
 0x163   :  { %3959 = vmatpush.bf16.msra.mxu3 %v6026_v11  ;;  %3921 = vmatmul.bf16.vlgmr.msra.gmra.mxu0 %v9006_v63  ;;  %v6566_v11 = vld [vmem:[%s10614_s1 + $0x13c] sm:$0xf]  ;;  %v5421_v3 = vld [vmem:[%s10614_s1 + $0x828] sm:$0xf] }
 0x164   :  { %3965 = vmatpush.bf16.msrb.mxu0 %v4874_v12  ;;  %3934 = vmatmul.bf16.vlgmr.msra.gmra.mxu1 %v9015_v2  ;;  %v4531_v12 = vld [vmem:[%s10614_s1 + $0x17c] sm:$0xf0] }
 0x165   :  { %3978 = vmatpush.bf16.msrb.mxu1 %v5418_v18  ;;  %3947 = vmatmul.bf16.vlgmr.msra.gmra.mxu2 %v8997_v61  ;;  %v6702_v18 = vld [vmem:[%s10614_s1 + $0x57c] sm:$0xf]  ;;  %v4534_v34 = vor.u32 %v6566_v11, %v4531_v12  ;;  %v603_v11 = vperm.slane %v9027_v4, 6 }
 0x166   :  { %3991 = vmatpush.bf16.msrb.mxu2 %v5962_v20  ;;  %3960 = vmatmul.bf16.vlgmr.msra.gmra.mxu3 %v9009_v0 }
 0x167   :  { %4004 = vmatpush.bf16.msrb.mxu3 %v6506_v28  ;;  %v5619_v28 = vld [vmem:[%s10614_s1 + $0x9fc] sm:$0xf0] }
 0x168   :  { %3966 = vmatpush.bf16.msrb.mxu0 %v4806_v36  ;;  %v9484_v20 = vpop.f32.mrf.mxu2  ;;  %v3716_v35 = vpop.f32.mrf.mxu0  ;;  %v5078_v36 = vor.u32 %v6702_v18, %v5075_v24  ;;  %v4878_v18 = vor.u32 %v6660_v1, %v4877_v19  ;;  %v5966_v24 = vor.u32 %v6932_v6, %v5965_v5  ;;  %v6728_v5 = vld [vmem:[%s10614_s1 + $0x648] sm:$0xf0]  ;;  %v5693_v6 = vld [vmem:[%s10614_s1 + $0xa48] sm:$0xf] }
 0x169   :  { %3979 = vmatpush.bf16.msrb.mxu1 %v5350_v38  ;;  %v9495_v51 = vpop.f32.mrf.mxu3  ;;  %v5622_v38 = vor.u32 %v6838_v44, %v5619_v28  ;;  %v3729_v42 = vpop.f32.mrf.mxu1  ;;  %v4809_v44 = vld [vmem:[%s10614_s1 + $0x360] sm:$0xf]  ;;  %v6643_v28 = vld [vmem:[%s10614_s1 + $0x3a0] sm:$0xf0] }
 0x16a   :  { %3992 = vmatpush.bf16.msrb.mxu2 %v5894_v39  ;;  %v6549_v39 = vld [vmem:[%s10614_s1 + $0xb4] sm:$0xf]  ;;  %v6915_v35 = vld [vmem:[%s10614_s1 + $0xc20] sm:$0xf0]  ;;  %v4810_v41 = vor.u32 %v6643_v28, %v4809_v44  ;;  %v4537_v44 = vld [vmem:[%s10614_s1 + $0x140] sm:$0xf] }
 0x16b   :  { %4005 = vmatpush.bf16.msrb.mxu3 %v6438_v45  ;;  %v6166_v45 = vor.u32 %v6974_v30, %v6163_v33  ;;  %v5353_v30 = vld [vmem:[%s10614_s1 + $0x7a0] sm:$0xf]  ;;  %v6779_v33 = vld [vmem:[%s10614_s1 + $0x7e0] sm:$0xf0] }
 0x16c   :  { %3967 = vmatpush.bf16.msrb.mxu0 %v4738_v52  ;;  %v602_v52 = vperm.slane %v9027_v4, 5  ;;  %v5354_v42 = vor.u32 %v6779_v33, %v5353_v30  ;;  %v6575_v28 = vld [vmem:[%s10614_s1 + $0x180] sm:$0xf0]  ;;  %v5081_v30 = vld [vmem:[%s10614_s1 + $0x580] sm:$0xf] }
 0x16d   :  { %3980 = vmatpush.bf16.msrb.mxu1 %v5282_v29  ;;  %v4466_v29 = vor.u32 %v6549_v39, %v4463_v40  ;;  %v3715_v40 = vadd.f32 %v9447_v32, %v603_v11 }
 0x16e   :  { %3993 = vmatpush.bf16.msrb.mxu2 %v5826_v53  ;;  %v6532_v53 = vld [vmem:[%s10614_s1 + $0x2c] sm:$0xf] }
 0x16f   :  { %4006 = vmatpush.bf16.msrb.mxu3 %v6370_v56  ;;  %v6668_v56 = vld [vmem:[%s10614_s1 + $0x46c] sm:$0xf] }
 0x170   :  { %3968 = vmatpush.bf16.msrb.mxu0 %v4670_v60  ;;  %v3742_v58 = vpop.f32.mrf.mxu2  ;;  %v6940_v60 = vld [vmem:[%s10614_s1 + $0xcec] sm:$0xf]  ;;  %v4942_v7 = vor.u32 %v6668_v56, %v4939_v17  ;;  %v6745_v56 = vld [vmem:[%s10614_s1 + $0x6d0] sm:$0xf0]  ;;  %v5761_v17 = vld [vmem:[%s10614_s1 + $0xad0] sm:$0xf] }
 0x171   :  { %3981 = vmatpush.bf16.msrb.mxu1 %v5214_v37  ;;  %v6027_v37 = vld [vmem:[%s10614_s1 + $0xd2c] sm:$0xf0]  ;;  %v5762_v19 = vor.u32 %v6881_v57, %v5761_v17 }
 0x172   :  { %3994 = vmatpush.bf16.msrb.mxu2 %v5758_v62  ;;  %v3755_v62 = vpop.f32.mrf.mxu3  ;;  %v6030_v12 = vor.u32 %v6940_v60, %v6027_v37  ;;  %v6305_v58 = vld [vmem:[%s10614_s1 + $0xf10] sm:$0xf] }
 0x173   :  { %4007 = vmatpush.bf16.msrb.mxu3 %v6302_v23  ;;  %v4398_v23 = vor.u32 %v6532_v53, %v4395_v14  ;;  %v3728_v53 = vadd.f32 %v9458_v22, %v3715_v40  ;;  %v4742_v14 = vor.u32 %v6626_v50, %v4741_v46  ;;  %v604_v22 = vperm.slane %v9027_v4, 7  ;;  %v7017_v4 = vld [vmem:[%s10614_s1 + $0xf50] sm:$0xf0]  ;;  %v4469_v46 = vld [vmem:[%s10614_s1 + $0xb8] sm:$0xf] }
 0x174   :  { %3969 = vmatpush.bf16.msrb.mxu0 %v4602_v9  ;;  %v6509_v9 = vld [vmem:[%s10614_s1 + $0x10a8] sm:$0xf]  ;;  %v4281_v40 = vmax.f32 %v9093_v54, 0.0  ;;  %v5013_v54 = vld [vmem:[%s10614_s1 + $0x4f8] sm:$0xf] }
 0x175   :  { %3982 = vmatpush.bf16.msrb.mxu1 %v5146_v43  ;;  %v7068_v43 = vld [vmem:[%s10614_s1 + $0x10e8] sm:$0xf0]  ;;  %v3741_v59 = vadd.f32 %v9484_v20, %v3728_v53  ;;  %v6306_v20 = vor.u32 %v7017_v4, %v6305_v58  ;;  %v5557_v53 = vld [vmem:[%s10614_s1 + $0x938] sm:$0xf]  ;;  %v6677_v58 = vld [vmem:[%s10614_s1 + $0x4b0] sm:$0xf0] }
 0x176   :  { %3995 = vmatpush.bf16.msrb.mxu2 %v5690_v10  ;;  %v3663_v10 = vadd.f32 %v9243_v27, %v602_v52  ;;  %v6510_v27 = vor.u32 %v7068_v43, %v6509_v9  ;;  %v7034_v52 = vld [vmem:[%s10614_s1 + $0xfd8] sm:$0xf0]  ;;  %v6237_v9 = vld [vmem:[%s10614_s1 + $0xe88] sm:$0xf]  ;;  %v7000_v43 = vld [vmem:[%s10614_s1 + $0xec8] sm:$0xf0] }
 0x177   :  { %4008 = vmatpush.bf16.msrb.mxu3 %v6234_v21  ;;  %v5422_v21 = vor.u32 %v6796_v47, %v5421_v3  ;;  %v6592_v47 = vld [vmem:[%s10614_s1 + $0x208] sm:$0xf0]  ;;  %v3754_v11 = vadd.f32 %v9495_v51, %v3741_v59  ;;  %v6238_v51 = vor.u32 %v7000_v43, %v6237_v9  ;;  %v5489_v4 = vld [vmem:[%s10614_s1 + $0x8b0] sm:$0xf] }
 0x178   :  { %3970 = vmatpush.bf16.msrb.mxu0 %v4534_v34  ;;  %v5897_v34 = vld [vmem:[%s10614_s1 + $0xbe0] sm:$0xf]  ;;  %v3676_v39 = vadd.f32 %v9245_v25, %v3663_v10  ;;  %v5285_v25 = vld [vmem:[%s10614_s1 + $0x718] sm:$0xf] }
 0x179   :  { %3983 = vmatpush.bf16.msrb.mxu1 %v5078_v36  ;;  %v6441_v36 = vld [vmem:[%s10614_s1 + $0x1020] sm:$0xf] }
 0x17a   :  { %3996 = vmatpush.bf16.msrb.mxu2 %v5622_v38  ;;  %v7051_v38 = vld [vmem:[%s10614_s1 + $0x1060] sm:$0xf0] }
 0x17b   :  { %4009 = vmatpush.bf16.msrb.mxu3 %v6166_v45  ;;  %v5898_v45 = vor.u32 %v6915_v35, %v5897_v34  ;;  %v6442_v32 = vor.u32 %v7051_v38, %v6441_v36  ;;  %v6711_v34 = vld [vmem:[%s10614_s1 + $0x5c0] sm:$0xf0]  ;;  %v5625_v35 = vld [vmem:[%s10614_s1 + $0x9c0] sm:$0xf] }
 0x17c   :  { %3971 = vmatpush.bf16.msrb.mxu0 %v4466_v29  ;;  %v3689_v29 = vadd.f32 %v9271_v26, %v3676_v39  ;;  %v5217_v26 = vld [vmem:[%s10614_s1 + $0x690] sm:$0xf]  ;;  %v6847_v36 = vld [vmem:[%s10614_s1 + $0xa00] sm:$0xf0]  ;;  %v6169_v38 = vld [vmem:[%s10614_s1 + $0xe00] sm:$0xf] }
 0x17d   :  { %3984 = vmatpush.bf16.msrb.mxu1 %v5010_v16  ;;  %v5830_v16 = vor.u32 %v6898_v13, %v5829_v49  ;;  %v5218_v62 = vor.u32 %v6745_v56, %v5217_v26  ;;  %v6983_v39 = vld [vmem:[%s10614_s1 + $0xe40] sm:$0xf0]  ;;  %v6694_v49 = vld [vmem:[%s10614_s1 + $0x538] sm:$0xf0]  ;;  %v4945_v56 = vld [vmem:[%s10614_s1 + $0x470] sm:$0xf] }
 0x17e   :  { %3997 = vmatpush.bf16.msrb.mxu2 %v5554_v55  ;;  %v6609_v55 = vld [vmem:[%s10614_s1 + $0x290] sm:$0xf0]  ;;  %v5014_v17 = vor.u32 %v6694_v49, %v5013_v54  ;;  %v4946_v9 = vor.u32 %v6677_v58, %v4945_v56  ;;  %v9837_v54 = vld [vmem:[%s10616_s2 + $0x8] sm:$0xff]  ;;  %v7026_v49 = vld [vmem:[%s10614_s1 + $0xf9c] sm:$0xf] }
 0x17f   :  { %4010 = vmatpush.bf16.msrb.mxu3 %v6098_v15  ;;  %v3702_v15 = vadd.f32 %v9282_v31, %v3689_v29  ;;  %v5149_v31 = vld [vmem:[%s10614_s1 + $0x608] sm:$0xf]  ;;  %v6170_v29 = vor.u32 %v6983_v39, %v6169_v38  ;;  %v6618_v39 = vld [vmem:[%s10614_s1 + $0x2dc] sm:$0xf]  ;;  %v6873_v56 = vld [vmem:[%s10614_s1 + $0xad4] sm:$0xf] }
 0x180   :  { %3972 = vmatpush.bf16.msrb.mxu0 %v4398_v23  ;;  %v3766_v37 = vpop.f32.mrf.mxu0  ;;  %v4605_v23 = vld [vmem:[%s10614_s1 + $0x1c8] sm:$0xf]  ;;  %v6307_v58 = vld [vmem:[%s10614_s1 + $0xf54] sm:$0xf0] }
 0x181   :  { %3985 = vmatpush.bf16.msrb.mxu1 %v4942_v7  ;;  %v3767_v1 = vadd.f32 %v3766_v37, %v604_v22  ;;  %v3779_v3 = vpop.f32.mrf.mxu1  ;;  %v6864_v7 = vld [vmem:[%s10614_s1 + $0xa88] sm:$0xf0]  ;;  %v4282_v10 = vmax.f32 %v3702_v15, 0.0  ;;  %v6813_v15 = vld [vmem:[%s10614_s1 + $0x8f0] sm:$0xf0] }
 0x182   :  { %3998 = vmatpush.bf16.msrb.mxu2 %v5486_v8  ;;  %v5490_v43 = vor.u32 %v6813_v15, %v5489_v4 }
 0x183   :  { %4011 = vmatpush.bf16.msrb.mxu3 %v6030_v12  ;;  %3973 = vmatmul.bf16.vlgmr.msrb.gmra.mxu0 %v9006_v63  ;;  %v4673_v63 = vld [vmem:[%s10614_s1 + $0x250] sm:$0xf]  ;;  %v3780_v8 = vadd.f32 %v3779_v3, %v3767_v1  ;;  %v4606_v12 = vor.u32 %v6592_v47, %v4605_v23  ;;  %v6949_v1 = vld [vmem:[%s10614_s1 + $0xd30] sm:$0xf0]  ;;  %v6652_v3 = vld [vmem:[%s10614_s1 + $0x3ec] sm:$0xf] }
 0x184   :  { %4017 = vmatpush.bf16.msra.mxu0 %v4878_v18  ;;  %3986 = vmatmul.bf16.vlgmr.msrb.gmra.mxu1 %v9015_v2  ;;  %v4674_v60 = vor.u32 %v6609_v55, %v4673_v63  ;;  %v5150_v18 = vor.u32 %v6728_v5, %v5149_v31  ;;  %v6101_v63 = vld [vmem:[%s10614_s1 + $0xd78] sm:$0xf]  ;;  %v4879_v31 = vld [vmem:[%s10614_s1 + $0x42c] sm:$0xf0] }
 0x185   :  { %4030 = vmatpush.bf16.msra.mxu1 %v5422_v21  ;;  %3999 = vmatmul.bf16.vlgmr.msrb.gmra.mxu2 %v8997_v61  ;;  %v6373_v61 = vld [vmem:[%s10614_s1 + $0xf98] sm:$0xf]  ;;  %v5694_v21 = vor.u32 %v6864_v7, %v5693_v6  ;;  %v5423_v5 = vld [vmem:[%s10614_s1 + $0x86c] sm:$0xf0]  ;;  %v6924_v7 = vld [vmem:[%s10614_s1 + $0xc6c] sm:$0xf] }
 0x186   :  { %4043 = vmatpush.bf16.msra.mxu2 %v5966_v24  ;;  %4012 = vmatmul.bf16.vlgmr.msrb.gmra.mxu3 %v9009_v0  ;;  %v5286_v0 = vor.u32 %v6762_v48, %v5285_v25  ;;  %v6374_v2 = vor.u32 %v7034_v52, %v6373_v61  ;;  %v5082_v25 = vor.u32 %v6711_v34, %v5081_v30  ;;  %v6558_v48 = vld [vmem:[%s10614_s1 + $0xf8] sm:$0xf0]  ;;  %v4313_v61 = vrot.slane %v4282_v10, 6  ;;  %v7060_v10 = vld [vmem:[%s10614_s1 + $0x10ac] sm:$0xf] }
 0x187   :  { %4056 = vmatpush.bf16.msra.mxu3 %v6510_v27  ;;  %v4470_v22 = vor.u32 %v6558_v48, %v4469_v46  ;;  %v6771_v30 = vld [vmem:[%s10614_s1 + $0x7a4] sm:$0xf]  ;;  %v5899_v34 = vld [vmem:[%s10614_s1 + $0xc24] sm:$0xf0]  ;;  %v5287_v46 = vld [vmem:[%s10614_s1 + $0x75c] sm:$0xf0] }
 0x188   :  { %4018 = vmatpush.bf16.msra.mxu0 %v4810_v41  ;;  %v3792_v24 = vpop.f32.mrf.mxu2  ;;  %v4283_v41 = vmax.f32 %v3754_v11, 0.0  ;;  %v3768_v50 = vpop.f32.mrf.mxu0  ;;  %v6511_v11 = vld [vmem:[%s10614_s1 + $0x10ec] sm:$0xf0] }
 0x189   :  { %4031 = vmatpush.bf16.msra.mxu1 %v5354_v42  ;;  %v3793_v27 = vadd.f32 %v3792_v24, %v3780_v8  ;;  %v3805_v33 = vpop.f32.mrf.mxu3  ;;  %v3781_v13 = vpop.f32.mrf.mxu1  ;;  %v5967_v8 = vld [vmem:[%s10614_s1 + $0xcac] sm:$0xf0] }
 0x18a   :  { %4044 = vmatpush.bf16.msra.mxu2 %v5898_v45  ;;  %v4538_v45 = vor.u32 %v6575_v28, %v4537_v44  ;;  %v4314_v55 = vrot.slane %v4283_v41, 4  ;;  %v5970_v24 = vor.u32 %v6924_v7, %v5967_v8  ;;  %v6635_v44 = vld [vmem:[%s10614_s1 + $0x364] sm:$0xf]  ;;  %v4811_v28 = vld [vmem:[%s10614_s1 + $0x3a4] sm:$0xf0]  ;;  %v9831_v48 = vld [vmem:[#allocation1 + $0x12] sm:$0xff] }
 0x18b   :  { %4057 = vmatpush.bf16.msra.mxu3 %v6442_v32  ;;  %v3806_v42 = vadd.f32 %v3805_v33, %v3793_v27  ;;  %v5626_v32 = vor.u32 %v6847_v36, %v5625_v35  ;;  %v5355_v27 = vld [vmem:[%s10614_s1 + $0x7e4] sm:$0xf0]  ;;  %v6907_v33 = vld [vmem:[%s10614_s1 + $0xbe4] sm:$0xf]  ;;  %v4814_v38 = vor.u32 %v6635_v44, %v4811_v28  ;;  %v6375_v13 = vld [vmem:[%s10614_s1 + $0xfdc] sm:$0xf0] }
 0x18c   :  { %4019 = vmatpush.bf16.msra.mxu0 %v4742_v14  ;;  %v6830_v14 = vld [vmem:[%s10614_s1 + $0x978] sm:$0xf0]  ;;  %v7043_v35 = vld [vmem:[%s10614_s1 + $0x1024] sm:$0xf]  ;;  %v6443_v36 = vld [vmem:[%s10614_s1 + $0x1064] sm:$0xf0]  ;;  %v5902_v41 = vor.u32 %v6907_v33, %v5899_v34 }
 0x18d   :  { %4032 = vmatpush.bf16.msra.mxu1 %v5286_v0  ;;  %v4284_v52 = vmax.f32 %v3806_v42, 0.0  ;;  %v6966_v0 = vld [vmem:[%s10614_s1 + $0xdb8] sm:$0xf0]  ;;  %v5558_v57 = vor.u32 %v6830_v14, %v5557_v53  ;;  %v4743_v42 = vld [vmem:[%s10614_s1 + $0x31c] sm:$0xf0]  ;;  %v6446_v50 = vor.u32 %v7043_v35, %v6443_v36  ;;  %v9854_v14 = vld [vmem:[#allocation1 + $0x9] sm:$0xff] }
 0x18e   :  { %4045 = vmatpush.bf16.msra.mxu2 %v5830_v16  ;;  %v4401_v16 = vld [vmem:[%s10614_s1 + $0x30] sm:$0xf]  ;;  %v6601_v53 = vld [vmem:[%s10614_s1 + $0x254] sm:$0xf]  ;;  %v6839_v44 = vld [vmem:[%s10614_s1 + $0x9c4] sm:$0xf] }
 0x18f   :  { %4058 = vmatpush.bf16.msra.mxu3 %v6374_v2  ;;  %v4315_v26 = vrot.slane %v4284_v52, 2  ;;  %v6541_v2 = vld [vmem:[%s10614_s1 + $0x70] sm:$0xf0]  ;;  %v9848_v52 = vld [vmem:[#allocation1 + $0x1b] sm:$0xff]  ;;  %v5627_v28 = vld [vmem:[%s10614_s1 + $0xa04] sm:$0xf0] }
 0x190   :  { %4020 = vmatpush.bf16.msra.mxu0 %v4674_v60  ;;  %v3794_v59 = vpop.f32.mrf.mxu2  ;;  %v4328_v60 = vsel %vm4322_vm0, %v4281_v40, %v4313_v61  ;;  %v4402_v6 = vor.u32 %v6541_v2, %v4401_v16  ;;  %v5358_v40 = vor.u32 %v6771_v30, %v5355_v27  ;;  %v9845_v61 = vld [vmem:[#allocation1] sm:$0xff]  ;;  %v4675_v16 = vld [vmem:[%s10614_s1 + $0x294] sm:$0xf0]  ;;  %v6171_v33 = vld [vmem:[%s10614_s1 + $0xe44] sm:$0xf0] }
 0x191   :  { %4033 = vmatpush.bf16.msra.mxu1 %v5218_v62  ;;  %v4329_v37 = vsel %vm4324_vm1, %v4314_v55, %v4315_v26  ;;  %v6102_v62 = vor.u32 %v6966_v0, %v6101_v63  ;;  %v3807_v23 = vpop.f32.mrf.mxu3  ;;  %v6737_v55 = vld [vmem:[%s10614_s1 + $0x694] sm:$0xf]  ;;  %v605_v26 = vperm.slane %v9837_v54, 0  ;;  %v5219_v2 = vld [vmem:[%s10614_s1 + $0x6d4] sm:$0xf0]  ;;  %v4678_v4 = vor.u32 %v6601_v53, %v4675_v16 }
 0x192   :  { %4046 = vmatpush.bf16.msra.mxu2 %v5762_v19  ;;  %v6033_v19 = vld [vmem:[%s10614_s1 + $0xcf0] sm:$0xf]  ;;  %v4330_v47 = vsel %vm4326_vm2, %v4328_v60, %v4329_v37  ;;  %v5222_v59 = vor.u32 %v6737_v55, %v5219_v2  ;;  %v6584_v37 = vld [vmem:[%s10614_s1 + $0x1cc] sm:$0xf]  ;;  %v6975_v27 = vld [vmem:[%s10614_s1 + $0xe04] sm:$0xf] }
 0x193   :  { %4059 = vmatpush.bf16.msra.mxu3 %v6306_v20  ;;  %v6788_v20 = vld [vmem:[%s10614_s1 + $0x82c] sm:$0xf]  ;;  %4342 = vst [vmem:[%s10617_s3 + $0x8] sm:$0xff] %v4330_v47  ;;  %v5151_v47 = vld [vmem:[%s10614_s1 + $0x64c] sm:$0xf0] }
 0x194   :  { %4021 = vmatpush.bf16.msra.mxu0 %v4606_v12  ;;  %v6034_v12 = vor.u32 %v6949_v1, %v6033_v19  ;;  %v6720_v19 = vld [vmem:[%s10614_s1 + $0x60c] sm:$0xf]  ;;  %v6533_v53 = vld [vmem:[%s10614_s1 + $0x34] sm:$0xf] }
 0x195   :  { %4034 = vmatpush.bf16.msra.mxu1 %v5150_v18  ;;  %v4882_v18 = vor.u32 %v6652_v3, %v4879_v31  ;;  %v6856_v31 = vld [vmem:[%s10614_s1 + $0xa4c] sm:$0xf]  ;;  %v6669_v55 = vld [vmem:[%s10614_s1 + $0x474] sm:$0xf] }
 0x196   :  { %4047 = vmatpush.bf16.msra.mxu2 %v5694_v21  ;;  %v5426_v21 = vor.u32 %v6788_v20, %v5423_v5  ;;  %v5695_v20 = vld [vmem:[%s10614_s1 + $0xa8c] sm:$0xf0]  ;;  %v6992_v5 = vld [vmem:[%s10614_s1 + $0xe8c] sm:$0xf] }
 0x197   :  { %4060 = vmatpush.bf16.msra.mxu3 %v6238_v51  ;;  %v6514_v51 = vor.u32 %v7060_v10, %v6511_v11  ;;  %v6567_v10 = vld [vmem:[%s10614_s1 + $0x144] sm:$0xf]  ;;  %v4539_v11 = vld [vmem:[%s10614_s1 + $0x184] sm:$0xf0] }
 0x198   :  { %4022 = vmatpush.bf16.msra.mxu0 %v4538_v45  ;;  %v6754_v45 = vld [vmem:[%s10614_s1 + $0x71c] sm:$0xf]  ;;  %v4542_v34 = vor.u32 %v6567_v10, %v4539_v11  ;;  %v6780_v11 = vld [vmem:[%s10614_s1 + $0x7e8] sm:$0xf0] }
 0x199   :  { %4035 = vmatpush.bf16.msra.mxu1 %v5082_v25  ;;  %v6890_v25 = vld [vmem:[%s10614_s1 + $0xb5c] sm:$0xf]  ;;  %v5290_v63 = vor.u32 %v6754_v45, %v5287_v46  ;;  %v6174_v46 = vor.u32 %v6975_v27, %v6171_v33  ;;  %v6627_v27 = vld [vmem:[%s10614_s1 + $0x320] sm:$0xf0]  ;;  %v5293_v33 = vld [vmem:[%s10614_s1 + $0x720] sm:$0xf] }
 0x19a   :  { %4048 = vmatpush.bf16.msra.mxu2 %v5626_v32  ;;  %v5831_v32 = vld [vmem:[%s10614_s1 + $0xb9c] sm:$0xf0] }
 0x19b   :  { %4061 = vmatpush.bf16.msra.mxu3 %v6170_v29  ;;  %v4746_v29 = vor.u32 %v6618_v39, %v4743_v42  ;;  %v5834_v0 = vor.u32 %v6890_v25, %v5831_v32  ;;  %v5630_v39 = vor.u32 %v6839_v44, %v5627_v28  ;;  %v6686_v42 = vld [vmem:[%s10614_s1 + $0x4fc] sm:$0xf]  ;;  %v5559_v32 = vld [vmem:[%s10614_s1 + $0x97c] sm:$0xf0] }
 0x19c   :  { %4023 = vmatpush.bf16.msra.mxu0 %v4470_v22  ;;  %v6378_v22 = vor.u32 %v7026_v49, %v6375_v13  ;;  %v6822_v25 = vld [vmem:[%s10614_s1 + $0x93c] sm:$0xf]  ;;  %v6103_v13 = vld [vmem:[%s10614_s1 + $0xdbc] sm:$0xf0] }
 0x19d   :  { %4036 = vmatpush.bf16.msra.mxu1 %v5014_v17  ;;  %v5763_v17 = vld [vmem:[%s10614_s1 + $0xb14] sm:$0xf0]  ;;  %v6958_v49 = vld [vmem:[%s10614_s1 + $0xd7c] sm:$0xf]  ;;  %v5562_v16 = vor.u32 %v6822_v25, %v5559_v32 }
 0x19e   :  { %4049 = vmatpush.bf16.msra.mxu2 %v5558_v57  ;;  %v7009_v57 = vld [vmem:[%s10614_s1 + $0xf14] sm:$0xf]  ;;  %v5766_v60 = vor.u32 %v6873_v56, %v5763_v17  ;;  %v6106_v56 = vor.u32 %v6958_v49, %v6103_v13  ;;  %v5491_v17 = vld [vmem:[%s10614_s1 + $0x8f4] sm:$0xf0]  ;;  %v6610_v25 = vld [vmem:[%s10614_s1 + $0x298] sm:$0xf0] }
 0x19f   :  { %4062 = vmatpush.bf16.msra.mxu3 %v6102_v62  ;;  %v4607_v62 = vld [vmem:[%s10614_s1 + $0x20c] sm:$0xf0]  ;;  %v6310_v23 = vor.u32 %v7009_v57, %v6307_v58  ;;  %v6941_v57 = vld [vmem:[%s10614_s1 + $0xcf4] sm:$0xf]  ;;  %v6035_v58 = vld [vmem:[%s10614_s1 + $0xd34] sm:$0xf0] }
 0x1a0   :  { %4024 = vmatpush.bf16.msra.mxu0 %v4402_v6  ;;  %v3818_v15 = vpop.f32.mrf.mxu0  ;;  %v6239_v6 = vld [vmem:[%s10614_s1 + $0xecc] sm:$0xf0]  ;;  %v4610_v8 = vor.u32 %v6584_v37, %v4607_v62  ;;  %v6797_v62 = vld [vmem:[%s10614_s1 + $0x870] sm:$0xf0]  ;;  %v5225_v32 = vld [vmem:[%s10614_s1 + $0x698] sm:$0xf] }
 0x1a1   :  { %4037 = vmatpush.bf16.msra.mxu1 %v4946_v9  ;;  %v3819_v1 = vadd.f32 %v3818_v15, %v605_v26  ;;  %v3831_v3 = vpop.f32.mrf.mxu1  ;;  %v5154_v9 = vor.u32 %v6720_v19, %v5151_v47  ;;  %v4947_v26 = vld [vmem:[%s10614_s1 + $0x4b4] sm:$0xf0]  ;;  %v4885_v15 = vld [vmem:[%s10614_s1 + $0x3f0] sm:$0xf]  ;;  %v6746_v13 = vld [vmem:[%s10614_s1 + $0x6d8] sm:$0xf0] }
 0x1a2   :  { %4050 = vmatpush.bf16.msra.mxu2 %v5490_v43  ;;  %v5698_v43 = vor.u32 %v6856_v31, %v5695_v20  ;;  %v5973_v19 = vld [vmem:[%s10614_s1 + $0xc70] sm:$0xf]  ;;  %v7069_v31 = vld [vmem:[%s10614_s1 + $0x10f0] sm:$0xf0]  ;;  %v6038_v20 = vor.u32 %v6941_v57, %v6035_v58 }
 0x1a3   :  { %4063 = vmatpush.bf16.msra.mxu3 %v6034_v12  ;;  %4025 = vmatmul.bf16.vlgmr.msra.gmra.mxu0 %v9845_v61  ;;  %v3832_v7 = vadd.f32 %v3831_v3, %v3819_v1  ;;  %v6703_v12 = vld [vmem:[%s10614_s1 + $0x584] sm:$0xf]  ;;  %v6933_v1 = vld [vmem:[%s10614_s1 + $0xcb0] sm:$0xf0]  ;;  %v4950_v3 = vor.u32 %v6669_v55, %v4947_v26  ;;  %v6517_v47 = vld [vmem:[%s10614_s1 + $0x10b0] sm:$0xf]  ;;  %v5226_v26 = vor.u32 %v6746_v13, %v5225_v32 }
 0x1a4   :  { %4069 = vmatpush.bf16.msrb.mxu0 %v4882_v18  ;;  %4038 = vmatmul.bf16.vlgmr.msra.gmra.mxu1 %v9854_v14  ;;  %v6518_v10 = vor.u32 %v7069_v31, %v6517_v47  ;;  %v5157_v57 = vld [vmem:[%s10614_s1 + $0x610] sm:$0xf]  ;;  %v6576_v47 = vld [vmem:[%s10614_s1 + $0x188] sm:$0xf0]  ;;  %v5089_v31 = vld [vmem:[%s10614_s1 + $0x588] sm:$0xf] }
 0x1a5   :  { %4082 = vmatpush.bf16.msrb.mxu1 %v5426_v21  ;;  %4051 = vmatmul.bf16.vlgmr.msra.gmra.mxu2 %v9831_v48  ;;  %v6242_v21 = vor.u32 %v6992_v5, %v6239_v6  ;;  %v6041_v13 = vld [vmem:[%s10614_s1 + $0xcf8] sm:$0xf] }
 0x1a6   :  { %4095 = vmatpush.bf16.msrb.mxu2 %v5970_v24  ;;  %4064 = vmatmul.bf16.vlgmr.msra.gmra.mxu3 %v9848_v52  ;;  %v5083_v24 = vld [vmem:[%s10614_s1 + $0x5c4] sm:$0xf0] }
 0x1a7   :  { %4108 = vmatpush.bf16.msrb.mxu3 %v6514_v51 }
 0x1a8   :  { %4070 = vmatpush.bf16.msrb.mxu0 %v4814_v38  ;;  %v3844_v18 = vpop.f32.mrf.mxu2  ;;  %v3820_v36 = vpop.f32.mrf.mxu0  ;;  %v5086_v38 = vor.u32 %v6703_v12, %v5083_v24  ;;  %v5905_v12 = vld [vmem:[%s10614_s1 + $0xbe8] sm:$0xf]  ;;  %v7052_v24 = vld [vmem:[%s10614_s1 + $0x1068] sm:$0xf0] }
 0x1a9   :  { %4083 = vmatpush.bf16.msrb.mxu1 %v5358_v40  ;;  %v3845_v30 = vadd.f32 %v3844_v18, %v3832_v7  ;;  %v3857_v51 = vpop.f32.mrf.mxu3  ;;  %v6550_v40 = vld [vmem:[%s10614_s1 + $0xbc] sm:$0xf]  ;;  %v3833_v45 = vpop.f32.mrf.mxu1  ;;  %v5974_v7 = vor.u32 %v6933_v1, %v5973_v19  ;;  %v6916_v18 = vld [vmem:[%s10614_s1 + $0xc28] sm:$0xf0]  ;;  %v6763_v36 = vld [vmem:[%s10614_s1 + $0x760] sm:$0xf0] }
 0x1aa   :  { %4096 = vmatpush.bf16.msrb.mxu2 %v5902_v41  ;;  %v4471_v41 = vld [vmem:[%s10614_s1 + $0xfc] sm:$0xf0]  ;;  %v5294_v45 = vor.u32 %v6763_v36, %v5293_v33  ;;  %v6831_v33 = vld [vmem:[%s10614_s1 + $0x980] sm:$0xf0] }
 0x1ab   :  { %4109 = vmatpush.bf16.msrb.mxu3 %v6446_v50  ;;  %v9927_v35 = vadd.f32 %v3857_v51, %v3845_v30  ;;  %v5015_v50 = vld [vmem:[%s10614_s1 + $0x53c] sm:$0xf0]  ;;  %v5906_v30 = vor.u32 %v6916_v18, %v5905_v12  ;;  %v6967_v36 = vld [vmem:[%s10614_s1 + $0xdc0] sm:$0xf0] }
 0x1ac   :  { %4071 = vmatpush.bf16.msrb.mxu0 %v4746_v29  ;;  %v4474_v29 = vor.u32 %v6550_v40, %v4471_v41  ;;  %v4749_v51 = vld [vmem:[%s10614_s1 + $0x2e0] sm:$0xf]  ;;  %v7035_v41 = vld [vmem:[%s10614_s1 + $0xfe0] sm:$0xf0] }
 0x1ad   :  { %4084 = vmatpush.bf16.msrb.mxu1 %v5290_v63  ;;  %v4403_v63 = vld [vmem:[%s10614_s1 + $0x74] sm:$0xf0]  ;;  %v6381_v40 = vld [vmem:[%s10614_s1 + $0xfa0] sm:$0xf] }
 0x1ae   :  { %4097 = vmatpush.bf16.msrb.mxu2 %v5834_v0  ;;  %v5018_v0 = vor.u32 %v6686_v42, %v5015_v50  ;;  %v4406_v37 = vor.u32 %v6533_v53, %v4403_v63  ;;  %v4750_v42 = vor.u32 %v6627_v27, %v4749_v51  ;;  %v4681_v50 = vld [vmem:[%s10614_s1 + $0x258] sm:$0xf]  ;;  %v6382_v49 = vor.u32 %v7035_v41, %v6381_v40  ;;  %v6882_v53 = vld [vmem:[%s10614_s1 + $0xb18] sm:$0xf0]  ;;  %v6695_v51 = vld [vmem:[%s10614_s1 + $0x540] sm:$0xf0] }
 0x1af   :  { %4110 = vmatpush.bf16.msrb.mxu3 %v6378_v22  ;;  %v6805_v22 = vld [vmem:[%s10614_s1 + $0x8b4] sm:$0xf]  ;;  %v6313_v63 = vld [vmem:[%s10614_s1 + $0xf18] sm:$0xf]  ;;  %v5565_v27 = vld [vmem:[%s10614_s1 + $0x940] sm:$0xf] }
 0x1b0   :  { %4072 = vmatpush.bf16.msrb.mxu0 %v4678_v4  ;;  %v3846_v2 = vpop.f32.mrf.mxu2  ;;  %v6542_v40 = vld [vmem:[%s10614_s1 + $0x78] sm:$0xf0] }
 0x1b1   :  { %4085 = vmatpush.bf16.msrb.mxu1 %v5222_v59  ;;  %v3859_v4 = vpop.f32.mrf.mxu3  ;;  %v6661_v59 = vld [vmem:[%s10614_s1 + $0x430] sm:$0xf0] }
 0x1b2   :  { %4098 = vmatpush.bf16.msrb.mxu2 %v5766_v60  ;;  %v5429_v60 = vld [vmem:[%s10614_s1 + $0x830] sm:$0xf]  ;;  %v4886_v5 = vor.u32 %v6661_v59, %v4885_v15  ;;  %v6729_v4 = vld [vmem:[%s10614_s1 + $0x650] sm:$0xf0] }
 0x1b3   :  { %4111 = vmatpush.bf16.msrb.mxu3 %v6310_v23  ;;  %v5494_v23 = vor.u32 %v6805_v22, %v5491_v17  ;;  %v5430_v6 = vor.u32 %v6797_v62, %v5429_v60  ;;  %v6593_v17 = vld [vmem:[%s10614_s1 + $0x210] sm:$0xf0]  ;;  %v5701_v15 = vld [vmem:[%s10614_s1 + $0xa50] sm:$0xf]  ;;  %v5158_v19 = vor.u32 %v6729_v4, %v5157_v57 }
 0x1b4   :  { %4073 = vmatpush.bf16.msrb.mxu0 %v4610_v8  ;;  %v4817_v8 = vld [vmem:[%s10614_s1 + $0x368] sm:$0xf]  ;;  %v6865_v59 = vld [vmem:[%s10614_s1 + $0xa90] sm:$0xf0]  ;;  %v6245_v60 = vld [vmem:[%s10614_s1 + $0xe90] sm:$0xf] }
 0x1b5   :  { %4086 = vmatpush.bf16.msrb.mxu1 %v5154_v9  ;;  %v6644_v9 = vld [vmem:[%s10614_s1 + $0x3a8] sm:$0xf0]  ;;  %v5702_v1 = vor.u32 %v6865_v59, %v5701_v15  ;;  %v7061_v4 = vld [vmem:[%s10614_s1 + $0x10b4] sm:$0xf]  ;;  %v6519_v15 = vld [vmem:[%s10614_s1 + $0x10f4] sm:$0xf0] }
 0x1b6   :  { %4099 = vmatpush.bf16.msrb.mxu2 %v5698_v43  ;;  %v5361_v43 = vld [vmem:[%s10614_s1 + $0x7a8] sm:$0xf]  ;;  %v4818_v44 = vor.u32 %v6644_v9, %v4817_v8  ;;  %v6848_v8 = vld [vmem:[%s10614_s1 + $0xa08] sm:$0xf0] }
 0x1b7   :  { %4112 = vmatpush.bf16.msrb.mxu3 %v6242_v21  ;;  %v6449_v21 = vld [vmem:[%s10614_s1 + $0x1028] sm:$0xf]  ;;  %v5362_v28 = vor.u32 %v6780_v11, %v5361_v43  ;;  %v6984_v43 = vld [vmem:[%s10614_s1 + $0xe48] sm:$0xf0] }
 0x1b8   :  { %4074 = vmatpush.bf16.msrb.mxu0 %v4542_v34  ;;  %v6450_v34 = vor.u32 %v7052_v24, %v6449_v21  ;;  %v6177_v9 = vld [vmem:[%s10614_s1 + $0xe08] sm:$0xf]  ;;  %v4477_v21 = vld [vmem:[%s10614_s1 + $0xc0] sm:$0xf]  ;;  %v6559_v24 = vld [vmem:[%s10614_s1 + $0x100] sm:$0xf0] }
 0x1b9   :  { %4087 = vmatpush.bf16.msrb.mxu1 %v5086_v38  ;;  %v5837_v38 = vld [vmem:[%s10614_s1 + $0xb60] sm:$0xf] }
 0x1ba   :  { %4100 = vmatpush.bf16.msrb.mxu2 %v5630_v39  ;;  %v6899_v39 = vld [vmem:[%s10614_s1 + $0xba0] sm:$0xf0] }
 0x1bb   :  { %4113 = vmatpush.bf16.msrb.mxu3 %v6174_v46  ;;  %v5838_v46 = vor.u32 %v6899_v39, %v5837_v38  ;;  %v4478_v38 = vor.u32 %v6559_v24, %v4477_v21  ;;  %v4409_v39 = vld [vmem:[%s10614_s1 + $0x38] sm:$0xf]  ;;  %v5295_v24 = vld [vmem:[%s10614_s1 + $0x764] sm:$0xf0] }
 0x1bc   :  { %4075 = vmatpush.bf16.msrb.mxu0 %v4474_v29  ;;  %v5769_v29 = vld [vmem:[%s10614_s1 + $0xad8] sm:$0xf] }
 0x1bd   :  { %4088 = vmatpush.bf16.msrb.mxu1 %v5018_v0  ;;  %v7018_v0 = vld [vmem:[%s10614_s1 + $0xf58] sm:$0xf0]  ;;  %v5770_v22 = vor.u32 %v6882_v53, %v5769_v29 }
 0x1be   :  { %4101 = vmatpush.bf16.msrb.mxu2 %v5562_v16  ;;  %v4682_v16 = vor.u32 %v6610_v25, %v4681_v50  ;;  %v6314_v58 = vor.u32 %v7018_v0, %v6313_v63  ;;  %v5497_v50 = vld [vmem:[%s10614_s1 + $0x8b8] sm:$0xf]  ;;  %v6950_v29 = vld [vmem:[%s10614_s1 + $0xd38] sm:$0xf0]  ;;  %v6653_v63 = vld [vmem:[%s10614_s1 + $0x3f4] sm:$0xf] }
 0x1bf   :  { %4114 = vmatpush.bf16.msrb.mxu3 %v6106_v56  ;;  %v4613_v56 = vld [vmem:[%s10614_s1 + $0x1d0] sm:$0xf]  ;;  %v4887_v0 = vld [vmem:[%s10614_s1 + $0x434] sm:$0xf0]  ;;  %v6042_v59 = vor.u32 %v6950_v29, %v6041_v13  ;;  %v6585_v29 = vld [vmem:[%s10614_s1 + $0x1d4] sm:$0xf] }
 0x1c0   :  { %4076 = vmatpush.bf16.msrb.mxu0 %v4406_v37  ;;  %v10077_v55 = vpop.f32.mrf.mxu0  ;;  %v7001_v37 = vld [vmem:[%s10614_s1 + $0xed0] sm:$0xf0]  ;;  %v4614_v62 = vor.u32 %v6593_v17, %v4613_v56  ;;  %v5975_v17 = vld [vmem:[%s10614_s1 + $0xcb4] sm:$0xf0] }
 0x1c1   :  { %4089 = vmatpush.bf16.msrb.mxu1 %v4950_v3  ;;  %v10079_v2 = vpop.f32.mrf.mxu1  ;;  %v6925_v56 = vld [vmem:[%s10614_s1 + $0xc74] sm:$0xf] }
 0x1c2   :  { %4102 = vmatpush.bf16.msrb.mxu2 %v5494_v23  ;;  %v4545_v23 = vld [vmem:[%s10614_s1 + $0x148] sm:$0xf] }
 0x1c3   :  { %4115 = vmatpush.bf16.msrb.mxu3 %v6038_v20  ;;  %4077 = vmatmul.bf16.vlgmr.msrb.gmra.mxu0 %v9845_v61  ;;  %v6246_v20 = vor.u32 %v7001_v37, %v6245_v60  ;;  %v4890_v60 = vor.u32 %v6653_v63, %v4887_v0  ;;  %v6721_v63 = vld [vmem:[%s10614_s1 + $0x614] sm:$0xf] }
 0x1c4   :  { %4121 = vmatpush.bf16.msra.mxu0 %v4886_v5  ;;  %4090 = vmatmul.bf16.vlgmr.msrb.gmra.mxu1 %v9854_v14 }
 0x1c5   :  { %4134 = vmatpush.bf16.msra.mxu1 %v5430_v6  ;;  %4103 = vmatmul.bf16.vlgmr.msrb.gmra.mxu2 %v9831_v48  ;;  %v6712_v6 = vld [vmem:[%s10614_s1 + $0x5c8] sm:$0xf0] }
 0x1c6   :  { %4147 = vmatpush.bf16.msra.mxu2 %v5974_v7  ;;  %4116 = vmatmul.bf16.vlgmr.msrb.gmra.mxu3 %v9848_v52  ;;  %v5633_v7 = vld [vmem:[%s10614_s1 + $0x9c8] sm:$0xf]  ;;  %v5090_v12 = vor.u32 %v6712_v6, %v5089_v31  ;;  %v5363_v31 = vld [vmem:[%s10614_s1 + $0x7ec] sm:$0xf0] }
 0x1c7   :  { %4160 = vmatpush.bf16.msra.mxu3 %v6518_v10  ;;  %v4546_v10 = vor.u32 %v6576_v47, %v4545_v23  ;;  %v5634_v18 = vor.u32 %v6848_v8, %v5633_v7  ;;  %v6772_v23 = vld [vmem:[%s10614_s1 + $0x7ac] sm:$0xf]  ;;  %v6522_v47 = vor.u32 %v7061_v4, %v6519_v15  ;;  %v5907_v6 = vld [vmem:[%s10614_s1 + $0xc2c] sm:$0xf0] }
 0x1c8   :  { %4122 = vmatpush.bf16.msra.mxu0 %v4818_v44  ;;  %v10105_v3 = vpop.f32.mrf.mxu2  ;;  %v3872_v11 = vpop.f32.mrf.mxu0  ;;  %v5021_v44 = vld [vmem:[%s10614_s1 + $0x500] sm:$0xf]  ;;  %v7044_v7 = vld [vmem:[%s10614_s1 + $0x102c] sm:$0xf]  ;;  %v6451_v8 = vld [vmem:[%s10614_s1 + $0x106c] sm:$0xf0] }
 0x1c9   :  { %4135 = vmatpush.bf16.msra.mxu1 %v5362_v28  ;;  %v10116_v5 = vpop.f32.mrf.mxu3  ;;  %v3885_v28 = vpop.f32.mrf.mxu1  ;;  %v5022_v41 = vor.u32 %v6695_v51, %v5021_v44  ;;  %v6619_v11 = vld [vmem:[%s10614_s1 + $0x2e4] sm:$0xf]  ;;  %v6454_v21 = vor.u32 %v7044_v7, %v6451_v8  ;;  %v6383_v51 = vld [vmem:[%s10614_s1 + $0xfe4] sm:$0xf0] }
 0x1ca   :  { %4148 = vmatpush.bf16.msra.mxu2 %v5906_v30  ;;  %v6178_v30 = vor.u32 %v6984_v43, %v6177_v9  ;;  %v5366_v43 = vor.u32 %v6772_v23, %v5363_v31  ;;  %v6891_v44 = vld [vmem:[%s10614_s1 + $0xb64] sm:$0xf]  ;;  %v5839_v28 = vld [vmem:[%s10614_s1 + $0xba4] sm:$0xf0]  ;;  %v6840_v23 = vld [vmem:[%s10614_s1 + $0x9cc] sm:$0xf] }
 0x1cb   :  { %4161 = vmatpush.bf16.msra.mxu3 %v6450_v34  ;;  %v6109_v34 = vld [vmem:[%s10614_s1 + $0xd80] sm:$0xf] }
 0x1cc   :  { %4123 = vmatpush.bf16.msra.mxu0 %v4750_v42  ;;  %v5566_v42 = vor.u32 %v6831_v33, %v5565_v27  ;;  %v6110_v32 = vor.u32 %v6967_v36, %v6109_v34  ;;  %v5842_v34 = vor.u32 %v6891_v44, %v5839_v28  ;;  %v6602_v36 = vld [vmem:[%s10614_s1 + $0x25c] sm:$0xf]  ;;  %v6823_v44 = vld [vmem:[%s10614_s1 + $0x944] sm:$0xf]  ;;  %v5567_v28 = vld [vmem:[%s10614_s1 + $0x984] sm:$0xf0] }
 0x1cd   :  { %4136 = vmatpush.bf16.msra.mxu1 %v5294_v45  ;;  %v4953_v45 = vld [vmem:[%s10614_s1 + $0x478] sm:$0xf] }
 0x1ce   :  { %4149 = vmatpush.bf16.msra.mxu2 %v5838_v46  ;;  %v6678_v46 = vld [vmem:[%s10614_s1 + $0x4b8] sm:$0xf0] }
 0x1cf   :  { %4162 = vmatpush.bf16.msra.mxu3 %v6382_v49  ;;  %v6814_v49 = vld [vmem:[%s10614_s1 + $0x8f8] sm:$0xf0]  ;;  %v4954_v57 = vor.u32 %v6678_v46, %v4953_v45  ;;  %v5771_v45 = vld [vmem:[%s10614_s1 + $0xb1c] sm:$0xf0] }
 0x1d0   :  { %4124 = vmatpush.bf16.msra.mxu0 %v4682_v16  ;;  %v3898_v25 = vpop.f32.mrf.mxu2  ;;  %v6789_v16 = vld [vmem:[%s10614_s1 + $0x834] sm:$0xf]  ;;  %v7010_v46 = vld [vmem:[%s10614_s1 + $0xf1c] sm:$0xf] }
 0x1d1   :  { %4137 = vmatpush.bf16.msra.mxu1 %v5226_v26  ;;  %v3911_v53 = vpop.f32.mrf.mxu3  ;;  %v4410_v26 = vor.u32 %v6542_v40, %v4409_v39  ;;  %v6738_v39 = vld [vmem:[%s10614_s1 + $0x69c] sm:$0xf] }
 0x1d2   :  { %4150 = vmatpush.bf16.msra.mxu2 %v5770_v22  ;;  %v5431_v22 = vld [vmem:[%s10614_s1 + $0x874] sm:$0xf0] }
 0x1d3   :  { %4163 = vmatpush.bf16.msra.mxu3 %v6314_v58  ;;  %v5498_v58 = vor.u32 %v6814_v49, %v5497_v50  ;;  %v5434_v37 = vor.u32 %v6789_v16, %v5431_v22  ;;  %v6315_v50 = vld [vmem:[%s10614_s1 + $0xf5c] sm:$0xf0]  ;;  %v4615_v53 = vld [vmem:[%s10614_s1 + $0x214] sm:$0xf0]  ;;  %v6857_v22 = vld [vmem:[%s10614_s1 + $0xa54] sm:$0xf] }
 0x1d4   :  { %4125 = vmatpush.bf16.msra.mxu0 %v4614_v62  ;;  %v5978_v62 = vor.u32 %v6925_v56, %v5975_v17  ;;  %v6318_v16 = vor.u32 %v7010_v46, %v6315_v50  ;;  %v5703_v56 = vld [vmem:[%s10614_s1 + $0xa94] sm:$0xf0]  ;;  %v6993_v17 = vld [vmem:[%s10614_s1 + $0xe94] sm:$0xf]  ;;  %v5499_v50 = vld [vmem:[%s10614_s1 + $0x8fc] sm:$0xf0] }
 0x1d5   :  { %4138 = vmatpush.bf16.msra.mxu1 %v5158_v19  ;;  %v6636_v19 = vld [vmem:[%s10614_s1 + $0x36c] sm:$0xf]  ;;  %v5706_v15 = vor.u32 %v6857_v22, %v5703_v56  ;;  %v5981_v22 = vld [vmem:[%s10614_s1 + $0xc78] sm:$0xf]  ;;  %v6934_v56 = vld [vmem:[%s10614_s1 + $0xcb8] sm:$0xf0] }
 0x1d6   :  { %4151 = vmatpush.bf16.msra.mxu2 %v5702_v1  ;;  %v4819_v1 = vld [vmem:[%s10614_s1 + $0x3ac] sm:$0xf0] }
 0x1d7   :  { %4164 = vmatpush.bf16.msra.mxu3 %v6246_v20  ;;  %v6908_v20 = vld [vmem:[%s10614_s1 + $0xbec] sm:$0xf]  ;;  %v4822_v9 = vor.u32 %v6636_v19, %v4819_v1  ;;  %v5091_v1 = vld [vmem:[%s10614_s1 + $0x5cc] sm:$0xf0] }
 0x1d8   :  { %4126 = vmatpush.bf16.msra.mxu0 %v4546_v10  ;;  %v5910_v10 = vor.u32 %v6908_v20, %v5907_v6  ;;  %v6976_v20 = vld [vmem:[%s10614_s1 + $0xe0c] sm:$0xf]  ;;  %v6179_v6 = vld [vmem:[%s10614_s1 + $0xe4c] sm:$0xf0] }
 0x1d9   :  { %4139 = vmatpush.bf16.msra.mxu1 %v5090_v12  ;;  %v4751_v12 = vld [vmem:[%s10614_s1 + $0x324] sm:$0xf0] }
 0x1da   :  { %4152 = vmatpush.bf16.msra.mxu2 %v5634_v18  ;;  %v6755_v18 = vld [vmem:[%s10614_s1 + $0x724] sm:$0xf]  ;;  %v4754_v27 = vor.u32 %v6619_v11, %v4751_v12  ;;  %v4479_v11 = vld [vmem:[%s10614_s1 + $0x104] sm:$0xf0] }
 0x1db   :  { %4165 = vmatpush.bf16.msra.mxu3 %v6178_v30  ;;  %v7027_v30 = vld [vmem:[%s10614_s1 + $0xfa4] sm:$0xf]  ;;  %v5298_v33 = vor.u32 %v6755_v18, %v5295_v24  ;;  %v5023_v24 = vld [vmem:[%s10614_s1 + $0x544] sm:$0xf0] }
 0x1dc   :  { %4127 = vmatpush.bf16.msra.mxu0 %v4478_v38  ;;  %v4683_v38 = vld [vmem:[%s10614_s1 + $0x29c] sm:$0xf0]  ;;  %v6386_v40 = vor.u32 %v7027_v30, %v6383_v51  ;;  %v6687_v12 = vld [vmem:[%s10614_s1 + $0x504] sm:$0xf]  ;;  %v6111_v51 = vld [vmem:[%s10614_s1 + $0xdc4] sm:$0xf0] }
 0x1dd   :  { %4140 = vmatpush.bf16.msra.mxu1 %v5022_v41  ;;  %v5227_v41 = vld [vmem:[%s10614_s1 + $0x6dc] sm:$0xf0]  ;;  %v4686_v25 = vor.u32 %v6602_v36, %v4683_v38  ;;  %v6959_v30 = vld [vmem:[%s10614_s1 + $0xd84] sm:$0xf]  ;;  %v5026_v38 = vor.u32 %v6687_v12, %v5023_v24  ;;  %v4757_v24 = vld [vmem:[%s10614_s1 + $0x2e8] sm:$0xf] }
 0x1de   :  { %4153 = vmatpush.bf16.msra.mxu2 %v5566_v42  ;;  %v6874_v42 = vld [vmem:[%s10614_s1 + $0xadc] sm:$0xf]  ;;  %v5230_v49 = vor.u32 %v6738_v39, %v5227_v41  ;;  %v4411_v36 = vld [vmem:[%s10614_s1 + $0x7c] sm:$0xf0]  ;;  %v5570_v39 = vor.u32 %v6823_v44, %v5567_v28  ;;  %v6114_v46 = vor.u32 %v6959_v30, %v6111_v51  ;;  %v6628_v44 = vld [vmem:[%s10614_s1 + $0x328] sm:$0xf0] }
 0x1df   :  { %4166 = vmatpush.bf16.msra.mxu3 %v6110_v32  ;;  %v5774_v13 = vor.u32 %v6874_v42, %v5771_v45  ;;  %v4955_v41 = vld [vmem:[%s10614_s1 + $0x4bc] sm:$0xf0]  ;;  %v6806_v42 = vld [vmem:[%s10614_s1 + $0x8bc] sm:$0xf]  ;;  %v6764_v28 = vld [vmem:[%s10614_s1 + $0x768] sm:$0xf0] }
 0x1e0   :  { %4128 = vmatpush.bf16.msra.mxu0 %v4410_v26  ;;  %v10281_v32 = vpop.f32.mrf.mxu0  ;;  %v5159_v26 = vld [vmem:[%s10614_s1 + $0x654] sm:$0xf0]  ;;  %v5845_v30 = vld [vmem:[%s10614_s1 + $0xb68] sm:$0xf]  ;;  %v6900_v51 = vld [vmem:[%s10614_s1 + $0xba8] sm:$0xf0] }
 0x1e1   :  { %4141 = vmatpush.bf16.msra.mxu1 %v4954_v57  ;;  %v10292_v0 = vpop.f32.mrf.mxu1  ;;  %v6247_v57 = vld [vmem:[%s10614_s1 + $0xed4] sm:$0xf0]  ;;  %v5162_v4 = vor.u32 %v6721_v63, %v5159_v26  ;;  %v6798_v26 = vld [vmem:[%s10614_s1 + $0x878] sm:$0xf0] }
 0x1e2   :  { %4154 = vmatpush.bf16.msra.mxu2 %v5498_v58  ;;  %v4618_v58 = vor.u32 %v6585_v29, %v4615_v53  ;;  %v6250_v19 = vor.u32 %v6993_v17, %v6247_v57  ;;  %v4893_v29 = vld [vmem:[%s10614_s1 + $0x3f8] sm:$0xf]  ;;  %v6662_v53 = vld [vmem:[%s10614_s1 + $0x438] sm:$0xf0]  ;;  %v5502_v57 = vor.u32 %v6806_v42, %v5499_v50  ;;  %v6883_v42 = vld [vmem:[%s10614_s1 + $0xb20] sm:$0xf0] }
 0x1e3   :  { %4167 = vmatpush.bf16.msra.mxu3 %v6042_v59  ;;  %4129 = vmatmul.bf16.vlgmr.msra.gmra.mxu0 %v9845_v61  ;;  %v6568_v59 = vld [vmem:[%s10614_s1 + $0x14c] sm:$0xf]  ;;  %v5437_v63 = vld [vmem:[%s10614_s1 + $0x838] sm:$0xf] }
 0x1e4   :  { %4173 = vmatpush.bf16.msrb.mxu0 %v4890_v60  ;;  %4142 = vmatmul.bf16.vlgmr.msra.gmra.mxu1 %v9854_v14  ;;  %v4547_v60 = vld [vmem:[%s10614_s1 + $0x18c] sm:$0xf0] }
 0x1e5   :  { %4186 = vmatpush.bf16.msrb.mxu1 %v5434_v37  ;;  %4155 = vmatmul.bf16.vlgmr.msra.gmra.mxu2 %v9831_v48  ;;  %v6704_v37 = vld [vmem:[%s10614_s1 + $0x58c] sm:$0xf]  ;;  %v4550_v7 = vor.u32 %v6568_v59, %v4547_v60  ;;  %v607_v59 = vperm.slane %v9837_v54, 2 }
 0x1e6   :  { %4199 = vmatpush.bf16.msrb.mxu2 %v5978_v62  ;;  %4168 = vmatmul.bf16.vlgmr.msra.gmra.mxu3 %v9848_v52 }
 0x1e7   :  { %4212 = vmatpush.bf16.msrb.mxu3 %v6522_v47  ;;  %v5635_v47 = vld [vmem:[%s10614_s1 + $0xa0c] sm:$0xf0] }
 0x1e8   :  { %4174 = vmatpush.bf16.msrb.mxu0 %v4822_v9  ;;  %v10318_v62 = vpop.f32.mrf.mxu2  ;;  %v3924_v8 = vpop.f32.mrf.mxu0  ;;  %v5094_v9 = vor.u32 %v6704_v37, %v5091_v1  ;;  %v4894_v37 = vor.u32 %v6662_v53, %v4893_v29  ;;  %v5982_v1 = vor.u32 %v6934_v56, %v5981_v22  ;;  %v6730_v22 = vld [vmem:[%s10614_s1 + $0x658] sm:$0xf0]  ;;  %v5709_v56 = vld [vmem:[%s10614_s1 + $0xa58] sm:$0xf] }
 0x1e9   :  { %4187 = vmatpush.bf16.msrb.mxu1 %v5366_v43  ;;  %v10329_v31 = vpop.f32.mrf.mxu3  ;;  %v5638_v43 = vor.u32 %v6840_v23, %v5635_v47  ;;  %v3937_v18 = vpop.f32.mrf.mxu1  ;;  %v4825_v23 = vld [vmem:[%s10614_s1 + $0x370] sm:$0xf]  ;;  %v6645_v47 = vld [vmem:[%s10614_s1 + $0x3b0] sm:$0xf0] }
 0x1ea   :  { %4200 = vmatpush.bf16.msrb.mxu2 %v5910_v10  ;;  %v6551_v10 = vld [vmem:[%s10614_s1 + $0xc4] sm:$0xf]  ;;  %v6917_v8 = vld [vmem:[%s10614_s1 + $0xc30] sm:$0xf0]  ;;  %v4826_v12 = vor.u32 %v6645_v47, %v4825_v23  ;;  %v4553_v23 = vld [vmem:[%s10614_s1 + $0x150] sm:$0xf] }
 0x1eb   :  { %4213 = vmatpush.bf16.msrb.mxu3 %v6454_v21  ;;  %v6182_v21 = vor.u32 %v6976_v20, %v6179_v6  ;;  %v5369_v20 = vld [vmem:[%s10614_s1 + $0x7b0] sm:$0xf]  ;;  %v6781_v6 = vld [vmem:[%s10614_s1 + $0x7f0] sm:$0xf0] }
 0x1ec   :  { %4175 = vmatpush.bf16.msrb.mxu0 %v4754_v27  ;;  %v606_v27 = vperm.slane %v9837_v54, 1  ;;  %v5370_v18 = vor.u32 %v6781_v6, %v5369_v20  ;;  %v6577_v47 = vld [vmem:[%s10614_s1 + $0x190] sm:$0xf0]  ;;  %v5097_v20 = vld [vmem:[%s10614_s1 + $0x590] sm:$0xf] }
 0x1ed   :  { %4188 = vmatpush.bf16.msrb.mxu1 %v5298_v33  ;;  %v4482_v33 = vor.u32 %v6551_v10, %v4479_v11  ;;  %v3923_v11 = vadd.f32 %v10281_v32, %v607_v59 }
 0x1ee   :  { %4201 = vmatpush.bf16.msrb.mxu2 %v5842_v34  ;;  %v6534_v34 = vld [vmem:[%s10614_s1 + $0x3c] sm:$0xf] }
 0x1ef   :  { %4214 = vmatpush.bf16.msrb.mxu3 %v6386_v40  ;;  %v6670_v40 = vld [vmem:[%s10614_s1 + $0x47c] sm:$0xf] }
 0x1f0   :  { %4176 = vmatpush.bf16.msrb.mxu0 %v4686_v25  ;;  %v3950_v45 = vpop.f32.mrf.mxu2  ;;  %v6942_v25 = vld [vmem:[%s10614_s1 + $0xcfc] sm:$0xf]  ;;  %v4958_v17 = vor.u32 %v6670_v40, %v4955_v41  ;;  %v6747_v40 = vld [vmem:[%s10614_s1 + $0x6e0] sm:$0xf0]  ;;  %v5777_v41 = vld [vmem:[%s10614_s1 + $0xae0] sm:$0xf] }
 0x1f1   :  { %4189 = vmatpush.bf16.msrb.mxu1 %v5230_v49  ;;  %v6043_v49 = vld [vmem:[%s10614_s1 + $0xd3c] sm:$0xf0]  ;;  %v5778_v29 = vor.u32 %v6883_v42, %v5777_v41  ;;  %v6543_v42 = vld [vmem:[%s10614_s1 + $0x80] sm:$0xf0] }
 0x1f2   :  { %4202 = vmatpush.bf16.msrb.mxu2 %v5774_v13  ;;  %v3963_v13 = vpop.f32.mrf.mxu3  ;;  %v6046_v60 = vor.u32 %v6942_v25, %v6043_v49  ;;  %v6321_v45 = vld [vmem:[%s10614_s1 + $0xf20] sm:$0xf] }
 0x1f3   :  { %4215 = vmatpush.bf16.msrb.mxu3 %v6318_v16  ;;  %v4414_v16 = vor.u32 %v6534_v34, %v4411_v36  ;;  %v3936_v34 = vadd.f32 %v10292_v0, %v3923_v11  ;;  %v4758_v36 = vor.u32 %v6628_v44, %v4757_v24  ;;  %v608_v0 = vperm.slane %v9837_v54, 3  ;;  %v7019_v54 = vld [vmem:[%s10614_s1 + $0xf60] sm:$0xf0]  ;;  %v4417_v41 = vld [vmem:[%s10614_s1 + $0x40] sm:$0xf] }
 0x1f4   :  { %4177 = vmatpush.bf16.msrb.mxu0 %v4618_v58  ;;  %v6525_v58 = vld [vmem:[%s10614_s1 + $0x10b8] sm:$0xf] }
 0x1f5   :  { %4190 = vmatpush.bf16.msrb.mxu1 %v5162_v4  ;;  %v7070_v4 = vld [vmem:[%s10614_s1 + $0x10f8] sm:$0xf0]  ;;  %v3949_v50 = vadd.f32 %v10318_v62, %v3936_v34  ;;  %v6322_v62 = vor.u32 %v7019_v54, %v6321_v45  ;;  %v5573_v34 = vld [vmem:[%s10614_s1 + $0x948] sm:$0xf] }
 0x1f6   :  { %4203 = vmatpush.bf16.msrb.mxu2 %v5706_v15  ;;  %v3871_v15 = vadd.f32 %v10077_v55, %v606_v27  ;;  %v6526_v55 = vor.u32 %v7070_v4, %v6525_v58  ;;  %v7036_v27 = vld [vmem:[%s10614_s1 + $0xfe8] sm:$0xf0]  ;;  %v6253_v58 = vld [vmem:[%s10614_s1 + $0xe98] sm:$0xf]  ;;  %v7002_v4 = vld [vmem:[%s10614_s1 + $0xed8] sm:$0xf0] }
 0x1f7   :  { %4216 = vmatpush.bf16.msrb.mxu3 %v6250_v19  ;;  %v5438_v19 = vor.u32 %v6798_v26, %v5437_v63  ;;  %v6594_v26 = vld [vmem:[%s10614_s1 + $0x218] sm:$0xf0]  ;;  %v3962_v59 = vadd.f32 %v10329_v31, %v3949_v50  ;;  %v6254_v31 = vor.u32 %v7002_v4, %v6253_v58  ;;  %v7089_v4 = vld [vmem:[%s10616_s2 + $0x8] sm:$0xff] }
 0x1f8   :  { %4178 = vmatpush.bf16.msrb.mxu0 %v4550_v7  ;;  %v5913_v7 = vld [vmem:[%s10614_s1 + $0xbf0] sm:$0xf]  ;;  %v3884_v10 = vadd.f32 %v10079_v2, %v3871_v15  ;;  %v5301_v2 = vld [vmem:[%s10614_s1 + $0x728] sm:$0xf]  ;;  %v7088_v58 = vld [vmem:[#allocation1 + $0x1b] sm:$0xff] }
 0x1f9   :  { %4191 = vmatpush.bf16.msrb.mxu1 %v5094_v9  ;;  %v6457_v9 = vld [vmem:[%s10614_s1 + $0x1030] sm:$0xf]  ;;  %v4287_v11 = vmax.f32 %v3962_v59, 0.0 }
 0x1fa   :  { %4204 = vmatpush.bf16.msrb.mxu2 %v5638_v43  ;;  %v7053_v43 = vld [vmem:[%s10614_s1 + $0x1070] sm:$0xf0] }
 0x1fb   :  { %4217 = vmatpush.bf16.msrb.mxu3 %v6182_v21  ;;  %v5914_v21 = vor.u32 %v6917_v8, %v5913_v7  ;;  %v6458_v32 = vor.u32 %v7053_v43, %v6457_v9  ;;  %v6713_v7 = vld [vmem:[%s10614_s1 + $0x5d0] sm:$0xf0]  ;;  %v5641_v8 = vld [vmem:[%s10614_s1 + $0x9d0] sm:$0xf] }
 0x1fc   :  { %4179 = vmatpush.bf16.msrb.mxu0 %v4482_v33  ;;  %v3897_v33 = vadd.f32 %v10105_v3, %v3884_v10  ;;  %v5233_v3 = vld [vmem:[%s10614_s1 + $0x6a0] sm:$0xf]  ;;  %v6849_v9 = vld [vmem:[%s10614_s1 + $0xa10] sm:$0xf0]  ;;  %v6185_v43 = vld [vmem:[%s10614_s1 + $0xe10] sm:$0xf]  ;;  %v5098_v44 = vor.u32 %v6713_v7, %v5097_v20 }
 0x1fd   :  { %4192 = vmatpush.bf16.msrb.mxu1 %v5026_v38  ;;  %v5846_v38 = vor.u32 %v6900_v51, %v5845_v30  ;;  %v5234_v13 = vor.u32 %v6747_v40, %v5233_v3  ;;  %v6985_v10 = vld [vmem:[%s10614_s1 + $0xe50] sm:$0xf0]  ;;  %v6696_v30 = vld [vmem:[%s10614_s1 + $0x548] sm:$0xf0] }
 0x1fe   :  { %4205 = vmatpush.bf16.msrb.mxu2 %v5570_v39  ;;  %v6611_v39 = vld [vmem:[%s10614_s1 + $0x2a0] sm:$0xf0] }
 0x1ff   :  { %4218 = vmatpush.bf16.msrb.mxu3 %v6114_v46  ;;  %v3910_v46 = vadd.f32 %v10116_v5, %v3897_v33  ;;  %v5165_v5 = vld [vmem:[%s10614_s1 + $0x618] sm:$0xf]  ;;  %v6186_v33 = vor.u32 %v6985_v10, %v6185_v43 }
 0x200   :  { %4180 = vmatpush.bf16.msrb.mxu0 %v4414_v16  ;;  %v3974_v49 = vpop.f32.mrf.mxu0  ;;  %v4621_v16 = vld [vmem:[%s10614_s1 + $0x1d8] sm:$0xf] }
 0x201   :  { %4193 = vmatpush.bf16.msrb.mxu1 %v4958_v17  ;;  %v3975_v53 = vadd.f32 %v3974_v49, %v608_v0  ;;  %v3987_v63 = vpop.f32.mrf.mxu1  ;;  %v6866_v17 = vld [vmem:[%s10614_s1 + $0xa98] sm:$0xf0]  ;;  %v4286_v15 = vmax.f32 %v3910_v46, 0.0  ;;  %v5505_v49 = vld [vmem:[%s10614_s1 + $0x8c0] sm:$0xf] }
 0x202   :  { %4206 = vmatpush.bf16.msrb.mxu2 %v5502_v57 }
 0x203   :  { %4219 = vmatpush.bf16.msrb.mxu3 %v6046_v60  ;;  %4181 = vmatmul.bf16.vlgmr.msrb.gmra.mxu0 %v9845_v61  ;;  %v4689_v61 = vld [vmem:[%s10614_s1 + $0x260] sm:$0xf]  ;;  %v3988_v57 = vadd.f32 %v3987_v63, %v3975_v53  ;;  %v4622_v60 = vor.u32 %v6594_v26, %v4621_v16  ;;  %v6951_v16 = vld [vmem:[%s10614_s1 + $0xd40] sm:$0xf0]  ;;  %v4418_v26 = vor.u32 %v6543_v42, %v4417_v41 }
 0x204   :  { %4225 = vmatpush.bf16.msra.mxu0 %v4894_v37  ;;  %4194 = vmatmul.bf16.vlgmr.msrb.gmra.mxu1 %v9854_v14  ;;  %v4690_v25 = vor.u32 %v6611_v39, %v4689_v61  ;;  %v5166_v37 = vor.u32 %v6730_v22, %v5165_v5  ;;  %v6117_v61 = vld [vmem:[%s10614_s1 + $0xd88] sm:$0xf]  ;;  %v4317_v39 = vrot.slane %v4287_v11, 4  ;;  %v6049_v63 = vld [vmem:[%s10614_s1 + $0xd00] sm:$0xf] }
 0x205   :  { %4238 = vmatpush.bf16.msra.mxu1 %v5438_v19  ;;  %4207 = vmatmul.bf16.vlgmr.msrb.gmra.mxu2 %v9831_v48  ;;  %v6389_v48 = vld [vmem:[%s10614_s1 + $0xfa8] sm:$0xf]  ;;  %v5710_v19 = vor.u32 %v6866_v17, %v5709_v56  ;;  %v6050_v22 = vor.u32 %v6951_v16, %v6049_v63  ;;  %v7085_v56 = vld [vmem:[#allocation1] sm:$0xff] }
 0x206   :  { %4251 = vmatpush.bf16.msra.mxu2 %v5982_v1  ;;  %4220 = vmatmul.bf16.vlgmr.msrb.gmra.mxu3 %v9848_v52  ;;  %v5302_v52 = vor.u32 %v6764_v28, %v5301_v2  ;;  %v6390_v14 = vor.u32 %v7036_v27, %v6389_v48  ;;  %v5642_v2 = vor.u32 %v6849_v9, %v5641_v8  ;;  %v5029_v28 = vld [vmem:[%s10614_s1 + $0x508] sm:$0xf]  ;;  %v4316_v48 = vrot.slane %v4286_v15, 6 }
 0x207   :  { %4264 = vmatpush.bf16.msra.mxu3 %v6526_v55  ;;  %v7086_v17 = vld [vmem:[#allocation1 + $0x9] sm:$0xff]  ;;  %v609_v15 = vperm.slane %v7089_v4, 4 }
 0x208   :  { %4226 = vmatpush.bf16.msra.mxu0 %v4826_v12  ;;  %v4000_v1 = vpop.f32.mrf.mxu2  ;;  %v3976_v24 = vpop.f32.mrf.mxu0 }
 0x209   :  { %4239 = vmatpush.bf16.msra.mxu1 %v5370_v18  ;;  %v4001_v55 = vadd.f32 %v4000_v1, %v3988_v57  ;;  %v4013_v6 = vpop.f32.mrf.mxu3  ;;  %v4554_v18 = vor.u32 %v6577_v47, %v4553_v23  ;;  %v3989_v51 = vpop.f32.mrf.mxu1  ;;  %v7087_v57 = vld [vmem:[#allocation1 + $0x12] sm:$0xff] }
 0x20a   :  { %4252 = vmatpush.bf16.msra.mxu2 %v5914_v21  ;;  %v4485_v21 = vld [vmem:[%s10614_s1 + $0xc8] sm:$0xf] }
 0x20b   :  { %4265 = vmatpush.bf16.msra.mxu3 %v6458_v32  ;;  %v4014_v12 = vadd.f32 %v4013_v6, %v4001_v55  ;;  %v6560_v32 = vld [vmem:[%s10614_s1 + $0x108] sm:$0xf0] }
 0x20c   :  { %4227 = vmatpush.bf16.msra.mxu0 %v4758_v36  ;;  %v6832_v36 = vld [vmem:[%s10614_s1 + $0x988] sm:$0xf0]  ;;  %v4486_v0 = vor.u32 %v6560_v32, %v4485_v21 }
 0x20d   :  { %4240 = vmatpush.bf16.msra.mxu1 %v5302_v52  ;;  %v4288_v27 = vmax.f32 %v4014_v12, 0.0  ;;  %v6968_v52 = vld [vmem:[%s10614_s1 + $0xdc8] sm:$0xf0]  ;;  %v5574_v40 = vor.u32 %v6832_v36, %v5573_v34 }
 0x20e   :  { %4253 = vmatpush.bf16.msra.mxu2 %v5846_v38  ;;  %v4285_v38 = vmax.f32 %v9927_v35, 0.0  ;;  %v4961_v35 = vld [vmem:[%s10614_s1 + $0x480] sm:$0xf]  ;;  %v6118_v50 = vor.u32 %v6968_v52, %v6117_v61 }
 0x20f   :  { %4266 = vmatpush.bf16.msra.mxu3 %v6390_v14  ;;  %v4318_v3 = vrot.slane %v4288_v27, 2  ;;  %v5030_v14 = vor.u32 %v6696_v30, %v5029_v28  ;;  %v610_v27 = vperm.slane %v7089_v4, 5 }
 0x210   :  { %4228 = vmatpush.bf16.msra.mxu0 %v4690_v25  ;;  %v4002_v45 = vpop.f32.mrf.mxu2  ;;  %v4331_v54 = vsel %vm4322_vm0, %v4285_v38, %v4316_v48  ;;  %v6679_v25 = vld [vmem:[%s10614_s1 + $0x4c0] sm:$0xf0]  ;;  %v612_v38 = vperm.slane %v7089_v4, 7 }
 0x211   :  { %4241 = vmatpush.bf16.msra.mxu1 %v5234_v13  ;;  %v4332_v46 = vsel %vm4324_vm1, %v4317_v39, %v4318_v3  ;;  %v6815_v13 = vld [vmem:[%s10614_s1 + $0x900] sm:$0xf0]  ;;  %v4962_v5 = vor.u32 %v6679_v25, %v4961_v35 }
 0x212   :  { %4254 = vmatpush.bf16.msra.mxu2 %v5778_v29  ;;  %v4015_v29 = vpop.f32.mrf.mxu3  ;;  %v4333_v53 = vsel %vm4326_vm2, %v4331_v54, %v4332_v46 }
 0x213   :  { %4267 = vmatpush.bf16.msra.mxu3 %v6322_v62  ;;  %4343 = vst [vmem:[%s10617_s3 + $0x10] sm:$0xff] %v4333_v53  ;;  %v5506_v62 = vor.u32 %v6815_v13, %v5505_v49 }
 0x214   :  { %4229 = vmatpush.bf16.msra.mxu0 %v4622_v60 }
 0x215   :  { %4242 = vmatpush.bf16.msra.mxu1 %v5166_v37 }
 0x216   :  { %4255 = vmatpush.bf16.msra.mxu2 %v5710_v19 }
 0x217   :  { %4268 = vmatpush.bf16.msra.mxu3 %v6254_v31 }
 0x218   :  { %4230 = vmatpush.bf16.msra.mxu0 %v4554_v18 }
 0x219   :  { %4243 = vmatpush.bf16.msra.mxu1 %v5098_v44 }
 0x21a   :  { %4256 = vmatpush.bf16.msra.mxu2 %v5642_v2 }
 0x21b   :  { %4269 = vmatpush.bf16.msra.mxu3 %v6186_v33  ;;  %v611_v33 = vperm.slane %v7089_v4, 6 }
 0x21c   :  { %4231 = vmatpush.bf16.msra.mxu0 %v4486_v0 }
 0x21d   :  { %4244 = vmatpush.bf16.msra.mxu1 %v5030_v14 }
 0x21e   :  { %4257 = vmatpush.bf16.msra.mxu2 %v5574_v40 }
 0x21f   :  { %4270 = vmatpush.bf16.msra.mxu3 %v6118_v50 }
 0x220   :  { %4232 = vmatpush.bf16.msra.mxu0 %v4418_v26  ;;  %v4026_v59 = vpop.f32.mrf.mxu0 }
 0x221   :  { %4245 = vmatpush.bf16.msra.mxu1 %v4962_v5  ;;  %v4027_v60 = vadd.f32 %v4026_v59, %v609_v15  ;;  %v4039_v37 = vpop.f32.mrf.mxu1 }
 0x222   :  { %4258 = vmatpush.bf16.msra.mxu2 %v5506_v62 }
 0x223   :  { %4271 = vmatpush.bf16.msra.mxu3 %v6050_v22  ;;  %4233 = vmatmul.bf16.vlgmr.msra.gmra.mxu0 %v7085_v56  ;;  %v4040_v19 = vadd.f32 %v4039_v37, %v4027_v60 }
 0x224   :  { %4246 = vmatmul.bf16.vlgmr.msra.gmra.mxu1 %v7086_v17 }
 0x225   :  { %4259 = vmatmul.bf16.vlgmr.msra.gmra.mxu2 %v7087_v57 }
 0x226   :  { %4272 = vmatmul.bf16.vlgmr.msra.gmra.mxu3 %v7088_v58  ;;  %v7071_v58 = vld [vmem:[%s10616_s2 + $0x10] ss:$0 sm:$0xff] }
 0x228   :  { %v4052_v1 = vpop.f32.mrf.mxu2  ;;  %v4028_v31 = vpop.f32.mrf.mxu0 }
 0x229   :  { %v4053_v23 = vadd.f32 %v4052_v1, %v4040_v19  ;;  %v4065_v47 = vpop.f32.mrf.mxu3  ;;  %v4041_v55 = vpop.f32.mrf.mxu1 }
 0x22b   :  { %v4066_v20 = vadd.f32 %v4065_v47, %v4053_v23 }
 0x22d   :  { %v4289_v16 = vmax.f32 %v4066_v20, 0.0 }
 0x230   :  { %v4054_v6 = vpop.f32.mrf.mxu2 }
 0x231   :  { %v4067_v7 = vpop.f32.mrf.mxu3 }
 0x240   :  { %v4078_v8 = vpop.f32.mrf.mxu0 }
 0x241   :  { %v4091_v9 = vpop.f32.mrf.mxu1  ;;  %v4079_v34 = vadd.f32 %v4078_v8, %v610_v27 }
 0x243   :  { %v4092_v61 = vadd.f32 %v4091_v9, %v4079_v34 }
 0x248   :  { %v4104_v43 = vpop.f32.mrf.mxu2  ;;  %v4080_v11 = vpop.f32.mrf.mxu0 }
 0x249   :  { %v4117_v10 = vpop.f32.mrf.mxu3  ;;  %v4093_v12 = vpop.f32.mrf.mxu1  ;;  %v4105_v39 = vadd.f32 %v4104_v43, %v4092_v61 }
 0x24b   :  { %v4118_v41 = vadd.f32 %v4117_v10, %v4105_v39 }
 0x24d   :  { %v4290_v54 = vmax.f32 %v4118_v41, 0.0 }
 0x24f   :  { %v4319_v53 = vrot.slane %v4290_v54, 6 }
 0x250   :  { %v4106_v18 = vpop.f32.mrf.mxu2 }
 0x251   :  { %v4119_v21 = vpop.f32.mrf.mxu3  ;;  %v4334_v22 = vsel %vm4322_vm0, %v4289_v16, %v4319_v53 }
 0x260   :  { %v4130_v24 = vpop.f32.mrf.mxu0 }
 0x261   :  { %v4143_v44 = vpop.f32.mrf.mxu1  ;;  %v4131_v36 = vadd.f32 %v4130_v24, %v611_v33 }
 0x263   :  { %v4144_v52 = vadd.f32 %v4143_v44, %v4131_v36 }
 0x268   :  { %v4156_v2 = vpop.f32.mrf.mxu2  ;;  %v4132_v28 = vpop.f32.mrf.mxu0 }
 0x269   :  { %v4169_v32 = vpop.f32.mrf.mxu3  ;;  %v4145_v30 = vpop.f32.mrf.mxu1  ;;  %v4157_v3 = vadd.f32 %v4156_v2, %v4144_v52 }
 0x26b   :  { %v4170_v35 = vadd.f32 %v4169_v32, %v4157_v3 }
 0x26d   :  { %v4291_v25 = vmax.f32 %v4170_v35, 0.0 }
 0x26f   :  { %v4320_v26 = vrot.slane %v4291_v25, 4 }
 0x270   :  { %v4158_v51 = vpop.f32.mrf.mxu2 }
 0x271   :  { %v4171_v48 = vpop.f32.mrf.mxu3 }
 0x280   :  { %v4182_v0 = vpop.f32.mrf.mxu0 }
 0x281   :  { %v4183_v14 = vadd.f32 %v4182_v0, %v612_v38  ;;  %v4195_v40 = vpop.f32.mrf.mxu1 }
 0x283   :  { %v4196_v42 = vadd.f32 %v4195_v40, %v4183_v14 }
 0x288   :  { %v4208_v45 = vpop.f32.mrf.mxu2  ;;  %v4184_v13 = vpop.f32.mrf.mxu0 }
 0x289   :  { %v4209_v46 = vadd.f32 %v4208_v45, %v4196_v42  ;;  %v4221_v50 = vpop.f32.mrf.mxu3  ;;  %v4197_v29 = vpop.f32.mrf.mxu1 }
 0x28b   :  { %v4222_v49 = vadd.f32 %v4221_v50, %v4209_v46 }
 0x28d   :  { %v4292_v63 = vmax.f32 %v4222_v49, 0.0 }
 0x28f   :  { %v4321_v5 = vrot.slane %v4292_v63, 2 }
 0x290   :  { %v4210_v62 = vpop.f32.mrf.mxu2 }
 0x291   :  { %v4335_v56 = vsel %vm4324_vm1, %v4320_v26, %v4321_v5  ;;  %v4223_v17 = vpop.f32.mrf.mxu3 }
 0x292   :  { %v4336_v57 = vsel %vm4326_vm2, %v4334_v22, %v4335_v56 }
 0x293   :  { %4344 = vst [vmem:[%s10617_s3 + $0x18] sm:$0xff] %v4336_v57 }
 0x2a0   :  { %v4234_v4 = vpop.f32.mrf.mxu0 }
 0x2a1   :  { %v4235_v15 = vadd.f32 %v7071_v58, %v4234_v4  ;;  %v4247_v59 = vpop.f32.mrf.mxu1 }
 0x2a3   :  { %v4248_v60 = vadd.f32 %v4247_v59, %v4235_v15 }
 0x2a8   :  { %v4260_v37 = vpop.f32.mrf.mxu2  ;;  %v4236_v23 = vpop.f32.mrf.mxu0 }
 0x2a9   :  { %v4261_v19 = vadd.f32 %v4260_v37, %v4248_v60  ;;  %v4273_v1 = vpop.f32.mrf.mxu3  ;;  %v4249_v47 = vpop.f32.mrf.mxu1 }
 0x2ab   :  { %v4274_v20 = vadd.f32 %v4273_v1, %v4261_v19 }
 0x2ad   :  { %v4293_v31 = vmax.f32 %v4274_v20, 0.0 }
 0x2af   :  { %4346 = vst.msk [vmem:[%s10617_s3 + $0x20] sm:$0x3] %vm4345_vm3, %v4293_v31 }
 0x2b0   :  { %v4262_v55 = vpop.f32.mrf.mxu2 }
 0x2b1   :  { %v4275_v6 = vpop.f32.mrf.mxu3 }

</bundles_post_ra>
